<compile_context>
chip_gen: v6e
topology: v6e:2x2x1
jax: 0.10.0
libtpu: 0.0.40
codegen_flags: <defaults>
</compile_context>

<pallas_src>
import functools

import jax
import jax.numpy as jnp
from jax.experimental import pallas as pl
from jax.experimental.pallas import tpu as pltpu


# -----------------------------------------------------------------------------
# In-kernel building blocks (operate on VMEM values / weight refs)
# -----------------------------------------------------------------------------
def _conv3_taps(x, wp, wc, wn, b):
    """k=3 temporal conv (zero padding) via pltpu.roll taps.  x: (T, Cin) f32.
    wp/wc/wn: (Cin, Cout) bf16 refs, b: (1, Cout) f32 ref.  Returns pre-act."""
    t = x.shape[0]
    row = jax.lax.broadcasted_iota(jnp.int32, x.shape, 0)
    prev = jnp.where(row == 0, 0.0, pltpu.roll(x, shift=1, axis=0))          # x[t-1]
    nxt = jnp.where(row == t - 1, 0.0, pltpu.roll(x, shift=t - 1, axis=0))   # x[t+1]
    return (jnp.dot(prev.astype(jnp.bfloat16), wp[...], preferred_element_type=jnp.float32)
            + jnp.dot(x.astype(jnp.bfloat16), wc[...], preferred_element_type=jnp.float32)
            + jnp.dot(nxt.astype(jnp.bfloat16), wn[...], preferred_element_type=jnp.float32)
            + b[...])


def _gcnext_block(x, y, p, kk):
    """One GCNeXt / EgoPartiteGNeXtC-style block (all in VMEM).

    x: (T, C) f32 nodes, y: (M, C) f32 neighbour set.
    temporal: 1x1 -> relu -> grouped k=3 (roll taps) -> relu -> 1x1
    semantic: kNN of x among y (iterative row-max + mask, one-hot MXU gather),
              edge-conv MLP on cat(x, y_j - x) with the x-half GEMM hoisted,
              max over k neighbours (unrolled jnp.maximum chain)
    returns relu(tout + x + sout)
    """
    (t1w, t1b, t2p, t2c, t2n, t2b, t3w, t3b,
     w1a, w1b, b1, w2, b2, w3, b3) = p
    xb = x.astype(jnp.bfloat16)

    # ---------------- temporal path ----------------
    h1 = jnp.maximum(jnp.dot(xb, t1w[...], preferred_element_type=jnp.float32)
                     + t1b[...], 0.0)                                        # (T, wd)
    h2 = jnp.maximum(_conv3_taps(h1, t2p, t2c, t2n, t2b), 0.0)               # (T, wd)
    tout = jnp.dot(h2.astype(jnp.bfloat16), t3w[...],
                   preferred_element_type=jnp.float32) + t3b[...]            # (T, C)

    # ---------------- semantic (graph) path ----------------
    m = y.shape[0]
    # negative squared distances, f32 for exact neighbour selection
    xy = jax.lax.dot_general(x, y, (((1,), (1,)), ((), ())),
                             preferred_element_type=jnp.float32)             # (T, M)
    xx = jnp.sum(x * x, axis=-1, keepdims=True)                              # (T, 1)
    yy = jnp.sum(y * y, axis=-1, keepdims=True)                              # (M, 1)
    d = 2.0 * xy - xx - jnp.transpose(yy)                                    # (T, M)

    # x-half of edge-conv layer-1 computed once (not per neighbour)
    hx = jnp.dot(xb, w1a[...], preferred_element_type=jnp.float32)           # (T, wd)

    colf = jax.lax.broadcasted_iota(jnp.int32, d.shape, 1).astype(jnp.float32)
    neg_big = jnp.float32(-1e30)
    sout = None
    for _ in range(kk):                                                      # static unroll
        rowmax = jnp.max(d, axis=-1, keepdims=True)                          # (T, 1)
        is_max = d >= rowmax
        first_idx = jnp.min(jnp.where(is_max, colf, jnp.float32(m)),
                            axis=-1, keepdims=True)                          # tie -> first col
        onehot = colf == first_idx                                           # (T, M) bool
        nb = jnp.dot(onehot.astype(jnp.float32), y,
                     preferred_element_type=jnp.float32)                     # exact gather (T, C)
        d = jnp.where(onehot, neg_big, d)                                    # remove chosen col
        diff = (nb - x).astype(jnp.bfloat16)
        h = jnp.maximum(hx + jnp.dot(diff, w1b[...],
                                     preferred_element_type=jnp.float32) + b1[...], 0.0)
        h = jnp.maximum(jnp.dot(h.astype(jnp.bfloat16), w2[...],
                                preferred_element_type=jnp.float32) + b2[...], 0.0)
        s = jnp.dot(h.astype(jnp.bfloat16), w3[...],
                    preferred_element_type=jnp.float32) + b3[...]            # (T, C)
        sout = s if sout is None else jnp.maximum(sout, s)                   # unrolled max-over-k

    return jnp.maximum(tout + x + sout, 0.0)


# -----------------------------------------------------------------------------
# Fused per-module kernels (one pallas_call per sub-module, grid over batch)
# -----------------------------------------------------------------------------
def _snippet_gcn_kernel(*refs, kk):
    """SnippetGCN: conv3 backbone -> GCNeXt(self) -> GCNeXt(self) -> + identity."""
    # TODO(synk): SnippetGCN source not provided; GCNeXt-style structure used.
    x_ref = refs[0]
    bbp, bbc, bbn, bbb = refs[1:5]
    p1 = refs[5:20]
    p2 = refs[20:35]
    o_ref = refs[35]

    x = x_ref[0]                                                             # (T, C) f32
    base = jnp.maximum(_conv3_taps(x, bbp, bbc, bbn, bbb), 0.0)
    g1 = _gcnext_block(base, base, p1, kk)                                   # self graph
    g2 = _gcnext_block(g1, g1, p2, kk)                                       # self graph
    o_ref[0] = g2 + x                                                        # identity add


def _snippet_shot_query_kernel(*refs, kk):
    """SnippetShotQueryGCN: conv3 + topic 1x1 backbones -> 2 bipartite GCNeXt -> + identity."""
    # TODO(synk): EgoPartiteGNeXtC source not provided; GCNeXt-style structure used.
    x_ref, topic_ref = refs[0], refs[1]
    bbp, bbc, bbn, bbb = refs[2:6]
    btw, btb = refs[6:8]
    p1 = refs[8:23]
    p2 = refs[23:38]
    o_ref = refs[38]

    x = x_ref[0]                                                             # (T, C) f32
    topic = topic_ref[0]                                                     # (M, Dt) f32
    base = jnp.maximum(_conv3_taps(x, bbp, bbc, bbn, bbb), 0.0)              # (T, C)
    tf = jnp.maximum(jnp.dot(topic.astype(jnp.bfloat16), btw[...],
                             preferred_element_type=jnp.float32) + btb[...], 0.0)  # (M, C)
    g1 = _gcnext_block(base, tf, p1, kk)                                     # bipartite graph
    g2 = _gcnext_block(g1, tf, p2, kk)                                       # bipartite graph
    o_ref[0] = g2 + x                                                        # identity add


# -----------------------------------------------------------------------------
# Pallas wrappers
# -----------------------------------------------------------------------------
def _gcn_weight_arrays(p, c, wd):
    bf = jnp.bfloat16
    t2 = p["t2_w"].astype(bf)
    return [
        p["t1_w"].astype(bf), p["t1_b"].reshape(1, wd),
        t2[:wd], t2[wd:2 * wd], t2[2 * wd:], p["t2_b"].reshape(1, wd),
        p["t3_w"].astype(bf), p["t3_b"].reshape(1, c),
        p["s1_wa"].astype(bf), p["s1_wb"].astype(bf), p["s1_b"].reshape(1, wd),
        p["s2_w"].astype(bf), p["s2_b"].reshape(1, wd),
        p["s3_w"].astype(bf), p["s3_b"].reshape(1, c),
    ]


def _weight_specs(arrays):
    # Weights are small 2-D tiles, identical for every batch element: constant
    # index_map keeps them resident in VMEM across the grid.
    return [pl.BlockSpec(a.shape, lambda i: (0, 0)) for a in arrays]


def snippet_gcn_apply(x, p, k):
    """x: (B, T, C) channels-last.  One fused pallas_call, grid over batch."""
    b, t, c = x.shape
    wd = p["gcn1"]["t1_w"].shape[1]
    kk = min(k, t)
    bb = p["bb_w"].astype(jnp.bfloat16)                                      # (3C, C)
    bb_arrays = [bb[:c], bb[c:2 * c], bb[2 * c:], p["bb_b"].reshape(1, c)]
    weight_arrays = (bb_arrays
                     + _gcn_weight_arrays(p["gcn1"], c, wd)
                     + _gcn_weight_arrays(p["gcn2"], c, wd))
    in_arrays = [x] + weight_arrays
    in_specs = [pl.BlockSpec((1, t, c), lambda i: (i, 0, 0))] + _weight_specs(weight_arrays)
    kernel = functools.partial(_snippet_gcn_kernel, kk=kk)
    return pl.pallas_call(
        kernel,
        out_shape=jax.ShapeDtypeStruct((b, t, c), jnp.float32),
        grid=(b,),
        in_specs=in_specs,
        out_specs=pl.BlockSpec((1, t, c), lambda i: (i, 0, 0)),
        compiler_params=pltpu.CompilerParams(dimension_semantics=("parallel",)),
    )(*in_arrays)


def snippet_shot_query_apply(x, topic, p, k):
    """x: (B, T, C), topic: (B, M, Dt).  One fused pallas_call, grid over batch."""
    b, t, c = x.shape
    m, dt = topic.shape[1], topic.shape[2]
    wd = p["gcn1"]["t1_w"].shape[1]
    kk = min(k, m)
    bb = p["bb1_w"].astype(jnp.bfloat16)                                     # (3C, C)
    bb_arrays = [bb[:c], bb[c:2 * c], bb[2 * c:], p["bb1_b"].reshape(1, c)]
    bt_arrays = [p["bbt_w"].astype(jnp.bfloat16), p["bbt_b"].reshape(1, c)]  # (Dt, C), (1, C)
    weight_arrays = (bb_arrays + bt_arrays
                     + _gcn_weight_arrays(p["gcn1"], c, wd)
                     + _gcn_weight_arrays(p["gcn2"], c, wd))
    in_arrays = [x, topic] + weight_arrays
    in_specs = ([pl.BlockSpec((1, t, c), lambda i: (i, 0, 0)),
                 pl.BlockSpec((1, m, dt), lambda i: (i, 0, 0))]
                + _weight_specs(weight_arrays))
    kernel = functools.partial(_snippet_shot_query_kernel, kk=kk)
    return pl.pallas_call(
        kernel,
        out_shape=jax.ShapeDtypeStruct((b, t, c), jnp.float32),
        grid=(b,),
        in_specs=in_specs,
        out_specs=pl.BlockSpec((1, t, c), lambda i: (i, 0, 0)),
        compiler_params=pltpu.CompilerParams(dimension_semantics=("parallel",)),
    )(*in_arrays)


# -----------------------------------------------------------------------------
# Parameter construction (Conv1d -> dense matmul weights, BN folded)
# -----------------------------------------------------------------------------
def grouped_conv_to_dense(w, groups):
    """PyTorch Conv1d weight (C_out, C_in/g, K) -> dense (K*C_in, C_out)."""
    c_out, c_in_g, k = w.shape
    c_in = c_in_g * groups
    out_per_g = c_out // groups
    dense = jnp.zeros((k, c_in, c_out), dtype=jnp.float32)
    for g in range(groups):
        co = slice(g * out_per_g, (g + 1) * out_per_g)
        ci = slice(g * c_in_g, (g + 1) * c_in_g)
        dense = dense.at[:, ci, co].set(jnp.transpose(w[co], (2, 1, 0)))
    return dense.reshape(k * c_in, c_out)


def conv_params(key, c_out, c_in_g, ksize):
    kw, kb = jax.random.split(key)
    fan_in = c_in_g * ksize
    std = (2.0 / fan_in) ** 0.5                        # kaiming normal
    w = jax.random.normal(kw, (c_out, c_in_g, ksize), jnp.float32) * std
    bound = 1.0 / (fan_in ** 0.5)
    b = jax.random.uniform(kb, (c_out,), jnp.float32, -bound, bound)
    return w, b


def bn_fold(conv_bias, eps=1e-5):
    """Eval-mode BatchNorm1d with fresh-init stats -> per-channel scale/bias."""
    c = conv_bias.shape[0]
    gamma = jnp.ones((c,), jnp.float32)
    beta = jnp.zeros((c,), jnp.float32)
    mean = jnp.zeros((c,), jnp.float32)
    var = jnp.ones((c,), jnp.float32)
    scale = gamma / jnp.sqrt(var + eps)
    bias = (conv_bias - mean) * scale + beta
    return scale, bias


def make_gcnext_params(key, c, wd, gcn_groups):
    ks = jax.random.split(key, 6)
    t1w, t1b = conv_params(ks[0], wd, c, 1)
    t2w, t2b = conv_params(ks[1], wd, wd // gcn_groups, 3)
    t3w, t3b = conv_params(ks[2], c, wd, 1)
    s1w, s1b = conv_params(ks[3], wd, 2 * c, 1)
    s2w, s2b = conv_params(ks[4], wd, wd // gcn_groups, 1)
    s3w, s3b = conv_params(ks[5], c, wd, 1)
    s1d = grouped_conv_to_dense(s1w, 1)                # (2C, Wd): [x-half ; (y-x)-half]
    return dict(
        t1_w=grouped_conv_to_dense(t1w, 1), t1_b=t1b,
        t2_w=grouped_conv_to_dense(t2w, gcn_groups), t2_b=t2b,
        t3_w=grouped_conv_to_dense(t3w, 1), t3_b=t3b,
        s1_wa=s1d[:c], s1_wb=s1d[c:], s1_b=s1b,
        s2_w=grouped_conv_to_dense(s2w, gcn_groups), s2_b=s2b,
        s3_w=grouped_conv_to_dense(s3w, 1), s3_b=s3b,
    )


def make_params(key, c, dt, conv_groups, gcn_groups, width_group, ego_gcn_num):
    wd = gcn_groups * width_group
    k_sg, k_ego = jax.random.split(key)

    # SnippetGCN  # TODO(synk): original SnippetGCN source not provided; GCNeXt-style approximation
    ks = jax.random.split(k_sg, 3)
    bbw, bbb = conv_params(ks[0], c, c // conv_groups, 3)
    scale, bias = bn_fold(bbb)
    snippet_gcn = dict(
        bb_w=grouped_conv_to_dense(bbw, conv_groups) * scale[None, :], bb_b=bias,
        gcn1=make_gcnext_params(ks[1], c, wd, gcn_groups),
        gcn2=make_gcnext_params(ks[2], c, wd, gcn_groups),
    )

    ego = []
    for ke in jax.random.split(k_ego, ego_gcn_num):
        ks = jax.random.split(ke, 4)
        b1w, b1b = conv_params(ks[0], c, c // conv_groups, 3)
        s1, bi1 = bn_fold(b1b)
        btw, btb = conv_params(ks[1], c, dt // conv_groups, 1)
        st, bit = bn_fold(btb)
        ego.append(dict(
            bb1_w=grouped_conv_to_dense(b1w, conv_groups) * s1[None, :], bb1_b=bi1,
            bbt_w=grouped_conv_to_dense(btw, conv_groups) * st[None, :], bbt_b=bit,
            gcn1=make_gcnext_params(ks[2], c, wd, gcn_groups),
            gcn2=make_gcnext_params(ks[3], c, wd, gcn_groups),
        ))
    return dict(snippet_gcn=snippet_gcn, ego=ego)


# -----------------------------------------------------------------------------
# Forward pass
# -----------------------------------------------------------------------------
def shot_query_graph_stream_apply(video_features, topic_embeddings, params, *, k, ego_gcn_num):
    b = video_features.shape[0]
    tmp = video_features.reshape(b, -1, video_features.shape[-1])        # (B, T, C)
    x = snippet_gcn_apply(tmp, params["snippet_gcn"], k)
    for i in range(ego_gcn_num):
        x = snippet_shot_query_apply(x, topic_embeddings, params["ego"][i], k)
    return x                                                             # (B, T, C)


# -----------------------------------------------------------------------------
if __name__ == "__main__":
    B, T, M = 2, 16, 8
    C, Dt = 64, 32
    conv_groups, gcn_groups, width_group = 4, 8, 4
    k, ego_gcn_num = 4, 1

    key = jax.random.PRNGKey(0)
    kp, kv, kt = jax.random.split(key, 3)
    params = make_params(kp, C, Dt, conv_groups, gcn_groups, width_group, ego_gcn_num)
    video_features = jax.random.normal(kv, (B, T, C), jnp.float32)
    topic_embeddings = jax.random.normal(kt, (B, M, Dt), jnp.float32)

    fwd = jax.jit(functools.partial(shot_query_graph_stream_apply, k=k, ego_gcn_num=ego_gcn_num))
    out = fwd(video_features, topic_embeddings, params)
    out = jax.block_until_ready(out)

    assert out.shape == (B, T, C), out.shape
    assert bool(jnp.all(jnp.isfinite(out)))
    print("KERNEL_OK")
</pallas_src>

<mosaic_0001>
module attributes {stable_mosaic.version = 11 : i64} {
  func.func @_snippet_gcn_kernel(%arg0: i32, %arg1: memref<1x16x64xf32, #tpu.memory_space<vmem>>, %arg2: memref<64x64xbf16, #tpu.memory_space<vmem>>, %arg3: memref<64x64xbf16, #tpu.memory_space<vmem>>, %arg4: memref<64x64xbf16, #tpu.memory_space<vmem>>, %arg5: memref<1x64xf32, #tpu.memory_space<vmem>>, %arg6: memref<64x32xbf16, #tpu.memory_space<vmem>>, %arg7: memref<1x32xf32, #tpu.memory_space<vmem>>, %arg8: memref<32x32xbf16, #tpu.memory_space<vmem>>, %arg9: memref<32x32xbf16, #tpu.memory_space<vmem>>, %arg10: memref<32x32xbf16, #tpu.memory_space<vmem>>, %arg11: memref<1x32xf32, #tpu.memory_space<vmem>>, %arg12: memref<32x64xbf16, #tpu.memory_space<vmem>>, %arg13: memref<1x64xf32, #tpu.memory_space<vmem>>, %arg14: memref<64x32xbf16, #tpu.memory_space<vmem>>, %arg15: memref<64x32xbf16, #tpu.memory_space<vmem>>, %arg16: memref<1x32xf32, #tpu.memory_space<vmem>>, %arg17: memref<32x32xbf16, #tpu.memory_space<vmem>>, %arg18: memref<1x32xf32, #tpu.memory_space<vmem>>, %arg19: memref<32x64xbf16, #tpu.memory_space<vmem>>, %arg20: memref<1x64xf32, #tpu.memory_space<vmem>>, %arg21: memref<64x32xbf16, #tpu.memory_space<vmem>>, %arg22: memref<1x32xf32, #tpu.memory_space<vmem>>, %arg23: memref<32x32xbf16, #tpu.memory_space<vmem>>, %arg24: memref<32x32xbf16, #tpu.memory_space<vmem>>, %arg25: memref<32x32xbf16, #tpu.memory_space<vmem>>, %arg26: memref<1x32xf32, #tpu.memory_space<vmem>>, %arg27: memref<32x64xbf16, #tpu.memory_space<vmem>>, %arg28: memref<1x64xf32, #tpu.memory_space<vmem>>, %arg29: memref<64x32xbf16, #tpu.memory_space<vmem>>, %arg30: memref<64x32xbf16, #tpu.memory_space<vmem>>, %arg31: memref<1x32xf32, #tpu.memory_space<vmem>>, %arg32: memref<32x32xbf16, #tpu.memory_space<vmem>>, %arg33: memref<1x32xf32, #tpu.memory_space<vmem>>, %arg34: memref<32x64xbf16, #tpu.memory_space<vmem>>, %arg35: memref<1x64xf32, #tpu.memory_space<vmem>>, %arg36: memref<1x16x64xf32, #tpu.memory_space<vmem>>) attributes {dimension_semantics = [#tpu.dimension_semantics<parallel>], iteration_bounds = array<i64: 2>, scalar_prefetch = 0 : i64, scratch_operands = 0 : i64, tpu.core_type = #tpu.core_type<tc>, window_params = [{transform_indices = @transform_0, window_bounds = array<i64: 1, 16, 64>}, {pipeline_mode = #tpu.pipeline_mode<synchronous>, transform_indices = @transform_1, window_bounds = array<i64: 64, 64>}, {pipeline_mode = #tpu.pipeline_mode<synchronous>, transform_indices = @transform_2, window_bounds = array<i64: 64, 64>}, {pipeline_mode = #tpu.pipeline_mode<synchronous>, transform_indices = @transform_3, window_bounds = array<i64: 64, 64>}, {pipeline_mode = #tpu.pipeline_mode<synchronous>, transform_indices = @transform_4, window_bounds = array<i64: 1, 64>}, {pipeline_mode = #tpu.pipeline_mode<synchronous>, transform_indices = @transform_5, window_bounds = array<i64: 64, 32>}, {pipeline_mode = #tpu.pipeline_mode<synchronous>, transform_indices = @transform_6, window_bounds = array<i64: 1, 32>}, {pipeline_mode = #tpu.pipeline_mode<synchronous>, transform_indices = @transform_7, window_bounds = array<i64: 32, 32>}, {pipeline_mode = #tpu.pipeline_mode<synchronous>, transform_indices = @transform_8, window_bounds = array<i64: 32, 32>}, {pipeline_mode = #tpu.pipeline_mode<synchronous>, transform_indices = @transform_9, window_bounds = array<i64: 32, 32>}, {pipeline_mode = #tpu.pipeline_mode<synchronous>, transform_indices = @transform_10, window_bounds = array<i64: 1, 32>}, {pipeline_mode = #tpu.pipeline_mode<synchronous>, transform_indices = @transform_11, window_bounds = array<i64: 32, 64>}, {pipeline_mode = #tpu.pipeline_mode<synchronous>, transform_indices = @transform_12, window_bounds = array<i64: 1, 64>}, {pipeline_mode = #tpu.pipeline_mode<synchronous>, transform_indices = @transform_13, window_bounds = array<i64: 64, 32>}, {pipeline_mode = #tpu.pipeline_mode<synchronous>, transform_indices = @transform_14, window_bounds = array<i64: 64, 32>}, {pipeline_mode = #tpu.pipeline_mode<synchronous>, transform_indices = @transform_15, window_bounds = array<i64: 1, 32>}, {pipeline_mode = #tpu.pipeline_mode<synchronous>, transform_indices = @transform_16, window_bounds = array<i64: 32, 32>}, {pipeline_mode = #tpu.pipeline_mode<synchronous>, transform_indices = @transform_17, window_bounds = array<i64: 1, 32>}, {pipeline_mode = #tpu.pipeline_mode<synchronous>, transform_indices = @transform_18, window_bounds = array<i64: 32, 64>}, {pipeline_mode = #tpu.pipeline_mode<synchronous>, transform_indices = @transform_19, window_bounds = array<i64: 1, 64>}, {pipeline_mode = #tpu.pipeline_mode<synchronous>, transform_indices = @transform_20, window_bounds = array<i64: 64, 32>}, {pipeline_mode = #tpu.pipeline_mode<synchronous>, transform_indices = @transform_21, window_bounds = array<i64: 1, 32>}, {pipeline_mode = #tpu.pipeline_mode<synchronous>, transform_indices = @transform_22, window_bounds = array<i64: 32, 32>}, {pipeline_mode = #tpu.pipeline_mode<synchronous>, transform_indices = @transform_23, window_bounds = array<i64: 32, 32>}, {pipeline_mode = #tpu.pipeline_mode<synchronous>, transform_indices = @transform_24, window_bounds = array<i64: 32, 32>}, {pipeline_mode = #tpu.pipeline_mode<synchronous>, transform_indices = @transform_25, window_bounds = array<i64: 1, 32>}, {pipeline_mode = #tpu.pipeline_mode<synchronous>, transform_indices = @transform_26, window_bounds = array<i64: 32, 64>}, {pipeline_mode = #tpu.pipeline_mode<synchronous>, transform_indices = @transform_27, window_bounds = array<i64: 1, 64>}, {pipeline_mode = #tpu.pipeline_mode<synchronous>, transform_indices = @transform_28, window_bounds = array<i64: 64, 32>}, {pipeline_mode = #tpu.pipeline_mode<synchronous>, transform_indices = @transform_29, window_bounds = array<i64: 64, 32>}, {pipeline_mode = #tpu.pipeline_mode<synchronous>, transform_indices = @transform_30, window_bounds = array<i64: 1, 32>}, {pipeline_mode = #tpu.pipeline_mode<synchronous>, transform_indices = @transform_31, window_bounds = array<i64: 32, 32>}, {pipeline_mode = #tpu.pipeline_mode<synchronous>, transform_indices = @transform_32, window_bounds = array<i64: 1, 32>}, {pipeline_mode = #tpu.pipeline_mode<synchronous>, transform_indices = @transform_33, window_bounds = array<i64: 32, 64>}, {pipeline_mode = #tpu.pipeline_mode<synchronous>, transform_indices = @transform_34, window_bounds = array<i64: 1, 64>}, {transform_indices = @transform_35, window_bounds = array<i64: 1, 16, 64>}]} {
    %c0 = arith.constant 0 : index
    %c0_0 = arith.constant 0 : index
    %c0_1 = arith.constant 0 : index
    %0 = vector.load %arg1[%c0, %c0_0, %c0_1] : memref<1x16x64xf32, #tpu.memory_space<vmem>>, vector<1x16x64xf32>
    %1 = vector.shape_cast %0 : vector<1x16x64xf32> to vector<16x64xf32>
    %2 = tpu.iota {dimensions = array<i32: 0>} : vector<16x64xi32>
    %c0_i32 = arith.constant 0 : i32
    %3 = vector.broadcast %c0_i32 : i32 to vector<16x64xi32>
    %4 = arith.cmpi eq, %2, %3 : vector<16x64xi32>
    %c1_i32 = arith.constant 1 : i32
    %5 = tpu.dynamic_rotate %1 by %c1_i32 dim 0 : vector<16x64xf32>, i32 -> vector<16x64xf32>
    %cst = arith.constant 0.000000e+00 : f32
    %6 = vector.broadcast %cst : f32 to vector<16x64xf32>
    %7 = arith.select %4, %6, %5 : vector<16x64xi1>, vector<16x64xf32>
    %c15_i32 = arith.constant 15 : i32
    %8 = vector.broadcast %c15_i32 : i32 to vector<16x64xi32>
    %9 = arith.cmpi eq, %2, %8 : vector<16x64xi32>
    %c15_i32_2 = arith.constant 15 : i32
    %10 = tpu.dynamic_rotate %1 by %c15_i32_2 dim 0 : vector<16x64xf32>, i32 -> vector<16x64xf32>
    %cst_3 = arith.constant 0.000000e+00 : f32
    %11 = vector.broadcast %cst_3 : f32 to vector<16x64xf32>
    %12 = arith.select %9, %11, %10 : vector<16x64xi1>, vector<16x64xf32>
    %13 = arith.truncf %7 : vector<16x64xf32> to vector<16x64xbf16>
    %c0_4 = arith.constant 0 : index
    %c0_5 = arith.constant 0 : index
    %14 = vector.load %arg2[%c0_4, %c0_5] : memref<64x64xbf16, #tpu.memory_space<vmem>>, vector<64x64xbf16>
    %cst_6 = arith.constant dense<0.000000e+00> : vector<16x64xf32>
    %15 = tpu.matmul %13, %14, %cst_6 {dimension_numbers = #tpu.dot_dimension_numbers<[1], [0], [0], [1], [0, 0, 1, 1], [], []>} : vector<16x64xbf16>, vector<64x64xbf16>, vector<16x64xf32> -> vector<16x64xf32>
    %16 = arith.truncf %1 : vector<16x64xf32> to vector<16x64xbf16>
    %c0_7 = arith.constant 0 : index
    %c0_8 = arith.constant 0 : index
    %17 = vector.load %arg3[%c0_7, %c0_8] : memref<64x64xbf16, #tpu.memory_space<vmem>>, vector<64x64xbf16>
    %cst_9 = arith.constant dense<0.000000e+00> : vector<16x64xf32>
    %18 = tpu.matmul %16, %17, %cst_9 {dimension_numbers = #tpu.dot_dimension_numbers<[1], [0], [0], [1], [0, 0, 1, 1], [], []>} : vector<16x64xbf16>, vector<64x64xbf16>, vector<16x64xf32> -> vector<16x64xf32>
    %19 = arith.addf %15, %18 : vector<16x64xf32>
    %20 = arith.truncf %12 : vector<16x64xf32> to vector<16x64xbf16>
    %c0_10 = arith.constant 0 : index
    %c0_11 = arith.constant 0 : index
    %21 = vector.load %arg4[%c0_10, %c0_11] : memref<64x64xbf16, #tpu.memory_space<vmem>>, vector<64x64xbf16>
    %cst_12 = arith.constant dense<0.000000e+00> : vector<16x64xf32>
    %22 = tpu.matmul %20, %21, %cst_12 {dimension_numbers = #tpu.dot_dimension_numbers<[1], [0], [0], [1], [0, 0, 1, 1], [], []>} : vector<16x64xbf16>, vector<64x64xbf16>, vector<16x64xf32> -> vector<16x64xf32>
    %23 = arith.addf %19, %22 : vector<16x64xf32>
    %c0_13 = arith.constant 0 : index
    %c0_14 = arith.constant 0 : index
    %24 = vector.load %arg5[%c0_13, %c0_14] : memref<1x64xf32, #tpu.memory_space<vmem>>, vector<1x64xf32>
    %25 = vector.broadcast %24 : vector<1x64xf32> to vector<16x64xf32>
    %26 = arith.addf %23, %25 : vector<16x64xf32>
    %cst_15 = arith.constant 0.000000e+00 : f32
    %27 = vector.broadcast %cst_15 : f32 to vector<16x64xf32>
    %28 = arith.maximumf %26, %27 : vector<16x64xf32>
    %29 = arith.truncf %28 : vector<16x64xf32> to vector<16x64xbf16>
    %c0_16 = arith.constant 0 : index
    %c0_17 = arith.constant 0 : index
    %30 = vector.load %arg6[%c0_16, %c0_17] : memref<64x32xbf16, #tpu.memory_space<vmem>>, vector<64x32xbf16>
    %cst_18 = arith.constant dense<0.000000e+00> : vector<16x32xf32>
    %31 = tpu.matmul %29, %30, %cst_18 {dimension_numbers = #tpu.dot_dimension_numbers<[1], [0], [0], [1], [0, 0, 1, 1], [], []>} : vector<16x64xbf16>, vector<64x32xbf16>, vector<16x32xf32> -> vector<16x32xf32>
    %c0_19 = arith.constant 0 : index
    %c0_20 = arith.constant 0 : index
    %32 = vector.load %arg7[%c0_19, %c0_20] : memref<1x32xf32, #tpu.memory_space<vmem>>, vector<1x32xf32>
    %33 = vector.broadcast %32 : vector<1x32xf32> to vector<16x32xf32>
    %34 = arith.addf %31, %33 : vector<16x32xf32>
    %cst_21 = arith.constant 0.000000e+00 : f32
    %35 = vector.broadcast %cst_21 : f32 to vector<16x32xf32>
    %36 = arith.maximumf %34, %35 : vector<16x32xf32>
    %37 = tpu.iota {dimensions = array<i32: 0>} : vector<16x32xi32>
    %c0_i32_22 = arith.constant 0 : i32
    %38 = vector.broadcast %c0_i32_22 : i32 to vector<16x32xi32>
    %39 = arith.cmpi eq, %37, %38 : vector<16x32xi32>
    %c1_i32_23 = arith.constant 1 : i32
    %40 = tpu.dynamic_rotate %36 by %c1_i32_23 dim 0 : vector<16x32xf32>, i32 -> vector<16x32xf32>
    %cst_24 = arith.constant 0.000000e+00 : f32
    %41 = vector.broadcast %cst_24 : f32 to vector<16x32xf32>
    %42 = arith.select %39, %41, %40 : vector<16x32xi1>, vector<16x32xf32>
    %c15_i32_25 = arith.constant 15 : i32
    %43 = vector.broadcast %c15_i32_25 : i32 to vector<16x32xi32>
    %44 = arith.cmpi eq, %37, %43 : vector<16x32xi32>
    %c15_i32_26 = arith.constant 15 : i32
    %45 = tpu.dynamic_rotate %36 by %c15_i32_26 dim 0 : vector<16x32xf32>, i32 -> vector<16x32xf32>
    %cst_27 = arith.constant 0.000000e+00 : f32
    %46 = vector.broadcast %cst_27 : f32 to vector<16x32xf32>
    %47 = arith.select %44, %46, %45 : vector<16x32xi1>, vector<16x32xf32>
    %48 = arith.truncf %42 : vector<16x32xf32> to vector<16x32xbf16>
    %c0_28 = arith.constant 0 : index
    %c0_29 = arith.constant 0 : index
    %49 = vector.load %arg8[%c0_28, %c0_29] : memref<32x32xbf16, #tpu.memory_space<vmem>>, vector<32x32xbf16>
    %cst_30 = arith.constant dense<0.000000e+00> : vector<16x32xf32>
    %50 = tpu.matmul %48, %49, %cst_30 {dimension_numbers = #tpu.dot_dimension_numbers<[1], [0], [0], [1], [0, 0, 1, 1], [], []>} : vector<16x32xbf16>, vector<32x32xbf16>, vector<16x32xf32> -> vector<16x32xf32>
    %51 = arith.truncf %36 : vector<16x32xf32> to vector<16x32xbf16>
    %c0_31 = arith.constant 0 : index
    %c0_32 = arith.constant 0 : index
    %52 = vector.load %arg9[%c0_31, %c0_32] : memref<32x32xbf16, #tpu.memory_space<vmem>>, vector<32x32xbf16>
    %cst_33 = arith.constant dense<0.000000e+00> : vector<16x32xf32>
    %53 = tpu.matmul %51, %52, %cst_33 {dimension_numbers = #tpu.dot_dimension_numbers<[1], [0], [0], [1], [0, 0, 1, 1], [], []>} : vector<16x32xbf16>, vector<32x32xbf16>, vector<16x32xf32> -> vector<16x32xf32>
    %54 = arith.addf %50, %53 : vector<16x32xf32>
    %55 = arith.truncf %47 : vector<16x32xf32> to vector<16x32xbf16>
    %c0_34 = arith.constant 0 : index
    %c0_35 = arith.constant 0 : index
    %56 = vector.load %arg10[%c0_34, %c0_35] : memref<32x32xbf16, #tpu.memory_space<vmem>>, vector<32x32xbf16>
    %cst_36 = arith.constant dense<0.000000e+00> : vector<16x32xf32>
    %57 = tpu.matmul %55, %56, %cst_36 {dimension_numbers = #tpu.dot_dimension_numbers<[1], [0], [0], [1], [0, 0, 1, 1], [], []>} : vector<16x32xbf16>, vector<32x32xbf16>, vector<16x32xf32> -> vector<16x32xf32>
    %58 = arith.addf %54, %57 : vector<16x32xf32>
    %c0_37 = arith.constant 0 : index
    %c0_38 = arith.constant 0 : index
    %59 = vector.load %arg11[%c0_37, %c0_38] : memref<1x32xf32, #tpu.memory_space<vmem>>, vector<1x32xf32>
    %60 = vector.broadcast %59 : vector<1x32xf32> to vector<16x32xf32>
    %61 = arith.addf %58, %60 : vector<16x32xf32>
    %cst_39 = arith.constant 0.000000e+00 : f32
    %62 = vector.broadcast %cst_39 : f32 to vector<16x32xf32>
    %63 = arith.maximumf %61, %62 : vector<16x32xf32>
    %64 = arith.truncf %63 : vector<16x32xf32> to vector<16x32xbf16>
    %c0_40 = arith.constant 0 : index
    %c0_41 = arith.constant 0 : index
    %65 = vector.load %arg12[%c0_40, %c0_41] : memref<32x64xbf16, #tpu.memory_space<vmem>>, vector<32x64xbf16>
    %cst_42 = arith.constant dense<0.000000e+00> : vector<16x64xf32>
    %66 = tpu.matmul %64, %65, %cst_42 {dimension_numbers = #tpu.dot_dimension_numbers<[1], [0], [0], [1], [0, 0, 1, 1], [], []>} : vector<16x32xbf16>, vector<32x64xbf16>, vector<16x64xf32> -> vector<16x64xf32>
    %c0_43 = arith.constant 0 : index
    %c0_44 = arith.constant 0 : index
    %67 = vector.load %arg13[%c0_43, %c0_44] : memref<1x64xf32, #tpu.memory_space<vmem>>, vector<1x64xf32>
    %68 = vector.broadcast %67 : vector<1x64xf32> to vector<16x64xf32>
    %69 = arith.addf %66, %68 : vector<16x64xf32>
    %cst_45 = arith.constant dense<0.000000e+00> : vector<16x16xf32>
    %70 = tpu.matmul %28, %28, %cst_45 {dimension_numbers = #tpu.dot_dimension_numbers<[1], [1], [0], [0], [0, 0, 1, 0], [], []>} : vector<16x64xf32>, vector<16x64xf32>, vector<16x16xf32> -> vector<16x16xf32>
    %71 = arith.mulf %28, %28 : vector<16x64xf32>
    %cst_46 = arith.constant dense<0.000000e+00> : vector<16xf32>
    %72 = vector.multi_reduction <add>, %71, %cst_46 [1] : vector<16x64xf32> to vector<16xf32>
    %73 = vector.shape_cast %72 : vector<16xf32> to vector<16x1xf32>
    %74 = arith.mulf %28, %28 : vector<16x64xf32>
    %cst_47 = arith.constant dense<0.000000e+00> : vector<16xf32>
    %75 = vector.multi_reduction <add>, %74, %cst_47 [1] : vector<16x64xf32> to vector<16xf32>
    %76 = vector.shape_cast %75 : vector<16xf32> to vector<16x1xf32>
    %cst_48 = arith.constant 2.000000e+00 : f32
    %77 = vector.broadcast %cst_48 : f32 to vector<16x16xf32>
    %78 = arith.mulf %77, %70 : vector<16x16xf32>
    %79 = vector.broadcast %73 : vector<16x1xf32> to vector<16x16xf32>
    %80 = arith.subf %78, %79 : vector<16x16xf32>
    %81 = tpu.transpose %76, [1, 0] : vector<16x1xf32> -> vector<1x16xf32>
    %82 = vector.broadcast %81 : vector<1x16xf32> to vector<16x16xf32>
    %83 = arith.subf %80, %82 : vector<16x16xf32>
    %c0_49 = arith.constant 0 : index
    %c0_50 = arith.constant 0 : index
    %84 = vector.load %arg14[%c0_49, %c0_50] : memref<64x32xbf16, #tpu.memory_space<vmem>>, vector<64x32xbf16>
    %cst_51 = arith.constant dense<0.000000e+00> : vector<16x32xf32>
    %85 = tpu.matmul %29, %84, %cst_51 {dimension_numbers = #tpu.dot_dimension_numbers<[1], [0], [0], [1], [0, 0, 1, 1], [], []>} : vector<16x64xbf16>, vector<64x32xbf16>, vector<16x32xf32> -> vector<16x32xf32>
    %86 = tpu.iota {dimensions = array<i32: 1>} : vector<16x16xi32>
    %87 = arith.sitofp %86 : vector<16x16xi32> to vector<16x16xf32>
    %cst_52 = arith.constant dense<0xFF800000> : vector<16xf32>
    %88 = vector.multi_reduction <maximumf>, %83, %cst_52 [1] : vector<16x16xf32> to vector<16xf32>
    %89 = vector.shape_cast %88 : vector<16xf32> to vector<16x1xf32>
    %90 = vector.broadcast %89 : vector<16x1xf32> to vector<16x16xf32>
    %91 = arith.cmpf oge, %83, %90 : vector<16x16xf32>
    %cst_53 = arith.constant 1.600000e+01 : f32
    %92 = vector.broadcast %cst_53 : f32 to vector<16x16xf32>
    %93 = arith.select %91, %87, %92 : vector<16x16xi1>, vector<16x16xf32>
    %cst_54 = arith.constant dense<0x7F800000> : vector<16xf32>
    %94 = vector.multi_reduction <minimumf>, %93, %cst_54 [1] : vector<16x16xf32> to vector<16xf32>
    %95 = vector.shape_cast %94 : vector<16xf32> to vector<16x1xf32>
    %96 = vector.broadcast %95 : vector<16x1xf32> to vector<16x16xf32>
    %97 = arith.cmpf oeq, %87, %96 : vector<16x16xf32>
    %98 = arith.extui %97 : vector<16x16xi1> to vector<16x16xi32>
    %99 = arith.sitofp %98 : vector<16x16xi32> to vector<16x16xf32>
    %cst_55 = arith.constant dense<0.000000e+00> : vector<16x64xf32>
    %100 = tpu.matmul %99, %28, %cst_55 {dimension_numbers = #tpu.dot_dimension_numbers<[1], [0], [0], [1], [0, 0, 1, 1], [], []>} : vector<16x16xf32>, vector<16x64xf32>, vector<16x64xf32> -> vector<16x64xf32>
    %cst_56 = arith.constant -1.000000e+30 : f32
    %101 = vector.broadcast %cst_56 : f32 to vector<16x16xf32>
    %102 = arith.select %97, %101, %83 : vector<16x16xi1>, vector<16x16xf32>
    %103 = arith.subf %100, %28 : vector<16x64xf32>
    %104 = arith.truncf %103 : vector<16x64xf32> to vector<16x64xbf16>
    %c0_57 = arith.constant 0 : index
    %c0_58 = arith.constant 0 : index
    %105 = vector.load %arg15[%c0_57, %c0_58] : memref<64x32xbf16, #tpu.memory_space<vmem>>, vector<64x32xbf16>
    %cst_59 = arith.constant dense<0.000000e+00> : vector<16x32xf32>
    %106 = tpu.matmul %104, %105, %cst_59 {dimension_numbers = #tpu.dot_dimension_numbers<[1], [0], [0], [1], [0, 0, 1, 1], [], []>} : vector<16x64xbf16>, vector<64x32xbf16>, vector<16x32xf32> -> vector<16x32xf32>
    %107 = arith.addf %85, %106 : vector<16x32xf32>
    %c0_60 = arith.constant 0 : index
    %c0_61 = arith.constant 0 : index
    %108 = vector.load %arg16[%c0_60, %c0_61] : memref<1x32xf32, #tpu.memory_space<vmem>>, vector<1x32xf32>
    %109 = vector.broadcast %108 : vector<1x32xf32> to vector<16x32xf32>
    %110 = arith.addf %107, %109 : vector<16x32xf32>
    %cst_62 = arith.constant 0.000000e+00 : f32
    %111 = vector.broadcast %cst_62 : f32 to vector<16x32xf32>
    %112 = arith.maximumf %110, %111 : vector<16x32xf32>
    %113 = arith.truncf %112 : vector<16x32xf32> to vector<16x32xbf16>
    %c0_63 = arith.constant 0 : index
    %c0_64 = arith.constant 0 : index
    %114 = vector.load %arg17[%c0_63, %c0_64] : memref<32x32xbf16, #tpu.memory_space<vmem>>, vector<32x32xbf16>
    %cst_65 = arith.constant dense<0.000000e+00> : vector<16x32xf32>
    %115 = tpu.matmul %113, %114, %cst_65 {dimension_numbers = #tpu.dot_dimension_numbers<[1], [0], [0], [1], [0, 0, 1, 1], [], []>} : vector<16x32xbf16>, vector<32x32xbf16>, vector<16x32xf32> -> vector<16x32xf32>
    %c0_66 = arith.constant 0 : index
    %c0_67 = arith.constant 0 : index
    %116 = vector.load %arg18[%c0_66, %c0_67] : memref<1x32xf32, #tpu.memory_space<vmem>>, vector<1x32xf32>
    %117 = vector.broadcast %116 : vector<1x32xf32> to vector<16x32xf32>
    %118 = arith.addf %115, %117 : vector<16x32xf32>
    %cst_68 = arith.constant 0.000000e+00 : f32
    %119 = vector.broadcast %cst_68 : f32 to vector<16x32xf32>
    %120 = arith.maximumf %118, %119 : vector<16x32xf32>
    %121 = arith.truncf %120 : vector<16x32xf32> to vector<16x32xbf16>
    %c0_69 = arith.constant 0 : index
    %c0_70 = arith.constant 0 : index
    %122 = vector.load %arg19[%c0_69, %c0_70] : memref<32x64xbf16, #tpu.memory_space<vmem>>, vector<32x64xbf16>
    %cst_71 = arith.constant dense<0.000000e+00> : vector<16x64xf32>
    %123 = tpu.matmul %121, %122, %cst_71 {dimension_numbers = #tpu.dot_dimension_numbers<[1], [0], [0], [1], [0, 0, 1, 1], [], []>} : vector<16x32xbf16>, vector<32x64xbf16>, vector<16x64xf32> -> vector<16x64xf32>
    %c0_72 = arith.constant 0 : index
    %c0_73 = arith.constant 0 : index
    %124 = vector.load %arg20[%c0_72, %c0_73] : memref<1x64xf32, #tpu.memory_space<vmem>>, vector<1x64xf32>
    %125 = vector.broadcast %124 : vector<1x64xf32> to vector<16x64xf32>
    %126 = arith.addf %123, %125 : vector<16x64xf32>
    %cst_74 = arith.constant dense<0xFF800000> : vector<16xf32>
    %127 = vector.multi_reduction <maximumf>, %102, %cst_74 [1] : vector<16x16xf32> to vector<16xf32>
    %128 = vector.shape_cast %127 : vector<16xf32> to vector<16x1xf32>
    %129 = vector.broadcast %128 : vector<16x1xf32> to vector<16x16xf32>
    %130 = arith.cmpf oge, %102, %129 : vector<16x16xf32>
    %cst_75 = arith.constant 1.600000e+01 : f32
    %131 = vector.broadcast %cst_75 : f32 to vector<16x16xf32>
    %132 = arith.select %130, %87, %131 : vector<16x16xi1>, vector<16x16xf32>
    %cst_76 = arith.constant dense<0x7F800000> : vector<16xf32>
    %133 = vector.multi_reduction <minimumf>, %132, %cst_76 [1] : vector<16x16xf32> to vector<16xf32>
    %134 = vector.shape_cast %133 : vector<16xf32> to vector<16x1xf32>
    %135 = vector.broadcast %134 : vector<16x1xf32> to vector<16x16xf32>
    %136 = arith.cmpf oeq, %87, %135 : vector<16x16xf32>
    %137 = arith.extui %136 : vector<16x16xi1> to vector<16x16xi32>
    %138 = arith.sitofp %137 : vector<16x16xi32> to vector<16x16xf32>
    %cst_77 = arith.constant dense<0.000000e+00> : vector<16x64xf32>
    %139 = tpu.matmul %138, %28, %cst_77 {dimension_numbers = #tpu.dot_dimension_numbers<[1], [0], [0], [1], [0, 0, 1, 1], [], []>} : vector<16x16xf32>, vector<16x64xf32>, vector<16x64xf32> -> vector<16x64xf32>
    %cst_78 = arith.constant -1.000000e+30 : f32
    %140 = vector.broadcast %cst_78 : f32 to vector<16x16xf32>
    %141 = arith.select %136, %140, %102 : vector<16x16xi1>, vector<16x16xf32>
    %142 = arith.subf %139, %28 : vector<16x64xf32>
    %143 = arith.truncf %142 : vector<16x64xf32> to vector<16x64xbf16>
    %c0_79 = arith.constant 0 : index
    %c0_80 = arith.constant 0 : index
    %144 = vector.load %arg15[%c0_79, %c0_80] : memref<64x32xbf16, #tpu.memory_space<vmem>>, vector<64x32xbf16>
    %cst_81 = arith.constant dense<0.000000e+00> : vector<16x32xf32>
    %145 = tpu.matmul %143, %144, %cst_81 {dimension_numbers = #tpu.dot_dimension_numbers<[1], [0], [0], [1], [0, 0, 1, 1], [], []>} : vector<16x64xbf16>, vector<64x32xbf16>, vector<16x32xf32> -> vector<16x32xf32>
    %146 = arith.addf %85, %145 : vector<16x32xf32>
    %c0_82 = arith.constant 0 : index
    %c0_83 = arith.constant 0 : index
    %147 = vector.load %arg16[%c0_82, %c0_83] : memref<1x32xf32, #tpu.memory_space<vmem>>, vector<1x32xf32>
    %148 = vector.broadcast %147 : vector<1x32xf32> to vector<16x32xf32>
    %149 = arith.addf %146, %148 : vector<16x32xf32>
    %cst_84 = arith.constant 0.000000e+00 : f32
    %150 = vector.broadcast %cst_84 : f32 to vector<16x32xf32>
    %151 = arith.maximumf %149, %150 : vector<16x32xf32>
    %152 = arith.truncf %151 : vector<16x32xf32> to vector<16x32xbf16>
    %c0_85 = arith.constant 0 : index
    %c0_86 = arith.constant 0 : index
    %153 = vector.load %arg17[%c0_85, %c0_86] : memref<32x32xbf16, #tpu.memory_space<vmem>>, vector<32x32xbf16>
    %cst_87 = arith.constant dense<0.000000e+00> : vector<16x32xf32>
    %154 = tpu.matmul %152, %153, %cst_87 {dimension_numbers = #tpu.dot_dimension_numbers<[1], [0], [0], [1], [0, 0, 1, 1], [], []>} : vector<16x32xbf16>, vector<32x32xbf16>, vector<16x32xf32> -> vector<16x32xf32>
    %c0_88 = arith.constant 0 : index
    %c0_89 = arith.constant 0 : index
    %155 = vector.load %arg18[%c0_88, %c0_89] : memref<1x32xf32, #tpu.memory_space<vmem>>, vector<1x32xf32>
    %156 = vector.broadcast %155 : vector<1x32xf32> to vector<16x32xf32>
    %157 = arith.addf %154, %156 : vector<16x32xf32>
    %cst_90 = arith.constant 0.000000e+00 : f32
    %158 = vector.broadcast %cst_90 : f32 to vector<16x32xf32>
    %159 = arith.maximumf %157, %158 : vector<16x32xf32>
    %160 = arith.truncf %159 : vector<16x32xf32> to vector<16x32xbf16>
    %c0_91 = arith.constant 0 : index
    %c0_92 = arith.constant 0 : index
    %161 = vector.load %arg19[%c0_91, %c0_92] : memref<32x64xbf16, #tpu.memory_space<vmem>>, vector<32x64xbf16>
    %cst_93 = arith.constant dense<0.000000e+00> : vector<16x64xf32>
    %162 = tpu.matmul %160, %161, %cst_93 {dimension_numbers = #tpu.dot_dimension_numbers<[1], [0], [0], [1], [0, 0, 1, 1], [], []>} : vector<16x32xbf16>, vector<32x64xbf16>, vector<16x64xf32> -> vector<16x64xf32>
    %c0_94 = arith.constant 0 : index
    %c0_95 = arith.constant 0 : index
    %163 = vector.load %arg20[%c0_94, %c0_95] : memref<1x64xf32, #tpu.memory_space<vmem>>, vector<1x64xf32>
    %164 = vector.broadcast %163 : vector<1x64xf32> to vector<16x64xf32>
    %165 = arith.addf %162, %164 : vector<16x64xf32>
    %166 = arith.maximumf %126, %165 : vector<16x64xf32>
    %cst_96 = arith.constant dense<0xFF800000> : vector<16xf32>
    %167 = vector.multi_reduction <maximumf>, %141, %cst_96 [1] : vector<16x16xf32> to vector<16xf32>
    %168 = vector.shape_cast %167 : vector<16xf32> to vector<16x1xf32>
    %169 = vector.broadcast %168 : vector<16x1xf32> to vector<16x16xf32>
    %170 = arith.cmpf oge, %141, %169 : vector<16x16xf32>
    %cst_97 = arith.constant 1.600000e+01 : f32
    %171 = vector.broadcast %cst_97 : f32 to vector<16x16xf32>
    %172 = arith.select %170, %87, %171 : vector<16x16xi1>, vector<16x16xf32>
    %cst_98 = arith.constant dense<0x7F800000> : vector<16xf32>
    %173 = vector.multi_reduction <minimumf>, %172, %cst_98 [1] : vector<16x16xf32> to vector<16xf32>
    %174 = vector.shape_cast %173 : vector<16xf32> to vector<16x1xf32>
    %175 = vector.broadcast %174 : vector<16x1xf32> to vector<16x16xf32>
    %176 = arith.cmpf oeq, %87, %175 : vector<16x16xf32>
    %177 = arith.extui %176 : vector<16x16xi1> to vector<16x16xi32>
    %178 = arith.sitofp %177 : vector<16x16xi32> to vector<16x16xf32>
    %cst_99 = arith.constant dense<0.000000e+00> : vector<16x64xf32>
    %179 = tpu.matmul %178, %28, %cst_99 {dimension_numbers = #tpu.dot_dimension_numbers<[1], [0], [0], [1], [0, 0, 1, 1], [], []>} : vector<16x16xf32>, vector<16x64xf32>, vector<16x64xf32> -> vector<16x64xf32>
    %cst_100 = arith.constant -1.000000e+30 : f32
    %180 = vector.broadcast %cst_100 : f32 to vector<16x16xf32>
    %181 = arith.select %176, %180, %141 : vector<16x16xi1>, vector<16x16xf32>
    %182 = arith.subf %179, %28 : vector<16x64xf32>
    %183 = arith.truncf %182 : vector<16x64xf32> to vector<16x64xbf16>
    %c0_101 = arith.constant 0 : index
    %c0_102 = arith.constant 0 : index
    %184 = vector.load %arg15[%c0_101, %c0_102] : memref<64x32xbf16, #tpu.memory_space<vmem>>, vector<64x32xbf16>
    %cst_103 = arith.constant dense<0.000000e+00> : vector<16x32xf32>
    %185 = tpu.matmul %183, %184, %cst_103 {dimension_numbers = #tpu.dot_dimension_numbers<[1], [0], [0], [1], [0, 0, 1, 1], [], []>} : vector<16x64xbf16>, vector<64x32xbf16>, vector<16x32xf32> -> vector<16x32xf32>
    %186 = arith.addf %85, %185 : vector<16x32xf32>
    %c0_104 = arith.constant 0 : index
    %c0_105 = arith.constant 0 : index
    %187 = vector.load %arg16[%c0_104, %c0_105] : memref<1x32xf32, #tpu.memory_space<vmem>>, vector<1x32xf32>
    %188 = vector.broadcast %187 : vector<1x32xf32> to vector<16x32xf32>
    %189 = arith.addf %186, %188 : vector<16x32xf32>
    %cst_106 = arith.constant 0.000000e+00 : f32
    %190 = vector.broadcast %cst_106 : f32 to vector<16x32xf32>
    %191 = arith.maximumf %189, %190 : vector<16x32xf32>
    %192 = arith.truncf %191 : vector<16x32xf32> to vector<16x32xbf16>
    %c0_107 = arith.constant 0 : index
    %c0_108 = arith.constant 0 : index
    %193 = vector.load %arg17[%c0_107, %c0_108] : memref<32x32xbf16, #tpu.memory_space<vmem>>, vector<32x32xbf16>
    %cst_109 = arith.constant dense<0.000000e+00> : vector<16x32xf32>
    %194 = tpu.matmul %192, %193, %cst_109 {dimension_numbers = #tpu.dot_dimension_numbers<[1], [0], [0], [1], [0, 0, 1, 1], [], []>} : vector<16x32xbf16>, vector<32x32xbf16>, vector<16x32xf32> -> vector<16x32xf32>
    %c0_110 = arith.constant 0 : index
    %c0_111 = arith.constant 0 : index
    %195 = vector.load %arg18[%c0_110, %c0_111] : memref<1x32xf32, #tpu.memory_space<vmem>>, vector<1x32xf32>
    %196 = vector.broadcast %195 : vector<1x32xf32> to vector<16x32xf32>
    %197 = arith.addf %194, %196 : vector<16x32xf32>
    %cst_112 = arith.constant 0.000000e+00 : f32
    %198 = vector.broadcast %cst_112 : f32 to vector<16x32xf32>
    %199 = arith.maximumf %197, %198 : vector<16x32xf32>
    %200 = arith.truncf %199 : vector<16x32xf32> to vector<16x32xbf16>
    %c0_113 = arith.constant 0 : index
    %c0_114 = arith.constant 0 : index
    %201 = vector.load %arg19[%c0_113, %c0_114] : memref<32x64xbf16, #tpu.memory_space<vmem>>, vector<32x64xbf16>
    %cst_115 = arith.constant dense<0.000000e+00> : vector<16x64xf32>
    %202 = tpu.matmul %200, %201, %cst_115 {dimension_numbers = #tpu.dot_dimension_numbers<[1], [0], [0], [1], [0, 0, 1, 1], [], []>} : vector<16x32xbf16>, vector<32x64xbf16>, vector<16x64xf32> -> vector<16x64xf32>
    %c0_116 = arith.constant 0 : index
    %c0_117 = arith.constant 0 : index
    %203 = vector.load %arg20[%c0_116, %c0_117] : memref<1x64xf32, #tpu.memory_space<vmem>>, vector<1x64xf32>
    %204 = vector.broadcast %203 : vector<1x64xf32> to vector<16x64xf32>
    %205 = arith.addf %202, %204 : vector<16x64xf32>
    %206 = arith.maximumf %166, %205 : vector<16x64xf32>
    %cst_118 = arith.constant dense<0xFF800000> : vector<16xf32>
    %207 = vector.multi_reduction <maximumf>, %181, %cst_118 [1] : vector<16x16xf32> to vector<16xf32>
    %208 = vector.shape_cast %207 : vector<16xf32> to vector<16x1xf32>
    %209 = vector.broadcast %208 : vector<16x1xf32> to vector<16x16xf32>
    %210 = arith.cmpf oge, %181, %209 : vector<16x16xf32>
    %cst_119 = arith.constant 1.600000e+01 : f32
    %211 = vector.broadcast %cst_119 : f32 to vector<16x16xf32>
    %212 = arith.select %210, %87, %211 : vector<16x16xi1>, vector<16x16xf32>
    %cst_120 = arith.constant dense<0x7F800000> : vector<16xf32>
    %213 = vector.multi_reduction <minimumf>, %212, %cst_120 [1] : vector<16x16xf32> to vector<16xf32>
    %214 = vector.shape_cast %213 : vector<16xf32> to vector<16x1xf32>
    %215 = vector.broadcast %214 : vector<16x1xf32> to vector<16x16xf32>
    %216 = arith.cmpf oeq, %87, %215 : vector<16x16xf32>
    %217 = arith.extui %216 : vector<16x16xi1> to vector<16x16xi32>
    %218 = arith.sitofp %217 : vector<16x16xi32> to vector<16x16xf32>
    %cst_121 = arith.constant dense<0.000000e+00> : vector<16x64xf32>
    %219 = tpu.matmul %218, %28, %cst_121 {dimension_numbers = #tpu.dot_dimension_numbers<[1], [0], [0], [1], [0, 0, 1, 1], [], []>} : vector<16x16xf32>, vector<16x64xf32>, vector<16x64xf32> -> vector<16x64xf32>
    %220 = arith.subf %219, %28 : vector<16x64xf32>
    %221 = arith.truncf %220 : vector<16x64xf32> to vector<16x64xbf16>
    %c0_122 = arith.constant 0 : index
    %c0_123 = arith.constant 0 : index
    %222 = vector.load %arg15[%c0_122, %c0_123] : memref<64x32xbf16, #tpu.memory_space<vmem>>, vector<64x32xbf16>
    %cst_124 = arith.constant dense<0.000000e+00> : vector<16x32xf32>
    %223 = tpu.matmul %221, %222, %cst_124 {dimension_numbers = #tpu.dot_dimension_numbers<[1], [0], [0], [1], [0, 0, 1, 1], [], []>} : vector<16x64xbf16>, vector<64x32xbf16>, vector<16x32xf32> -> vector<16x32xf32>
    %224 = arith.addf %85, %223 : vector<16x32xf32>
    %c0_125 = arith.constant 0 : index
    %c0_126 = arith.constant 0 : index
    %225 = vector.load %arg16[%c0_125, %c0_126] : memref<1x32xf32, #tpu.memory_space<vmem>>, vector<1x32xf32>
    %226 = vector.broadcast %225 : vector<1x32xf32> to vector<16x32xf32>
    %227 = arith.addf %224, %226 : vector<16x32xf32>
    %cst_127 = arith.constant 0.000000e+00 : f32
    %228 = vector.broadcast %cst_127 : f32 to vector<16x32xf32>
    %229 = arith.maximumf %227, %228 : vector<16x32xf32>
    %230 = arith.truncf %229 : vector<16x32xf32> to vector<16x32xbf16>
    %c0_128 = arith.constant 0 : index
    %c0_129 = arith.constant 0 : index
    %231 = vector.load %arg17[%c0_128, %c0_129] : memref<32x32xbf16, #tpu.memory_space<vmem>>, vector<32x32xbf16>
    %cst_130 = arith.constant dense<0.000000e+00> : vector<16x32xf32>
    %232 = tpu.matmul %230, %231, %cst_130 {dimension_numbers = #tpu.dot_dimension_numbers<[1], [0], [0], [1], [0, 0, 1, 1], [], []>} : vector<16x32xbf16>, vector<32x32xbf16>, vector<16x32xf32> -> vector<16x32xf32>
    %c0_131 = arith.constant 0 : index
    %c0_132 = arith.constant 0 : index
    %233 = vector.load %arg18[%c0_131, %c0_132] : memref<1x32xf32, #tpu.memory_space<vmem>>, vector<1x32xf32>
    %234 = vector.broadcast %233 : vector<1x32xf32> to vector<16x32xf32>
    %235 = arith.addf %232, %234 : vector<16x32xf32>
    %cst_133 = arith.constant 0.000000e+00 : f32
    %236 = vector.broadcast %cst_133 : f32 to vector<16x32xf32>
    %237 = arith.maximumf %235, %236 : vector<16x32xf32>
    %238 = arith.truncf %237 : vector<16x32xf32> to vector<16x32xbf16>
    %c0_134 = arith.constant 0 : index
    %c0_135 = arith.constant 0 : index
    %239 = vector.load %arg19[%c0_134, %c0_135] : memref<32x64xbf16, #tpu.memory_space<vmem>>, vector<32x64xbf16>
    %cst_136 = arith.constant dense<0.000000e+00> : vector<16x64xf32>
    %240 = tpu.matmul %238, %239, %cst_136 {dimension_numbers = #tpu.dot_dimension_numbers<[1], [0], [0], [1], [0, 0, 1, 1], [], []>} : vector<16x32xbf16>, vector<32x64xbf16>, vector<16x64xf32> -> vector<16x64xf32>
    %c0_137 = arith.constant 0 : index
    %c0_138 = arith.constant 0 : index
    %241 = vector.load %arg20[%c0_137, %c0_138] : memref<1x64xf32, #tpu.memory_space<vmem>>, vector<1x64xf32>
    %242 = vector.broadcast %241 : vector<1x64xf32> to vector<16x64xf32>
    %243 = arith.addf %240, %242 : vector<16x64xf32>
    %244 = arith.maximumf %206, %243 : vector<16x64xf32>
    %245 = arith.addf %69, %28 : vector<16x64xf32>
    %246 = arith.addf %245, %244 : vector<16x64xf32>
    %cst_139 = arith.constant 0.000000e+00 : f32
    %247 = vector.broadcast %cst_139 : f32 to vector<16x64xf32>
    %248 = arith.maximumf %246, %247 : vector<16x64xf32>
    %249 = arith.truncf %248 : vector<16x64xf32> to vector<16x64xbf16>
    %c0_140 = arith.constant 0 : index
    %c0_141 = arith.constant 0 : index
    %250 = vector.load %arg21[%c0_140, %c0_141] : memref<64x32xbf16, #tpu.memory_space<vmem>>, vector<64x32xbf16>
    %cst_142 = arith.constant dense<0.000000e+00> : vector<16x32xf32>
    %251 = tpu.matmul %249, %250, %cst_142 {dimension_numbers = #tpu.dot_dimension_numbers<[1], [0], [0], [1], [0, 0, 1, 1], [], []>} : vector<16x64xbf16>, vector<64x32xbf16>, vector<16x32xf32> -> vector<16x32xf32>
    %c0_143 = arith.constant 0 : index
    %c0_144 = arith.constant 0 : index
    %252 = vector.load %arg22[%c0_143, %c0_144] : memref<1x32xf32, #tpu.memory_space<vmem>>, vector<1x32xf32>
    %253 = vector.broadcast %252 : vector<1x32xf32> to vector<16x32xf32>
    %254 = arith.addf %251, %253 : vector<16x32xf32>
    %cst_145 = arith.constant 0.000000e+00 : f32
    %255 = vector.broadcast %cst_145 : f32 to vector<16x32xf32>
    %256 = arith.maximumf %254, %255 : vector<16x32xf32>
    %257 = tpu.iota {dimensions = array<i32: 0>} : vector<16x32xi32>
    %c0_i32_146 = arith.constant 0 : i32
    %258 = vector.broadcast %c0_i32_146 : i32 to vector<16x32xi32>
    %259 = arith.cmpi eq, %257, %258 : vector<16x32xi32>
    %c1_i32_147 = arith.constant 1 : i32
    %260 = tpu.dynamic_rotate %256 by %c1_i32_147 dim 0 : vector<16x32xf32>, i32 -> vector<16x32xf32>
    %cst_148 = arith.constant 0.000000e+00 : f32
    %261 = vector.broadcast %cst_148 : f32 to vector<16x32xf32>
    %262 = arith.select %259, %261, %260 : vector<16x32xi1>, vector<16x32xf32>
    %c15_i32_149 = arith.constant 15 : i32
    %263 = vector.broadcast %c15_i32_149 : i32 to vector<16x32xi32>
    %264 = arith.cmpi eq, %257, %263 : vector<16x32xi32>
    %c15_i32_150 = arith.constant 15 : i32
    %265 = tpu.dynamic_rotate %256 by %c15_i32_150 dim 0 : vector<16x32xf32>, i32 -> vector<16x32xf32>
    %cst_151 = arith.constant 0.000000e+00 : f32
    %266 = vector.broadcast %cst_151 : f32 to vector<16x32xf32>
    %267 = arith.select %264, %266, %265 : vector<16x32xi1>, vector<16x32xf32>
    %268 = arith.truncf %262 : vector<16x32xf32> to vector<16x32xbf16>
    %c0_152 = arith.constant 0 : index
    %c0_153 = arith.constant 0 : index
    %269 = vector.load %arg23[%c0_152, %c0_153] : memref<32x32xbf16, #tpu.memory_space<vmem>>, vector<32x32xbf16>
    %cst_154 = arith.constant dense<0.000000e+00> : vector<16x32xf32>
    %270 = tpu.matmul %268, %269, %cst_154 {dimension_numbers = #tpu.dot_dimension_numbers<[1], [0], [0], [1], [0, 0, 1, 1], [], []>} : vector<16x32xbf16>, vector<32x32xbf16>, vector<16x32xf32> -> vector<16x32xf32>
    %271 = arith.truncf %256 : vector<16x32xf32> to vector<16x32xbf16>
    %c0_155 = arith.constant 0 : index
    %c0_156 = arith.constant 0 : index
    %272 = vector.load %arg24[%c0_155, %c0_156] : memref<32x32xbf16, #tpu.memory_space<vmem>>, vector<32x32xbf16>
    %cst_157 = arith.constant dense<0.000000e+00> : vector<16x32xf32>
    %273 = tpu.matmul %271, %272, %cst_157 {dimension_numbers = #tpu.dot_dimension_numbers<[1], [0], [0], [1], [0, 0, 1, 1], [], []>} : vector<16x32xbf16>, vector<32x32xbf16>, vector<16x32xf32> -> vector<16x32xf32>
    %274 = arith.addf %270, %273 : vector<16x32xf32>
    %275 = arith.truncf %267 : vector<16x32xf32> to vector<16x32xbf16>
    %c0_158 = arith.constant 0 : index
    %c0_159 = arith.constant 0 : index
    %276 = vector.load %arg25[%c0_158, %c0_159] : memref<32x32xbf16, #tpu.memory_space<vmem>>, vector<32x32xbf16>
    %cst_160 = arith.constant dense<0.000000e+00> : vector<16x32xf32>
    %277 = tpu.matmul %275, %276, %cst_160 {dimension_numbers = #tpu.dot_dimension_numbers<[1], [0], [0], [1], [0, 0, 1, 1], [], []>} : vector<16x32xbf16>, vector<32x32xbf16>, vector<16x32xf32> -> vector<16x32xf32>
    %278 = arith.addf %274, %277 : vector<16x32xf32>
    %c0_161 = arith.constant 0 : index
    %c0_162 = arith.constant 0 : index
    %279 = vector.load %arg26[%c0_161, %c0_162] : memref<1x32xf32, #tpu.memory_space<vmem>>, vector<1x32xf32>
    %280 = vector.broadcast %279 : vector<1x32xf32> to vector<16x32xf32>
    %281 = arith.addf %278, %280 : vector<16x32xf32>
    %cst_163 = arith.constant 0.000000e+00 : f32
    %282 = vector.broadcast %cst_163 : f32 to vector<16x32xf32>
    %283 = arith.maximumf %281, %282 : vector<16x32xf32>
    %284 = arith.truncf %283 : vector<16x32xf32> to vector<16x32xbf16>
    %c0_164 = arith.constant 0 : index
    %c0_165 = arith.constant 0 : index
    %285 = vector.load %arg27[%c0_164, %c0_165] : memref<32x64xbf16, #tpu.memory_space<vmem>>, vector<32x64xbf16>
    %cst_166 = arith.constant dense<0.000000e+00> : vector<16x64xf32>
    %286 = tpu.matmul %284, %285, %cst_166 {dimension_numbers = #tpu.dot_dimension_numbers<[1], [0], [0], [1], [0, 0, 1, 1], [], []>} : vector<16x32xbf16>, vector<32x64xbf16>, vector<16x64xf32> -> vector<16x64xf32>
    %c0_167 = arith.constant 0 : index
    %c0_168 = arith.constant 0 : index
    %287 = vector.load %arg28[%c0_167, %c0_168] : memref<1x64xf32, #tpu.memory_space<vmem>>, vector<1x64xf32>
    %288 = vector.broadcast %287 : vector<1x64xf32> to vector<16x64xf32>
    %289 = arith.addf %286, %288 : vector<16x64xf32>
    %cst_169 = arith.constant dense<0.000000e+00> : vector<16x16xf32>
    %290 = tpu.matmul %248, %248, %cst_169 {dimension_numbers = #tpu.dot_dimension_numbers<[1], [1], [0], [0], [0, 0, 1, 0], [], []>} : vector<16x64xf32>, vector<16x64xf32>, vector<16x16xf32> -> vector<16x16xf32>
    %291 = arith.mulf %248, %248 : vector<16x64xf32>
    %cst_170 = arith.constant dense<0.000000e+00> : vector<16xf32>
    %292 = vector.multi_reduction <add>, %291, %cst_170 [1] : vector<16x64xf32> to vector<16xf32>
    %293 = vector.shape_cast %292 : vector<16xf32> to vector<16x1xf32>
    %294 = arith.mulf %248, %248 : vector<16x64xf32>
    %cst_171 = arith.constant dense<0.000000e+00> : vector<16xf32>
    %295 = vector.multi_reduction <add>, %294, %cst_171 [1] : vector<16x64xf32> to vector<16xf32>
    %296 = vector.shape_cast %295 : vector<16xf32> to vector<16x1xf32>
    %cst_172 = arith.constant 2.000000e+00 : f32
    %297 = vector.broadcast %cst_172 : f32 to vector<16x16xf32>
    %298 = arith.mulf %297, %290 : vector<16x16xf32>
    %299 = vector.broadcast %293 : vector<16x1xf32> to vector<16x16xf32>
    %300 = arith.subf %298, %299 : vector<16x16xf32>
    %301 = tpu.transpose %296, [1, 0] : vector<16x1xf32> -> vector<1x16xf32>
    %302 = vector.broadcast %301 : vector<1x16xf32> to vector<16x16xf32>
    %303 = arith.subf %300, %302 : vector<16x16xf32>
    %c0_173 = arith.constant 0 : index
    %c0_174 = arith.constant 0 : index
    %304 = vector.load %arg29[%c0_173, %c0_174] : memref<64x32xbf16, #tpu.memory_space<vmem>>, vector<64x32xbf16>
    %cst_175 = arith.constant dense<0.000000e+00> : vector<16x32xf32>
    %305 = tpu.matmul %249, %304, %cst_175 {dimension_numbers = #tpu.dot_dimension_numbers<[1], [0], [0], [1], [0, 0, 1, 1], [], []>} : vector<16x64xbf16>, vector<64x32xbf16>, vector<16x32xf32> -> vector<16x32xf32>
    %306 = tpu.iota {dimensions = array<i32: 1>} : vector<16x16xi32>
    %307 = arith.sitofp %306 : vector<16x16xi32> to vector<16x16xf32>
    %cst_176 = arith.constant dense<0xFF800000> : vector<16xf32>
    %308 = vector.multi_reduction <maximumf>, %303, %cst_176 [1] : vector<16x16xf32> to vector<16xf32>
    %309 = vector.shape_cast %308 : vector<16xf32> to vector<16x1xf32>
    %310 = vector.broadcast %309 : vector<16x1xf32> to vector<16x16xf32>
    %311 = arith.cmpf oge, %303, %310 : vector<16x16xf32>
    %cst_177 = arith.constant 1.600000e+01 : f32
    %312 = vector.broadcast %cst_177 : f32 to vector<16x16xf32>
    %313 = arith.select %311, %307, %312 : vector<16x16xi1>, vector<16x16xf32>
    %cst_178 = arith.constant dense<0x7F800000> : vector<16xf32>
    %314 = vector.multi_reduction <minimumf>, %313, %cst_178 [1] : vector<16x16xf32> to vector<16xf32>
    %315 = vector.shape_cast %314 : vector<16xf32> to vector<16x1xf32>
    %316 = vector.broadcast %315 : vector<16x1xf32> to vector<16x16xf32>
    %317 = arith.cmpf oeq, %307, %316 : vector<16x16xf32>
    %318 = arith.extui %317 : vector<16x16xi1> to vector<16x16xi32>
    %319 = arith.sitofp %318 : vector<16x16xi32> to vector<16x16xf32>
    %cst_179 = arith.constant dense<0.000000e+00> : vector<16x64xf32>
    %320 = tpu.matmul %319, %248, %cst_179 {dimension_numbers = #tpu.dot_dimension_numbers<[1], [0], [0], [1], [0, 0, 1, 1], [], []>} : vector<16x16xf32>, vector<16x64xf32>, vector<16x64xf32> -> vector<16x64xf32>
    %cst_180 = arith.constant -1.000000e+30 : f32
    %321 = vector.broadcast %cst_180 : f32 to vector<16x16xf32>
    %322 = arith.select %317, %321, %303 : vector<16x16xi1>, vector<16x16xf32>
    %323 = arith.subf %320, %248 : vector<16x64xf32>
    %324 = arith.truncf %323 : vector<16x64xf32> to vector<16x64xbf16>
    %c0_181 = arith.constant 0 : index
    %c0_182 = arith.constant 0 : index
    %325 = vector.load %arg30[%c0_181, %c0_182] : memref<64x32xbf16, #tpu.memory_space<vmem>>, vector<64x32xbf16>
    %cst_183 = arith.constant dense<0.000000e+00> : vector<16x32xf32>
    %326 = tpu.matmul %324, %325, %cst_183 {dimension_numbers = #tpu.dot_dimension_numbers<[1], [0], [0], [1], [0, 0, 1, 1], [], []>} : vector<16x64xbf16>, vector<64x32xbf16>, vector<16x32xf32> -> vector<16x32xf32>
    %327 = arith.addf %305, %326 : vector<16x32xf32>
    %c0_184 = arith.constant 0 : index
    %c0_185 = arith.constant 0 : index
    %328 = vector.load %arg31[%c0_184, %c0_185] : memref<1x32xf32, #tpu.memory_space<vmem>>, vector<1x32xf32>
    %329 = vector.broadcast %328 : vector<1x32xf32> to vector<16x32xf32>
    %330 = arith.addf %327, %329 : vector<16x32xf32>
    %cst_186 = arith.constant 0.000000e+00 : f32
    %331 = vector.broadcast %cst_186 : f32 to vector<16x32xf32>
    %332 = arith.maximumf %330, %331 : vector<16x32xf32>
    %333 = arith.truncf %332 : vector<16x32xf32> to vector<16x32xbf16>
    %c0_187 = arith.constant 0 : index
    %c0_188 = arith.constant 0 : index
    %334 = vector.load %arg32[%c0_187, %c0_188] : memref<32x32xbf16, #tpu.memory_space<vmem>>, vector<32x32xbf16>
    %cst_189 = arith.constant dense<0.000000e+00> : vector<16x32xf32>
    %335 = tpu.matmul %333, %334, %cst_189 {dimension_numbers = #tpu.dot_dimension_numbers<[1], [0], [0], [1], [0, 0, 1, 1], [], []>} : vector<16x32xbf16>, vector<32x32xbf16>, vector<16x32xf32> -> vector<16x32xf32>
    %c0_190 = arith.constant 0 : index
    %c0_191 = arith.constant 0 : index
    %336 = vector.load %arg33[%c0_190, %c0_191] : memref<1x32xf32, #tpu.memory_space<vmem>>, vector<1x32xf32>
    %337 = vector.broadcast %336 : vector<1x32xf32> to vector<16x32xf32>
    %338 = arith.addf %335, %337 : vector<16x32xf32>
    %cst_192 = arith.constant 0.000000e+00 : f32
    %339 = vector.broadcast %cst_192 : f32 to vector<16x32xf32>
    %340 = arith.maximumf %338, %339 : vector<16x32xf32>
    %341 = arith.truncf %340 : vector<16x32xf32> to vector<16x32xbf16>
    %c0_193 = arith.constant 0 : index
    %c0_194 = arith.constant 0 : index
    %342 = vector.load %arg34[%c0_193, %c0_194] : memref<32x64xbf16, #tpu.memory_space<vmem>>, vector<32x64xbf16>
    %cst_195 = arith.constant dense<0.000000e+00> : vector<16x64xf32>
    %343 = tpu.matmul %341, %342, %cst_195 {dimension_numbers = #tpu.dot_dimension_numbers<[1], [0], [0], [1], [0, 0, 1, 1], [], []>} : vector<16x32xbf16>, vector<32x64xbf16>, vector<16x64xf32> -> vector<16x64xf32>
    %c0_196 = arith.constant 0 : index
    %c0_197 = arith.constant 0 : index
    %344 = vector.load %arg35[%c0_196, %c0_197] : memref<1x64xf32, #tpu.memory_space<vmem>>, vector<1x64xf32>
    %345 = vector.broadcast %344 : vector<1x64xf32> to vector<16x64xf32>
    %346 = arith.addf %343, %345 : vector<16x64xf32>
    %cst_198 = arith.constant dense<0xFF800000> : vector<16xf32>
    %347 = vector.multi_reduction <maximumf>, %322, %cst_198 [1] : vector<16x16xf32> to vector<16xf32>
    %348 = vector.shape_cast %347 : vector<16xf32> to vector<16x1xf32>
    %349 = vector.broadcast %348 : vector<16x1xf32> to vector<16x16xf32>
    %350 = arith.cmpf oge, %322, %349 : vector<16x16xf32>
    %cst_199 = arith.constant 1.600000e+01 : f32
    %351 = vector.broadcast %cst_199 : f32 to vector<16x16xf32>
    %352 = arith.select %350, %307, %351 : vector<16x16xi1>, vector<16x16xf32>
    %cst_200 = arith.constant dense<0x7F800000> : vector<16xf32>
    %353 = vector.multi_reduction <minimumf>, %352, %cst_200 [1] : vector<16x16xf32> to vector<16xf32>
    %354 = vector.shape_cast %353 : vector<16xf32> to vector<16x1xf32>
    %355 = vector.broadcast %354 : vector<16x1xf32> to vector<16x16xf32>
    %356 = arith.cmpf oeq, %307, %355 : vector<16x16xf32>
    %357 = arith.extui %356 : vector<16x16xi1> to vector<16x16xi32>
    %358 = arith.sitofp %357 : vector<16x16xi32> to vector<16x16xf32>
    %cst_201 = arith.constant dense<0.000000e+00> : vector<16x64xf32>
    %359 = tpu.matmul %358, %248, %cst_201 {dimension_numbers = #tpu.dot_dimension_numbers<[1], [0], [0], [1], [0, 0, 1, 1], [], []>} : vector<16x16xf32>, vector<16x64xf32>, vector<16x64xf32> -> vector<16x64xf32>
    %cst_202 = arith.constant -1.000000e+30 : f32
    %360 = vector.broadcast %cst_202 : f32 to vector<16x16xf32>
    %361 = arith.select %356, %360, %322 : vector<16x16xi1>, vector<16x16xf32>
    %362 = arith.subf %359, %248 : vector<16x64xf32>
    %363 = arith.truncf %362 : vector<16x64xf32> to vector<16x64xbf16>
    %c0_203 = arith.constant 0 : index
    %c0_204 = arith.constant 0 : index
    %364 = vector.load %arg30[%c0_203, %c0_204] : memref<64x32xbf16, #tpu.memory_space<vmem>>, vector<64x32xbf16>
    %cst_205 = arith.constant dense<0.000000e+00> : vector<16x32xf32>
    %365 = tpu.matmul %363, %364, %cst_205 {dimension_numbers = #tpu.dot_dimension_numbers<[1], [0], [0], [1], [0, 0, 1, 1], [], []>} : vector<16x64xbf16>, vector<64x32xbf16>, vector<16x32xf32> -> vector<16x32xf32>
    %366 = arith.addf %305, %365 : vector<16x32xf32>
    %c0_206 = arith.constant 0 : index
    %c0_207 = arith.constant 0 : index
    %367 = vector.load %arg31[%c0_206, %c0_207] : memref<1x32xf32, #tpu.memory_space<vmem>>, vector<1x32xf32>
    %368 = vector.broadcast %367 : vector<1x32xf32> to vector<16x32xf32>
    %369 = arith.addf %366, %368 : vector<16x32xf32>
    %cst_208 = arith.constant 0.000000e+00 : f32
    %370 = vector.broadcast %cst_208 : f32 to vector<16x32xf32>
    %371 = arith.maximumf %369, %370 : vector<16x32xf32>
    %372 = arith.truncf %371 : vector<16x32xf32> to vector<16x32xbf16>
    %c0_209 = arith.constant 0 : index
    %c0_210 = arith.constant 0 : index
    %373 = vector.load %arg32[%c0_209, %c0_210] : memref<32x32xbf16, #tpu.memory_space<vmem>>, vector<32x32xbf16>
    %cst_211 = arith.constant dense<0.000000e+00> : vector<16x32xf32>
    %374 = tpu.matmul %372, %373, %cst_211 {dimension_numbers = #tpu.dot_dimension_numbers<[1], [0], [0], [1], [0, 0, 1, 1], [], []>} : vector<16x32xbf16>, vector<32x32xbf16>, vector<16x32xf32> -> vector<16x32xf32>
    %c0_212 = arith.constant 0 : index
    %c0_213 = arith.constant 0 : index
    %375 = vector.load %arg33[%c0_212, %c0_213] : memref<1x32xf32, #tpu.memory_space<vmem>>, vector<1x32xf32>
    %376 = vector.broadcast %375 : vector<1x32xf32> to vector<16x32xf32>
    %377 = arith.addf %374, %376 : vector<16x32xf32>
    %cst_214 = arith.constant 0.000000e+00 : f32
    %378 = vector.broadcast %cst_214 : f32 to vector<16x32xf32>
    %379 = arith.maximumf %377, %378 : vector<16x32xf32>
    %380 = arith.truncf %379 : vector<16x32xf32> to vector<16x32xbf16>
    %c0_215 = arith.constant 0 : index
    %c0_216 = arith.constant 0 : index
    %381 = vector.load %arg34[%c0_215, %c0_216] : memref<32x64xbf16, #tpu.memory_space<vmem>>, vector<32x64xbf16>
    %cst_217 = arith.constant dense<0.000000e+00> : vector<16x64xf32>
    %382 = tpu.matmul %380, %381, %cst_217 {dimension_numbers = #tpu.dot_dimension_numbers<[1], [0], [0], [1], [0, 0, 1, 1], [], []>} : vector<16x32xbf16>, vector<32x64xbf16>, vector<16x64xf32> -> vector<16x64xf32>
    %c0_218 = arith.constant 0 : index
    %c0_219 = arith.constant 0 : index
    %383 = vector.load %arg35[%c0_218, %c0_219] : memref<1x64xf32, #tpu.memory_space<vmem>>, vector<1x64xf32>
    %384 = vector.broadcast %383 : vector<1x64xf32> to vector<16x64xf32>
    %385 = arith.addf %382, %384 : vector<16x64xf32>
    %386 = arith.maximumf %346, %385 : vector<16x64xf32>
    %cst_220 = arith.constant dense<0xFF800000> : vector<16xf32>
    %387 = vector.multi_reduction <maximumf>, %361, %cst_220 [1] : vector<16x16xf32> to vector<16xf32>
    %388 = vector.shape_cast %387 : vector<16xf32> to vector<16x1xf32>
    %389 = vector.broadcast %388 : vector<16x1xf32> to vector<16x16xf32>
    %390 = arith.cmpf oge, %361, %389 : vector<16x16xf32>
    %cst_221 = arith.constant 1.600000e+01 : f32
    %391 = vector.broadcast %cst_221 : f32 to vector<16x16xf32>
    %392 = arith.select %390, %307, %391 : vector<16x16xi1>, vector<16x16xf32>
    %cst_222 = arith.constant dense<0x7F800000> : vector<16xf32>
    %393 = vector.multi_reduction <minimumf>, %392, %cst_222 [1] : vector<16x16xf32> to vector<16xf32>
    %394 = vector.shape_cast %393 : vector<16xf32> to vector<16x1xf32>
    %395 = vector.broadcast %394 : vector<16x1xf32> to vector<16x16xf32>
    %396 = arith.cmpf oeq, %307, %395 : vector<16x16xf32>
    %397 = arith.extui %396 : vector<16x16xi1> to vector<16x16xi32>
    %398 = arith.sitofp %397 : vector<16x16xi32> to vector<16x16xf32>
    %cst_223 = arith.constant dense<0.000000e+00> : vector<16x64xf32>
    %399 = tpu.matmul %398, %248, %cst_223 {dimension_numbers = #tpu.dot_dimension_numbers<[1], [0], [0], [1], [0, 0, 1, 1], [], []>} : vector<16x16xf32>, vector<16x64xf32>, vector<16x64xf32> -> vector<16x64xf32>
    %cst_224 = arith.constant -1.000000e+30 : f32
    %400 = vector.broadcast %cst_224 : f32 to vector<16x16xf32>
    %401 = arith.select %396, %400, %361 : vector<16x16xi1>, vector<16x16xf32>
    %402 = arith.subf %399, %248 : vector<16x64xf32>
    %403 = arith.truncf %402 : vector<16x64xf32> to vector<16x64xbf16>
    %c0_225 = arith.constant 0 : index
    %c0_226 = arith.constant 0 : index
    %404 = vector.load %arg30[%c0_225, %c0_226] : memref<64x32xbf16, #tpu.memory_space<vmem>>, vector<64x32xbf16>
    %cst_227 = arith.constant dense<0.000000e+00> : vector<16x32xf32>
    %405 = tpu.matmul %403, %404, %cst_227 {dimension_numbers = #tpu.dot_dimension_numbers<[1], [0], [0], [1], [0, 0, 1, 1], [], []>} : vector<16x64xbf16>, vector<64x32xbf16>, vector<16x32xf32> -> vector<16x32xf32>
    %406 = arith.addf %305, %405 : vector<16x32xf32>
    %c0_228 = arith.constant 0 : index
    %c0_229 = arith.constant 0 : index
    %407 = vector.load %arg31[%c0_228, %c0_229] : memref<1x32xf32, #tpu.memory_space<vmem>>, vector<1x32xf32>
    %408 = vector.broadcast %407 : vector<1x32xf32> to vector<16x32xf32>
    %409 = arith.addf %406, %408 : vector<16x32xf32>
    %cst_230 = arith.constant 0.000000e+00 : f32
    %410 = vector.broadcast %cst_230 : f32 to vector<16x32xf32>
    %411 = arith.maximumf %409, %410 : vector<16x32xf32>
    %412 = arith.truncf %411 : vector<16x32xf32> to vector<16x32xbf16>
    %c0_231 = arith.constant 0 : index
    %c0_232 = arith.constant 0 : index
    %413 = vector.load %arg32[%c0_231, %c0_232] : memref<32x32xbf16, #tpu.memory_space<vmem>>, vector<32x32xbf16>
    %cst_233 = arith.constant dense<0.000000e+00> : vector<16x32xf32>
    %414 = tpu.matmul %412, %413, %cst_233 {dimension_numbers = #tpu.dot_dimension_numbers<[1], [0], [0], [1], [0, 0, 1, 1], [], []>} : vector<16x32xbf16>, vector<32x32xbf16>, vector<16x32xf32> -> vector<16x32xf32>
    %c0_234 = arith.constant 0 : index
    %c0_235 = arith.constant 0 : index
    %415 = vector.load %arg33[%c0_234, %c0_235] : memref<1x32xf32, #tpu.memory_space<vmem>>, vector<1x32xf32>
    %416 = vector.broadcast %415 : vector<1x32xf32> to vector<16x32xf32>
    %417 = arith.addf %414, %416 : vector<16x32xf32>
    %cst_236 = arith.constant 0.000000e+00 : f32
    %418 = vector.broadcast %cst_236 : f32 to vector<16x32xf32>
    %419 = arith.maximumf %417, %418 : vector<16x32xf32>
    %420 = arith.truncf %419 : vector<16x32xf32> to vector<16x32xbf16>
    %c0_237 = arith.constant 0 : index
    %c0_238 = arith.constant 0 : index
    %421 = vector.load %arg34[%c0_237, %c0_238] : memref<32x64xbf16, #tpu.memory_space<vmem>>, vector<32x64xbf16>
    %cst_239 = arith.constant dense<0.000000e+00> : vector<16x64xf32>
    %422 = tpu.matmul %420, %421, %cst_239 {dimension_numbers = #tpu.dot_dimension_numbers<[1], [0], [0], [1], [0, 0, 1, 1], [], []>} : vector<16x32xbf16>, vector<32x64xbf16>, vector<16x64xf32> -> vector<16x64xf32>
    %c0_240 = arith.constant 0 : index
    %c0_241 = arith.constant 0 : index
    %423 = vector.load %arg35[%c0_240, %c0_241] : memref<1x64xf32, #tpu.memory_space<vmem>>, vector<1x64xf32>
    %424 = vector.broadcast %423 : vector<1x64xf32> to vector<16x64xf32>
    %425 = arith.addf %422, %424 : vector<16x64xf32>
    %426 = arith.maximumf %386, %425 : vector<16x64xf32>
    %cst_242 = arith.constant dense<0xFF800000> : vector<16xf32>
    %427 = vector.multi_reduction <maximumf>, %401, %cst_242 [1] : vector<16x16xf32> to vector<16xf32>
    %428 = vector.shape_cast %427 : vector<16xf32> to vector<16x1xf32>
    %429 = vector.broadcast %428 : vector<16x1xf32> to vector<16x16xf32>
    %430 = arith.cmpf oge, %401, %429 : vector<16x16xf32>
    %cst_243 = arith.constant 1.600000e+01 : f32
    %431 = vector.broadcast %cst_243 : f32 to vector<16x16xf32>
    %432 = arith.select %430, %307, %431 : vector<16x16xi1>, vector<16x16xf32>
    %cst_244 = arith.constant dense<0x7F800000> : vector<16xf32>
    %433 = vector.multi_reduction <minimumf>, %432, %cst_244 [1] : vector<16x16xf32> to vector<16xf32>
    %434 = vector.shape_cast %433 : vector<16xf32> to vector<16x1xf32>
    %435 = vector.broadcast %434 : vector<16x1xf32> to vector<16x16xf32>
    %436 = arith.cmpf oeq, %307, %435 : vector<16x16xf32>
    %437 = arith.extui %436 : vector<16x16xi1> to vector<16x16xi32>
    %438 = arith.sitofp %437 : vector<16x16xi32> to vector<16x16xf32>
    %cst_245 = arith.constant dense<0.000000e+00> : vector<16x64xf32>
    %439 = tpu.matmul %438, %248, %cst_245 {dimension_numbers = #tpu.dot_dimension_numbers<[1], [0], [0], [1], [0, 0, 1, 1], [], []>} : vector<16x16xf32>, vector<16x64xf32>, vector<16x64xf32> -> vector<16x64xf32>
    %440 = arith.subf %439, %248 : vector<16x64xf32>
    %441 = arith.truncf %440 : vector<16x64xf32> to vector<16x64xbf16>
    %c0_246 = arith.constant 0 : index
    %c0_247 = arith.constant 0 : index
    %442 = vector.load %arg30[%c0_246, %c0_247] : memref<64x32xbf16, #tpu.memory_space<vmem>>, vector<64x32xbf16>
    %cst_248 = arith.constant dense<0.000000e+00> : vector<16x32xf32>
    %443 = tpu.matmul %441, %442, %cst_248 {dimension_numbers = #tpu.dot_dimension_numbers<[1], [0], [0], [1], [0, 0, 1, 1], [], []>} : vector<16x64xbf16>, vector<64x32xbf16>, vector<16x32xf32> -> vector<16x32xf32>
    %444 = arith.addf %305, %443 : vector<16x32xf32>
    %c0_249 = arith.constant 0 : index
    %c0_250 = arith.constant 0 : index
    %445 = vector.load %arg31[%c0_249, %c0_250] : memref<1x32xf32, #tpu.memory_space<vmem>>, vector<1x32xf32>
    %446 = vector.broadcast %445 : vector<1x32xf32> to vector<16x32xf32>
    %447 = arith.addf %444, %446 : vector<16x32xf32>
    %cst_251 = arith.constant 0.000000e+00 : f32
    %448 = vector.broadcast %cst_251 : f32 to vector<16x32xf32>
    %449 = arith.maximumf %447, %448 : vector<16x32xf32>
    %450 = arith.truncf %449 : vector<16x32xf32> to vector<16x32xbf16>
    %c0_252 = arith.constant 0 : index
    %c0_253 = arith.constant 0 : index
    %451 = vector.load %arg32[%c0_252, %c0_253] : memref<32x32xbf16, #tpu.memory_space<vmem>>, vector<32x32xbf16>
    %cst_254 = arith.constant dense<0.000000e+00> : vector<16x32xf32>
    %452 = tpu.matmul %450, %451, %cst_254 {dimension_numbers = #tpu.dot_dimension_numbers<[1], [0], [0], [1], [0, 0, 1, 1], [], []>} : vector<16x32xbf16>, vector<32x32xbf16>, vector<16x32xf32> -> vector<16x32xf32>
    %c0_255 = arith.constant 0 : index
    %c0_256 = arith.constant 0 : index
    %453 = vector.load %arg33[%c0_255, %c0_256] : memref<1x32xf32, #tpu.memory_space<vmem>>, vector<1x32xf32>
    %454 = vector.broadcast %453 : vector<1x32xf32> to vector<16x32xf32>
    %455 = arith.addf %452, %454 : vector<16x32xf32>
    %cst_257 = arith.constant 0.000000e+00 : f32
    %456 = vector.broadcast %cst_257 : f32 to vector<16x32xf32>
    %457 = arith.maximumf %455, %456 : vector<16x32xf32>
    %458 = arith.truncf %457 : vector<16x32xf32> to vector<16x32xbf16>
    %c0_258 = arith.constant 0 : index
    %c0_259 = arith.constant 0 : index
    %459 = vector.load %arg34[%c0_258, %c0_259] : memref<32x64xbf16, #tpu.memory_space<vmem>>, vector<32x64xbf16>
    %cst_260 = arith.constant dense<0.000000e+00> : vector<16x64xf32>
    %460 = tpu.matmul %458, %459, %cst_260 {dimension_numbers = #tpu.dot_dimension_numbers<[1], [0], [0], [1], [0, 0, 1, 1], [], []>} : vector<16x32xbf16>, vector<32x64xbf16>, vector<16x64xf32> -> vector<16x64xf32>
    %c0_261 = arith.constant 0 : index
    %c0_262 = arith.constant 0 : index
    %461 = vector.load %arg35[%c0_261, %c0_262] : memref<1x64xf32, #tpu.memory_space<vmem>>, vector<1x64xf32>
    %462 = vector.broadcast %461 : vector<1x64xf32> to vector<16x64xf32>
    %463 = arith.addf %460, %462 : vector<16x64xf32>
    %464 = arith.maximumf %426, %463 : vector<16x64xf32>
    %465 = arith.addf %289, %248 : vector<16x64xf32>
    %466 = arith.addf %465, %464 : vector<16x64xf32>
    %cst_263 = arith.constant 0.000000e+00 : f32
    %467 = vector.broadcast %cst_263 : f32 to vector<16x64xf32>
    %468 = arith.maximumf %466, %467 : vector<16x64xf32>
    %469 = arith.addf %468, %1 : vector<16x64xf32>
    %c0_264 = arith.constant 0 : index
    %c0_265 = arith.constant 0 : index
    %c0_266 = arith.constant 0 : index
    %470 = vector.load %arg36[%c0_264, %c0_265, %c0_266] : memref<1x16x64xf32, #tpu.memory_space<vmem>>, vector<1x16x64xf32>
    %471 = vector.shape_cast %470 : vector<1x16x64xf32> to vector<16x64xf32>
    %472 = vector.shape_cast %469 : vector<16x64xf32> to vector<1x16x64xf32>
    tpu.vector_store %arg36[%c0_264, %c0_265, %c0_266], %472 {strides = array<i32>} : memref<1x16x64xf32, #tpu.memory_space<vmem>>, vector<1x16x64xf32>,
    return
  }
  func.func @transform_0(%arg0: i32) -> (i32, i32, i32) {
    %c0_i32 = arith.constant 0 : i32
    %c0_i32_0 = arith.constant 0 : i32
    %c0_i32_1 = arith.constant 0 : i32
    return %arg0, %c0_i32, %c0_i32_0 : i32, i32, i32
  }
  func.func @transform_1(%arg0: i32) -> (i32, i32) {
    %c0_i32 = arith.constant 0 : i32
    %c0_i32_0 = arith.constant 0 : i32
    %c0_i32_1 = arith.constant 0 : i32
    return %c0_i32, %c0_i32_0 : i32, i32
  }
  func.func @transform_2(%arg0: i32) -> (i32, i32) {
    %c0_i32 = arith.constant 0 : i32
    %c0_i32_0 = arith.constant 0 : i32
    %c0_i32_1 = arith.constant 0 : i32
    return %c0_i32, %c0_i32_0 : i32, i32
  }
  func.func @transform_3(%arg0: i32) -> (i32, i32) {
    %c0_i32 = arith.constant 0 : i32
    %c0_i32_0 = arith.constant 0 : i32
    %c0_i32_1 = arith.constant 0 : i32
    return %c0_i32, %c0_i32_0 : i32, i32
  }
  func.func @transform_4(%arg0: i32) -> (i32, i32) {
    %c0_i32 = arith.constant 0 : i32
    %c0_i32_0 = arith.constant 0 : i32
    %c0_i32_1 = arith.constant 0 : i32
    return %c0_i32, %c0_i32_0 : i32, i32
  }
  func.func @transform_5(%arg0: i32) -> (i32, i32) {
    %c0_i32 = arith.constant 0 : i32
    %c0_i32_0 = arith.constant 0 : i32
    %c0_i32_1 = arith.constant 0 : i32
    return %c0_i32, %c0_i32_0 : i32, i32
  }
  func.func @transform_6(%arg0: i32) -> (i32, i32) {
    %c0_i32 = arith.constant 0 : i32
    %c0_i32_0 = arith.constant 0 : i32
    %c0_i32_1 = arith.constant 0 : i32
    return %c0_i32, %c0_i32_0 : i32, i32
  }
  func.func @transform_7(%arg0: i32) -> (i32, i32) {
    %c0_i32 = arith.constant 0 : i32
    %c0_i32_0 = arith.constant 0 : i32
    %c0_i32_1 = arith.constant 0 : i32
    return %c0_i32, %c0_i32_0 : i32, i32
  }
  func.func @transform_8(%arg0: i32) -> (i32, i32) {
    %c0_i32 = arith.constant 0 : i32
    %c0_i32_0 = arith.constant 0 : i32
    %c0_i32_1 = arith.constant 0 : i32
    return %c0_i32, %c0_i32_0 : i32, i32
  }
  func.func @transform_9(%arg0: i32) -> (i32, i32) {
    %c0_i32 = arith.constant 0 : i32
    %c0_i32_0 = arith.constant 0 : i32
    %c0_i32_1 = arith.constant 0 : i32
    return %c0_i32, %c0_i32_0 : i32, i32
  }
  func.func @transform_10(%arg0: i32) -> (i32, i32) {
    %c0_i32 = arith.constant 0 : i32
    %c0_i32_0 = arith.constant 0 : i32
    %c0_i32_1 = arith.constant 0 : i32
    return %c0_i32, %c0_i32_0 : i32, i32
  }
  func.func @transform_11(%arg0: i32) -> (i32, i32) {
    %c0_i32 = arith.constant 0 : i32
    %c0_i32_0 = arith.constant 0 : i32
    %c0_i32_1 = arith.constant 0 : i32
    return %c0_i32, %c0_i32_0 : i32, i32
  }
  func.func @transform_12(%arg0: i32) -> (i32, i32) {
    %c0_i32 = arith.constant 0 : i32
    %c0_i32_0 = arith.constant 0 : i32
    %c0_i32_1 = arith.constant 0 : i32
    return %c0_i32, %c0_i32_0 : i32, i32
  }
  func.func @transform_13(%arg0: i32) -> (i32, i32) {
    %c0_i32 = arith.constant 0 : i32
    %c0_i32_0 = arith.constant 0 : i32
    %c0_i32_1 = arith.constant 0 : i32
    return %c0_i32, %c0_i32_0 : i32, i32
  }
  func.func @transform_14(%arg0: i32) -> (i32, i32) {
    %c0_i32 = arith.constant 0 : i32
    %c0_i32_0 = arith.constant 0 : i32
    %c0_i32_1 = arith.constant 0 : i32
    return %c0_i32, %c0_i32_0 : i32, i32
  }
  func.func @transform_15(%arg0: i32) -> (i32, i32) {
    %c0_i32 = arith.constant 0 : i32
    %c0_i32_0 = arith.constant 0 : i32
    %c0_i32_1 = arith.constant 0 : i32
    return %c0_i32, %c0_i32_0 : i32, i32
  }
  func.func @transform_16(%arg0: i32) -> (i32, i32) {
    %c0_i32 = arith.constant 0 : i32
    %c0_i32_0 = arith.constant 0 : i32
    %c0_i32_1 = arith.constant 0 : i32
    return %c0_i32, %c0_i32_0 : i32, i32
  }
  func.func @transform_17(%arg0: i32) -> (i32, i32) {
    %c0_i32 = arith.constant 0 : i32
    %c0_i32_0 = arith.constant 0 : i32
    %c0_i32_1 = arith.constant 0 : i32
    return %c0_i32, %c0_i32_0 : i32, i32
  }
  func.func @transform_18(%arg0: i32) -> (i32, i32) {
    %c0_i32 = arith.constant 0 : i32
    %c0_i32_0 = arith.constant 0 : i32
    %c0_i32_1 = arith.constant 0 : i32
    return %c0_i32, %c0_i32_0 : i32, i32
  }
  func.func @transform_19(%arg0: i32) -> (i32, i32) {
    %c0_i32 = arith.constant 0 : i32
    %c0_i32_0 = arith.constant 0 : i32
    %c0_i32_1 = arith.constant 0 : i32
    return %c0_i32, %c0_i32_0 : i32, i32
  }
  func.func @transform_20(%arg0: i32) -> (i32, i32) {
    %c0_i32 = arith.constant 0 : i32
    %c0_i32_0 = arith.constant 0 : i32
    %c0_i32_1 = arith.constant 0 : i32
    return %c0_i32, %c0_i32_0 : i32, i32
  }
  func.func @transform_21(%arg0: i32) -> (i32, i32) {
    %c0_i32 = arith.constant 0 : i32
    %c0_i32_0 = arith.constant 0 : i32
    %c0_i32_1 = arith.constant 0 : i32
    return %c0_i32, %c0_i32_0 : i32, i32
  }
  func.func @transform_22(%arg0: i32) -> (i32, i32) {
    %c0_i32 = arith.constant 0 : i32
    %c0_i32_0 = arith.constant 0 : i32
    %c0_i32_1 = arith.constant 0 : i32
    return %c0_i32, %c0_i32_0 : i32, i32
  }
  func.func @transform_23(%arg0: i32) -> (i32, i32) {
    %c0_i32 = arith.constant 0 : i32
    %c0_i32_0 = arith.constant 0 : i32
    %c0_i32_1 = arith.constant 0 : i32
    return %c0_i32, %c0_i32_0 : i32, i32
  }
  func.func @transform_24(%arg0: i32) -> (i32, i32) {
    %c0_i32 = arith.constant 0 : i32
    %c0_i32_0 = arith.constant 0 : i32
    %c0_i32_1 = arith.constant 0 : i32
    return %c0_i32, %c0_i32_0 : i32, i32
  }
  func.func @transform_25(%arg0: i32) -> (i32, i32) {
    %c0_i32 = arith.constant 0 : i32
    %c0_i32_0 = arith.constant 0 : i32
    %c0_i32_1 = arith.constant 0 : i32
    return %c0_i32, %c0_i32_0 : i32, i32
  }
  func.func @transform_26(%arg0: i32) -> (i32, i32) {
    %c0_i32 = arith.constant 0 : i32
    %c0_i32_0 = arith.constant 0 : i32
    %c0_i32_1 = arith.constant 0 : i32
    return %c0_i32, %c0_i32_0 : i32, i32
  }
  func.func @transform_27(%arg0: i32) -> (i32, i32) {
    %c0_i32 = arith.constant 0 : i32
    %c0_i32_0 = arith.constant 0 : i32
    %c0_i32_1 = arith.constant 0 : i32
    return %c0_i32, %c0_i32_0 : i32, i32
  }
  func.func @transform_28(%arg0: i32) -> (i32, i32) {
    %c0_i32 = arith.constant 0 : i32
    %c0_i32_0 = arith.constant 0 : i32
    %c0_i32_1 = arith.constant 0 : i32
    return %c0_i32, %c0_i32_0 : i32, i32
  }
  func.func @transform_29(%arg0: i32) -> (i32, i32) {
    %c0_i32 = arith.constant 0 : i32
    %c0_i32_0 = arith.constant 0 : i32
    %c0_i32_1 = arith.constant 0 : i32
    return %c0_i32, %c0_i32_0 : i32, i32
  }
  func.func @transform_30(%arg0: i32) -> (i32, i32) {
    %c0_i32 = arith.constant 0 : i32
    %c0_i32_0 = arith.constant 0 : i32
    %c0_i32_1 = arith.constant 0 : i32
    return %c0_i32, %c0_i32_0 : i32, i32
  }
  func.func @transform_31(%arg0: i32) -> (i32, i32) {
    %c0_i32 = arith.constant 0 : i32
    %c0_i32_0 = arith.constant 0 : i32
    %c0_i32_1 = arith.constant 0 : i32
    return %c0_i32, %c0_i32_0 : i32, i32
  }
  func.func @transform_32(%arg0: i32) -> (i32, i32) {
    %c0_i32 = arith.constant 0 : i32
    %c0_i32_0 = arith.constant 0 : i32
    %c0_i32_1 = arith.constant 0 : i32
    return %c0_i32, %c0_i32_0 : i32, i32
  }
  func.func @transform_33(%arg0: i32) -> (i32, i32) {
    %c0_i32 = arith.constant 0 : i32
    %c0_i32_0 = arith.constant 0 : i32
    %c0_i32_1 = arith.constant 0 : i32
    return %c0_i32, %c0_i32_0 : i32, i32
  }
  func.func @transform_34(%arg0: i32) -> (i32, i32) {
    %c0_i32 = arith.constant 0 : i32
    %c0_i32_0 = arith.constant 0 : i32
    %c0_i32_1 = arith.constant 0 : i32
    return %c0_i32, %c0_i32_0 : i32, i32
  }
  func.func @transform_35(%arg0: i32) -> (i32, i32, i32) {
    %c0_i32 = arith.constant 0 : i32
    %c0_i32_0 = arith.constant 0 : i32
    %c0_i32_1 = arith.constant 0 : i32
    return %arg0, %c0_i32, %c0_i32_0 : i32, i32, i32
  }
}

module attributes {stable_mosaic.version = 11 : i64} {
  func.func @_snippet_shot_query_kernel(%arg0: i32, %arg1: memref<1x16x64xf32, #tpu.memory_space<vmem>>, %arg2: memref<1x8x32xf32, #tpu.memory_space<vmem>>, %arg3: memref<64x64xbf16, #tpu.memory_space<vmem>>, %arg4: memref<64x64xbf16, #tpu.memory_space<vmem>>, %arg5: memref<64x64xbf16, #tpu.memory_space<vmem>>, %arg6: memref<1x64xf32, #tpu.memory_space<vmem>>, %arg7: memref<32x64xbf16, #tpu.memory_space<vmem>>, %arg8: memref<1x64xf32, #tpu.memory_space<vmem>>, %arg9: memref<64x32xbf16, #tpu.memory_space<vmem>>, %arg10: memref<1x32xf32, #tpu.memory_space<vmem>>, %arg11: memref<32x32xbf16, #tpu.memory_space<vmem>>, %arg12: memref<32x32xbf16, #tpu.memory_space<vmem>>, %arg13: memref<32x32xbf16, #tpu.memory_space<vmem>>, %arg14: memref<1x32xf32, #tpu.memory_space<vmem>>, %arg15: memref<32x64xbf16, #tpu.memory_space<vmem>>, %arg16: memref<1x64xf32, #tpu.memory_space<vmem>>, %arg17: memref<64x32xbf16, #tpu.memory_space<vmem>>, %arg18: memref<64x32xbf16, #tpu.memory_space<vmem>>, %arg19: memref<1x32xf32, #tpu.memory_space<vmem>>, %arg20: memref<32x32xbf16, #tpu.memory_space<vmem>>, %arg21: memref<1x32xf32, #tpu.memory_space<vmem>>, %arg22: memref<32x64xbf16, #tpu.memory_space<vmem>>, %arg23: memref<1x64xf32, #tpu.memory_space<vmem>>, %arg24: memref<64x32xbf16, #tpu.memory_space<vmem>>, %arg25: memref<1x32xf32, #tpu.memory_space<vmem>>, %arg26: memref<32x32xbf16, #tpu.memory_space<vmem>>, %arg27: memref<32x32xbf16, #tpu.memory_space<vmem>>, %arg28: memref<32x32xbf16, #tpu.memory_space<vmem>>, %arg29: memref<1x32xf32, #tpu.memory_space<vmem>>, %arg30: memref<32x64xbf16, #tpu.memory_space<vmem>>, %arg31: memref<1x64xf32, #tpu.memory_space<vmem>>, %arg32: memref<64x32xbf16, #tpu.memory_space<vmem>>, %arg33: memref<64x32xbf16, #tpu.memory_space<vmem>>, %arg34: memref<1x32xf32, #tpu.memory_space<vmem>>, %arg35: memref<32x32xbf16, #tpu.memory_space<vmem>>, %arg36: memref<1x32xf32, #tpu.memory_space<vmem>>, %arg37: memref<32x64xbf16, #tpu.memory_space<vmem>>, %arg38: memref<1x64xf32, #tpu.memory_space<vmem>>, %arg39: memref<1x16x64xf32, #tpu.memory_space<vmem>>) attributes {dimension_semantics = [#tpu.dimension_semantics<parallel>], iteration_bounds = array<i64: 2>, scalar_prefetch = 0 : i64, scratch_operands = 0 : i64, tpu.core_type = #tpu.core_type<tc>, window_params = [{transform_indices = @transform_0, window_bounds = array<i64: 1, 16, 64>}, {transform_indices = @transform_1, window_bounds = array<i64: 1, 8, 32>}, {pipeline_mode = #tpu.pipeline_mode<synchronous>, transform_indices = @transform_2, window_bounds = array<i64: 64, 64>}, {pipeline_mode = #tpu.pipeline_mode<synchronous>, transform_indices = @transform_3, window_bounds = array<i64: 64, 64>}, {pipeline_mode = #tpu.pipeline_mode<synchronous>, transform_indices = @transform_4, window_bounds = array<i64: 64, 64>}, {pipeline_mode = #tpu.pipeline_mode<synchronous>, transform_indices = @transform_5, window_bounds = array<i64: 1, 64>}, {pipeline_mode = #tpu.pipeline_mode<synchronous>, transform_indices = @transform_6, window_bounds = array<i64: 32, 64>}, {pipeline_mode = #tpu.pipeline_mode<synchronous>, transform_indices = @transform_7, window_bounds = array<i64: 1, 64>}, {pipeline_mode = #tpu.pipeline_mode<synchronous>, transform_indices = @transform_8, window_bounds = array<i64: 64, 32>}, {pipeline_mode = #tpu.pipeline_mode<synchronous>, transform_indices = @transform_9, window_bounds = array<i64: 1, 32>}, {pipeline_mode = #tpu.pipeline_mode<synchronous>, transform_indices = @transform_10, window_bounds = array<i64: 32, 32>}, {pipeline_mode = #tpu.pipeline_mode<synchronous>, transform_indices = @transform_11, window_bounds = array<i64: 32, 32>}, {pipeline_mode = #tpu.pipeline_mode<synchronous>, transform_indices = @transform_12, window_bounds = array<i64: 32, 32>}, {pipeline_mode = #tpu.pipeline_mode<synchronous>, transform_indices = @transform_13, window_bounds = array<i64: 1, 32>}, {pipeline_mode = #tpu.pipeline_mode<synchronous>, transform_indices = @transform_14, window_bounds = array<i64: 32, 64>}, {pipeline_mode = #tpu.pipeline_mode<synchronous>, transform_indices = @transform_15, window_bounds = array<i64: 1, 64>}, {pipeline_mode = #tpu.pipeline_mode<synchronous>, transform_indices = @transform_16, window_bounds = array<i64: 64, 32>}, {pipeline_mode = #tpu.pipeline_mode<synchronous>, transform_indices = @transform_17, window_bounds = array<i64: 64, 32>}, {pipeline_mode = #tpu.pipeline_mode<synchronous>, transform_indices = @transform_18, window_bounds = array<i64: 1, 32>}, {pipeline_mode = #tpu.pipeline_mode<synchronous>, transform_indices = @transform_19, window_bounds = array<i64: 32, 32>}, {pipeline_mode = #tpu.pipeline_mode<synchronous>, transform_indices = @transform_20, window_bounds = array<i64: 1, 32>}, {pipeline_mode = #tpu.pipeline_mode<synchronous>, transform_indices = @transform_21, window_bounds = array<i64: 32, 64>}, {pipeline_mode = #tpu.pipeline_mode<synchronous>, transform_indices = @transform_22, window_bounds = array<i64: 1, 64>}, {pipeline_mode = #tpu.pipeline_mode<synchronous>, transform_indices = @transform_23, window_bounds = array<i64: 64, 32>}, {pipeline_mode = #tpu.pipeline_mode<synchronous>, transform_indices = @transform_24, window_bounds = array<i64: 1, 32>}, {pipeline_mode = #tpu.pipeline_mode<synchronous>, transform_indices = @transform_25, window_bounds = array<i64: 32, 32>}, {pipeline_mode = #tpu.pipeline_mode<synchronous>, transform_indices = @transform_26, window_bounds = array<i64: 32, 32>}, {pipeline_mode = #tpu.pipeline_mode<synchronous>, transform_indices = @transform_27, window_bounds = array<i64: 32, 32>}, {pipeline_mode = #tpu.pipeline_mode<synchronous>, transform_indices = @transform_28, window_bounds = array<i64: 1, 32>}, {pipeline_mode = #tpu.pipeline_mode<synchronous>, transform_indices = @transform_29, window_bounds = array<i64: 32, 64>}, {pipeline_mode = #tpu.pipeline_mode<synchronous>, transform_indices = @transform_30, window_bounds = array<i64: 1, 64>}, {pipeline_mode = #tpu.pipeline_mode<synchronous>, transform_indices = @transform_31, window_bounds = array<i64: 64, 32>}, {pipeline_mode = #tpu.pipeline_mode<synchronous>, transform_indices = @transform_32, window_bounds = array<i64: 64, 32>}, {pipeline_mode = #tpu.pipeline_mode<synchronous>, transform_indices = @transform_33, window_bounds = array<i64: 1, 32>}, {pipeline_mode = #tpu.pipeline_mode<synchronous>, transform_indices = @transform_34, window_bounds = array<i64: 32, 32>}, {pipeline_mode = #tpu.pipeline_mode<synchronous>, transform_indices = @transform_35, window_bounds = array<i64: 1, 32>}, {pipeline_mode = #tpu.pipeline_mode<synchronous>, transform_indices = @transform_36, window_bounds = array<i64: 32, 64>}, {pipeline_mode = #tpu.pipeline_mode<synchronous>, transform_indices = @transform_37, window_bounds = array<i64: 1, 64>}, {transform_indices = @transform_38, window_bounds = array<i64: 1, 16, 64>}]} {
    %c0 = arith.constant 0 : index
    %c0_0 = arith.constant 0 : index
    %c0_1 = arith.constant 0 : index
    %0 = vector.load %arg1[%c0, %c0_0, %c0_1] : memref<1x16x64xf32, #tpu.memory_space<vmem>>, vector<1x16x64xf32>
    %1 = vector.shape_cast %0 : vector<1x16x64xf32> to vector<16x64xf32>
    %c0_2 = arith.constant 0 : index
    %c0_3 = arith.constant 0 : index
    %c0_4 = arith.constant 0 : index
    %2 = vector.load %arg2[%c0_2, %c0_3, %c0_4] : memref<1x8x32xf32, #tpu.memory_space<vmem>>, vector<1x8x32xf32>
    %3 = vector.shape_cast %2 : vector<1x8x32xf32> to vector<8x32xf32>
    %4 = tpu.iota {dimensions = array<i32: 0>} : vector<16x64xi32>
    %c0_i32 = arith.constant 0 : i32
    %5 = vector.broadcast %c0_i32 : i32 to vector<16x64xi32>
    %6 = arith.cmpi eq, %4, %5 : vector<16x64xi32>
    %c1_i32 = arith.constant 1 : i32
    %7 = tpu.dynamic_rotate %1 by %c1_i32 dim 0 : vector<16x64xf32>, i32 -> vector<16x64xf32>
    %cst = arith.constant 0.000000e+00 : f32
    %8 = vector.broadcast %cst : f32 to vector<16x64xf32>
    %9 = arith.select %6, %8, %7 : vector<16x64xi1>, vector<16x64xf32>
    %c15_i32 = arith.constant 15 : i32
    %10 = vector.broadcast %c15_i32 : i32 to vector<16x64xi32>
    %11 = arith.cmpi eq, %4, %10 : vector<16x64xi32>
    %c15_i32_5 = arith.constant 15 : i32
    %12 = tpu.dynamic_rotate %1 by %c15_i32_5 dim 0 : vector<16x64xf32>, i32 -> vector<16x64xf32>
    %cst_6 = arith.constant 0.000000e+00 : f32
    %13 = vector.broadcast %cst_6 : f32 to vector<16x64xf32>
    %14 = arith.select %11, %13, %12 : vector<16x64xi1>, vector<16x64xf32>
    %15 = arith.truncf %9 : vector<16x64xf32> to vector<16x64xbf16>
    %c0_7 = arith.constant 0 : index
    %c0_8 = arith.constant 0 : index
    %16 = vector.load %arg3[%c0_7, %c0_8] : memref<64x64xbf16, #tpu.memory_space<vmem>>, vector<64x64xbf16>
    %cst_9 = arith.constant dense<0.000000e+00> : vector<16x64xf32>
    %17 = tpu.matmul %15, %16, %cst_9 {dimension_numbers = #tpu.dot_dimension_numbers<[1], [0], [0], [1], [0, 0, 1, 1], [], []>} : vector<16x64xbf16>, vector<64x64xbf16>, vector<16x64xf32> -> vector<16x64xf32>
    %18 = arith.truncf %1 : vector<16x64xf32> to vector<16x64xbf16>
    %c0_10 = arith.constant 0 : index
    %c0_11 = arith.constant 0 : index
    %19 = vector.load %arg4[%c0_10, %c0_11] : memref<64x64xbf16, #tpu.memory_space<vmem>>, vector<64x64xbf16>
    %cst_12 = arith.constant dense<0.000000e+00> : vector<16x64xf32>
    %20 = tpu.matmul %18, %19, %cst_12 {dimension_numbers = #tpu.dot_dimension_numbers<[1], [0], [0], [1], [0, 0, 1, 1], [], []>} : vector<16x64xbf16>, vector<64x64xbf16>, vector<16x64xf32> -> vector<16x64xf32>
    %21 = arith.addf %17, %20 : vector<16x64xf32>
    %22 = arith.truncf %14 : vector<16x64xf32> to vector<16x64xbf16>
    %c0_13 = arith.constant 0 : index
    %c0_14 = arith.constant 0 : index
    %23 = vector.load %arg5[%c0_13, %c0_14] : memref<64x64xbf16, #tpu.memory_space<vmem>>, vector<64x64xbf16>
    %cst_15 = arith.constant dense<0.000000e+00> : vector<16x64xf32>
    %24 = tpu.matmul %22, %23, %cst_15 {dimension_numbers = #tpu.dot_dimension_numbers<[1], [0], [0], [1], [0, 0, 1, 1], [], []>} : vector<16x64xbf16>, vector<64x64xbf16>, vector<16x64xf32> -> vector<16x64xf32>
    %25 = arith.addf %21, %24 : vector<16x64xf32>
    %c0_16 = arith.constant 0 : index
    %c0_17 = arith.constant 0 : index
    %26 = vector.load %arg6[%c0_16, %c0_17] : memref<1x64xf32, #tpu.memory_space<vmem>>, vector<1x64xf32>
    %27 = vector.broadcast %26 : vector<1x64xf32> to vector<16x64xf32>
    %28 = arith.addf %25, %27 : vector<16x64xf32>
    %cst_18 = arith.constant 0.000000e+00 : f32
    %29 = vector.broadcast %cst_18 : f32 to vector<16x64xf32>
    %30 = arith.maximumf %28, %29 : vector<16x64xf32>
    %31 = arith.truncf %3 : vector<8x32xf32> to vector<8x32xbf16>
    %c0_19 = arith.constant 0 : index
    %c0_20 = arith.constant 0 : index
    %32 = vector.load %arg7[%c0_19, %c0_20] : memref<32x64xbf16, #tpu.memory_space<vmem>>, vector<32x64xbf16>
    %cst_21 = arith.constant dense<0.000000e+00> : vector<8x64xf32>
    %33 = tpu.matmul %31, %32, %cst_21 {dimension_numbers = #tpu.dot_dimension_numbers<[1], [0], [0], [1], [0, 0, 1, 1], [], []>} : vector<8x32xbf16>, vector<32x64xbf16>, vector<8x64xf32> -> vector<8x64xf32>
    %c0_22 = arith.constant 0 : index
    %c0_23 = arith.constant 0 : index
    %34 = vector.load %arg8[%c0_22, %c0_23] : memref<1x64xf32, #tpu.memory_space<vmem>>, vector<1x64xf32>
    %35 = vector.broadcast %34 : vector<1x64xf32> to vector<8x64xf32>
    %36 = arith.addf %33, %35 : vector<8x64xf32>
    %cst_24 = arith.constant 0.000000e+00 : f32
    %37 = vector.broadcast %cst_24 : f32 to vector<8x64xf32>
    %38 = arith.maximumf %36, %37 : vector<8x64xf32>
    %39 = arith.truncf %30 : vector<16x64xf32> to vector<16x64xbf16>
    %c0_25 = arith.constant 0 : index
    %c0_26 = arith.constant 0 : index
    %40 = vector.load %arg9[%c0_25, %c0_26] : memref<64x32xbf16, #tpu.memory_space<vmem>>, vector<64x32xbf16>
    %cst_27 = arith.constant dense<0.000000e+00> : vector<16x32xf32>
    %41 = tpu.matmul %39, %40, %cst_27 {dimension_numbers = #tpu.dot_dimension_numbers<[1], [0], [0], [1], [0, 0, 1, 1], [], []>} : vector<16x64xbf16>, vector<64x32xbf16>, vector<16x32xf32> -> vector<16x32xf32>
    %c0_28 = arith.constant 0 : index
    %c0_29 = arith.constant 0 : index
    %42 = vector.load %arg10[%c0_28, %c0_29] : memref<1x32xf32, #tpu.memory_space<vmem>>, vector<1x32xf32>
    %43 = vector.broadcast %42 : vector<1x32xf32> to vector<16x32xf32>
    %44 = arith.addf %41, %43 : vector<16x32xf32>
    %cst_30 = arith.constant 0.000000e+00 : f32
    %45 = vector.broadcast %cst_30 : f32 to vector<16x32xf32>
    %46 = arith.maximumf %44, %45 : vector<16x32xf32>
    %47 = tpu.iota {dimensions = array<i32: 0>} : vector<16x32xi32>
    %c0_i32_31 = arith.constant 0 : i32
    %48 = vector.broadcast %c0_i32_31 : i32 to vector<16x32xi32>
    %49 = arith.cmpi eq, %47, %48 : vector<16x32xi32>
    %c1_i32_32 = arith.constant 1 : i32
    %50 = tpu.dynamic_rotate %46 by %c1_i32_32 dim 0 : vector<16x32xf32>, i32 -> vector<16x32xf32>
    %cst_33 = arith.constant 0.000000e+00 : f32
    %51 = vector.broadcast %cst_33 : f32 to vector<16x32xf32>
    %52 = arith.select %49, %51, %50 : vector<16x32xi1>, vector<16x32xf32>
    %c15_i32_34 = arith.constant 15 : i32
    %53 = vector.broadcast %c15_i32_34 : i32 to vector<16x32xi32>
    %54 = arith.cmpi eq, %47, %53 : vector<16x32xi32>
    %c15_i32_35 = arith.constant 15 : i32
    %55 = tpu.dynamic_rotate %46 by %c15_i32_35 dim 0 : vector<16x32xf32>, i32 -> vector<16x32xf32>
    %cst_36 = arith.constant 0.000000e+00 : f32
    %56 = vector.broadcast %cst_36 : f32 to vector<16x32xf32>
    %57 = arith.select %54, %56, %55 : vector<16x32xi1>, vector<16x32xf32>
    %58 = arith.truncf %52 : vector<16x32xf32> to vector<16x32xbf16>
    %c0_37 = arith.constant 0 : index
    %c0_38 = arith.constant 0 : index
    %59 = vector.load %arg11[%c0_37, %c0_38] : memref<32x32xbf16, #tpu.memory_space<vmem>>, vector<32x32xbf16>
    %cst_39 = arith.constant dense<0.000000e+00> : vector<16x32xf32>
    %60 = tpu.matmul %58, %59, %cst_39 {dimension_numbers = #tpu.dot_dimension_numbers<[1], [0], [0], [1], [0, 0, 1, 1], [], []>} : vector<16x32xbf16>, vector<32x32xbf16>, vector<16x32xf32> -> vector<16x32xf32>
    %61 = arith.truncf %46 : vector<16x32xf32> to vector<16x32xbf16>
    %c0_40 = arith.constant 0 : index
    %c0_41 = arith.constant 0 : index
    %62 = vector.load %arg12[%c0_40, %c0_41] : memref<32x32xbf16, #tpu.memory_space<vmem>>, vector<32x32xbf16>
    %cst_42 = arith.constant dense<0.000000e+00> : vector<16x32xf32>
    %63 = tpu.matmul %61, %62, %cst_42 {dimension_numbers = #tpu.dot_dimension_numbers<[1], [0], [0], [1], [0, 0, 1, 1], [], []>} : vector<16x32xbf16>, vector<32x32xbf16>, vector<16x32xf32> -> vector<16x32xf32>
    %64 = arith.addf %60, %63 : vector<16x32xf32>
    %65 = arith.truncf %57 : vector<16x32xf32> to vector<16x32xbf16>
    %c0_43 = arith.constant 0 : index
    %c0_44 = arith.constant 0 : index
    %66 = vector.load %arg13[%c0_43, %c0_44] : memref<32x32xbf16, #tpu.memory_space<vmem>>, vector<32x32xbf16>
    %cst_45 = arith.constant dense<0.000000e+00> : vector<16x32xf32>
    %67 = tpu.matmul %65, %66, %cst_45 {dimension_numbers = #tpu.dot_dimension_numbers<[1], [0], [0], [1], [0, 0, 1, 1], [], []>} : vector<16x32xbf16>, vector<32x32xbf16>, vector<16x32xf32> -> vector<16x32xf32>
    %68 = arith.addf %64, %67 : vector<16x32xf32>
    %c0_46 = arith.constant 0 : index
    %c0_47 = arith.constant 0 : index
    %69 = vector.load %arg14[%c0_46, %c0_47] : memref<1x32xf32, #tpu.memory_space<vmem>>, vector<1x32xf32>
    %70 = vector.broadcast %69 : vector<1x32xf32> to vector<16x32xf32>
    %71 = arith.addf %68, %70 : vector<16x32xf32>
    %cst_48 = arith.constant 0.000000e+00 : f32
    %72 = vector.broadcast %cst_48 : f32 to vector<16x32xf32>
    %73 = arith.maximumf %71, %72 : vector<16x32xf32>
    %74 = arith.truncf %73 : vector<16x32xf32> to vector<16x32xbf16>
    %c0_49 = arith.constant 0 : index
    %c0_50 = arith.constant 0 : index
    %75 = vector.load %arg15[%c0_49, %c0_50] : memref<32x64xbf16, #tpu.memory_space<vmem>>, vector<32x64xbf16>
    %cst_51 = arith.constant dense<0.000000e+00> : vector<16x64xf32>
    %76 = tpu.matmul %74, %75, %cst_51 {dimension_numbers = #tpu.dot_dimension_numbers<[1], [0], [0], [1], [0, 0, 1, 1], [], []>} : vector<16x32xbf16>, vector<32x64xbf16>, vector<16x64xf32> -> vector<16x64xf32>
    %c0_52 = arith.constant 0 : index
    %c0_53 = arith.constant 0 : index
    %77 = vector.load %arg16[%c0_52, %c0_53] : memref<1x64xf32, #tpu.memory_space<vmem>>, vector<1x64xf32>
    %78 = vector.broadcast %77 : vector<1x64xf32> to vector<16x64xf32>
    %79 = arith.addf %76, %78 : vector<16x64xf32>
    %cst_54 = arith.constant dense<0.000000e+00> : vector<16x8xf32>
    %80 = tpu.matmul %30, %38, %cst_54 {dimension_numbers = #tpu.dot_dimension_numbers<[1], [1], [0], [0], [0, 0, 1, 0], [], []>} : vector<16x64xf32>, vector<8x64xf32>, vector<16x8xf32> -> vector<16x8xf32>
    %81 = arith.mulf %30, %30 : vector<16x64xf32>
    %cst_55 = arith.constant dense<0.000000e+00> : vector<16xf32>
    %82 = vector.multi_reduction <add>, %81, %cst_55 [1] : vector<16x64xf32> to vector<16xf32>
    %83 = vector.shape_cast %82 : vector<16xf32> to vector<16x1xf32>
    %84 = arith.mulf %38, %38 : vector<8x64xf32>
    %cst_56 = arith.constant dense<0.000000e+00> : vector<8xf32>
    %85 = vector.multi_reduction <add>, %84, %cst_56 [1] : vector<8x64xf32> to vector<8xf32>
    %86 = vector.shape_cast %85 : vector<8xf32> to vector<8x1xf32>
    %cst_57 = arith.constant 2.000000e+00 : f32
    %87 = vector.broadcast %cst_57 : f32 to vector<16x8xf32>
    %88 = arith.mulf %87, %80 : vector<16x8xf32>
    %89 = vector.broadcast %83 : vector<16x1xf32> to vector<16x8xf32>
    %90 = arith.subf %88, %89 : vector<16x8xf32>
    %91 = tpu.transpose %86, [1, 0] : vector<8x1xf32> -> vector<1x8xf32>
    %92 = vector.broadcast %91 : vector<1x8xf32> to vector<16x8xf32>
    %93 = arith.subf %90, %92 : vector<16x8xf32>
    %c0_58 = arith.constant 0 : index
    %c0_59 = arith.constant 0 : index
    %94 = vector.load %arg17[%c0_58, %c0_59] : memref<64x32xbf16, #tpu.memory_space<vmem>>, vector<64x32xbf16>
    %cst_60 = arith.constant dense<0.000000e+00> : vector<16x32xf32>
    %95 = tpu.matmul %39, %94, %cst_60 {dimension_numbers = #tpu.dot_dimension_numbers<[1], [0], [0], [1], [0, 0, 1, 1], [], []>} : vector<16x64xbf16>, vector<64x32xbf16>, vector<16x32xf32> -> vector<16x32xf32>
    %96 = tpu.iota {dimensions = array<i32: 1>} : vector<16x8xi32>
    %97 = arith.sitofp %96 : vector<16x8xi32> to vector<16x8xf32>
    %cst_61 = arith.constant dense<0xFF800000> : vector<16xf32>
    %98 = vector.multi_reduction <maximumf>, %93, %cst_61 [1] : vector<16x8xf32> to vector<16xf32>
    %99 = vector.shape_cast %98 : vector<16xf32> to vector<16x1xf32>
    %100 = vector.broadcast %99 : vector<16x1xf32> to vector<16x8xf32>
    %101 = arith.cmpf oge, %93, %100 : vector<16x8xf32>
    %cst_62 = arith.constant 8.000000e+00 : f32
    %102 = vector.broadcast %cst_62 : f32 to vector<16x8xf32>
    %103 = arith.select %101, %97, %102 : vector<16x8xi1>, vector<16x8xf32>
    %cst_63 = arith.constant dense<0x7F800000> : vector<16xf32>
    %104 = vector.multi_reduction <minimumf>, %103, %cst_63 [1] : vector<16x8xf32> to vector<16xf32>
    %105 = vector.shape_cast %104 : vector<16xf32> to vector<16x1xf32>
    %106 = vector.broadcast %105 : vector<16x1xf32> to vector<16x8xf32>
    %107 = arith.cmpf oeq, %97, %106 : vector<16x8xf32>
    %108 = arith.extui %107 : vector<16x8xi1> to vector<16x8xi32>
    %109 = arith.sitofp %108 : vector<16x8xi32> to vector<16x8xf32>
    %cst_64 = arith.constant dense<0.000000e+00> : vector<16x64xf32>
    %110 = tpu.matmul %109, %38, %cst_64 {dimension_numbers = #tpu.dot_dimension_numbers<[1], [0], [0], [1], [0, 0, 1, 1], [], []>} : vector<16x8xf32>, vector<8x64xf32>, vector<16x64xf32> -> vector<16x64xf32>
    %cst_65 = arith.constant -1.000000e+30 : f32
    %111 = vector.broadcast %cst_65 : f32 to vector<16x8xf32>
    %112 = arith.select %107, %111, %93 : vector<16x8xi1>, vector<16x8xf32>
    %113 = arith.subf %110, %30 : vector<16x64xf32>
    %114 = arith.truncf %113 : vector<16x64xf32> to vector<16x64xbf16>
    %c0_66 = arith.constant 0 : index
    %c0_67 = arith.constant 0 : index
    %115 = vector.load %arg18[%c0_66, %c0_67] : memref<64x32xbf16, #tpu.memory_space<vmem>>, vector<64x32xbf16>
    %cst_68 = arith.constant dense<0.000000e+00> : vector<16x32xf32>
    %116 = tpu.matmul %114, %115, %cst_68 {dimension_numbers = #tpu.dot_dimension_numbers<[1], [0], [0], [1], [0, 0, 1, 1], [], []>} : vector<16x64xbf16>, vector<64x32xbf16>, vector<16x32xf32> -> vector<16x32xf32>
    %117 = arith.addf %95, %116 : vector<16x32xf32>
    %c0_69 = arith.constant 0 : index
    %c0_70 = arith.constant 0 : index
    %118 = vector.load %arg19[%c0_69, %c0_70] : memref<1x32xf32, #tpu.memory_space<vmem>>, vector<1x32xf32>
    %119 = vector.broadcast %118 : vector<1x32xf32> to vector<16x32xf32>
    %120 = arith.addf %117, %119 : vector<16x32xf32>
    %cst_71 = arith.constant 0.000000e+00 : f32
    %121 = vector.broadcast %cst_71 : f32 to vector<16x32xf32>
    %122 = arith.maximumf %120, %121 : vector<16x32xf32>
    %123 = arith.truncf %122 : vector<16x32xf32> to vector<16x32xbf16>
    %c0_72 = arith.constant 0 : index
    %c0_73 = arith.constant 0 : index
    %124 = vector.load %arg20[%c0_72, %c0_73] : memref<32x32xbf16, #tpu.memory_space<vmem>>, vector<32x32xbf16>
    %cst_74 = arith.constant dense<0.000000e+00> : vector<16x32xf32>
    %125 = tpu.matmul %123, %124, %cst_74 {dimension_numbers = #tpu.dot_dimension_numbers<[1], [0], [0], [1], [0, 0, 1, 1], [], []>} : vector<16x32xbf16>, vector<32x32xbf16>, vector<16x32xf32> -> vector<16x32xf32>
    %c0_75 = arith.constant 0 : index
    %c0_76 = arith.constant 0 : index
    %126 = vector.load %arg21[%c0_75, %c0_76] : memref<1x32xf32, #tpu.memory_space<vmem>>, vector<1x32xf32>
    %127 = vector.broadcast %126 : vector<1x32xf32> to vector<16x32xf32>
    %128 = arith.addf %125, %127 : vector<16x32xf32>
    %cst_77 = arith.constant 0.000000e+00 : f32
    %129 = vector.broadcast %cst_77 : f32 to vector<16x32xf32>
    %130 = arith.maximumf %128, %129 : vector<16x32xf32>
    %131 = arith.truncf %130 : vector<16x32xf32> to vector<16x32xbf16>
    %c0_78 = arith.constant 0 : index
    %c0_79 = arith.constant 0 : index
    %132 = vector.load %arg22[%c0_78, %c0_79] : memref<32x64xbf16, #tpu.memory_space<vmem>>, vector<32x64xbf16>
    %cst_80 = arith.constant dense<0.000000e+00> : vector<16x64xf32>
    %133 = tpu.matmul %131, %132, %cst_80 {dimension_numbers = #tpu.dot_dimension_numbers<[1], [0], [0], [1], [0, 0, 1, 1], [], []>} : vector<16x32xbf16>, vector<32x64xbf16>, vector<16x64xf32> -> vector<16x64xf32>
    %c0_81 = arith.constant 0 : index
    %c0_82 = arith.constant 0 : index
    %134 = vector.load %arg23[%c0_81, %c0_82] : memref<1x64xf32, #tpu.memory_space<vmem>>, vector<1x64xf32>
    %135 = vector.broadcast %134 : vector<1x64xf32> to vector<16x64xf32>
    %136 = arith.addf %133, %135 : vector<16x64xf32>
    %cst_83 = arith.constant dense<0xFF800000> : vector<16xf32>
    %137 = vector.multi_reduction <maximumf>, %112, %cst_83 [1] : vector<16x8xf32> to vector<16xf32>
    %138 = vector.shape_cast %137 : vector<16xf32> to vector<16x1xf32>
    %139 = vector.broadcast %138 : vector<16x1xf32> to vector<16x8xf32>
    %140 = arith.cmpf oge, %112, %139 : vector<16x8xf32>
    %cst_84 = arith.constant 8.000000e+00 : f32
    %141 = vector.broadcast %cst_84 : f32 to vector<16x8xf32>
    %142 = arith.select %140, %97, %141 : vector<16x8xi1>, vector<16x8xf32>
    %cst_85 = arith.constant dense<0x7F800000> : vector<16xf32>
    %143 = vector.multi_reduction <minimumf>, %142, %cst_85 [1] : vector<16x8xf32> to vector<16xf32>
    %144 = vector.shape_cast %143 : vector<16xf32> to vector<16x1xf32>
    %145 = vector.broadcast %144 : vector<16x1xf32> to vector<16x8xf32>
    %146 = arith.cmpf oeq, %97, %145 : vector<16x8xf32>
    %147 = arith.extui %146 : vector<16x8xi1> to vector<16x8xi32>
    %148 = arith.sitofp %147 : vector<16x8xi32> to vector<16x8xf32>
    %cst_86 = arith.constant dense<0.000000e+00> : vector<16x64xf32>
    %149 = tpu.matmul %148, %38, %cst_86 {dimension_numbers = #tpu.dot_dimension_numbers<[1], [0], [0], [1], [0, 0, 1, 1], [], []>} : vector<16x8xf32>, vector<8x64xf32>, vector<16x64xf32> -> vector<16x64xf32>
    %cst_87 = arith.constant -1.000000e+30 : f32
    %150 = vector.broadcast %cst_87 : f32 to vector<16x8xf32>
    %151 = arith.select %146, %150, %112 : vector<16x8xi1>, vector<16x8xf32>
    %152 = arith.subf %149, %30 : vector<16x64xf32>
    %153 = arith.truncf %152 : vector<16x64xf32> to vector<16x64xbf16>
    %c0_88 = arith.constant 0 : index
    %c0_89 = arith.constant 0 : index
    %154 = vector.load %arg18[%c0_88, %c0_89] : memref<64x32xbf16, #tpu.memory_space<vmem>>, vector<64x32xbf16>
    %cst_90 = arith.constant dense<0.000000e+00> : vector<16x32xf32>
    %155 = tpu.matmul %153, %154, %cst_90 {dimension_numbers = #tpu.dot_dimension_numbers<[1], [0], [0], [1], [0, 0, 1, 1], [], []>} : vector<16x64xbf16>, vector<64x32xbf16>, vector<16x32xf32> -> vector<16x32xf32>
    %156 = arith.addf %95, %155 : vector<16x32xf32>
    %c0_91 = arith.constant 0 : index
    %c0_92 = arith.constant 0 : index
    %157 = vector.load %arg19[%c0_91, %c0_92] : memref<1x32xf32, #tpu.memory_space<vmem>>, vector<1x32xf32>
    %158 = vector.broadcast %157 : vector<1x32xf32> to vector<16x32xf32>
    %159 = arith.addf %156, %158 : vector<16x32xf32>
    %cst_93 = arith.constant 0.000000e+00 : f32
    %160 = vector.broadcast %cst_93 : f32 to vector<16x32xf32>
    %161 = arith.maximumf %159, %160 : vector<16x32xf32>
    %162 = arith.truncf %161 : vector<16x32xf32> to vector<16x32xbf16>
    %c0_94 = arith.constant 0 : index
    %c0_95 = arith.constant 0 : index
    %163 = vector.load %arg20[%c0_94, %c0_95] : memref<32x32xbf16, #tpu.memory_space<vmem>>, vector<32x32xbf16>
    %cst_96 = arith.constant dense<0.000000e+00> : vector<16x32xf32>
    %164 = tpu.matmul %162, %163, %cst_96 {dimension_numbers = #tpu.dot_dimension_numbers<[1], [0], [0], [1], [0, 0, 1, 1], [], []>} : vector<16x32xbf16>, vector<32x32xbf16>, vector<16x32xf32> -> vector<16x32xf32>
    %c0_97 = arith.constant 0 : index
    %c0_98 = arith.constant 0 : index
    %165 = vector.load %arg21[%c0_97, %c0_98] : memref<1x32xf32, #tpu.memory_space<vmem>>, vector<1x32xf32>
    %166 = vector.broadcast %165 : vector<1x32xf32> to vector<16x32xf32>
    %167 = arith.addf %164, %166 : vector<16x32xf32>
    %cst_99 = arith.constant 0.000000e+00 : f32
    %168 = vector.broadcast %cst_99 : f32 to vector<16x32xf32>
    %169 = arith.maximumf %167, %168 : vector<16x32xf32>
    %170 = arith.truncf %169 : vector<16x32xf32> to vector<16x32xbf16>
    %c0_100 = arith.constant 0 : index
    %c0_101 = arith.constant 0 : index
    %171 = vector.load %arg22[%c0_100, %c0_101] : memref<32x64xbf16, #tpu.memory_space<vmem>>, vector<32x64xbf16>
    %cst_102 = arith.constant dense<0.000000e+00> : vector<16x64xf32>
    %172 = tpu.matmul %170, %171, %cst_102 {dimension_numbers = #tpu.dot_dimension_numbers<[1], [0], [0], [1], [0, 0, 1, 1], [], []>} : vector<16x32xbf16>, vector<32x64xbf16>, vector<16x64xf32> -> vector<16x64xf32>
    %c0_103 = arith.constant 0 : index
    %c0_104 = arith.constant 0 : index
    %173 = vector.load %arg23[%c0_103, %c0_104] : memref<1x64xf32, #tpu.memory_space<vmem>>, vector<1x64xf32>
    %174 = vector.broadcast %173 : vector<1x64xf32> to vector<16x64xf32>
    %175 = arith.addf %172, %174 : vector<16x64xf32>
    %176 = arith.maximumf %136, %175 : vector<16x64xf32>
    %cst_105 = arith.constant dense<0xFF800000> : vector<16xf32>
    %177 = vector.multi_reduction <maximumf>, %151, %cst_105 [1] : vector<16x8xf32> to vector<16xf32>
    %178 = vector.shape_cast %177 : vector<16xf32> to vector<16x1xf32>
    %179 = vector.broadcast %178 : vector<16x1xf32> to vector<16x8xf32>
    %180 = arith.cmpf oge, %151, %179 : vector<16x8xf32>
    %cst_106 = arith.constant 8.000000e+00 : f32
    %181 = vector.broadcast %cst_106 : f32 to vector<16x8xf32>
    %182 = arith.select %180, %97, %181 : vector<16x8xi1>, vector<16x8xf32>
    %cst_107 = arith.constant dense<0x7F800000> : vector<16xf32>
    %183 = vector.multi_reduction <minimumf>, %182, %cst_107 [1] : vector<16x8xf32> to vector<16xf32>
    %184 = vector.shape_cast %183 : vector<16xf32> to vector<16x1xf32>
    %185 = vector.broadcast %184 : vector<16x1xf32> to vector<16x8xf32>
    %186 = arith.cmpf oeq, %97, %185 : vector<16x8xf32>
    %187 = arith.extui %186 : vector<16x8xi1> to vector<16x8xi32>
    %188 = arith.sitofp %187 : vector<16x8xi32> to vector<16x8xf32>
    %cst_108 = arith.constant dense<0.000000e+00> : vector<16x64xf32>
    %189 = tpu.matmul %188, %38, %cst_108 {dimension_numbers = #tpu.dot_dimension_numbers<[1], [0], [0], [1], [0, 0, 1, 1], [], []>} : vector<16x8xf32>, vector<8x64xf32>, vector<16x64xf32> -> vector<16x64xf32>
    %cst_109 = arith.constant -1.000000e+30 : f32
    %190 = vector.broadcast %cst_109 : f32 to vector<16x8xf32>
    %191 = arith.select %186, %190, %151 : vector<16x8xi1>, vector<16x8xf32>
    %192 = arith.subf %189, %30 : vector<16x64xf32>
    %193 = arith.truncf %192 : vector<16x64xf32> to vector<16x64xbf16>
    %c0_110 = arith.constant 0 : index
    %c0_111 = arith.constant 0 : index
    %194 = vector.load %arg18[%c0_110, %c0_111] : memref<64x32xbf16, #tpu.memory_space<vmem>>, vector<64x32xbf16>
    %cst_112 = arith.constant dense<0.000000e+00> : vector<16x32xf32>
    %195 = tpu.matmul %193, %194, %cst_112 {dimension_numbers = #tpu.dot_dimension_numbers<[1], [0], [0], [1], [0, 0, 1, 1], [], []>} : vector<16x64xbf16>, vector<64x32xbf16>, vector<16x32xf32> -> vector<16x32xf32>
    %196 = arith.addf %95, %195 : vector<16x32xf32>
    %c0_113 = arith.constant 0 : index
    %c0_114 = arith.constant 0 : index
    %197 = vector.load %arg19[%c0_113, %c0_114] : memref<1x32xf32, #tpu.memory_space<vmem>>, vector<1x32xf32>
    %198 = vector.broadcast %197 : vector<1x32xf32> to vector<16x32xf32>
    %199 = arith.addf %196, %198 : vector<16x32xf32>
    %cst_115 = arith.constant 0.000000e+00 : f32
    %200 = vector.broadcast %cst_115 : f32 to vector<16x32xf32>
    %201 = arith.maximumf %199, %200 : vector<16x32xf32>
    %202 = arith.truncf %201 : vector<16x32xf32> to vector<16x32xbf16>
    %c0_116 = arith.constant 0 : index
    %c0_117 = arith.constant 0 : index
    %203 = vector.load %arg20[%c0_116, %c0_117] : memref<32x32xbf16, #tpu.memory_space<vmem>>, vector<32x32xbf16>
    %cst_118 = arith.constant dense<0.000000e+00> : vector<16x32xf32>
    %204 = tpu.matmul %202, %203, %cst_118 {dimension_numbers = #tpu.dot_dimension_numbers<[1], [0], [0], [1], [0, 0, 1, 1], [], []>} : vector<16x32xbf16>, vector<32x32xbf16>, vector<16x32xf32> -> vector<16x32xf32>
    %c0_119 = arith.constant 0 : index
    %c0_120 = arith.constant 0 : index
    %205 = vector.load %arg21[%c0_119, %c0_120] : memref<1x32xf32, #tpu.memory_space<vmem>>, vector<1x32xf32>
    %206 = vector.broadcast %205 : vector<1x32xf32> to vector<16x32xf32>
    %207 = arith.addf %204, %206 : vector<16x32xf32>
    %cst_121 = arith.constant 0.000000e+00 : f32
    %208 = vector.broadcast %cst_121 : f32 to vector<16x32xf32>
    %209 = arith.maximumf %207, %208 : vector<16x32xf32>
    %210 = arith.truncf %209 : vector<16x32xf32> to vector<16x32xbf16>
    %c0_122 = arith.constant 0 : index
    %c0_123 = arith.constant 0 : index
    %211 = vector.load %arg22[%c0_122, %c0_123] : memref<32x64xbf16, #tpu.memory_space<vmem>>, vector<32x64xbf16>
    %cst_124 = arith.constant dense<0.000000e+00> : vector<16x64xf32>
    %212 = tpu.matmul %210, %211, %cst_124 {dimension_numbers = #tpu.dot_dimension_numbers<[1], [0], [0], [1], [0, 0, 1, 1], [], []>} : vector<16x32xbf16>, vector<32x64xbf16>, vector<16x64xf32> -> vector<16x64xf32>
    %c0_125 = arith.constant 0 : index
    %c0_126 = arith.constant 0 : index
    %213 = vector.load %arg23[%c0_125, %c0_126] : memref<1x64xf32, #tpu.memory_space<vmem>>, vector<1x64xf32>
    %214 = vector.broadcast %213 : vector<1x64xf32> to vector<16x64xf32>
    %215 = arith.addf %212, %214 : vector<16x64xf32>
    %216 = arith.maximumf %176, %215 : vector<16x64xf32>
    %cst_127 = arith.constant dense<0xFF800000> : vector<16xf32>
    %217 = vector.multi_reduction <maximumf>, %191, %cst_127 [1] : vector<16x8xf32> to vector<16xf32>
    %218 = vector.shape_cast %217 : vector<16xf32> to vector<16x1xf32>
    %219 = vector.broadcast %218 : vector<16x1xf32> to vector<16x8xf32>
    %220 = arith.cmpf oge, %191, %219 : vector<16x8xf32>
    %cst_128 = arith.constant 8.000000e+00 : f32
    %221 = vector.broadcast %cst_128 : f32 to vector<16x8xf32>
    %222 = arith.select %220, %97, %221 : vector<16x8xi1>, vector<16x8xf32>
    %cst_129 = arith.constant dense<0x7F800000> : vector<16xf32>
    %223 = vector.multi_reduction <minimumf>, %222, %cst_129 [1] : vector<16x8xf32> to vector<16xf32>
    %224 = vector.shape_cast %223 : vector<16xf32> to vector<16x1xf32>
    %225 = vector.broadcast %224 : vector<16x1xf32> to vector<16x8xf32>
    %226 = arith.cmpf oeq, %97, %225 : vector<16x8xf32>
    %227 = arith.extui %226 : vector<16x8xi1> to vector<16x8xi32>
    %228 = arith.sitofp %227 : vector<16x8xi32> to vector<16x8xf32>
    %cst_130 = arith.constant dense<0.000000e+00> : vector<16x64xf32>
    %229 = tpu.matmul %228, %38, %cst_130 {dimension_numbers = #tpu.dot_dimension_numbers<[1], [0], [0], [1], [0, 0, 1, 1], [], []>} : vector<16x8xf32>, vector<8x64xf32>, vector<16x64xf32> -> vector<16x64xf32>
    %230 = arith.subf %229, %30 : vector<16x64xf32>
    %231 = arith.truncf %230 : vector<16x64xf32> to vector<16x64xbf16>
    %c0_131 = arith.constant 0 : index
    %c0_132 = arith.constant 0 : index
    %232 = vector.load %arg18[%c0_131, %c0_132] : memref<64x32xbf16, #tpu.memory_space<vmem>>, vector<64x32xbf16>
    %cst_133 = arith.constant dense<0.000000e+00> : vector<16x32xf32>
    %233 = tpu.matmul %231, %232, %cst_133 {dimension_numbers = #tpu.dot_dimension_numbers<[1], [0], [0], [1], [0, 0, 1, 1], [], []>} : vector<16x64xbf16>, vector<64x32xbf16>, vector<16x32xf32> -> vector<16x32xf32>
    %234 = arith.addf %95, %233 : vector<16x32xf32>
    %c0_134 = arith.constant 0 : index
    %c0_135 = arith.constant 0 : index
    %235 = vector.load %arg19[%c0_134, %c0_135] : memref<1x32xf32, #tpu.memory_space<vmem>>, vector<1x32xf32>
    %236 = vector.broadcast %235 : vector<1x32xf32> to vector<16x32xf32>
    %237 = arith.addf %234, %236 : vector<16x32xf32>
    %cst_136 = arith.constant 0.000000e+00 : f32
    %238 = vector.broadcast %cst_136 : f32 to vector<16x32xf32>
    %239 = arith.maximumf %237, %238 : vector<16x32xf32>
    %240 = arith.truncf %239 : vector<16x32xf32> to vector<16x32xbf16>
    %c0_137 = arith.constant 0 : index
    %c0_138 = arith.constant 0 : index
    %241 = vector.load %arg20[%c0_137, %c0_138] : memref<32x32xbf16, #tpu.memory_space<vmem>>, vector<32x32xbf16>
    %cst_139 = arith.constant dense<0.000000e+00> : vector<16x32xf32>
    %242 = tpu.matmul %240, %241, %cst_139 {dimension_numbers = #tpu.dot_dimension_numbers<[1], [0], [0], [1], [0, 0, 1, 1], [], []>} : vector<16x32xbf16>, vector<32x32xbf16>, vector<16x32xf32> -> vector<16x32xf32>
    %c0_140 = arith.constant 0 : index
    %c0_141 = arith.constant 0 : index
    %243 = vector.load %arg21[%c0_140, %c0_141] : memref<1x32xf32, #tpu.memory_space<vmem>>, vector<1x32xf32>
    %244 = vector.broadcast %243 : vector<1x32xf32> to vector<16x32xf32>
    %245 = arith.addf %242, %244 : vector<16x32xf32>
    %cst_142 = arith.constant 0.000000e+00 : f32
    %246 = vector.broadcast %cst_142 : f32 to vector<16x32xf32>
    %247 = arith.maximumf %245, %246 : vector<16x32xf32>
    %248 = arith.truncf %247 : vector<16x32xf32> to vector<16x32xbf16>
    %c0_143 = arith.constant 0 : index
    %c0_144 = arith.constant 0 : index
    %249 = vector.load %arg22[%c0_143, %c0_144] : memref<32x64xbf16, #tpu.memory_space<vmem>>, vector<32x64xbf16>
    %cst_145 = arith.constant dense<0.000000e+00> : vector<16x64xf32>
    %250 = tpu.matmul %248, %249, %cst_145 {dimension_numbers = #tpu.dot_dimension_numbers<[1], [0], [0], [1], [0, 0, 1, 1], [], []>} : vector<16x32xbf16>, vector<32x64xbf16>, vector<16x64xf32> -> vector<16x64xf32>
    %c0_146 = arith.constant 0 : index
    %c0_147 = arith.constant 0 : index
    %251 = vector.load %arg23[%c0_146, %c0_147] : memref<1x64xf32, #tpu.memory_space<vmem>>, vector<1x64xf32>
    %252 = vector.broadcast %251 : vector<1x64xf32> to vector<16x64xf32>
    %253 = arith.addf %250, %252 : vector<16x64xf32>
    %254 = arith.maximumf %216, %253 : vector<16x64xf32>
    %255 = arith.addf %79, %30 : vector<16x64xf32>
    %256 = arith.addf %255, %254 : vector<16x64xf32>
    %cst_148 = arith.constant 0.000000e+00 : f32
    %257 = vector.broadcast %cst_148 : f32 to vector<16x64xf32>
    %258 = arith.maximumf %256, %257 : vector<16x64xf32>
    %259 = arith.truncf %258 : vector<16x64xf32> to vector<16x64xbf16>
    %c0_149 = arith.constant 0 : index
    %c0_150 = arith.constant 0 : index
    %260 = vector.load %arg24[%c0_149, %c0_150] : memref<64x32xbf16, #tpu.memory_space<vmem>>, vector<64x32xbf16>
    %cst_151 = arith.constant dense<0.000000e+00> : vector<16x32xf32>
    %261 = tpu.matmul %259, %260, %cst_151 {dimension_numbers = #tpu.dot_dimension_numbers<[1], [0], [0], [1], [0, 0, 1, 1], [], []>} : vector<16x64xbf16>, vector<64x32xbf16>, vector<16x32xf32> -> vector<16x32xf32>
    %c0_152 = arith.constant 0 : index
    %c0_153 = arith.constant 0 : index
    %262 = vector.load %arg25[%c0_152, %c0_153] : memref<1x32xf32, #tpu.memory_space<vmem>>, vector<1x32xf32>
    %263 = vector.broadcast %262 : vector<1x32xf32> to vector<16x32xf32>
    %264 = arith.addf %261, %263 : vector<16x32xf32>
    %cst_154 = arith.constant 0.000000e+00 : f32
    %265 = vector.broadcast %cst_154 : f32 to vector<16x32xf32>
    %266 = arith.maximumf %264, %265 : vector<16x32xf32>
    %267 = tpu.iota {dimensions = array<i32: 0>} : vector<16x32xi32>
    %c0_i32_155 = arith.constant 0 : i32
    %268 = vector.broadcast %c0_i32_155 : i32 to vector<16x32xi32>
    %269 = arith.cmpi eq, %267, %268 : vector<16x32xi32>
    %c1_i32_156 = arith.constant 1 : i32
    %270 = tpu.dynamic_rotate %266 by %c1_i32_156 dim 0 : vector<16x32xf32>, i32 -> vector<16x32xf32>
    %cst_157 = arith.constant 0.000000e+00 : f32
    %271 = vector.broadcast %cst_157 : f32 to vector<16x32xf32>
    %272 = arith.select %269, %271, %270 : vector<16x32xi1>, vector<16x32xf32>
    %c15_i32_158 = arith.constant 15 : i32
    %273 = vector.broadcast %c15_i32_158 : i32 to vector<16x32xi32>
    %274 = arith.cmpi eq, %267, %273 : vector<16x32xi32>
    %c15_i32_159 = arith.constant 15 : i32
    %275 = tpu.dynamic_rotate %266 by %c15_i32_159 dim 0 : vector<16x32xf32>, i32 -> vector<16x32xf32>
    %cst_160 = arith.constant 0.000000e+00 : f32
    %276 = vector.broadcast %cst_160 : f32 to vector<16x32xf32>
    %277 = arith.select %274, %276, %275 : vector<16x32xi1>, vector<16x32xf32>
    %278 = arith.truncf %272 : vector<16x32xf32> to vector<16x32xbf16>
    %c0_161 = arith.constant 0 : index
    %c0_162 = arith.constant 0 : index
    %279 = vector.load %arg26[%c0_161, %c0_162] : memref<32x32xbf16, #tpu.memory_space<vmem>>, vector<32x32xbf16>
    %cst_163 = arith.constant dense<0.000000e+00> : vector<16x32xf32>
    %280 = tpu.matmul %278, %279, %cst_163 {dimension_numbers = #tpu.dot_dimension_numbers<[1], [0], [0], [1], [0, 0, 1, 1], [], []>} : vector<16x32xbf16>, vector<32x32xbf16>, vector<16x32xf32> -> vector<16x32xf32>
    %281 = arith.truncf %266 : vector<16x32xf32> to vector<16x32xbf16>
    %c0_164 = arith.constant 0 : index
    %c0_165 = arith.constant 0 : index
    %282 = vector.load %arg27[%c0_164, %c0_165] : memref<32x32xbf16, #tpu.memory_space<vmem>>, vector<32x32xbf16>
    %cst_166 = arith.constant dense<0.000000e+00> : vector<16x32xf32>
    %283 = tpu.matmul %281, %282, %cst_166 {dimension_numbers = #tpu.dot_dimension_numbers<[1], [0], [0], [1], [0, 0, 1, 1], [], []>} : vector<16x32xbf16>, vector<32x32xbf16>, vector<16x32xf32> -> vector<16x32xf32>
    %284 = arith.addf %280, %283 : vector<16x32xf32>
    %285 = arith.truncf %277 : vector<16x32xf32> to vector<16x32xbf16>
    %c0_167 = arith.constant 0 : index
    %c0_168 = arith.constant 0 : index
    %286 = vector.load %arg28[%c0_167, %c0_168] : memref<32x32xbf16, #tpu.memory_space<vmem>>, vector<32x32xbf16>
    %cst_169 = arith.constant dense<0.000000e+00> : vector<16x32xf32>
    %287 = tpu.matmul %285, %286, %cst_169 {dimension_numbers = #tpu.dot_dimension_numbers<[1], [0], [0], [1], [0, 0, 1, 1], [], []>} : vector<16x32xbf16>, vector<32x32xbf16>, vector<16x32xf32> -> vector<16x32xf32>
    %288 = arith.addf %284, %287 : vector<16x32xf32>
    %c0_170 = arith.constant 0 : index
    %c0_171 = arith.constant 0 : index
    %289 = vector.load %arg29[%c0_170, %c0_171] : memref<1x32xf32, #tpu.memory_space<vmem>>, vector<1x32xf32>
    %290 = vector.broadcast %289 : vector<1x32xf32> to vector<16x32xf32>
    %291 = arith.addf %288, %290 : vector<16x32xf32>
    %cst_172 = arith.constant 0.000000e+00 : f32
    %292 = vector.broadcast %cst_172 : f32 to vector<16x32xf32>
    %293 = arith.maximumf %291, %292 : vector<16x32xf32>
    %294 = arith.truncf %293 : vector<16x32xf32> to vector<16x32xbf16>
    %c0_173 = arith.constant 0 : index
    %c0_174 = arith.constant 0 : index
    %295 = vector.load %arg30[%c0_173, %c0_174] : memref<32x64xbf16, #tpu.memory_space<vmem>>, vector<32x64xbf16>
    %cst_175 = arith.constant dense<0.000000e+00> : vector<16x64xf32>
    %296 = tpu.matmul %294, %295, %cst_175 {dimension_numbers = #tpu.dot_dimension_numbers<[1], [0], [0], [1], [0, 0, 1, 1], [], []>} : vector<16x32xbf16>, vector<32x64xbf16>, vector<16x64xf32> -> vector<16x64xf32>
    %c0_176 = arith.constant 0 : index
    %c0_177 = arith.constant 0 : index
    %297 = vector.load %arg31[%c0_176, %c0_177] : memref<1x64xf32, #tpu.memory_space<vmem>>, vector<1x64xf32>
    %298 = vector.broadcast %297 : vector<1x64xf32> to vector<16x64xf32>
    %299 = arith.addf %296, %298 : vector<16x64xf32>
    %cst_178 = arith.constant dense<0.000000e+00> : vector<16x8xf32>
    %300 = tpu.matmul %258, %38, %cst_178 {dimension_numbers = #tpu.dot_dimension_numbers<[1], [1], [0], [0], [0, 0, 1, 0], [], []>} : vector<16x64xf32>, vector<8x64xf32>, vector<16x8xf32> -> vector<16x8xf32>
    %301 = arith.mulf %258, %258 : vector<16x64xf32>
    %cst_179 = arith.constant dense<0.000000e+00> : vector<16xf32>
    %302 = vector.multi_reduction <add>, %301, %cst_179 [1] : vector<16x64xf32> to vector<16xf32>
    %303 = vector.shape_cast %302 : vector<16xf32> to vector<16x1xf32>
    %304 = arith.mulf %38, %38 : vector<8x64xf32>
    %cst_180 = arith.constant dense<0.000000e+00> : vector<8xf32>
    %305 = vector.multi_reduction <add>, %304, %cst_180 [1] : vector<8x64xf32> to vector<8xf32>
    %306 = vector.shape_cast %305 : vector<8xf32> to vector<8x1xf32>
    %cst_181 = arith.constant 2.000000e+00 : f32
    %307 = vector.broadcast %cst_181 : f32 to vector<16x8xf32>
    %308 = arith.mulf %307, %300 : vector<16x8xf32>
    %309 = vector.broadcast %303 : vector<16x1xf32> to vector<16x8xf32>
    %310 = arith.subf %308, %309 : vector<16x8xf32>
    %311 = tpu.transpose %306, [1, 0] : vector<8x1xf32> -> vector<1x8xf32>
    %312 = vector.broadcast %311 : vector<1x8xf32> to vector<16x8xf32>
    %313 = arith.subf %310, %312 : vector<16x8xf32>
    %c0_182 = arith.constant 0 : index
    %c0_183 = arith.constant 0 : index
    %314 = vector.load %arg32[%c0_182, %c0_183] : memref<64x32xbf16, #tpu.memory_space<vmem>>, vector<64x32xbf16>
    %cst_184 = arith.constant dense<0.000000e+00> : vector<16x32xf32>
    %315 = tpu.matmul %259, %314, %cst_184 {dimension_numbers = #tpu.dot_dimension_numbers<[1], [0], [0], [1], [0, 0, 1, 1], [], []>} : vector<16x64xbf16>, vector<64x32xbf16>, vector<16x32xf32> -> vector<16x32xf32>
    %316 = tpu.iota {dimensions = array<i32: 1>} : vector<16x8xi32>
    %317 = arith.sitofp %316 : vector<16x8xi32> to vector<16x8xf32>
    %cst_185 = arith.constant dense<0xFF800000> : vector<16xf32>
    %318 = vector.multi_reduction <maximumf>, %313, %cst_185 [1] : vector<16x8xf32> to vector<16xf32>
    %319 = vector.shape_cast %318 : vector<16xf32> to vector<16x1xf32>
    %320 = vector.broadcast %319 : vector<16x1xf32> to vector<16x8xf32>
    %321 = arith.cmpf oge, %313, %320 : vector<16x8xf32>
    %cst_186 = arith.constant 8.000000e+00 : f32
    %322 = vector.broadcast %cst_186 : f32 to vector<16x8xf32>
    %323 = arith.select %321, %317, %322 : vector<16x8xi1>, vector<16x8xf32>
    %cst_187 = arith.constant dense<0x7F800000> : vector<16xf32>
    %324 = vector.multi_reduction <minimumf>, %323, %cst_187 [1] : vector<16x8xf32> to vector<16xf32>
    %325 = vector.shape_cast %324 : vector<16xf32> to vector<16x1xf32>
    %326 = vector.broadcast %325 : vector<16x1xf32> to vector<16x8xf32>
    %327 = arith.cmpf oeq, %317, %326 : vector<16x8xf32>
    %328 = arith.extui %327 : vector<16x8xi1> to vector<16x8xi32>
    %329 = arith.sitofp %328 : vector<16x8xi32> to vector<16x8xf32>
    %cst_188 = arith.constant dense<0.000000e+00> : vector<16x64xf32>
    %330 = tpu.matmul %329, %38, %cst_188 {dimension_numbers = #tpu.dot_dimension_numbers<[1], [0], [0], [1], [0, 0, 1, 1], [], []>} : vector<16x8xf32>, vector<8x64xf32>, vector<16x64xf32> -> vector<16x64xf32>
    %cst_189 = arith.constant -1.000000e+30 : f32
    %331 = vector.broadcast %cst_189 : f32 to vector<16x8xf32>
    %332 = arith.select %327, %331, %313 : vector<16x8xi1>, vector<16x8xf32>
    %333 = arith.subf %330, %258 : vector<16x64xf32>
    %334 = arith.truncf %333 : vector<16x64xf32> to vector<16x64xbf16>
    %c0_190 = arith.constant 0 : index
    %c0_191 = arith.constant 0 : index
    %335 = vector.load %arg33[%c0_190, %c0_191] : memref<64x32xbf16, #tpu.memory_space<vmem>>, vector<64x32xbf16>
    %cst_192 = arith.constant dense<0.000000e+00> : vector<16x32xf32>
    %336 = tpu.matmul %334, %335, %cst_192 {dimension_numbers = #tpu.dot_dimension_numbers<[1], [0], [0], [1], [0, 0, 1, 1], [], []>} : vector<16x64xbf16>, vector<64x32xbf16>, vector<16x32xf32> -> vector<16x32xf32>
    %337 = arith.addf %315, %336 : vector<16x32xf32>
    %c0_193 = arith.constant 0 : index
    %c0_194 = arith.constant 0 : index
    %338 = vector.load %arg34[%c0_193, %c0_194] : memref<1x32xf32, #tpu.memory_space<vmem>>, vector<1x32xf32>
    %339 = vector.broadcast %338 : vector<1x32xf32> to vector<16x32xf32>
    %340 = arith.addf %337, %339 : vector<16x32xf32>
    %cst_195 = arith.constant 0.000000e+00 : f32
    %341 = vector.broadcast %cst_195 : f32 to vector<16x32xf32>
    %342 = arith.maximumf %340, %341 : vector<16x32xf32>
    %343 = arith.truncf %342 : vector<16x32xf32> to vector<16x32xbf16>
    %c0_196 = arith.constant 0 : index
    %c0_197 = arith.constant 0 : index
    %344 = vector.load %arg35[%c0_196, %c0_197] : memref<32x32xbf16, #tpu.memory_space<vmem>>, vector<32x32xbf16>
    %cst_198 = arith.constant dense<0.000000e+00> : vector<16x32xf32>
    %345 = tpu.matmul %343, %344, %cst_198 {dimension_numbers = #tpu.dot_dimension_numbers<[1], [0], [0], [1], [0, 0, 1, 1], [], []>} : vector<16x32xbf16>, vector<32x32xbf16>, vector<16x32xf32> -> vector<16x32xf32>
    %c0_199 = arith.constant 0 : index
    %c0_200 = arith.constant 0 : index
    %346 = vector.load %arg36[%c0_199, %c0_200] : memref<1x32xf32, #tpu.memory_space<vmem>>, vector<1x32xf32>
    %347 = vector.broadcast %346 : vector<1x32xf32> to vector<16x32xf32>
    %348 = arith.addf %345, %347 : vector<16x32xf32>
    %cst_201 = arith.constant 0.000000e+00 : f32
    %349 = vector.broadcast %cst_201 : f32 to vector<16x32xf32>
    %350 = arith.maximumf %348, %349 : vector<16x32xf32>
    %351 = arith.truncf %350 : vector<16x32xf32> to vector<16x32xbf16>
    %c0_202 = arith.constant 0 : index
    %c0_203 = arith.constant 0 : index
    %352 = vector.load %arg37[%c0_202, %c0_203] : memref<32x64xbf16, #tpu.memory_space<vmem>>, vector<32x64xbf16>
    %cst_204 = arith.constant dense<0.000000e+00> : vector<16x64xf32>
    %353 = tpu.matmul %351, %352, %cst_204 {dimension_numbers = #tpu.dot_dimension_numbers<[1], [0], [0], [1], [0, 0, 1, 1], [], []>} : vector<16x32xbf16>, vector<32x64xbf16>, vector<16x64xf32> -> vector<16x64xf32>
    %c0_205 = arith.constant 0 : index
    %c0_206 = arith.constant 0 : index
    %354 = vector.load %arg38[%c0_205, %c0_206] : memref<1x64xf32, #tpu.memory_space<vmem>>, vector<1x64xf32>
    %355 = vector.broadcast %354 : vector<1x64xf32> to vector<16x64xf32>
    %356 = arith.addf %353, %355 : vector<16x64xf32>
    %cst_207 = arith.constant dense<0xFF800000> : vector<16xf32>
    %357 = vector.multi_reduction <maximumf>, %332, %cst_207 [1] : vector<16x8xf32> to vector<16xf32>
    %358 = vector.shape_cast %357 : vector<16xf32> to vector<16x1xf32>
    %359 = vector.broadcast %358 : vector<16x1xf32> to vector<16x8xf32>
    %360 = arith.cmpf oge, %332, %359 : vector<16x8xf32>
    %cst_208 = arith.constant 8.000000e+00 : f32
    %361 = vector.broadcast %cst_208 : f32 to vector<16x8xf32>
    %362 = arith.select %360, %317, %361 : vector<16x8xi1>, vector<16x8xf32>
    %cst_209 = arith.constant dense<0x7F800000> : vector<16xf32>
    %363 = vector.multi_reduction <minimumf>, %362, %cst_209 [1] : vector<16x8xf32> to vector<16xf32>
    %364 = vector.shape_cast %363 : vector<16xf32> to vector<16x1xf32>
    %365 = vector.broadcast %364 : vector<16x1xf32> to vector<16x8xf32>
    %366 = arith.cmpf oeq, %317, %365 : vector<16x8xf32>
    %367 = arith.extui %366 : vector<16x8xi1> to vector<16x8xi32>
    %368 = arith.sitofp %367 : vector<16x8xi32> to vector<16x8xf32>
    %cst_210 = arith.constant dense<0.000000e+00> : vector<16x64xf32>
    %369 = tpu.matmul %368, %38, %cst_210 {dimension_numbers = #tpu.dot_dimension_numbers<[1], [0], [0], [1], [0, 0, 1, 1], [], []>} : vector<16x8xf32>, vector<8x64xf32>, vector<16x64xf32> -> vector<16x64xf32>
    %cst_211 = arith.constant -1.000000e+30 : f32
    %370 = vector.broadcast %cst_211 : f32 to vector<16x8xf32>
    %371 = arith.select %366, %370, %332 : vector<16x8xi1>, vector<16x8xf32>
    %372 = arith.subf %369, %258 : vector<16x64xf32>
    %373 = arith.truncf %372 : vector<16x64xf32> to vector<16x64xbf16>
    %c0_212 = arith.constant 0 : index
    %c0_213 = arith.constant 0 : index
    %374 = vector.load %arg33[%c0_212, %c0_213] : memref<64x32xbf16, #tpu.memory_space<vmem>>, vector<64x32xbf16>
    %cst_214 = arith.constant dense<0.000000e+00> : vector<16x32xf32>
    %375 = tpu.matmul %373, %374, %cst_214 {dimension_numbers = #tpu.dot_dimension_numbers<[1], [0], [0], [1], [0, 0, 1, 1], [], []>} : vector<16x64xbf16>, vector<64x32xbf16>, vector<16x32xf32> -> vector<16x32xf32>
    %376 = arith.addf %315, %375 : vector<16x32xf32>
    %c0_215 = arith.constant 0 : index
    %c0_216 = arith.constant 0 : index
    %377 = vector.load %arg34[%c0_215, %c0_216] : memref<1x32xf32, #tpu.memory_space<vmem>>, vector<1x32xf32>
    %378 = vector.broadcast %377 : vector<1x32xf32> to vector<16x32xf32>
    %379 = arith.addf %376, %378 : vector<16x32xf32>
    %cst_217 = arith.constant 0.000000e+00 : f32
    %380 = vector.broadcast %cst_217 : f32 to vector<16x32xf32>
    %381 = arith.maximumf %379, %380 : vector<16x32xf32>
    %382 = arith.truncf %381 : vector<16x32xf32> to vector<16x32xbf16>
    %c0_218 = arith.constant 0 : index
    %c0_219 = arith.constant 0 : index
    %383 = vector.load %arg35[%c0_218, %c0_219] : memref<32x32xbf16, #tpu.memory_space<vmem>>, vector<32x32xbf16>
    %cst_220 = arith.constant dense<0.000000e+00> : vector<16x32xf32>
    %384 = tpu.matmul %382, %383, %cst_220 {dimension_numbers = #tpu.dot_dimension_numbers<[1], [0], [0], [1], [0, 0, 1, 1], [], []>} : vector<16x32xbf16>, vector<32x32xbf16>, vector<16x32xf32> -> vector<16x32xf32>
    %c0_221 = arith.constant 0 : index
    %c0_222 = arith.constant 0 : index
    %385 = vector.load %arg36[%c0_221, %c0_222] : memref<1x32xf32, #tpu.memory_space<vmem>>, vector<1x32xf32>
    %386 = vector.broadcast %385 : vector<1x32xf32> to vector<16x32xf32>
    %387 = arith.addf %384, %386 : vector<16x32xf32>
    %cst_223 = arith.constant 0.000000e+00 : f32
    %388 = vector.broadcast %cst_223 : f32 to vector<16x32xf32>
    %389 = arith.maximumf %387, %388 : vector<16x32xf32>
    %390 = arith.truncf %389 : vector<16x32xf32> to vector<16x32xbf16>
    %c0_224 = arith.constant 0 : index
    %c0_225 = arith.constant 0 : index
    %391 = vector.load %arg37[%c0_224, %c0_225] : memref<32x64xbf16, #tpu.memory_space<vmem>>, vector<32x64xbf16>
    %cst_226 = arith.constant dense<0.000000e+00> : vector<16x64xf32>
    %392 = tpu.matmul %390, %391, %cst_226 {dimension_numbers = #tpu.dot_dimension_numbers<[1], [0], [0], [1], [0, 0, 1, 1], [], []>} : vector<16x32xbf16>, vector<32x64xbf16>, vector<16x64xf32> -> vector<16x64xf32>
    %c0_227 = arith.constant 0 : index
    %c0_228 = arith.constant 0 : index
    %393 = vector.load %arg38[%c0_227, %c0_228] : memref<1x64xf32, #tpu.memory_space<vmem>>, vector<1x64xf32>
    %394 = vector.broadcast %393 : vector<1x64xf32> to vector<16x64xf32>
    %395 = arith.addf %392, %394 : vector<16x64xf32>
    %396 = arith.maximumf %356, %395 : vector<16x64xf32>
    %cst_229 = arith.constant dense<0xFF800000> : vector<16xf32>
    %397 = vector.multi_reduction <maximumf>, %371, %cst_229 [1] : vector<16x8xf32> to vector<16xf32>
    %398 = vector.shape_cast %397 : vector<16xf32> to vector<16x1xf32>
    %399 = vector.broadcast %398 : vector<16x1xf32> to vector<16x8xf32>
    %400 = arith.cmpf oge, %371, %399 : vector<16x8xf32>
    %cst_230 = arith.constant 8.000000e+00 : f32
    %401 = vector.broadcast %cst_230 : f32 to vector<16x8xf32>
    %402 = arith.select %400, %317, %401 : vector<16x8xi1>, vector<16x8xf32>
    %cst_231 = arith.constant dense<0x7F800000> : vector<16xf32>
    %403 = vector.multi_reduction <minimumf>, %402, %cst_231 [1] : vector<16x8xf32> to vector<16xf32>
    %404 = vector.shape_cast %403 : vector<16xf32> to vector<16x1xf32>
    %405 = vector.broadcast %404 : vector<16x1xf32> to vector<16x8xf32>
    %406 = arith.cmpf oeq, %317, %405 : vector<16x8xf32>
    %407 = arith.extui %406 : vector<16x8xi1> to vector<16x8xi32>
    %408 = arith.sitofp %407 : vector<16x8xi32> to vector<16x8xf32>
    %cst_232 = arith.constant dense<0.000000e+00> : vector<16x64xf32>
    %409 = tpu.matmul %408, %38, %cst_232 {dimension_numbers = #tpu.dot_dimension_numbers<[1], [0], [0], [1], [0, 0, 1, 1], [], []>} : vector<16x8xf32>, vector<8x64xf32>, vector<16x64xf32> -> vector<16x64xf32>
    %cst_233 = arith.constant -1.000000e+30 : f32
    %410 = vector.broadcast %cst_233 : f32 to vector<16x8xf32>
    %411 = arith.select %406, %410, %371 : vector<16x8xi1>, vector<16x8xf32>
    %412 = arith.subf %409, %258 : vector<16x64xf32>
    %413 = arith.truncf %412 : vector<16x64xf32> to vector<16x64xbf16>
    %c0_234 = arith.constant 0 : index
    %c0_235 = arith.constant 0 : index
    %414 = vector.load %arg33[%c0_234, %c0_235] : memref<64x32xbf16, #tpu.memory_space<vmem>>, vector<64x32xbf16>
    %cst_236 = arith.constant dense<0.000000e+00> : vector<16x32xf32>
    %415 = tpu.matmul %413, %414, %cst_236 {dimension_numbers = #tpu.dot_dimension_numbers<[1], [0], [0], [1], [0, 0, 1, 1], [], []>} : vector<16x64xbf16>, vector<64x32xbf16>, vector<16x32xf32> -> vector<16x32xf32>
    %416 = arith.addf %315, %415 : vector<16x32xf32>
    %c0_237 = arith.constant 0 : index
    %c0_238 = arith.constant 0 : index
    %417 = vector.load %arg34[%c0_237, %c0_238] : memref<1x32xf32, #tpu.memory_space<vmem>>, vector<1x32xf32>
    %418 = vector.broadcast %417 : vector<1x32xf32> to vector<16x32xf32>
    %419 = arith.addf %416, %418 : vector<16x32xf32>
    %cst_239 = arith.constant 0.000000e+00 : f32
    %420 = vector.broadcast %cst_239 : f32 to vector<16x32xf32>
    %421 = arith.maximumf %419, %420 : vector<16x32xf32>
    %422 = arith.truncf %421 : vector<16x32xf32> to vector<16x32xbf16>
    %c0_240 = arith.constant 0 : index
    %c0_241 = arith.constant 0 : index
    %423 = vector.load %arg35[%c0_240, %c0_241] : memref<32x32xbf16, #tpu.memory_space<vmem>>, vector<32x32xbf16>
    %cst_242 = arith.constant dense<0.000000e+00> : vector<16x32xf32>
    %424 = tpu.matmul %422, %423, %cst_242 {dimension_numbers = #tpu.dot_dimension_numbers<[1], [0], [0], [1], [0, 0, 1, 1], [], []>} : vector<16x32xbf16>, vector<32x32xbf16>, vector<16x32xf32> -> vector<16x32xf32>
    %c0_243 = arith.constant 0 : index
    %c0_244 = arith.constant 0 : index
    %425 = vector.load %arg36[%c0_243, %c0_244] : memref<1x32xf32, #tpu.memory_space<vmem>>, vector<1x32xf32>
    %426 = vector.broadcast %425 : vector<1x32xf32> to vector<16x32xf32>
    %427 = arith.addf %424, %426 : vector<16x32xf32>
    %cst_245 = arith.constant 0.000000e+00 : f32
    %428 = vector.broadcast %cst_245 : f32 to vector<16x32xf32>
    %429 = arith.maximumf %427, %428 : vector<16x32xf32>
    %430 = arith.truncf %429 : vector<16x32xf32> to vector<16x32xbf16>
    %c0_246 = arith.constant 0 : index
    %c0_247 = arith.constant 0 : index
    %431 = vector.load %arg37[%c0_246, %c0_247] : memref<32x64xbf16, #tpu.memory_space<vmem>>, vector<32x64xbf16>
    %cst_248 = arith.constant dense<0.000000e+00> : vector<16x64xf32>
    %432 = tpu.matmul %430, %431, %cst_248 {dimension_numbers = #tpu.dot_dimension_numbers<[1], [0], [0], [1], [0, 0, 1, 1], [], []>} : vector<16x32xbf16>, vector<32x64xbf16>, vector<16x64xf32> -> vector<16x64xf32>
    %c0_249 = arith.constant 0 : index
    %c0_250 = arith.constant 0 : index
    %433 = vector.load %arg38[%c0_249, %c0_250] : memref<1x64xf32, #tpu.memory_space<vmem>>, vector<1x64xf32>
    %434 = vector.broadcast %433 : vector<1x64xf32> to vector<16x64xf32>
    %435 = arith.addf %432, %434 : vector<16x64xf32>
    %436 = arith.maximumf %396, %435 : vector<16x64xf32>
    %cst_251 = arith.constant dense<0xFF800000> : vector<16xf32>
    %437 = vector.multi_reduction <maximumf>, %411, %cst_251 [1] : vector<16x8xf32> to vector<16xf32>
    %438 = vector.shape_cast %437 : vector<16xf32> to vector<16x1xf32>
    %439 = vector.broadcast %438 : vector<16x1xf32> to vector<16x8xf32>
    %440 = arith.cmpf oge, %411, %439 : vector<16x8xf32>
    %cst_252 = arith.constant 8.000000e+00 : f32
    %441 = vector.broadcast %cst_252 : f32 to vector<16x8xf32>
    %442 = arith.select %440, %317, %441 : vector<16x8xi1>, vector<16x8xf32>
    %cst_253 = arith.constant dense<0x7F800000> : vector<16xf32>
    %443 = vector.multi_reduction <minimumf>, %442, %cst_253 [1] : vector<16x8xf32> to vector<16xf32>
    %444 = vector.shape_cast %443 : vector<16xf32> to vector<16x1xf32>
    %445 = vector.broadcast %444 : vector<16x1xf32> to vector<16x8xf32>
    %446 = arith.cmpf oeq, %317, %445 : vector<16x8xf32>
    %447 = arith.extui %446 : vector<16x8xi1> to vector<16x8xi32>
    %448 = arith.sitofp %447 : vector<16x8xi32> to vector<16x8xf32>
    %cst_254 = arith.constant dense<0.000000e+00> : vector<16x64xf32>
    %449 = tpu.matmul %448, %38, %cst_254 {dimension_numbers = #tpu.dot_dimension_numbers<[1], [0], [0], [1], [0, 0, 1, 1], [], []>} : vector<16x8xf32>, vector<8x64xf32>, vector<16x64xf32> -> vector<16x64xf32>
    %450 = arith.subf %449, %258 : vector<16x64xf32>
    %451 = arith.truncf %450 : vector<16x64xf32> to vector<16x64xbf16>
    %c0_255 = arith.constant 0 : index
    %c0_256 = arith.constant 0 : index
    %452 = vector.load %arg33[%c0_255, %c0_256] : memref<64x32xbf16, #tpu.memory_space<vmem>>, vector<64x32xbf16>
    %cst_257 = arith.constant dense<0.000000e+00> : vector<16x32xf32>
    %453 = tpu.matmul %451, %452, %cst_257 {dimension_numbers = #tpu.dot_dimension_numbers<[1], [0], [0], [1], [0, 0, 1, 1], [], []>} : vector<16x64xbf16>, vector<64x32xbf16>, vector<16x32xf32> -> vector<16x32xf32>
    %454 = arith.addf %315, %453 : vector<16x32xf32>
    %c0_258 = arith.constant 0 : index
    %c0_259 = arith.constant 0 : index
    %455 = vector.load %arg34[%c0_258, %c0_259] : memref<1x32xf32, #tpu.memory_space<vmem>>, vector<1x32xf32>
    %456 = vector.broadcast %455 : vector<1x32xf32> to vector<16x32xf32>
    %457 = arith.addf %454, %456 : vector<16x32xf32>
    %cst_260 = arith.constant 0.000000e+00 : f32
    %458 = vector.broadcast %cst_260 : f32 to vector<16x32xf32>
    %459 = arith.maximumf %457, %458 : vector<16x32xf32>
    %460 = arith.truncf %459 : vector<16x32xf32> to vector<16x32xbf16>
    %c0_261 = arith.constant 0 : index
    %c0_262 = arith.constant 0 : index
    %461 = vector.load %arg35[%c0_261, %c0_262] : memref<32x32xbf16, #tpu.memory_space<vmem>>, vector<32x32xbf16>
    %cst_263 = arith.constant dense<0.000000e+00> : vector<16x32xf32>
    %462 = tpu.matmul %460, %461, %cst_263 {dimension_numbers = #tpu.dot_dimension_numbers<[1], [0], [0], [1], [0, 0, 1, 1], [], []>} : vector<16x32xbf16>, vector<32x32xbf16>, vector<16x32xf32> -> vector<16x32xf32>
    %c0_264 = arith.constant 0 : index
    %c0_265 = arith.constant 0 : index
    %463 = vector.load %arg36[%c0_264, %c0_265] : memref<1x32xf32, #tpu.memory_space<vmem>>, vector<1x32xf32>
    %464 = vector.broadcast %463 : vector<1x32xf32> to vector<16x32xf32>
    %465 = arith.addf %462, %464 : vector<16x32xf32>
    %cst_266 = arith.constant 0.000000e+00 : f32
    %466 = vector.broadcast %cst_266 : f32 to vector<16x32xf32>
    %467 = arith.maximumf %465, %466 : vector<16x32xf32>
    %468 = arith.truncf %467 : vector<16x32xf32> to vector<16x32xbf16>
    %c0_267 = arith.constant 0 : index
    %c0_268 = arith.constant 0 : index
    %469 = vector.load %arg37[%c0_267, %c0_268] : memref<32x64xbf16, #tpu.memory_space<vmem>>, vector<32x64xbf16>
    %cst_269 = arith.constant dense<0.000000e+00> : vector<16x64xf32>
    %470 = tpu.matmul %468, %469, %cst_269 {dimension_numbers = #tpu.dot_dimension_numbers<[1], [0], [0], [1], [0, 0, 1, 1], [], []>} : vector<16x32xbf16>, vector<32x64xbf16>, vector<16x64xf32> -> vector<16x64xf32>
    %c0_270 = arith.constant 0 : index
    %c0_271 = arith.constant 0 : index
    %471 = vector.load %arg38[%c0_270, %c0_271] : memref<1x64xf32, #tpu.memory_space<vmem>>, vector<1x64xf32>
    %472 = vector.broadcast %471 : vector<1x64xf32> to vector<16x64xf32>
    %473 = arith.addf %470, %472 : vector<16x64xf32>
    %474 = arith.maximumf %436, %473 : vector<16x64xf32>
    %475 = arith.addf %299, %258 : vector<16x64xf32>
    %476 = arith.addf %475, %474 : vector<16x64xf32>
    %cst_272 = arith.constant 0.000000e+00 : f32
    %477 = vector.broadcast %cst_272 : f32 to vector<16x64xf32>
    %478 = arith.maximumf %476, %477 : vector<16x64xf32>
    %479 = arith.addf %478, %1 : vector<16x64xf32>
    %c0_273 = arith.constant 0 : index
    %c0_274 = arith.constant 0 : index
    %c0_275 = arith.constant 0 : index
    %480 = vector.load %arg39[%c0_273, %c0_274, %c0_275] : memref<1x16x64xf32, #tpu.memory_space<vmem>>, vector<1x16x64xf32>
    %481 = vector.shape_cast %480 : vector<1x16x64xf32> to vector<16x64xf32>
    %482 = vector.shape_cast %479 : vector<16x64xf32> to vector<1x16x64xf32>
    tpu.vector_store %arg39[%c0_273, %c0_274, %c0_275], %482 {strides = array<i32>} : memref<1x16x64xf32, #tpu.memory_space<vmem>>, vector<1x16x64xf32>,
    return
  }
  func.func @transform_0(%arg0: i32) -> (i32, i32, i32) {
    %c0_i32 = arith.constant 0 : i32
    %c0_i32_0 = arith.constant 0 : i32
    %c0_i32_1 = arith.constant 0 : i32
    return %arg0, %c0_i32, %c0_i32_0 : i32, i32, i32
  }
  func.func @transform_1(%arg0: i32) -> (i32, i32, i32) {
    %c0_i32 = arith.constant 0 : i32
    %c0_i32_0 = arith.constant 0 : i32
    %c0_i32_1 = arith.constant 0 : i32
    return %arg0, %c0_i32, %c0_i32_0 : i32, i32, i32
  }
  func.func @transform_2(%arg0: i32) -> (i32, i32) {
    %c0_i32 = arith.constant 0 : i32
    %c0_i32_0 = arith.constant 0 : i32
    %c0_i32_1 = arith.constant 0 : i32
    return %c0_i32, %c0_i32_0 : i32, i32
  }
  func.func @transform_3(%arg0: i32) -> (i32, i32) {
    %c0_i32 = arith.constant 0 : i32
    %c0_i32_0 = arith.constant 0 : i32
    %c0_i32_1 = arith.constant 0 : i32
    return %c0_i32, %c0_i32_0 : i32, i32
  }
  func.func @transform_4(%arg0: i32) -> (i32, i32) {
    %c0_i32 = arith.constant 0 : i32
    %c0_i32_0 = arith.constant 0 : i32
    %c0_i32_1 = arith.constant 0 : i32
    return %c0_i32, %c0_i32_0 : i32, i32
  }
  func.func @transform_5(%arg0: i32) -> (i32, i32) {
    %c0_i32 = arith.constant 0 : i32
    %c0_i32_0 = arith.constant 0 : i32
    %c0_i32_1 = arith.constant 0 : i32
    return %c0_i32, %c0_i32_0 : i32, i32
  }
  func.func @transform_6(%arg0: i32) -> (i32, i32) {
    %c0_i32 = arith.constant 0 : i32
    %c0_i32_0 = arith.constant 0 : i32
    %c0_i32_1 = arith.constant 0 : i32
    return %c0_i32, %c0_i32_0 : i32, i32
  }
  func.func @transform_7(%arg0: i32) -> (i32, i32) {
    %c0_i32 = arith.constant 0 : i32
    %c0_i32_0 = arith.constant 0 : i32
    %c0_i32_1 = arith.constant 0 : i32
    return %c0_i32, %c0_i32_0 : i32, i32
  }
  func.func @transform_8(%arg0: i32) -> (i32, i32) {
    %c0_i32 = arith.constant 0 : i32
    %c0_i32_0 = arith.constant 0 : i32
    %c0_i32_1 = arith.constant 0 : i32
    return %c0_i32, %c0_i32_0 : i32, i32
  }
  func.func @transform_9(%arg0: i32) -> (i32, i32) {
    %c0_i32 = arith.constant 0 : i32
    %c0_i32_0 = arith.constant 0 : i32
    %c0_i32_1 = arith.constant 0 : i32
    return %c0_i32, %c0_i32_0 : i32, i32
  }
  func.func @transform_10(%arg0: i32) -> (i32, i32) {
    %c0_i32 = arith.constant 0 : i32
    %c0_i32_0 = arith.constant 0 : i32
    %c0_i32_1 = arith.constant 0 : i32
    return %c0_i32, %c0_i32_0 : i32, i32
  }
  func.func @transform_11(%arg0: i32) -> (i32, i32) {
    %c0_i32 = arith.constant 0 : i32
    %c0_i32_0 = arith.constant 0 : i32
    %c0_i32_1 = arith.constant 0 : i32
    return %c0_i32, %c0_i32_0 : i32, i32
  }
  func.func @transform_12(%arg0: i32) -> (i32, i32) {
    %c0_i32 = arith.constant 0 : i32
    %c0_i32_0 = arith.constant 0 : i32
    %c0_i32_1 = arith.constant 0 : i32
    return %c0_i32, %c0_i32_0 : i32, i32
  }
  func.func @transform_13(%arg0: i32) -> (i32, i32) {
    %c0_i32 = arith.constant 0 : i32
    %c0_i32_0 = arith.constant 0 : i32
    %c0_i32_1 = arith.constant 0 : i32
    return %c0_i32, %c0_i32_0 : i32, i32
  }
  func.func @transform_14(%arg0: i32) -> (i32, i32) {
    %c0_i32 = arith.constant 0 : i32
    %c0_i32_0 = arith.constant 0 : i32
    %c0_i32_1 = arith.constant 0 : i32
    return %c0_i32, %c0_i32_0 : i32, i32
  }
  func.func @transform_15(%arg0: i32) -> (i32, i32) {
    %c0_i32 = arith.constant 0 : i32
    %c0_i32_0 = arith.constant 0 : i32
    %c0_i32_1 = arith.constant 0 : i32
    return %c0_i32, %c0_i32_0 : i32, i32
  }
  func.func @transform_16(%arg0: i32) -> (i32, i32) {
    %c0_i32 = arith.constant 0 : i32
    %c0_i32_0 = arith.constant 0 : i32
    %c0_i32_1 = arith.constant 0 : i32
    return %c0_i32, %c0_i32_0 : i32, i32
  }
  func.func @transform_17(%arg0: i32) -> (i32, i32) {
    %c0_i32 = arith.constant 0 : i32
    %c0_i32_0 = arith.constant 0 : i32
    %c0_i32_1 = arith.constant 0 : i32
    return %c0_i32, %c0_i32_0 : i32, i32
  }
  func.func @transform_18(%arg0: i32) -> (i32, i32) {
    %c0_i32 = arith.constant 0 : i32
    %c0_i32_0 = arith.constant 0 : i32
    %c0_i32_1 = arith.constant 0 : i32
    return %c0_i32, %c0_i32_0 : i32, i32
  }
  func.func @transform_19(%arg0: i32) -> (i32, i32) {
    %c0_i32 = arith.constant 0 : i32
    %c0_i32_0 = arith.constant 0 : i32
    %c0_i32_1 = arith.constant 0 : i32
    return %c0_i32, %c0_i32_0 : i32, i32
  }
  func.func @transform_20(%arg0: i32) -> (i32, i32) {
    %c0_i32 = arith.constant 0 : i32
    %c0_i32_0 = arith.constant 0 : i32
    %c0_i32_1 = arith.constant 0 : i32
    return %c0_i32, %c0_i32_0 : i32, i32
  }
  func.func @transform_21(%arg0: i32) -> (i32, i32) {
    %c0_i32 = arith.constant 0 : i32
    %c0_i32_0 = arith.constant 0 : i32
    %c0_i32_1 = arith.constant 0 : i32
    return %c0_i32, %c0_i32_0 : i32, i32
  }
  func.func @transform_22(%arg0: i32) -> (i32, i32) {
    %c0_i32 = arith.constant 0 : i32
    %c0_i32_0 = arith.constant 0 : i32
    %c0_i32_1 = arith.constant 0 : i32
    return %c0_i32, %c0_i32_0 : i32, i32
  }
  func.func @transform_23(%arg0: i32) -> (i32, i32) {
    %c0_i32 = arith.constant 0 : i32
    %c0_i32_0 = arith.constant 0 : i32
    %c0_i32_1 = arith.constant 0 : i32
    return %c0_i32, %c0_i32_0 : i32, i32
  }
  func.func @transform_24(%arg0: i32) -> (i32, i32) {
    %c0_i32 = arith.constant 0 : i32
    %c0_i32_0 = arith.constant 0 : i32
    %c0_i32_1 = arith.constant 0 : i32
    return %c0_i32, %c0_i32_0 : i32, i32
  }
  func.func @transform_25(%arg0: i32) -> (i32, i32) {
    %c0_i32 = arith.constant 0 : i32
    %c0_i32_0 = arith.constant 0 : i32
    %c0_i32_1 = arith.constant 0 : i32
    return %c0_i32, %c0_i32_0 : i32, i32
  }
  func.func @transform_26(%arg0: i32) -> (i32, i32) {
    %c0_i32 = arith.constant 0 : i32
    %c0_i32_0 = arith.constant 0 : i32
    %c0_i32_1 = arith.constant 0 : i32
    return %c0_i32, %c0_i32_0 : i32, i32
  }
  func.func @transform_27(%arg0: i32) -> (i32, i32) {
    %c0_i32 = arith.constant 0 : i32
    %c0_i32_0 = arith.constant 0 : i32
    %c0_i32_1 = arith.constant 0 : i32
    return %c0_i32, %c0_i32_0 : i32, i32
  }
  func.func @transform_28(%arg0: i32) -> (i32, i32) {
    %c0_i32 = arith.constant 0 : i32
    %c0_i32_0 = arith.constant 0 : i32
    %c0_i32_1 = arith.constant 0 : i32
    return %c0_i32, %c0_i32_0 : i32, i32
  }
  func.func @transform_29(%arg0: i32) -> (i32, i32) {
    %c0_i32 = arith.constant 0 : i32
    %c0_i32_0 = arith.constant 0 : i32
    %c0_i32_1 = arith.constant 0 : i32
    return %c0_i32, %c0_i32_0 : i32, i32
  }
  func.func @transform_30(%arg0: i32) -> (i32, i32) {
    %c0_i32 = arith.constant 0 : i32
    %c0_i32_0 = arith.constant 0 : i32
    %c0_i32_1 = arith.constant 0 : i32
    return %c0_i32, %c0_i32_0 : i32, i32
  }
  func.func @transform_31(%arg0: i32) -> (i32, i32) {
    %c0_i32 = arith.constant 0 : i32
    %c0_i32_0 = arith.constant 0 : i32
    %c0_i32_1 = arith.constant 0 : i32
    return %c0_i32, %c0_i32_0 : i32, i32
  }
  func.func @transform_32(%arg0: i32) -> (i32, i32) {
    %c0_i32 = arith.constant 0 : i32
    %c0_i32_0 = arith.constant 0 : i32
    %c0_i32_1 = arith.constant 0 : i32
    return %c0_i32, %c0_i32_0 : i32, i32
  }
  func.func @transform_33(%arg0: i32) -> (i32, i32) {
    %c0_i32 = arith.constant 0 : i32
    %c0_i32_0 = arith.constant 0 : i32
    %c0_i32_1 = arith.constant 0 : i32
    return %c0_i32, %c0_i32_0 : i32, i32
  }
  func.func @transform_34(%arg0: i32) -> (i32, i32) {
    %c0_i32 = arith.constant 0 : i32
    %c0_i32_0 = arith.constant 0 : i32
    %c0_i32_1 = arith.constant 0 : i32
    return %c0_i32, %c0_i32_0 : i32, i32
  }
  func.func @transform_35(%arg0: i32) -> (i32, i32) {
    %c0_i32 = arith.constant 0 : i32
    %c0_i32_0 = arith.constant 0 : i32
    %c0_i32_1 = arith.constant 0 : i32
    return %c0_i32, %c0_i32_0 : i32, i32
  }
  func.func @transform_36(%arg0: i32) -> (i32, i32) {
    %c0_i32 = arith.constant 0 : i32
    %c0_i32_0 = arith.constant 0 : i32
    %c0_i32_1 = arith.constant 0 : i32
    return %c0_i32, %c0_i32_0 : i32, i32
  }
  func.func @transform_37(%arg0: i32) -> (i32, i32) {
    %c0_i32 = arith.constant 0 : i32
    %c0_i32_0 = arith.constant 0 : i32
    %c0_i32_1 = arith.constant 0 : i32
    return %c0_i32, %c0_i32_0 : i32, i32
  }
  func.func @transform_38(%arg0: i32) -> (i32, i32, i32) {
    %c0_i32 = arith.constant 0 : i32
    %c0_i32_0 = arith.constant 0 : i32
    %c0_i32_1 = arith.constant 0 : i32
    return %arg0, %c0_i32, %c0_i32_0 : i32, i32, i32
  }
}

</mosaic_0001>

<bundles_post_ra>
// kernel: shot_query_graph_stream_apply.2
= control target key start
LH: loop header
LB: loop body
LE: loop exit
PB: predicated region body
PF: predicated region fallthrough
CT: control target
= control target key end

     0   :  { %s5670_s6 = smov 1   ;;  %s5671_s10 = smov 2   ;;  %s6712_s0 = inlined_call_operand.smem [shape: u32[36], index: -1, kind: input, shape index: {}] }
   0x1   :  { %s5715_s5 = sld [smem:[%s6712_s0]]   ;;  %s5672_s14 = smov 3  }
   0x2   :  { %s5720_s9 = sld [smem:[%s6712_s0 + %s5670_s6]]   ;;  %s5673_s18 = smov 4  }
   0x3   :  { %s5725_s13 = sld [smem:[%s6712_s0 + %s5671_s10]]   ;;  %s5674_s22 = smov 5  }
   0x4   :  { %s5730_s17 = sld [smem:[%s6712_s0 + %s5672_s14]]   ;;  %s5675_s26 = smov 6  }
   0x5   :  { %s5735_s21 = sld [smem:[%s6712_s0 + %s5673_s18]]   ;;  %s5676_s30 = smov 7  }
   0x6   :  { %s5740_s25 = sld [smem:[%s6712_s0 + %s5674_s22]]   ;;  %s5677_s4 = smov 8  }
   0x7   :  { %s5745_s29 = sld [smem:[%s6712_s0 + %s5675_s26]]   ;;  %s5678_s10 = smov 9  }
   0x8   :  { %s5750_s3 = sld [smem:[%s6712_s0 + %s5676_s30]]   ;;  %s5679_s15 = smov 10  }
   0x9   :  { %s5755_s8 = sld [smem:[%s6712_s0 + %s5677_s4]]   ;;  %s5680_s20 = smov 11  }
   0xa   :  { %s5760_s14 = sld [smem:[%s6712_s0 + %s5678_s10]]   ;;  %s5681_s26 = smov 12  }
   0xb   :  { %s5765_s19 = sld [smem:[%s6712_s0 + %s5679_s15]]   ;;  %s5682_s1 = smov 13  }
   0xc   :  { %s5770_s24 = sld [smem:[%s6712_s0 + %s5680_s20]]   ;;  %s5683_s7 = smov 14  }
   0xd   :  { %s5775_s30 = sld [smem:[%s6712_s0 + %s5681_s26]]   ;;  %s5684_s15 = smov 15  }
   0xe   :  { %s5780_s6 = sld [smem:[%s6712_s0 + %s5682_s1]]   ;;  %s5685_s22 = smov 16  }
   0xf   :  { %s5785_s12 = sld [smem:[%s6712_s0 + %s5683_s7]]   ;;  %s5686_s28 = smov 17  }
  0x10   :  { %s5790_s20 = sld [smem:[%s6712_s0 + %s5684_s15]]   ;;  %s5687_s7 = smov 18  }
  0x11   :  { %s5795_s27 = sld [smem:[%s6712_s0 + %s5685_s22]]   ;;  %s5688_s15 = smov 19  }
  0x12   :  { %s5800_s4 = sld [smem:[%s6712_s0 + %s5686_s28]]   ;;  %s5689_s22 = smov 20  }
  0x13   :  { %6726 = sst [smem:[#allocation2_spill]] %s5775_s30  ;;  %s5690_s28 = smov 21  }
  0x14   :  { %s5805_s30 = sld [smem:[%s6712_s0 + %s5687_s7]]   ;;  %s5691_s7 = smov 22  }
  0x16   :  { %6727 = sst [smem:[#allocation3_spill]] %s5790_s20 }
  0x17   :  { %6728 = sst [smem:[#allocation4_spill]] %s5795_s27 }
  0x18   :  { %6729 = sst [smem:[#allocation5_spill]] %s5800_s4 }
  0x19   :  { %s5810_s20 = sld [smem:[%s6712_s0 + %s5688_s15]]   ;;  %s5692_s15 = smov 23  }
  0x1a   :  { %6730 = sst [smem:[#allocation6_spill]] %s5805_s30 }
  0x1b   :  { %s5815_s27 = sld [smem:[%s6712_s0 + %s5689_s22]]   ;;  %s5693_s22 = smov 24  }
  0x1c   :  { %s5820_s4 = sld [smem:[%s6712_s0 + %s5690_s28]]   ;;  %s5694_s28 = smov 25  }
  0x1d   :  { %s5825_s30 = sld [smem:[%s6712_s0 + %s5691_s7]]   ;;  %s5695_s7 = smov 26  }
  0x1f   :  { %6731 = sst [smem:[#allocation7_spill]] %s5810_s20 }
  0x20   :  { %s5830_s20 = sld [smem:[%s6712_s0 + %s5692_s15]]   ;;  %s5696_s15 = smov 27  }
  0x21   :  { %6732 = sst [smem:[#allocation8_spill]] %s5815_s27 }
  0x22   :  { %6733 = sst [smem:[#allocation9_spill]] %s5820_s4 }
  0x23   :  { %6734 = sst [smem:[#allocation10_spill]] %s5825_s30 }
  0x24   :  { %s5835_s27 = sld [smem:[%s6712_s0 + %s5693_s22]]   ;;  %s5697_s22 = smov 28  }
  0x25   :  { %s5840_s4 = sld [smem:[%s6712_s0 + %s5694_s28]]   ;;  %s5698_s28 = smov 29  }
  0x26   :  { %6735 = sst [smem:[#allocation11_spill]] %s5830_s20 }
  0x27   :  { %s5845_s30 = sld [smem:[%s6712_s0 + %s5695_s7]]   ;;  %s5699_s7 = smov 30  }
  0x28   :  { %s5850_s20 = sld [smem:[%s6712_s0 + %s5696_s15]]   ;;  %s5700_s15 = smov 31  }
  0x2a   :  { %6736 = sst [smem:[#allocation12_spill]] %s5835_s27 }
  0x2b   :  { %6737 = sst [smem:[#allocation13_spill]] %s5840_s4 }
  0x2c   :  { %s5855_s27 = sld [smem:[%s6712_s0 + %s5697_s22]]   ;;  %s5701_s22 = smov 32  }
  0x2d   :  { %6738 = sst [smem:[#allocation14_spill]] %s5845_s30 }
  0x2e   :  { %6739 = sst [smem:[#allocation15_spill]] %s5850_s20 }
  0x2f   :  { %s5860_s4 = sld [smem:[%s6712_s0 + %s5698_s28]]   ;;  %s5702_s28 = smov 33  }
  0x30   :  { %s5865_s30 = sld [smem:[%s6712_s0 + %s5699_s7]]   ;;  %s5703_s7 = smov 34  }
  0x31   :  { %s5870_s20 = sld [smem:[%s6712_s0 + %s5700_s15]]   ;;  %s5704_s15 = smov 35  }
  0x32   :  { %6740 = sst [smem:[#allocation16_spill]] %s5855_s27 }
  0x33   :  { %s5875_s27 = sld [smem:[%s6712_s0 + %s5701_s22]]   ;;  %s5892_s22 = smov 0  }
  0x35   :  { %6741 = sst [smem:[#allocation17_spill]] %s5860_s4 }
  0x36   :  { %6742 = sst [smem:[#allocation18_spill]] %s5865_s30 }
  0x37   :  { %6743 = sst [smem:[#allocation19_spill]] %s5870_s20 }
  0x38   :  { %s5880_s4 = sld [smem:[%s6712_s0 + %s5702_s28]]  }
  0x39   :  { %s5885_s30 = sld [smem:[%s6712_s0 + %s5703_s7]]  }
  0x3a   :  { %s5890_s20 = sld [smem:[%s6712_s0 + %s5704_s15]]  }
  0x3b LB: > { %s4761_s23 = sadd.s32 4294967295, %s5668_s22   ;;  %p4765_p0 = scmp.ge.s32.totalorder %s5668_s22, 1  ;;  %s5668_s22 = sphi %s5892_s22, %s81_s22  }
  0x3c   : > { %p973_p1 = scmp.lt.s32.totalorder %s5668_s22, 3 }
  0x3e   : > { %p974_p2 = pnand %p4765_p0, %p973_p1 }
  0x3f   : > { %p1061_p3 = scmp.lt.s32.totalorder (!%p974_p2), %s4761_s23, 1  ;;  %s6744_s28 = sld [smem:[#allocation4_spill]] (!%p974_p2) }
  0x40   : > { %977 = sbr.rel (%p974_p2) target bundleno = 5888 (0x1700), region = 160  ;;  %s6745_s1 = sld [smem:[#allocation3_spill]] (!%p974_p2) }
  0x41   : > { %s6746_s2 = sld [smem:[#allocation6_spill]] (!%p974_p2) }
  0x42   : > { %s6747_s7 = sld [smem:[#allocation5_spill]] (!%p974_p2) }
  0x43   : > { %s6748_s10 = sld [smem:[#allocation7_spill]] (!%p974_p2) }
  0x44   : > { %s6749_s11 = sld [smem:[#allocation8_spill]] (!%p974_p2) }
  0x45   : > { %v5600_v0 = vld [vmem:[%s5725_s13 + $0x18] sm:$0xff]   ;;  %v5705_v1 = vmov 0.0   ;;  %v1074_v3 = vlaneseq  ;;  %v5602_v4 = vld [vmem:[%s5725_s13 + $0x10] sm:$0xff]   ;;  %vm5706_vm0 = vmmov 0   ;;  %s6764_s23 = smov (!%p1061_p3, %s4761_s23), 1  ;;  %v5604_v7 = vld [vmem:[%s5725_s13 + $0x8] sm:$0xff]  }
  0x46   : > { %5113 = vmatprep.subr.bf16.mxu0 %v5705_v1  ;;  %5125 = vmatprep.subr.bf16.mxu1 %v5705_v1  ;;  %v5601_v2 = vld [vmem:[%s5720_s9 + $0x18] sm:$0xff]   ;;  %v5603_v5 = vld [vmem:[%s5720_s9 + $0x10] sm:$0xff]   ;;  %s6723_s0 = sshll.u32 %s6764_s23, 4  ;;  %v5605_v8 = vld [vmem:[%s5720_s9 + $0x8] sm:$0xff]   ;;  %vm1137_vm3 = vcmask 523264   ;;  %vm1460_vm6 = vcmask 261120  }
  0x47   : > { %5114 = vmatpush3.bf16.msra.mxu0 %v5600_v0  ;;  %5121 = vmatprep.mubr.msk.bf16.mxu0 %vm5706_vm0, %v5705_v1  ;;  %v5915_v6 = vshrl.u32 %v1074_v3, 7  ;;  %s5924_s26 = scalar_lea.vmem %s5715_s5, %s6723_s0  ;;  %v5606_v9 = vld [vmem:[%s5725_s13] sm:$0xff]   ;;  %v5608_v24 = vld [vmem:[%s5730_s17 + $0x18] sm:$0xff]   ;;  %v5609_v26 = vld [vmem:[%s5730_s17 + $0x10] sm:$0xff]   ;;  %vm1910_vm7 = vcmask 130048   ;;  %s6750_s15 = sld [smem:[#allocation2_spill]] }
  0x48   : > { %5126 = vmatpush3.bf16.msra.mxu1 %v5601_v2  ;;  %5115 = vmatprep.subr.bf16.mxu0 %v5705_v1  ;;  %v1072_v10 = vld [vmem:[%s5924_s26] sm:$0xff]  ;;  %v1073_v11 = vld [vmem:[%s5924_s26 + $0x8] sm:$0xff]  ;;  %v5612_v31 = vld [vmem:[%s5740_s25 + $0x18] sm:$0xff]   ;;  %s6751_s16 = sld [smem:[#allocation12_spill]] }
  0x49   : > { %5127 = vmatprep.subr.bf16.mxu1 %v5705_v1  ;;  %5133 = vmatprep.mubr.msk.bf16.mxu1 %vm5706_vm0, %v5705_v1  ;;  %v1088_v12 = vrot.slane %v1072_v10, 1  ;;  %v1089_v13 = vrot.slane %v1073_v11, 1  ;;  %v1079_v14 = vrot.slane %v1072_v10, 7  ;;  %vm1081_vm1 = vcmp.lt.s32.totalorder %v5915_v6, 1  ;;  %v5607_v16 = vld [vmem:[%s5720_s9] sm:$0xff]   ;;  %v5610_v27 = vld [vmem:[%s5730_s17 + $0x8] sm:$0xff]  }
  0x4a   : > { %vm1077_vm2 = vcmp.eq.s32.totalorder %v5915_v6, 0  ;;  %v1080_v15 = vrot.slane %v1073_v11, 7  ;;  %v5935_v17 = vadd.s32 8, %v5915_v6  ;;  %vm1090_vm4 = vcmp.lt.s32.totalorder %v5915_v6, 7  ;;  %v5611_v28 = vld [vmem:[%s5730_s17] sm:$0xff]   ;;  %v5613_v32 = vld [vmem:[%s5740_s25 + $0x10] sm:$0xff]  }
  0x4b   : > { %5116 = vmatpush3.bf16.msra.mxu0 %v5602_v4  ;;  %v1104_v20 = vpack.c.bf16 %v1073_v11, %v1072_v10  ;;  %v1092_v22 = vsel %vm1090_vm4, %v1089_v13, %v1088_v12  ;;  %v1091_v29 = vsel %vm1090_vm4, %v1088_v12, %v1089_v13  ;;  %v5614_v33 = vld [vmem:[%s5740_s25 + $0x8] sm:$0xff]   ;;  %v5615_v34 = vld [vmem:[%s5740_s25] sm:$0xff]   ;;  %s6752_s18 = sld [smem:[#allocation11_spill]] }
  0x4c   : > { %5128 = vmatpush3.bf16.msra.mxu1 %v5603_v5  ;;  %5117 = vmatprep.subr.bf16.mxu0 %v5705_v1  ;;  %v1082_v18 = vsel %vm1081_vm1, %v1079_v14, %v1080_v15  ;;  %v1083_v19 = vsel %vm1081_vm1, %v1080_v15, %v1079_v14  ;;  %vm1087_vm5 = vcmp.eq.s32.totalorder %v5935_v17, 15  ;;  %v4785_v45 = vld [vmem:[%s5735_s21] ss:$0 sm:$0xff]  ;;  %v5616_v61 = vld [vmem:[%s5755_s8 + $0x8] sm:$0xff]   ;;  %s6759_s0 = sld [smem:[#allocation19_spill]] }
  0x4d   : > { %5129 = vmatprep.subr.bf16.mxu1 %v5705_v1  ;;  %v1084_v21 = vsel %vm1077_vm2, 0.0, %v1083_v19  ;;  %v1094_v25 = vsel %vm1087_vm5, 0.0, %v1092_v22  ;;  %v5617_v62 = vld [vmem:[%s5755_s8] sm:$0xff]   ;;  %v5618_v63 = vld [vmem:[%s5750_s3 + $0x8] sm:$0xff]  }
  0x4e   : > { %v1095_v23 = vpack.c.bf16 %v1082_v18, %v1084_v21  ;;  %v1250_v30 = vpack.c.bf16 %v1094_v25, %v1091_v29  ;;  %v5620_v0 = vld [vmem:[%s5750_s3] sm:$0xff]  }
  0x4f   : > { %5118 = vmatpush3.bf16.msra.mxu0 %v5604_v7  ;;  %v4786_v5 = vld [vmem:[%s5745_s29] ss:$0 sm:$0xff] }
  0x50   : > { %5130 = vmatpush3.bf16.msra.mxu1 %v5605_v8  ;;  %5119 = vmatprep.subr.bf16.mxu0 %v5705_v1 }
  0x51   : > { %5131 = vmatprep.subr.bf16.mxu1 %v5705_v1 }
  0x53   : > { %5120 = vmatpush3.bf16.msra.mxu0 %v5606_v9 }
  0x54   : > { %5132 = vmatpush3.bf16.msra.mxu1 %v5607_v16  ;;  %5137 = vmatprep.subr.bf16.mxu0 %v5705_v1  ;;  %v5619_v16 = vld [vmem:[%s5760_s14 + $0x8] sm:$0xff]  }
  0x55   : > { %5149 = vmatprep.subr.bf16.mxu1 %v5705_v1 }
  0x56   : > { %5122 = vmatmul.mubr.msk.bf16.vlgmr.msra.gmra.mxu0 %vm1137_vm3, %v1104_v20 }
  0x57   : > { %5134 = vmatmul.mubr.msk.bf16.vlgmr.msra.gmra.mxu1 %vm1137_vm3, %v1095_v23  ;;  %5138 = vmatpush3.bf16.msra.mxu0 %v5608_v24 }
  0x58   : > { %5139 = vmatprep.subr.bf16.mxu0 %v5705_v1  ;;  %5145 = vmatprep.mubr.msk.bf16.mxu0 %vm5706_vm0, %v5705_v1 }
  0x59   : > { %5157 = vmatprep.mubr.msk.bf16.mxu1 %vm5706_vm0, %v5705_v1  ;;  %5150 = vmatpush3.bf16.msra.mxu1 %v5612_v31  ;;  %v5622_v31 = vld [vmem:[%s5770_s24 + $0x8] sm:$0xff]  }
  0x5a   : > { %5151 = vmatprep.subr.bf16.mxu1 %v5705_v1 }
  0x5b   : > { %5140 = vmatpush3.bf16.msra.mxu0 %v5609_v26  ;;  %v5621_v26 = vld [vmem:[%s5760_s14] sm:$0xff]  }
  0x5c   : > { %5141 = vmatprep.subr.bf16.mxu0 %v5705_v1 }
  0x5d   : > { %5152 = vmatpush3.bf16.msra.mxu1 %v5613_v32  ;;  %v5623_v32 = vld [vmem:[%s5770_s24] sm:$0xff]  }
  0x5e   : > { %5153 = vmatprep.subr.bf16.mxu1 %v5705_v1 }
  0x5f   : > { %5142 = vmatpush3.bf16.msra.mxu0 %v5610_v27 }
  0x60   : > { %5143 = vmatprep.subr.bf16.mxu0 %v5705_v1 }
  0x61   : > { %5154 = vmatpush3.bf16.msra.mxu1 %v5614_v33 }
  0x62   : > { %5155 = vmatprep.subr.bf16.mxu1 %v5705_v1 }
  0x63   : > { %5144 = vmatpush3.bf16.msra.mxu0 %v5611_v28 }
  0x64   : > { %5161 = vmatprep.subr.bf16.mxu0 %v5705_v1 }
  0x65   : > { %5156 = vmatpush3.bf16.msra.mxu1 %v5615_v34 }
  0x66   : > { %5146 = vmatmul.mubr.msk.bf16.vlgmr.msra.gmra.mxu0 %vm1137_vm3, %v1250_v30  ;;  %5169 = vmatprep.subr.bf16.mxu1 %v5705_v1 }
  0x67   : > { %5165 = vmatprep.mubr.msk.bf16.mxu0 %vm5706_vm0, %v5705_v1  ;;  %5162 = vmatpush3.bf16.msra.mxu0 %v5616_v61 }
  0x68   : > { %5163 = vmatprep.subr.bf16.mxu0 %v5705_v1 }
  0x6b   : > { %5164 = vmatpush3.bf16.msra.mxu0 %v5617_v62 }
  0x6c   : > { %5177 = vmatprep.subr.bf16.mxu0 %v5705_v1 }
 0x116   : > { %v1175_v35 = vpop.f32.mrf.mxu0 }
 0x117   : > { %v1243_v36 = vpop.f32.mrf.mxu1 }
 0x118   : > { %v5123_v37 = vpop.f32.mrf.mxu0  ;;  %v1244_v43 = vadd.f32 %v1243_v36, %v1175_v35 }
 0x119   : > { %v5135_v38 = vpop.f32.mrf.mxu1 }
 0x11a   : > { %v1178_v39 = vpop.f32.mrf.mxu0 }
 0x11b   : > { %v1246_v40 = vpop.f32.mrf.mxu1 }
 0x11c   : > { %v5124_v41 = vpop.f32.mrf.mxu0  ;;  %v1247_v48 = vadd.f32 %v1246_v40, %v1178_v39 }
 0x11d   : > { %v5136_v42 = vpop.f32.mrf.mxu1 }
 0x126   : > { %v1320_v44 = vpop.f32.mrf.mxu0 }
 0x127   : > { %v1327_v46 = vadd.f32 %v1320_v44, %v1244_v43  ;;  %v4801_v43 = vld [vmem:[%s5765_s19] ss:$0 sm:$0xff] }
 0x128   : > { %v5147_v47 = vpop.f32.mrf.mxu0 }
 0x129   : > { %v1336_v49 = vadd.f32 %v4785_v45, %v1327_v46 }
 0x12a   : > { %v1323_v50 = vpop.f32.mrf.mxu0 }
 0x12b   : > { %v5980_v51 = vmax.f32 %v1336_v49, 0.0  ;;  %v1328_v52 = vadd.f32 %v1323_v50, %v1247_v48  ;;  %v1830_v50 = vsub.s32 0, %v5915_v6 }
 0x12c   : > { %v5148_v53 = vpop.f32.mrf.mxu0 }
 0x12d   : > { %v1337_v54 = vadd.f32 %v4785_v45, %v1328_v52  ;;  %v1784_v55 = vmul.f32 %v5980_v51, %v5980_v51 }
 0x12f   : > { %v5984_v56 = vmax.f32 %v1337_v54, 0.0  ;;  %v1786_v57 = vsel %vm1137_vm3, %v1784_v55, 0.0 }
 0x130   : > { %1787 = vadd.xlane.f32.xlu0 %v1786_v57 }
 0x131   : > { %v5989_v58 = vpack.c.bf16 %v5984_v56, %v5980_v51  ;;  %v1785_v59 = vmul.f32 %v5984_v56, %v5984_v56 }
 0x133   : > { %5158 = vmatmul.mubr.msk.bf16.vlgmr.msra.gmra.mxu1 %vm1137_vm3, %v5989_v58  ;;  %v1789_v60 = vsel %vm1137_vm3, %v1785_v59, 0.0 }
 0x134   : > { %1790 = vadd.xlane.f32.xlu0 %v1789_v60  ;;  %5173 = vmatprep.mubr.msk.bf16.mxu1 %vm5706_vm0, %v5705_v1 }
 0x135   : > { %5170 = vmatpush3.bf16.msra.mxu1 %v5618_v63  ;;  %v5624_v63 = vld [vmem:[%s5780_s6 + $0x18] sm:$0xff]  }
 0x136   : > { %5171 = vmatprep.subr.bf16.mxu1 %v5705_v1 }
 0x139   : > { %5172 = vmatpush3.bf16.msra.mxu1 %v5620_v0 }
 0x13a   : > { %5185 = vmatprep.subr.bf16.mxu1 %v5705_v1 }
 0x1b9   : > { %v6006_v2 = vpop.xlane.xlu0 %1787 }
 0x1ba   : > { %1796 = vxpose.xlu1.b32.start [1/2] (short) (narrow) %v6006_v2, 8 }
 0x1bd   : > { %v6009_v4 = vpop.xlane.xlu0 %1790 }
 0x1be   : > { %1797 = vxpose.xlu1.b32.end [2/2] (short) (narrow) %v6009_v4, 8 }
 0x1f3   : > { %v1417_v7 = vpop.f32.mrf.mxu1 }
 0x1f4   : > { %v1418_v8 = vadd.f32 %v4786_v5, %v1417_v7 }
 0x1f5   : > { %v5159_v9 = vpop.f32.mrf.mxu1 }
 0x1f6   : > { %v1424_v10 = vmax.f32 %v1418_v8, 0.0 }
 0x1f7   : > { %v1420_v11 = vpop.f32.mrf.mxu1 }
 0x1f8   : > { %v1421_v12 = vadd.f32 %v4786_v5, %v1420_v11  ;;  %v1426_v15 = vrot.slane %v1424_v10, 7  ;;  %v1432_v18 = vrot.slane %v1424_v10, 1 }
 0x1f9   : > { %v5160_v13 = vpop.f32.mrf.mxu1 }
 0x1fa   : > { %v1425_v14 = vmax.f32 %v1421_v12, 0.0  ;;  %v5626_v13 = vld [vmem:[%s5780_s6 + $0x8] sm:$0xff]  }
 0x1fc   : > { %v1427_v19 = vrot.slane %v1425_v14, 7  ;;  %v1433_v20 = vrot.slane %v1425_v14, 1  ;;  %v1443_v21 = vpack.c.bf16 %v1425_v14, %v1424_v10  ;;  %v5625_v10 = vld [vmem:[%s5780_s6 + $0x10] sm:$0xff]   ;;  %v1908_v14 = vand.u32 127, %v1074_v3 }
 0x1fe   : > { %v1428_v22 = vsel %vm1081_vm1, %v1426_v15, %v1427_v19  ;;  %v1429_v23 = vsel %vm1081_vm1, %v1427_v19, %v1426_v15  ;;  %v1435_v24 = vsel %vm1090_vm4, %v1433_v20, %v1432_v18  ;;  %5166 = vmatmul.mubr.msk.bf16.vlgmr.msra.gmra.mxu0 %vm1460_vm6, %v1443_v21  ;;  %v1434_v28 = vsel %vm1090_vm4, %v1432_v18, %v1433_v20 }
 0x1ff   : > { %v1430_v25 = vsel %vm1077_vm2, 0.0, %v1429_v23  ;;  %5178 = vmatpush3.bf16.msra.mxu0 %v5619_v16  ;;  %5181 = vmatprep.mubr.msk.bf16.mxu0 %vm5706_vm0, %v5705_v1  ;;  %v1437_v29 = vsel %vm1087_vm5, 0.0, %v1435_v24  ;;  %v6080_v16 = vcvt.s32.f32 %v1908_v14 }
 0x200   : > { %v1438_v27 = vpack.c.bf16 %v1428_v22, %v1430_v25  ;;  %5179 = vmatprep.subr.bf16.mxu0 %v5705_v1  ;;  %v1561_v30 = vpack.c.bf16 %v1437_v29, %v1434_v28 }
 0x202   : > { %5174 = vmatmul.mubr.msk.bf16.vlgmr.msra.gmra.mxu1 %vm1460_vm6, %v1438_v27 }
 0x203   : > { %5180 = vmatpush3.bf16.msra.mxu0 %v5621_v26  ;;  %5189 = vmatprep.mubr.msk.bf16.mxu1 %vm5706_vm0, %v5705_v1 }
 0x204   : > { %5193 = vmatprep.subr.msk.mxu0 %vm1137_vm3, %v5984_v56  ;;  %5186 = vmatpush3.bf16.msra.mxu1 %v5622_v31 }
 0x205   : > { %5187 = vmatprep.subr.bf16.mxu1 %v5705_v1 }
 0x206   : > { %5182 = vmatmul.mubr.msk.bf16.vlgmr.msra.gmra.mxu0 %vm1460_vm6, %v1561_v30 }
 0x207   : > { %5194 = vmatpush3.xpose.msk.msra.mxu0 %vm1137_vm3, %v5984_v56  ;;  %5197 = vmatprep.mubr.msk.f32.mxu0 %vm1137_vm3, %v5980_v51 }
 0x208   : > { %5195 = vmatprep.subr.msk.mxu0 %vm1137_vm3, %v5980_v51  ;;  %5188 = vmatpush3.bf16.msra.mxu1 %v5623_v32 }
 0x209   : > { %5200 = vmatprep.subr.bf16.mxu1 %v5705_v1 }
 0x20b   : > { %5196 = vmatpush3.xpose.msk.msra.mxu0 %vm1137_vm3, %v5980_v51 }
 0x20c   : > { %5212 = vmatprep.subr.mxu0 %v5984_v56 }
 0x20e   : > { %5198 = vmatmul.mubr.msk.f32.vlgmr.msra.gmra.mxu0 %vm1137_vm3, %v5984_v56 }
 0x20f   : > { %5213 = vmatpush3.msra.mxu0 %v5984_v56 }
 0x210   : > { %5214 = vmatprep.subr.mxu0 %v5980_v51 }
 0x211   : > { %5215 = vmatpush3.msra.mxu0 %v5980_v51 }
 0x212   : > { %5219 = vmatprep.subr.bf16.mxu0 %v5705_v1 }
 0x236   : > { %v1812_v53 = vpop.trf.xlu1 }
 0x237   : > { %v1831_v61 = vrot.slane %v1812_v53, %v1830_v50 }
 0x2be   : > { %v1498_v33 = vpop.f32.mrf.mxu0 }
 0x2c0   : > { %v5167_v34 = vpop.f32.mrf.mxu0 }
 0x2c1   : > { %v6099_v34 = vld [vmem:[%s5785_s12 + $0x18] sm:$0xff]  }
 0x2c2   : > { %v1501_v35 = vpop.f32.mrf.mxu0  ;;  %v1554_v36 = vpop.f32.mrf.mxu1 }
 0x2c3   : > { %v1555_v39 = vadd.f32 %v1554_v36, %v1498_v33 }
 0x2c4   : > { %v5168_v37 = vpop.f32.mrf.mxu0  ;;  %v5175_v38 = vpop.f32.mrf.mxu1 }
 0x2c5   : > { %v6107_v38 = vld [vmem:[%s5785_s12 + $0x10] sm:$0xff]  }
 0x2c6   : > { %v1557_v40 = vpop.f32.mrf.mxu1  ;;  %v1615_v41 = vpop.f32.mrf.mxu0 }
 0x2c7   : > { %v1622_v42 = vadd.f32 %v1615_v41, %v1555_v39  ;;  %v1558_v46 = vadd.f32 %v1557_v40, %v1501_v35  ;;  %v6114_v39 = vld [vmem:[%s5785_s12 + $0x8] sm:$0xff]   ;;  %v6119_v40 = vld [vmem:[%s5785_s12] sm:$0xff]  }
 0x2c8   : > { %v5176_v44 = vpop.f32.mrf.mxu1  ;;  %v5183_v45 = vpop.f32.mrf.mxu0 }
 0x2c9   : > { %v1631_v48 = vadd.f32 %v4801_v43, %v1622_v42 }
 0x2ca   : > { %v1618_v47 = vpop.f32.mrf.mxu0 }
 0x2cb   : > { %v1623_v49 = vadd.f32 %v1618_v47, %v1558_v46  ;;  %v1633_v57 = vmax.f32 %v1631_v48, 0.0 }
 0x2cc   : > { %v5184_v52 = vpop.f32.mrf.mxu0 }
 0x2cd   : > { %v1632_v54 = vadd.f32 %v4801_v43, %v1623_v49 }
 0x2ce   : > { %v5199_v55 = vpop.f32.mrf.mxu0 }
 0x2cf   : > { %v1634_v59 = vmax.f32 %v1632_v54, 0.0  ;;  %v1793_v60 = vmul.f32 2.0, %v5199_v55  ;;  %v6136_v54 = vld [vmem:[%s6744_s28 + $0x8] sm:$0xff]   ;;  %v6141_v55 = vld [vmem:[%s6744_s28] sm:$0xff]  }
 0x2d0   : > { %v1775_v62 = vpop.f32.mrf.mxu0 }
 0x2d1   : > { %v1635_v0 = vpack.c.bf16 %v1634_v59, %v1633_v57  ;;  %v1795_v5 = vsub.f32 %v1793_v60, %v6009_v4  ;;  %v1792_v7 = vmul.f32 2.0, %v1775_v62 }
 0x2d3   : > { %v1833_v8 = vsub.f32 %v1795_v5, %v1831_v61  ;;  %v1794_v9 = vsub.f32 %v1792_v7, %v6006_v2  ;;  %5190 = vmatmul.mubr.msk.bf16.vlgmr.msra.gmra.mxu1 %vm1460_vm6, %v1635_v0  ;;  %v5627_v2 = vld [vmem:[%s5780_s6] sm:$0xff]  }
 0x2d4   : > { %5201 = vmatpush3.bf16.msra.mxu1 %v5624_v63  ;;  %5208 = vmatprep.mubr.msk.bf16.mxu1 %vm5706_vm0, %v5705_v1 }
 0x2d5   : > { %v1832_v11 = vsub.f32 %v1794_v9, %v1831_v61  ;;  %v1914_v12 = vsel %vm1910_vm7, %v1833_v8, -inf  ;;  %5202 = vmatprep.subr.bf16.mxu1 %v5705_v1  ;;  %v6161_v9 = vld [vmem:[%s6745_s1] ss:$0 sm:$0xff]  ;;  %s6753_s1 = sld [smem:[#allocation9_spill]] }
 0x2d6   : > { %1915 = vmax.xlane.f32.xlu1 %v1914_v12 }
 0x2d7   : > { %v1911_v4 = vsel %vm1910_vm7, %v1832_v11, -inf }
 0x2d8   : > { %5203 = vmatpush3.bf16.msra.mxu1 %v5625_v10  ;;  %1912 = vmax.xlane.f32.xlu0 %v1911_v4 }
 0x2d9   : > { %5204 = vmatprep.subr.bf16.mxu1 %v5705_v1 }
 0x2dc   : > { %5205 = vmatpush3.bf16.msra.mxu1 %v5626_v13 }
 0x2dd   : > { %5206 = vmatprep.subr.bf16.mxu1 %v5705_v1 }
 0x2e0   : > { %5207 = vmatpush3.bf16.msra.mxu1 %v5627_v2 }
 0x2e1   : > { %5231 = vmatprep.subr.bf16.mxu1 %v5705_v1 }
 0x2e3   : > { %5209 = vmatmul.mubr.msk.bf16.vlgmr.msra.gmra.mxu1 %vm1137_vm3, %v5989_v58 }
 0x2e4   : > { %5235 = vmatprep.mubr.msk.bf16.mxu1 %vm5706_vm0, %v5705_v1  ;;  %5232 = vmatpush3.bf16.msra.mxu1 %v6136_v54 }
 0x2e5   : > { %5233 = vmatprep.subr.bf16.mxu1 %v5705_v1 }
 0x2e8   : > { %5234 = vmatpush3.bf16.msra.mxu1 %v6141_v55 }
 0x2e9   : > { %5239 = vmatprep.subr.bf16.mxu1 %v5705_v1 }
 0x35f   : > { %v1916_v15 = vpop.xlane.xlu1 %1915 }
 0x360   : > { %vm1918_vm8 = vcmp.ge.f32.partialorder %v1833_v8, %v1916_v15 }
 0x361   : > { %v1913_v18 = vpop.xlane.xlu0 %1912  ;;  %v1920_v21 = vsel %vm1918_vm8, %v6080_v16, 16.0 }
 0x362   : > { %vm1917_vm9 = vcmp.ge.f32.partialorder %v1832_v11, %v1913_v18  ;;  %v1924_v58 = vsel %vm1910_vm7, %v1920_v21, inf }
 0x363   : > { %v1919_v19 = vsel %vm1917_vm9, %v6080_v16, 16.0 }
 0x364   : > { %v1921_v20 = vsel %vm1910_vm7, %v1919_v19, inf }
 0x365   : > { %1922 = vmin.xlane.f32.xlu0 %v1921_v20 }
 0x369   : > { %1925 = vmin.xlane.f32.xlu0 %v1924_v58 }
 0x393   : > { %v6086_v22 = vpop.f32.mrf.mxu1 }
 0x395   : > { %v5191_v3 = vpop.f32.mrf.mxu1 }
 0x397   : > { %v6088_v23 = vpop.f32.mrf.mxu1 }
 0x399   : > { %v5192_v24 = vpop.f32.mrf.mxu1 }
 0x3a3   : > { %v6090_v25 = vpop.f32.mrf.mxu1 }
 0x3a5   : > { %v5210_v26 = vpop.f32.mrf.mxu1 }
 0x3a6   : > { %v6174_v26 = vld [vmem:[%s6746_s2 + $0x8] sm:$0xff]  }
 0x3a7   : > { %v6092_v27 = vpop.f32.mrf.mxu1 }
 0x3a9   : > { %v5211_v28 = vpop.f32.mrf.mxu1 }
 0x3aa   : > { %v6179_v28 = vld [vmem:[%s6746_s2] sm:$0xff]  }
 0x3ee   : > { %v1923_v29 = vpop.xlane.xlu0 %1922 }
 0x3ef   : > { %vm1927_vm10 = vcmp.eq.f32.partialorder %v6080_v16, %v1923_v29 }
 0x3f0   : > { %v4815_v30 = vsel %vm1927_vm10, 1.0, %v5705_v1  ;;  %v2014_v31 = vsel %vm1927_vm10, -1e+30, %v1832_v11 }
 0x3f1   : > { %5216 = vmatprep.mubr.msk.f32.mxu0 %vm1910_vm7, %v4815_v30  ;;  %v2246_v32 = vsel %vm1910_vm7, %v2014_v31, -inf }
 0x3f2   : > { %2247 = vmax.xlane.f32.xlu0 %v2246_v32  ;;  %v1926_v33 = vpop.xlane.xlu0 %1925 }
 0x3f3   : > { %vm1928_vm11 = vcmp.eq.f32.partialorder %v6080_v16, %v1926_v33 }
 0x3f4   : > { %v4816_v35 = vsel %vm1928_vm11, 1.0, %v5705_v1  ;;  %v2015_v36 = vsel %vm1928_vm11, -1e+30, %v1833_v8 }
 0x3f5   : > { %5217 = vmatmul.mubr.msk.f32.vlgmr.msra.gmra.mxu0 %vm1910_vm7, %v4816_v35  ;;  %v2249_v37 = vsel %vm1910_vm7, %v2015_v36, -inf }
 0x3f6   : > { %5220 = vmatpush3.bf16.msra.mxu0 %v6099_v34  ;;  %2250 = vmax.xlane.f32.xlu0 %v2249_v37 }
 0x3f7   : > { %5221 = vmatprep.subr.bf16.mxu0 %v5705_v1  ;;  %5227 = vmatprep.mubr.msk.bf16.mxu0 %vm5706_vm0, %v5705_v1 }
 0x3fa   : > { %5222 = vmatpush3.bf16.msra.mxu0 %v6107_v38 }
 0x3fb   : > { %5223 = vmatprep.subr.bf16.mxu0 %v5705_v1 }
 0x3fe   : > { %5224 = vmatpush3.bf16.msra.mxu0 %v6114_v39 }
 0x3ff   : > { %5225 = vmatprep.subr.bf16.mxu0 %v5705_v1 }
 0x402   : > { %5226 = vmatpush3.bf16.msra.mxu0 %v6119_v40 }
 0x403   : > { %5247 = vmatprep.subr.mxu0 %v5984_v56 }
 0x47b   : > { %v2248_v41 = vpop.xlane.xlu0 %2247 }
 0x47c   : > { %vm2252_vm12 = vcmp.ge.f32.partialorder %v2014_v31, %v2248_v41 }
 0x47d   : > { %v2254_v42 = vsel %vm2252_vm12, %v6080_v16, 16.0 }
 0x47e   : > { %v2256_v43 = vsel %vm1910_vm7, %v2254_v42, inf }
 0x47f   : > { %2257 = vmin.xlane.f32.xlu0 %v2256_v43  ;;  %v2251_v44 = vpop.xlane.xlu0 %2250 }
 0x480   : > { %vm2253_vm13 = vcmp.ge.f32.partialorder %v2015_v36, %v2251_v44 }
 0x481   : > { %v2255_v45 = vsel %vm2253_vm13, %v6080_v16, 16.0 }
 0x482   : > { %v2259_v46 = vsel %vm1910_vm7, %v2255_v45, inf }
 0x483   : > { %2260 = vmin.xlane.f32.xlu0 %v2259_v46 }
 0x4b5   : > { %v5218_v47 = vpop.f32.mrf.mxu0 }
 0x4b6   : > { %v2017_v49 = vsub.f32 %v5218_v47, %v5984_v56 }
 0x4b7   : > { %v2005_v48 = vpop.f32.mrf.mxu0 }
 0x4b8   : > { %v2016_v52 = vsub.f32 %v2005_v48, %v5980_v51 }
 0x4ba   : > { %v2018_v53 = vpack.c.bf16 %v2017_v49, %v2016_v52 }
 0x4bc   : > { %5228 = vmatmul.mubr.msk.bf16.vlgmr.msra.gmra.mxu0 %vm1137_vm3, %v2018_v53 }
 0x4bd   : > { %5248 = vmatpush3.msra.mxu0 %v5984_v56 }
 0x4be   : > { %5249 = vmatprep.subr.mxu0 %v5980_v51 }
 0x4bf   : > { %5250 = vmatpush3.msra.mxu0 %v5980_v51 }
 0x4c0   : > { %5266 = vmatprep.subr.bf16.mxu0 %v5705_v1 }
 0x508   : > { %v2258_v57 = vpop.xlane.xlu0 %2257 }
 0x509   : > { %vm2262_vm14 = vcmp.eq.f32.partialorder %v6080_v16, %v2258_v57 }
 0x50a   : > { %v4833_v59 = vsel %vm2262_vm14, 1.0, %v5705_v1  ;;  %v2349_v60 = vsel %vm2262_vm14, -1e+30, %v2014_v31 }
 0x50b   : > { %5251 = vmatprep.mubr.msk.f32.mxu0 %vm1910_vm7, %v4833_v59  ;;  %v2498_v61 = vsel %vm1910_vm7, %v2349_v60, -inf }
 0x50c   : > { %2499 = vmax.xlane.f32.xlu0 %v2498_v61  ;;  %v2261_v62 = vpop.xlane.xlu0 %2260 }
 0x50d   : > { %vm2263_vm15 = vcmp.eq.f32.partialorder %v6080_v16, %v2261_v62 }
 0x50e   : > { %v4834_v63 = vsel %vm2263_vm15, 1.0, %v5705_v1  ;;  %v2350_v0 = vsel %vm2263_vm15, -1e+30, %v2015_v36  ;;  %v6192_v36 = vld [vmem:[%s6747_s7] ss:$0 sm:$0xff]  ;;  %s6754_s7 = sld [smem:[#allocation10_spill]] }
 0x50f   : > { %5252 = vmatmul.mubr.msk.f32.vlgmr.msra.gmra.mxu0 %vm1910_vm7, %v4834_v63  ;;  %v2501_v5 = vsel %vm1910_vm7, %v2350_v0, -inf }
 0x510   : > { %2502 = vmax.xlane.f32.xlu0 %v2501_v5  ;;  %5267 = vmatpush3.bf16.msra.mxu0 %v6136_v54 }
 0x511   : > { %5268 = vmatprep.subr.bf16.mxu0 %v5705_v1  ;;  %5270 = vmatprep.mubr.msk.bf16.mxu0 %vm5706_vm0, %v5705_v1 }
 0x514   : > { %5269 = vmatpush3.bf16.msra.mxu0 %v6141_v55 }
 0x515   : > { %5274 = vmatprep.subr.bf16.mxu0 %v5705_v1 }
 0x57c   : > { %v2088_v7 = vpop.f32.mrf.mxu0 }
 0x57d   : > { %v2095_v8 = vadd.f32 %v2088_v7, %v6090_v25 }
 0x57e   : > { %v5229_v10 = vpop.f32.mrf.mxu0 }
 0x57f   : > { %v2104_v12 = vadd.f32 %v6161_v9, %v2095_v8 }
 0x580   : > { %v2091_v11 = vpop.f32.mrf.mxu0 }
 0x581   : > { %v2096_v4 = vadd.f32 %v2091_v11, %v6092_v27  ;;  %v2106_v14 = vmax.f32 %v2104_v12, 0.0 }
 0x582   : > { %v5230_v13 = vpop.f32.mrf.mxu0 }
 0x583   : > { %v2105_v2 = vadd.f32 %v6161_v9, %v2096_v4 }
 0x585   : > { %v2107_v15 = vmax.f32 %v2105_v2, 0.0 }
 0x587   : > { %v2108_v18 = vpack.c.bf16 %v2107_v15, %v2106_v14 }
 0x589   : > { %5236 = vmatmul.mubr.msk.bf16.vlgmr.msra.gmra.mxu1 %vm1460_vm6, %v2108_v18 }
 0x58a   : > { %5243 = vmatprep.mubr.msk.bf16.mxu1 %vm5706_vm0, %v5705_v1  ;;  %5240 = vmatpush3.bf16.msra.mxu1 %v6174_v26 }
 0x58b   : > { %5241 = vmatprep.subr.bf16.mxu1 %v5705_v1 }
 0x58e   : > { %5242 = vmatpush3.bf16.msra.mxu1 %v6179_v28 }
 0x58f   : > { %5254 = vmatprep.subr.bf16.mxu1 %v5705_v1 }
 0x595   : > { %v2500_v19 = vpop.xlane.xlu0 %2499 }
 0x596   : > { %vm2504_vm8 = vcmp.ge.f32.partialorder %v2349_v60, %v2500_v19 }
 0x597   : > { %v2506_v20 = vsel %vm2504_vm8, %v6080_v16, 16.0 }
 0x598   : > { %v2508_v21 = vsel %vm1910_vm7, %v2506_v20, inf }
 0x599   : > { %2509 = vmin.xlane.f32.xlu0 %v2508_v21  ;;  %v2503_v58 = vpop.xlane.xlu0 %2502 }
 0x59a   : > { %vm2505_vm9 = vcmp.ge.f32.partialorder %v2350_v0, %v2503_v58 }
 0x59b   : > { %v2507_v3 = vsel %vm2505_vm9, %v6080_v16, 16.0 }
 0x59c   : > { %v2511_v24 = vsel %vm1910_vm7, %v2507_v3, inf }
 0x59d   : > { %2512 = vmin.xlane.f32.xlu1 %v2511_v24 }
 0x5cf   : > { %v5253_v49 = vpop.f32.mrf.mxu0 }
 0x5d0   : > { %v2352_v57 = vsub.f32 %v5253_v49, %v5984_v56 }
 0x5d1   : > { %v2340_v52 = vpop.f32.mrf.mxu0 }
 0x5d2   : > { %v2351_v53 = vsub.f32 %v2340_v52, %v5980_v51 }
 0x5d4   : > { %v2353_v59 = vpack.c.bf16 %v2352_v57, %v2351_v53  ;;  %v6280_v57 = vld [vmem:[%s6748_s10] ss:$0 sm:$0xff]  ;;  %s6755_s10 = sld [smem:[#allocation14_spill]] }
 0x622   : > { %v2510_v29 = vpop.xlane.xlu0 %2509 }
 0x623   : > { %vm2514_vm10 = vcmp.eq.f32.partialorder %v6080_v16, %v2510_v29 }
 0x624   : > { %v2601_v30 = vsel %vm2514_vm10, -1e+30, %v2349_v60  ;;  %v4840_v60 = vsel %vm2514_vm10, 1.0, %v5705_v1 }
 0x625   : > { %v2750_v31 = vsel %vm1910_vm7, %v2601_v30, -inf }
 0x626   : > { %v2513_v32 = vpop.xlane.xlu1 %2512  ;;  %2751 = vmax.xlane.f32.xlu0 %v2750_v31 }
 0x627   : > { %vm2515_vm11 = vcmp.eq.f32.partialorder %v6080_v16, %v2513_v32 }
 0x628   : > { %v2602_v33 = vsel %vm2515_vm11, -1e+30, %v2350_v0  ;;  %v4841_v61 = vsel %vm2515_vm11, 1.0, %v5705_v1 }
 0x629   : > { %v2753_v35 = vsel %vm1910_vm7, %v2602_v33, -inf }
 0x62a   : > { %2754 = vmax.xlane.f32.xlu1 %v2753_v35 }
 0x649   : > { %v2169_v37 = vpop.f32.mrf.mxu1 }
 0x64a   : > { %v2170_v42 = vadd.f32 %v6192_v36, %v2169_v37 }
 0x64b   : > { %v5237_v41 = vpop.f32.mrf.mxu1 }
 0x64c   : > { %v2176_v46 = vmax.f32 %v2170_v42, 0.0 }
 0x64d   : > { %v2172_v43 = vpop.f32.mrf.mxu1 }
 0x64e   : > { %v2173_v44 = vadd.f32 %v6192_v36, %v2172_v43 }
 0x64f   : > { %v5238_v45 = vpop.f32.mrf.mxu1 }
 0x650   : > { %v2177_v47 = vmax.f32 %v2173_v44, 0.0 }
 0x652   : > { %v2178_v48 = vpack.c.bf16 %v2177_v47, %v2176_v46 }
 0x654   : > { %5244 = vmatmul.mubr.msk.bf16.vlgmr.msra.gmra.mxu1 %vm1460_vm6, %v2178_v48 }
 0x655   : > { %5255 = vmatpush3.bf16.msra.mxu1 %v6099_v34  ;;  %5262 = vmatprep.mubr.msk.bf16.mxu1 %vm5706_vm0, %v5705_v1 }
 0x656   : > { %5256 = vmatprep.subr.bf16.mxu1 %v5705_v1 }
 0x659   : > { %5257 = vmatpush3.bf16.msra.mxu1 %v6107_v38 }
 0x65a   : > { %5258 = vmatprep.subr.bf16.mxu1 %v5705_v1 }
 0x65d   : > { %5259 = vmatpush3.bf16.msra.mxu1 %v6114_v39 }
 0x65e   : > { %5260 = vmatprep.subr.bf16.mxu1 %v5705_v1 }
 0x661   : > { %5261 = vmatpush3.bf16.msra.mxu1 %v6119_v40 }
 0x662   : > { %5282 = vmatprep.subr.mxu1 %v5984_v56 }
 0x664   : > { %5263 = vmatmul.mubr.msk.bf16.vlgmr.msra.gmra.mxu1 %vm1137_vm3, %v2353_v59 }
 0x665   : > { %5283 = vmatpush3.msra.mxu1 %v5984_v56  ;;  %5286 = vmatprep.mubr.msk.f32.mxu1 %vm1910_vm7, %v4840_v60 }
 0x666   : > { %5284 = vmatprep.subr.mxu1 %v5980_v51 }
 0x667   : > { %5285 = vmatpush3.msra.mxu1 %v5980_v51 }
 0x668   : > { %5301 = vmatprep.subr.bf16.mxu1 %v5705_v1 }
 0x66c   : > { %5287 = vmatmul.mubr.msk.f32.vlgmr.msra.gmra.mxu1 %vm1910_vm7, %v4841_v61 }
 0x66d   : > { %5302 = vmatpush3.bf16.msra.mxu1 %v6136_v54  ;;  %5305 = vmatprep.mubr.msk.bf16.mxu1 %vm5706_vm0, %v5705_v1 }
 0x66e   : > { %5303 = vmatprep.subr.bf16.mxu1 %v5705_v1 }
 0x671   : > { %5304 = vmatpush3.bf16.msra.mxu1 %v6141_v55 }
 0x672   : > { %5309 = vmatprep.subr.bf16.mxu1 %v5705_v1 }
 0x6af   : > { %v2752_v62 = vpop.xlane.xlu0 %2751 }
 0x6b0   : > { %vm2756_vm12 = vcmp.ge.f32.partialorder %v2601_v30, %v2752_v62 }
 0x6b1   : > { %v2758_v63 = vsel %vm2756_vm12, %v6080_v16, 16.0 }
 0x6b2   : > { %v2760_v0 = vsel %vm1910_vm7, %v2758_v63, inf }
 0x6b3   : > { %v2755_v5 = vpop.xlane.xlu1 %2754  ;;  %2761 = vmin.xlane.f32.xlu0 %v2760_v0 }
 0x6b4   : > { %vm2757_vm13 = vcmp.ge.f32.partialorder %v2602_v33, %v2755_v5 }
 0x6b5   : > { %v2759_v7 = vsel %vm2757_vm13, %v6080_v16, 16.0 }
 0x6b6   : > { %v2763_v8 = vsel %vm1910_vm7, %v2759_v7, inf }
 0x6b7   : > { %2764 = vmin.xlane.f32.xlu1 %v2763_v8 }
 0x714   : > { %v6232_v10 = vpop.f32.mrf.mxu1 }
 0x715   : > { %v2240_v60 = vadd.f32 %v6280_v57, %v6232_v10 }
 0x716   : > { %v5245_v11 = vpop.f32.mrf.mxu1 }
 0x718   : > { %v6234_v12 = vpop.f32.mrf.mxu1 }
 0x719   : > { %v2243_v0 = vadd.f32 %v6280_v57, %v6234_v12 }
 0x71a   : > { %v5246_v4 = vpop.f32.mrf.mxu1 }
 0x724   : > { %v2391_v13 = vpop.f32.mrf.mxu1 }
 0x725   : > { %v2398_v2 = vadd.f32 %v2391_v13, %v6090_v25 }
 0x726   : > { %v5264_v14 = vpop.f32.mrf.mxu1 }
 0x727   : > { %v2400_v18 = vadd.f32 %v6161_v9, %v2398_v2 }
 0x728   : > { %v2394_v15 = vpop.f32.mrf.mxu1 }
 0x729   : > { %v2399_v19 = vadd.f32 %v2394_v15, %v6092_v27  ;;  %v2402_v58 = vmax.f32 %v2400_v18, 0.0 }
 0x72a   : > { %v5265_v20 = vpop.f32.mrf.mxu1 }
 0x72b   : > { %v2401_v21 = vadd.f32 %v6161_v9, %v2399_v19 }
 0x72c   : > { %v5288_v43 = vpop.f32.mrf.mxu1 }
 0x72d   : > { %v2403_v3 = vmax.f32 %v2401_v21, 0.0  ;;  %v2604_v47 = vsub.f32 %v5288_v43, %v5984_v56 }
 0x72e   : > { %v2592_v44 = vpop.f32.mrf.mxu1 }
 0x72f   : > { %v2404_v24 = vpack.c.bf16 %v2403_v3, %v2402_v58  ;;  %v2603_v45 = vsub.f32 %v2592_v44, %v5980_v51 }
 0x731   : > { %5271 = vmatmul.mubr.msk.bf16.vlgmr.msra.gmra.mxu0 %vm1460_vm6, %v2404_v24  ;;  %v2605_v48 = vpack.c.bf16 %v2604_v47, %v2603_v45 }
 0x732   : > { %5275 = vmatpush3.bf16.msra.mxu0 %v6174_v26  ;;  %5278 = vmatprep.mubr.msk.bf16.mxu0 %vm5706_vm0, %v5705_v1 }
 0x733   : > { %5276 = vmatprep.subr.bf16.mxu0 %v5705_v1 }
 0x736   : > { %5277 = vmatpush3.bf16.msra.mxu0 %v6179_v28 }
 0x737   : > { %5289 = vmatprep.subr.bf16.mxu0 %v5705_v1 }
 0x73c   : > { %v2762_v46 = vpop.xlane.xlu0 %2761 }
 0x73d   : > { %vm2766_vm14 = vcmp.eq.f32.partialorder %v6080_v16, %v2762_v46 }
 0x73e   : > { %v4847_v49 = vsel %vm2766_vm14, 1.0, %v5705_v1 }
 0x740   : > { %v2765_v52 = vpop.xlane.xlu1 %2764 }
 0x741   : > { %vm2767_vm15 = vcmp.eq.f32.partialorder %v6080_v16, %v2765_v52 }
 0x742   : > { %v4848_v53 = vsel %vm2767_vm15, 1.0, %v5705_v1 }
 0x7f1   : > { %v2442_v29 = vpop.f32.mrf.mxu0 }
 0x7f2   : > { %v2443_v31 = vadd.f32 %v6192_v36, %v2442_v29 }
 0x7f3   : > { %v5272_v30 = vpop.f32.mrf.mxu0 }
 0x7f4   : > { %v2449_v37 = vmax.f32 %v2443_v31, 0.0 }
 0x7f5   : > { %v2445_v32 = vpop.f32.mrf.mxu0 }
 0x7f6   : > { %v2446_v33 = vadd.f32 %v6192_v36, %v2445_v32 }
 0x7f7   : > { %v5273_v35 = vpop.f32.mrf.mxu0 }
 0x7f8   : > { %v2450_v41 = vmax.f32 %v2446_v33, 0.0 }
 0x7fa   : > { %v2451_v42 = vpack.c.bf16 %v2450_v41, %v2449_v37 }
 0x7fc   : > { %5279 = vmatmul.mubr.msk.bf16.vlgmr.msra.gmra.mxu0 %vm1460_vm6, %v2451_v42 }
 0x7fd   : > { %5290 = vmatpush3.bf16.msra.mxu0 %v6099_v34  ;;  %5297 = vmatprep.mubr.msk.bf16.mxu0 %vm5706_vm0, %v5705_v1 }
 0x7fe   : > { %5291 = vmatprep.subr.bf16.mxu0 %v5705_v1 }
 0x801   : > { %5292 = vmatpush3.bf16.msra.mxu0 %v6107_v38 }
 0x802   : > { %5293 = vmatprep.subr.bf16.mxu0 %v5705_v1 }
 0x805   : > { %5294 = vmatpush3.bf16.msra.mxu0 %v6114_v39 }
 0x806   : > { %5295 = vmatprep.subr.bf16.mxu0 %v5705_v1 }
 0x809   : > { %5296 = vmatpush3.bf16.msra.mxu0 %v6119_v40 }
 0x80a   : > { %5317 = vmatprep.subr.mxu0 %v5984_v56 }
 0x80c   : > { %5298 = vmatmul.mubr.msk.bf16.vlgmr.msra.gmra.mxu0 %vm1137_vm3, %v2605_v48 }
 0x80d   : > { %5318 = vmatpush3.msra.mxu0 %v5984_v56  ;;  %5321 = vmatprep.mubr.msk.f32.mxu0 %vm1910_vm7, %v4847_v49 }
 0x80e   : > { %5319 = vmatprep.subr.mxu0 %v5980_v51 }
 0x80f   : > { %5320 = vmatpush3.msra.mxu0 %v5980_v51 }
 0x810   : > { %5336 = vmatprep.subr.bf16.mxu0 %v5705_v1 }
 0x814   : > { %5322 = vmatmul.mubr.msk.f32.vlgmr.msra.gmra.mxu0 %vm1910_vm7, %v4848_v53 }
 0x815   : > { %5337 = vmatpush3.bf16.msra.mxu0 %v6136_v54  ;;  %5340 = vmatprep.mubr.msk.bf16.mxu0 %vm5706_vm0, %v5705_v1 }
 0x816   : > { %5338 = vmatprep.subr.bf16.mxu0 %v5705_v1 }
 0x819   : > { %5339 = vmatpush3.bf16.msra.mxu0 %v6141_v55 }
 0x81a   : > { %5344 = vmatprep.subr.bf16.mxu0 %v5705_v1 }
 0x8bc   : > { %v2489_v59 = vpop.f32.mrf.mxu0 }
 0x8bd   : > { %v2490_v61 = vadd.f32 %v6280_v57, %v2489_v59 }
 0x8be   : > { %v5280_v62 = vpop.f32.mrf.mxu0 }
 0x8bf   : > { %v2496_v63 = vmax.f32 %v2240_v60, %v2490_v61 }
 0x8c0   : > { %v2492_v54 = vpop.f32.mrf.mxu0 }
 0x8c1   : > { %v2493_v5 = vadd.f32 %v6280_v57, %v2492_v54 }
 0x8c2   : > { %v5281_v7 = vpop.f32.mrf.mxu0 }
 0x8c3   : > { %v2497_v55 = vmax.f32 %v2243_v0, %v2493_v5 }
 0x8cc   : > { %v2643_v8 = vpop.f32.mrf.mxu0 }
 0x8cd   : > { %v2650_v11 = vadd.f32 %v2643_v8, %v6090_v25 }
 0x8ce   : > { %v5299_v4 = vpop.f32.mrf.mxu0 }
 0x8cf   : > { %v2652_v2 = vadd.f32 %v6161_v9, %v2650_v11  ;;  %v5637_v11 = vld [vmem:[%s6749_s11 + $0x10] sm:$0xff]   ;;  %v5638_v4 = vld [vmem:[%s6749_s11 + $0x8] sm:$0xff]  }
 0x8d0   : > { %v2646_v13 = vpop.f32.mrf.mxu0 }
 0x8d1   : > { %v2651_v10 = vadd.f32 %v2646_v13, %v6092_v27  ;;  %v2654_v18 = vmax.f32 %v2652_v2, 0.0  ;;  %v5639_v13 = vld [vmem:[%s6749_s11] sm:$0xff]  }
 0x8d2   : > { %v5300_v14 = vpop.f32.mrf.mxu0 }
 0x8d3   : > { %v2653_v15 = vadd.f32 %v6161_v9, %v2651_v10 }
 0x8d4   : > { %v5323_v33 = vpop.f32.mrf.mxu0 }
 0x8d5   : > { %v2655_v19 = vmax.f32 %v2653_v15, 0.0  ;;  %v2854_v41 = vsub.f32 %v5323_v33, %v5984_v56 }
 0x8d6   : > { %v2844_v35 = vpop.f32.mrf.mxu0 }
 0x8d7   : > { %v2656_v20 = vpack.c.bf16 %v2655_v19, %v2654_v18  ;;  %v2853_v37 = vsub.f32 %v2844_v35, %v5980_v51  ;;  %v5641_v35 = vld [vmem:[%s6751_s16] sm:$0xff]  }
 0x8d9   : > { %5306 = vmatmul.mubr.msk.bf16.vlgmr.msra.gmra.mxu1 %vm1460_vm6, %v2656_v20 }
 0x8da   : > { %5310 = vmatpush3.bf16.msra.mxu1 %v6174_v26  ;;  %5313 = vmatprep.mubr.msk.bf16.mxu1 %vm5706_vm0, %v5705_v1 }
 0x8db   : > { %5311 = vmatprep.subr.bf16.mxu1 %v5705_v1 }
 0x8de   : > { %5312 = vmatpush3.bf16.msra.mxu1 %v6179_v28 }
 0x8df   : > { %5324 = vmatprep.subr.bf16.mxu1 %v5705_v1 }
 0x999   : > { %v2694_v12 = vpop.f32.mrf.mxu1 }
 0x99a   : > { %v2695_v58 = vadd.f32 %v6192_v36, %v2694_v12 }
 0x99b   : > { %v5307_v21 = vpop.f32.mrf.mxu1 }
 0x99c   : > { %v2701_v30 = vmax.f32 %v2695_v58, 0.0 }
 0x99d   : > { %v2697_v3 = vpop.f32.mrf.mxu1 }
 0x99e   : > { %v2698_v24 = vadd.f32 %v6192_v36, %v2697_v3 }
 0x99f   : > { %v5308_v29 = vpop.f32.mrf.mxu1 }
 0x9a0   : > { %v2702_v31 = vmax.f32 %v2698_v24, 0.0 }
 0x9a2   : > { %v2703_v32 = vpack.c.bf16 %v2702_v31, %v2701_v30 }
 0x9a4   : > { %5314 = vmatmul.mubr.msk.bf16.vlgmr.msra.gmra.mxu1 %vm1460_vm6, %v2703_v32  ;;  %v5640_v32 = vld [vmem:[%s6751_s16 + $0x8] sm:$0xff]  }
 0x9a5   : > { %5325 = vmatpush3.bf16.msra.mxu1 %v6099_v34  ;;  %5332 = vmatprep.mubr.msk.bf16.mxu1 %vm5706_vm0, %v5705_v1  ;;  %v2855_v34 = vpack.c.bf16 %v2854_v41, %v2853_v37  ;;  %v5642_v37 = vld [vmem:[%s6752_s18 + $0x8] sm:$0xff]   ;;  %v5643_v41 = vld [vmem:[%s6752_s18] sm:$0xff]  }
 0x9a6   : > { %5326 = vmatprep.subr.bf16.mxu1 %v5705_v1 }
 0x9a9   : > { %5327 = vmatpush3.bf16.msra.mxu1 %v6107_v38 }
 0x9aa   : > { %5328 = vmatprep.subr.bf16.mxu1 %v5705_v1 }
 0x9ad   : > { %5329 = vmatpush3.bf16.msra.mxu1 %v6114_v39 }
 0x9ae   : > { %5330 = vmatprep.subr.bf16.mxu1 %v5705_v1 }
 0x9b1   : > { %5331 = vmatpush3.bf16.msra.mxu1 %v6119_v40 }
 0x9b2   : > { %5352 = vmatprep.subr.bf16.mxu1 %v5705_v1 }
 0x9b4   : > { %5333 = vmatmul.mubr.msk.bf16.vlgmr.msra.gmra.mxu1 %vm1137_vm3, %v2855_v34 }
 0x9b5   : > { %5360 = vmatprep.mubr.msk.bf16.mxu1 %vm5706_vm0, %v5705_v1 }
 0xa64   : > { %v2741_v38 = vpop.f32.mrf.mxu1 }
 0xa65   : > { %v2742_v42 = vadd.f32 %v6280_v57, %v2741_v38 }
 0xa66   : > { %v5315_v39 = vpop.f32.mrf.mxu1 }
 0xa67   : > { %v2748_v43 = vmax.f32 %v2496_v63, %v2742_v42  ;;  %v4854_v42 = vld [vmem:[%s6753_s1] ss:$0 sm:$0xff]  ;;  %s6757_s1 = sld [smem:[#allocation16_spill]] }
 0xa68   : > { %v2744_v44 = vpop.f32.mrf.mxu1 }
 0xa69   : > { %v2745_v45 = vadd.f32 %v6280_v57, %v2744_v44 }
 0xa6a   : > { %v5316_v46 = vpop.f32.mrf.mxu1 }
 0xa6b   : > { %v2749_v47 = vmax.f32 %v2497_v55, %v2745_v45 }
 0xa74   : > { %v2893_v48 = vpop.f32.mrf.mxu1 }
 0xa75   : > { %v2900_v40 = vadd.f32 %v2893_v48, %v6090_v25  ;;  %v5636_v25 = vld [vmem:[%s6749_s11 + $0x18] sm:$0xff]  }
 0xa76   : > { %v5334_v49 = vpop.f32.mrf.mxu1  ;;  %5353 = vmatpush3.bf16.msra.mxu1 %v5636_v25 }
 0xa77   : > { %v2902_v53 = vadd.f32 %v6161_v9, %v2900_v40  ;;  %5354 = vmatprep.subr.bf16.mxu1 %v5705_v1 }
 0xa78   : > { %v2896_v52 = vpop.f32.mrf.mxu1 }
 0xa79   : > { %v2901_v59 = vadd.f32 %v2896_v52, %v6092_v27  ;;  %v2904_v62 = vmax.f32 %v2902_v53, 0.0  ;;  %v5644_v52 = vld [vmem:[%s6754_s7 + $0x8] sm:$0xff]  }
 0xa7a   : > { %v5335_v60 = vpop.f32.mrf.mxu1  ;;  %5355 = vmatpush3.bf16.msra.mxu1 %v5637_v11 }
 0xa7b   : > { %v2903_v61 = vadd.f32 %v6161_v9, %v2901_v59  ;;  %5356 = vmatprep.subr.bf16.mxu1 %v5705_v1 }
 0xa7d   : > { %v2905_v63 = vmax.f32 %v2903_v61, 0.0 }
 0xa7e   : > { %5357 = vmatpush3.bf16.msra.mxu1 %v5638_v4 }
 0xa7f   : > { %v2906_v54 = vpack.c.bf16 %v2905_v63, %v2904_v62  ;;  %5358 = vmatprep.subr.bf16.mxu1 %v5705_v1 }
 0xa81   : > { %5341 = vmatmul.mubr.msk.bf16.vlgmr.msra.gmra.mxu0 %vm1460_vm6, %v2906_v54 }
 0xa82   : > { %5345 = vmatpush3.bf16.msra.mxu0 %v6174_v26  ;;  %5348 = vmatprep.mubr.msk.bf16.mxu0 %vm5706_vm0, %v5705_v1 }
 0xa83   : > { %5346 = vmatprep.subr.bf16.mxu0 %v5705_v1  ;;  %5359 = vmatpush3.bf16.msra.mxu1 %v5639_v13 }
 0xa84   : > { %5380 = vmatprep.subr.bf16.mxu1 %v5705_v1 }
 0xa86   : > { %5347 = vmatpush3.bf16.msra.mxu0 %v6179_v28 }
 0xa87   : > { %5364 = vmatprep.subr.bf16.mxu0 %v5705_v1 }
 0xb41   : > { %v2944_v27 = vpop.f32.mrf.mxu0 }
 0xb42   : > { %v2945_v26 = vadd.f32 %v6192_v36, %v2944_v27  ;;  %v5645_v27 = vld [vmem:[%s6754_s7] sm:$0xff]  }
 0xb43   : > { %v5342_v9 = vpop.f32.mrf.mxu0 }
 0xb44   : > { %v2951_v55 = vmax.f32 %v2945_v26, 0.0 }
 0xb45   : > { %v2947_v0 = vpop.f32.mrf.mxu0 }
 0xb46   : > { %v2948_v5 = vadd.f32 %v6192_v36, %v2947_v0  ;;  %v4802_v36 = vld [vmem:[%s6750_s15] ss:$0 sm:$0xff]  ;;  %s6756_s15 = sld [smem:[#allocation13_spill]] }
 0xb47   : > { %v5343_v7 = vpop.f32.mrf.mxu0  ;;  %v1697_v2 = vadd.f32 %v4802_v36, %v6086_v22  ;;  %v1700_v19 = vadd.f32 %v4802_v36, %v6088_v23 }
 0xb48   : > { %v2952_v28 = vmax.f32 %v2948_v5, 0.0  ;;  %v5646_v5 = vld [vmem:[%s6755_s10 + $0x8] sm:$0xff]   ;;  %v5647_v7 = vld [vmem:[%s6755_s10] sm:$0xff]  }
 0xb49   : > { %v3000_v18 = vadd.f32 %v1697_v2, %v5980_v51  ;;  %v3001_v24 = vadd.f32 %v1700_v19, %v5984_v56 }
 0xb4a   : > { %v2953_v8 = vpack.c.bf16 %v2952_v28, %v2951_v55 }
 0xb4c   : > { %5349 = vmatmul.mubr.msk.bf16.vlgmr.msra.gmra.mxu0 %vm1460_vm6, %v2953_v8  ;;  %v4869_v19 = vld [vmem:[%s6756_s15] ss:$0 sm:$0xff]  ;;  %s6758_s15 = sld [smem:[#allocation17_spill]] }
 0xb4d   : > { %5368 = vmatprep.mubr.msk.bf16.mxu0 %vm5706_vm0, %v5705_v1  ;;  %5365 = vmatpush3.bf16.msra.mxu0 %v5642_v37 }
 0xb4e   : > { %5366 = vmatprep.subr.bf16.mxu0 %v5705_v1 }
 0xb51   : > { %5367 = vmatpush3.bf16.msra.mxu0 %v5643_v41 }
 0xb52   : > { %5372 = vmatprep.subr.bf16.mxu0 %v5705_v1 }
 0xc0c   : > { %v2991_v10 = vpop.f32.mrf.mxu0 }
 0xc0d   : > { %v2992_v14 = vadd.f32 %v6280_v57, %v2991_v10 }
 0xc0e   : > { %v5350_v15 = vpop.f32.mrf.mxu0 }
 0xc0f   : > { %v2998_v20 = vmax.f32 %v2748_v43, %v2992_v14 }
 0xc10   : > { %v2994_v12 = vpop.f32.mrf.mxu0 }
 0xc11   : > { %v3002_v21 = vadd.f32 %v3000_v18, %v2998_v20  ;;  %v2995_v58 = vadd.f32 %v6280_v57, %v2994_v12 }
 0xc12   : > { %v5351_v3 = vpop.f32.mrf.mxu0 }
 0xc13   : > { %v6350_v29 = vmax.f32 %v3002_v21, 0.0  ;;  %v2999_v22 = vmax.f32 %v2749_v47, %v2995_v58 }
 0xc15   : > { %v3003_v30 = vadd.f32 %v3001_v24, %v2999_v22  ;;  %v3449_v31 = vmul.f32 %v6350_v29, %v6350_v29 }
 0xc17   : > { %v6354_v51 = vmax.f32 %v3003_v30, 0.0  ;;  %v3451_v23 = vsel %vm1137_vm3, %v3449_v31, 0.0 }
 0xc18   : > { %3452 = vadd.xlane.f32.xlu0 %v3451_v23 }
 0xc19   : > { %v6360_v57 = vpack.c.bf16 %v6354_v51, %v6350_v29  ;;  %v3450_v56 = vmul.f32 %v6354_v51, %v6354_v51 }
 0xc1b   : > { %5361 = vmatmul.mubr.msk.bf16.vlgmr.msra.gmra.mxu1 %vm1137_vm3, %v6360_v57  ;;  %v3454_v33 = vsel %vm1137_vm3, %v3450_v56, 0.0 }
 0xc1c   : > { %5381 = vmatpush3.bf16.msra.mxu1 %v5640_v32  ;;  %3455 = vadd.xlane.f32.xlu1 %v3454_v33 }
 0xc1d   : > { %5382 = vmatprep.subr.bf16.mxu1 %v5705_v1  ;;  %5384 = vmatprep.mubr.msk.bf16.mxu1 %vm5706_vm0, %v5705_v1 }
 0xc20   : > { %5383 = vmatpush3.bf16.msra.mxu1 %v5641_v35 }
 0xc21   : > { %5396 = vmatprep.subr.msk.mxu1 %vm1137_vm3, %v6354_v51 }
 0xca1   : > { %v6377_v34 = vpop.xlane.xlu0 %3452 }
 0xca2   : > { %3461 = vxpose.xlu0.b32.start [1/2] (short) (narrow) %v6377_v34, 8 }
 0xca5   : > { %v6380_v38 = vpop.xlane.xlu1 %3455 }
 0xca6   : > { %3462 = vxpose.xlu0.b32.end [2/2] (short) (narrow) %v6380_v38, 8 }
 0xcdb   : > { %v3083_v39 = vpop.f32.mrf.mxu1 }
 0xcdc   : > { %v3084_v43 = vadd.f32 %v4854_v42, %v3083_v39  ;;  %v5648_v39 = vld [vmem:[%s6757_s1 + $0x18] sm:$0xff]  }
 0xcdd   : > { %v5362_v44 = vpop.f32.mrf.mxu1 }
 0xcde   : > { %v3090_v45 = vmax.f32 %v3084_v43, 0.0 }
 0xcdf   : > { %v3086_v46 = vpop.f32.mrf.mxu1 }
 0xce0   : > { %v3087_v47 = vadd.f32 %v4854_v42, %v3086_v46  ;;  %v3092_v49 = vrot.slane %v3090_v45, 7  ;;  %v3098_v53 = vrot.slane %v3090_v45, 1 }
 0xce1   : > { %v5363_v48 = vpop.f32.mrf.mxu1 }
 0xce2   : > { %v3091_v40 = vmax.f32 %v3087_v47, 0.0 }
 0xce4   : > { %v3093_v59 = vrot.slane %v3091_v40, 7  ;;  %v3099_v60 = vrot.slane %v3091_v40, 1  ;;  %v3109_v61 = vpack.c.bf16 %v3091_v40, %v3090_v45 }
 0xce6   : > { %v3095_v62 = vsel %vm1081_vm1, %v3093_v59, %v3092_v49  ;;  %v3100_v63 = vsel %vm1090_vm4, %v3098_v53, %v3099_v60  ;;  %v3101_v54 = vsel %vm1090_vm4, %v3099_v60, %v3098_v53  ;;  %5369 = vmatmul.mubr.msk.bf16.vlgmr.msra.gmra.mxu0 %vm1460_vm6, %v3109_v61  ;;  %v3094_v26 = vsel %vm1081_vm1, %v3092_v49, %v3093_v59 }
 0xce7   : > { %v3103_v25 = vsel %vm1087_vm5, 0.0, %v3101_v54  ;;  %5373 = vmatpush3.bf16.msra.mxu0 %v5644_v52  ;;  %5376 = vmatprep.mubr.msk.bf16.mxu0 %vm5706_vm0, %v5705_v1  ;;  %v3096_v0 = vsel %vm1077_vm2, 0.0, %v3095_v62 }
 0xce8   : > { %v3226_v9 = vpack.c.bf16 %v3103_v25, %v3100_v63  ;;  %5374 = vmatprep.subr.bf16.mxu0 %v5705_v1  ;;  %v3104_v17 = vpack.c.bf16 %v3094_v26, %v3096_v0 }
 0xcea   : > { %5385 = vmatmul.mubr.msk.bf16.vlgmr.msra.gmra.mxu1 %vm1460_vm6, %v3226_v9 }
 0xceb   : > { %5397 = vmatpush3.xpose.msk.msra.mxu1 %vm1137_vm3, %v6354_v51  ;;  %5375 = vmatpush3.bf16.msra.mxu0 %v5645_v27 }
 0xcec   : > { %5398 = vmatprep.subr.msk.mxu1 %vm1137_vm3, %v6350_v29  ;;  %5400 = vmatprep.mubr.msk.f32.mxu1 %vm1137_vm3, %v6350_v29 }
 0xced   : > { %5388 = vmatprep.subr.bf16.mxu0 %v5705_v1 }
 0xcee   : > { %5377 = vmatmul.mubr.msk.bf16.vlgmr.msra.gmra.mxu0 %vm1460_vm6, %v3104_v17  ;;  %v6465_v17 = vld [vmem:[%s6758_s15 + $0x18] sm:$0xff]  }
 0xcef   : > { %5399 = vmatpush3.xpose.msk.msra.mxu1 %vm1137_vm3, %v6350_v29  ;;  %5392 = vmatprep.mubr.msk.bf16.mxu0 %vm5706_vm0, %v5705_v1 }
 0xcf0   : > { %5415 = vmatprep.subr.mxu1 %v6354_v51  ;;  %5389 = vmatpush3.bf16.msra.mxu0 %v5646_v5 }
 0xcf1   : > { %5390 = vmatprep.subr.bf16.mxu0 %v5705_v1 }
 0xcf2   : > { %5401 = vmatmul.mubr.msk.f32.vlgmr.msra.gmra.mxu1 %vm1137_vm3, %v6354_v51 }
 0xcf3   : > { %5416 = vmatpush3.msra.mxu1 %v6354_v51 }
 0xcf4   : > { %5417 = vmatprep.subr.mxu1 %v6350_v29  ;;  %5391 = vmatpush3.bf16.msra.mxu0 %v5647_v7 }
 0xcf5   : > { %5418 = vmatpush3.msra.mxu1 %v6350_v29  ;;  %5403 = vmatprep.subr.bf16.mxu0 %v5705_v1 }
 0xcf6   : > { %5422 = vmatprep.subr.bf16.mxu1 %v5705_v1 }
 0xd1e   : > { %v3477_v3 = vpop.trf.xlu0 }
 0xd1f   : > { %v3496_v33 = vrot.slane %v3477_v3, %v1830_v50  ;;  %v5650_v50 = vld [vmem:[%s6757_s1 + $0x8] sm:$0xff]  }
 0xda6   : > { %v3163_v55 = vpop.f32.mrf.mxu0 }
 0xda8   : > { %v5370_v28 = vpop.f32.mrf.mxu0 }
 0xda9   : > { %v6473_v28 = vld [vmem:[%s6758_s15 + $0x10] sm:$0xff]  }
 0xdaa   : > { %v3166_v8 = vpop.f32.mrf.mxu0  ;;  %v3280_v11 = vpop.f32.mrf.mxu1 }
 0xdac   : > { %v5371_v4 = vpop.f32.mrf.mxu0  ;;  %v5386_v13 = vpop.f32.mrf.mxu1 }
 0xdae   : > { %v3219_v36 = vpop.f32.mrf.mxu0  ;;  %v3283_v2 = vpop.f32.mrf.mxu1 }
 0xdaf   : > { %v3220_v10 = vadd.f32 %v3219_v36, %v3163_v55 }
 0xdb0   : > { %v5378_v14 = vpop.f32.mrf.mxu0  ;;  %v5387_v15 = vpop.f32.mrf.mxu1 }
 0xdb1   : > { %v3287_v18 = vadd.f32 %v3280_v11, %v3220_v10  ;;  %v6485_v11 = vld [vmem:[%s6758_s15] sm:$0xff]  }
 0xdb2   : > { %v3222_v20 = vpop.f32.mrf.mxu0  ;;  %v5402_v12 = vpop.f32.mrf.mxu1 }
 0xdb3   : > { %v3223_v21 = vadd.f32 %v3222_v20, %v3166_v8  ;;  %v3458_v58 = vmul.f32 2.0, %v5402_v12  ;;  %v3296_v30 = vadd.f32 %v4869_v19, %v3287_v18  ;;  %v6480_v8 = vld [vmem:[%s6758_s15 + $0x8] sm:$0xff]  }
 0xdb4   : > { %v5379_v24 = vpop.f32.mrf.mxu0  ;;  %v3440_v22 = vpop.f32.mrf.mxu1 }
 0xdb5   : > { %v3288_v31 = vadd.f32 %v3283_v2, %v3223_v21  ;;  %v3457_v23 = vmul.f32 2.0, %v3440_v22  ;;  %v3460_v56 = vsub.f32 %v3458_v58, %v6380_v38  ;;  %v3298_v37 = vmax.f32 %v3296_v30, 0.0  ;;  %v5649_v38 = vld [vmem:[%s6757_s1 + $0x10] sm:$0xff]   ;;  %v6502_v21 = vld [vmem:[%s6759_s0 + $0x8] sm:$0xff]   ;;  %v6507_v58 = vld [vmem:[%s6759_s0] sm:$0xff]  }
 0xdb7   : > { %v3297_v32 = vadd.f32 %v4869_v19, %v3288_v31  ;;  %v3459_v35 = vsub.f32 %v3457_v23, %v6377_v34  ;;  %v3498_v44 = vsub.f32 %v3460_v56, %v3496_v33  ;;  %v5651_v34 = vld [vmem:[%s6757_s1] sm:$0xff]   ;;  %s6760_s1 = sld [smem:[#allocation18_spill]] }
 0xdb9   : > { %v3299_v41 = vmax.f32 %v3297_v32, 0.0  ;;  %v3497_v42 = vsub.f32 %v3459_v35, %v3496_v33  ;;  %v3575_v6 = vsel %vm1910_vm7, %v3498_v44, -inf }
 0xdbb   : > { %v3300_v43 = vpack.c.bf16 %v3299_v41, %v3298_v37  ;;  %v3572_v45 = vsel %vm1910_vm7, %v3497_v42, -inf }
 0xdbc   : > { %3573 = vmax.xlane.f32.xlu1 %v3572_v45 }
 0xdbd   : > { %5393 = vmatmul.mubr.msk.bf16.vlgmr.msra.gmra.mxu0 %vm1460_vm6, %v3300_v43  ;;  %v6527_v37 = vld [vmem:[%s6760_s1] ss:$0 sm:$0xff]  ;;  %s6761_s1 = sld [smem:[#allocation15_spill]] }
 0xdbe   : > { %5404 = vmatpush3.bf16.msra.mxu0 %v5648_v39  ;;  %5411 = vmatprep.mubr.msk.bf16.mxu0 %vm5706_vm0, %v5705_v1 }
 0xdbf   : > { %5405 = vmatprep.subr.bf16.mxu0 %v5705_v1 }
 0xdc0   : > { %3576 = vmax.xlane.f32.xlu1 %v3575_v6 }
 0xdc2   : > { %5406 = vmatpush3.bf16.msra.mxu0 %v5649_v38 }
 0xdc3   : > { %5407 = vmatprep.subr.bf16.mxu0 %v5705_v1 }
 0xdc6   : > { %5408 = vmatpush3.bf16.msra.mxu0 %v5650_v50 }
 0xdc7   : > { %5409 = vmatprep.subr.bf16.mxu0 %v5705_v1 }
 0xdca   : > { %5410 = vmatpush3.bf16.msra.mxu0 %v5651_v34 }
 0xdcb   : > { %5434 = vmatprep.subr.bf16.mxu0 %v5705_v1 }
 0xdcd   : > { %5412 = vmatmul.mubr.msk.bf16.vlgmr.msra.gmra.mxu0 %vm1137_vm3, %v6360_v57 }
 0xdce   : > { %5438 = vmatprep.mubr.msk.bf16.mxu0 %vm5706_vm0, %v5705_v1  ;;  %5435 = vmatpush3.bf16.msra.mxu0 %v6502_v21 }
 0xdcf   : > { %5436 = vmatprep.subr.bf16.mxu0 %v5705_v1 }
 0xdd2   : > { %5437 = vmatpush3.bf16.msra.mxu0 %v6507_v58 }
 0xdd3   : > { %5442 = vmatprep.subr.bf16.mxu0 %v5705_v1 }
 0xe45   : > { %v3574_v46 = vpop.xlane.xlu1 %3573 }
 0xe46   : > { %vm3578_vm1 = vcmp.ge.f32.partialorder %v3497_v42, %v3574_v46 }
 0xe47   : > { %v3580_v47 = vsel %vm3578_vm1, %v6080_v16, 16.0 }
 0xe48   : > { %v3582_v48 = vsel %vm1910_vm7, %v3580_v47, inf }
 0xe49   : > { %3583 = vmin.xlane.f32.xlu1 %v3582_v48  ;;  %v3577_v40 = vpop.xlane.xlu1 %3576 }
 0xe4a   : > { %vm3579_vm2 = vcmp.ge.f32.partialorder %v3498_v44, %v3577_v40 }
 0xe4b   : > { %v3581_v49 = vsel %vm3579_vm2, %v6080_v16, 16.0 }
 0xe4c   : > { %v3585_v52 = vsel %vm1910_vm7, %v3581_v49, inf }
 0xe4d   : > { %3586 = vmin.xlane.f32.xlu1 %v3585_v52  ;;  %v6540_v52 = vld [vmem:[%s5880_s4 + $0x8] sm:$0xff]  }
 0xe7d   : > { %v6452_v53 = vpop.f32.mrf.mxu0 }
 0xe7f   : > { %v5394_v57 = vpop.f32.mrf.mxu0 }
 0xe80   : > { %v6545_v57 = vld [vmem:[%s5880_s4] sm:$0xff]  }
 0xe81   : > { %v6454_v59 = vpop.f32.mrf.mxu0 }
 0xe83   : > { %v5395_v60 = vpop.f32.mrf.mxu0 }
 0xe8d   : > { %v6456_v61 = vpop.f32.mrf.mxu0 }
 0xe8f   : > { %v5413_v62 = vpop.f32.mrf.mxu0 }
 0xe91   : > { %v6458_v63 = vpop.f32.mrf.mxu0 }
 0xe93   : > { %v5414_v54 = vpop.f32.mrf.mxu0 }
 0xed2   : > { %v3584_v25 = vpop.xlane.xlu1 %3583 }
 0xed3   : > { %vm3588_vm4 = vcmp.eq.f32.partialorder %v6080_v16, %v3584_v25 }
 0xed4   : > { %v4883_v27 = vsel %vm3588_vm4, 1.0, %v5705_v1  ;;  %v3675_v9 = vsel %vm3588_vm4, -1e+30, %v3497_v42 }
 0xed5   : > { %5419 = vmatprep.mubr.msk.f32.mxu1 %vm1910_vm7, %v4883_v27  ;;  %v3907_v26 = vsel %vm1910_vm7, %v3675_v9, -inf }
 0xed6   : > { %3908 = vmax.xlane.f32.xlu1 %v3907_v26  ;;  %v3587_v0 = vpop.xlane.xlu1 %3586  ;;  %v6558_v26 = vld [vmem:[%s5875_s27] ss:$0 sm:$0xff] }
 0xed7   : > { %vm3589_vm5 = vcmp.eq.f32.partialorder %v6080_v16, %v3587_v0 }
 0xed8   : > { %v4884_v5 = vsel %vm3589_vm5, 1.0, %v5705_v1  ;;  %v3676_v7 = vsel %vm3589_vm5, -1e+30, %v3498_v44 }
 0xed9   : > { %5420 = vmatmul.mubr.msk.f32.vlgmr.msra.gmra.mxu1 %vm1910_vm7, %v4884_v5  ;;  %v3910_v55 = vsel %vm1910_vm7, %v3676_v7, -inf }
 0xeda   : > { %5423 = vmatpush3.bf16.msra.mxu1 %v6465_v17  ;;  %3911 = vmax.xlane.f32.xlu1 %v3910_v55 }
 0xedb   : > { %5424 = vmatprep.subr.bf16.mxu1 %v5705_v1  ;;  %5430 = vmatprep.mubr.msk.bf16.mxu1 %vm5706_vm0, %v5705_v1 }
 0xede   : > { %5425 = vmatpush3.bf16.msra.mxu1 %v6473_v28 }
 0xedf   : > { %5426 = vmatprep.subr.bf16.mxu1 %v5705_v1 }
 0xee2   : > { %5427 = vmatpush3.bf16.msra.mxu1 %v6480_v8 }
 0xee3   : > { %5428 = vmatprep.subr.bf16.mxu1 %v5705_v1 }
 0xee6   : > { %5429 = vmatpush3.bf16.msra.mxu1 %v6485_v11 }
 0xee7   : > { %5450 = vmatprep.subr.mxu1 %v6354_v51 }
 0xf5f   : > { %v3909_v4 = vpop.xlane.xlu1 %3908 }
 0xf60   : > { %vm3913_vm8 = vcmp.ge.f32.partialorder %v3675_v9, %v3909_v4 }
 0xf61   : > { %v3915_v13 = vsel %vm3913_vm8, %v6080_v16, 16.0 }
 0xf62   : > { %v3917_v36 = vsel %vm1910_vm7, %v3915_v13, inf }
 0xf63   : > { %3918 = vmin.xlane.f32.xlu1 %v3917_v36  ;;  %v3912_v2 = vpop.xlane.xlu1 %3911 }
 0xf64   : > { %vm3914_vm9 = vcmp.ge.f32.partialorder %v3676_v7, %v3912_v2 }
 0xf65   : > { %v3916_v10 = vsel %vm3914_vm9, %v6080_v16, 16.0 }
 0xf66   : > { %v3920_v14 = vsel %vm1910_vm7, %v3916_v10, inf }
 0xf67   : > { %3921 = vmin.xlane.f32.xlu1 %v3920_v14 }
 0xf99   : > { %v5421_v15 = vpop.f32.mrf.mxu1 }
 0xf9a   : > { %v3678_v19 = vsub.f32 %v5421_v15, %v6354_v51 }
 0xf9b   : > { %v3666_v18 = vpop.f32.mrf.mxu1 }
 0xf9c   : > { %v3677_v20 = vsub.f32 %v3666_v18, %v6350_v29 }
 0xf9e   : > { %v3679_v12 = vpack.c.bf16 %v3678_v19, %v3677_v20 }
 0xfa0   : > { %5431 = vmatmul.mubr.msk.bf16.vlgmr.msra.gmra.mxu1 %vm1137_vm3, %v3679_v12 }
 0xfa1   : > { %5451 = vmatpush3.msra.mxu1 %v6354_v51 }
 0xfa2   : > { %5452 = vmatprep.subr.mxu1 %v6350_v29 }
 0xfa3   : > { %5453 = vmatpush3.msra.mxu1 %v6350_v29 }
 0xfa4   : > { %5469 = vmatprep.subr.bf16.mxu1 %v5705_v1 }
 0xfec   : > { %v3919_v3 = vpop.xlane.xlu1 %3918 }
 0xfed   : > { %vm3923_vm10 = vcmp.eq.f32.partialorder %v6080_v16, %v3919_v3 }
 0xfee   : > { %v4901_v24 = vsel %vm3923_vm10, 1.0, %v5705_v1  ;;  %v4010_v22 = vsel %vm3923_vm10, -1e+30, %v3675_v9 }
 0xfef   : > { %5454 = vmatprep.mubr.msk.f32.mxu1 %vm1910_vm7, %v4901_v24  ;;  %v4159_v30 = vsel %vm1910_vm7, %v4010_v22, -inf }
 0xff0   : > { %4160 = vmax.xlane.f32.xlu1 %v4159_v30  ;;  %v3922_v31 = vpop.xlane.xlu1 %3921 }
 0xff1   : > { %vm3924_vm11 = vcmp.eq.f32.partialorder %v6080_v16, %v3922_v31 }
 0xff2   : > { %v4902_v23 = vsel %vm3924_vm11, 1.0, %v5705_v1  ;;  %v4011_v32 = vsel %vm3924_vm11, -1e+30, %v3676_v7 }
 0xff3   : > { %5455 = vmatmul.mubr.msk.f32.vlgmr.msra.gmra.mxu1 %vm1910_vm7, %v4902_v23  ;;  %v4162_v56 = vsel %vm1910_vm7, %v4011_v32, -inf }
 0xff4   : > { %4163 = vmax.xlane.f32.xlu1 %v4162_v56  ;;  %5470 = vmatpush3.bf16.msra.mxu1 %v6502_v21 }
 0xff5   : > { %5471 = vmatprep.subr.bf16.mxu1 %v5705_v1  ;;  %5473 = vmatprep.mubr.msk.bf16.mxu1 %vm5706_vm0, %v5705_v1 }
 0xff8   : > { %5472 = vmatpush3.bf16.msra.mxu1 %v6507_v58 }
 0xff9   : > { %5477 = vmatprep.subr.bf16.mxu1 %v5705_v1 }
0x1060   : > { %v3749_v33 = vpop.f32.mrf.mxu1 }
0x1061   : > { %v3756_v35 = vadd.f32 %v3749_v33, %v6456_v61 }
0x1062   : > { %v5432_v41 = vpop.f32.mrf.mxu1 }
0x1063   : > { %v3765_v39 = vadd.f32 %v6527_v37, %v3756_v35 }
0x1064   : > { %v3752_v42 = vpop.f32.mrf.mxu1 }
0x1065   : > { %v3757_v43 = vadd.f32 %v3752_v42, %v6458_v63  ;;  %v3767_v38 = vmax.f32 %v3765_v39, 0.0 }
0x1066   : > { %v5433_v44 = vpop.f32.mrf.mxu1 }
0x1067   : > { %v3766_v45 = vadd.f32 %v6527_v37, %v3757_v43 }
0x1069   : > { %v3768_v6 = vmax.f32 %v3766_v45, 0.0 }
0x106b   : > { %v3769_v50 = vpack.c.bf16 %v3768_v6, %v3767_v38 }
0x106d   : > { %5439 = vmatmul.mubr.msk.bf16.vlgmr.msra.gmra.mxu0 %vm1460_vm6, %v3769_v50 }
0x106e   : > { %5446 = vmatprep.mubr.msk.bf16.mxu0 %vm5706_vm0, %v5705_v1  ;;  %5443 = vmatpush3.bf16.msra.mxu0 %v6540_v52 }
0x106f   : > { %5444 = vmatprep.subr.bf16.mxu0 %v5705_v1 }
0x1072   : > { %5445 = vmatpush3.bf16.msra.mxu0 %v6545_v57 }
0x1073   : > { %5457 = vmatprep.subr.bf16.mxu0 %v5705_v1 }
0x1079   : > { %v4161_v34 = vpop.xlane.xlu1 %4160 }
0x107a   : > { %vm4165_vm12 = vcmp.ge.f32.partialorder %v4010_v22, %v4161_v34 }
0x107b   : > { %v4167_v46 = vsel %vm4165_vm12, %v6080_v16, 16.0 }
0x107c   : > { %v4169_v47 = vsel %vm1910_vm7, %v4167_v46, inf }
0x107d   : > { %4170 = vmin.xlane.f32.xlu1 %v4169_v47  ;;  %v4164_v48 = vpop.xlane.xlu1 %4163 }
0x107e   : > { %vm4166_vm13 = vcmp.ge.f32.partialorder %v4011_v32, %v4164_v48 }
0x107f   : > { %v4168_v40 = vsel %vm4166_vm13, %v6080_v16, 16.0 }
0x1080   : > { %v4172_v49 = vsel %vm1910_vm7, %v4168_v40, inf }
0x1081   : > { %4173 = vmin.xlane.f32.xlu1 %v4172_v49 }
0x10b3   : > { %v5456_v14 = vpop.f32.mrf.mxu1 }
0x10b4   : > { %v4013_v19 = vsub.f32 %v5456_v14, %v6354_v51  ;;  %v6646_v14 = vld [vmem:[%s5885_s30] ss:$0 sm:$0xff] }
0x10b5   : > { %v4001_v15 = vpop.f32.mrf.mxu1 }
0x10b6   : > { %v4012_v18 = vsub.f32 %v4001_v15, %v6350_v29 }
0x10b8   : > { %v4014_v20 = vpack.c.bf16 %v4013_v19, %v4012_v18 }
0x1106   : > { %v4171_v60 = vpop.xlane.xlu1 %4170 }
0x1107   : > { %vm4175_vm14 = vcmp.eq.f32.partialorder %v6080_v16, %v4171_v60 }
0x1108   : > { %v4262_v62 = vsel %vm4175_vm14, -1e+30, %v4010_v22  ;;  %v4908_v12 = vsel %vm4175_vm14, 1.0, %v5705_v1 }
0x1109   : > { %v4411_v54 = vsel %vm1910_vm7, %v4262_v62, -inf }
0x110a   : > { %4412 = vmax.xlane.f32.xlu0 %v4411_v54  ;;  %v4174_v25 = vpop.xlane.xlu1 %4173 }
0x110b   : > { %vm4176_vm15 = vcmp.eq.f32.partialorder %v6080_v16, %v4174_v25 }
0x110c   : > { %v4263_v27 = vsel %vm4176_vm15, -1e+30, %v4011_v32  ;;  %v4909_v3 = vsel %vm4176_vm15, 1.0, %v5705_v1 }
0x110d   : > { %v4414_v9 = vsel %vm1910_vm7, %v4263_v27, -inf }
0x110e   : > { %4415 = vmax.xlane.f32.xlu1 %v4414_v9 }
0x112d   : > { %v3830_v0 = vpop.f32.mrf.mxu0 }
0x112e   : > { %v3831_v7 = vadd.f32 %v6558_v26, %v3830_v0 }
0x112f   : > { %v5440_v5 = vpop.f32.mrf.mxu0 }
0x1130   : > { %v3837_v36 = vmax.f32 %v3831_v7, 0.0 }
0x1131   : > { %v3833_v55 = vpop.f32.mrf.mxu0 }
0x1132   : > { %v3834_v4 = vadd.f32 %v6558_v26, %v3833_v55 }
0x1133   : > { %v5441_v13 = vpop.f32.mrf.mxu0 }
0x1134   : > { %v3838_v2 = vmax.f32 %v3834_v4, 0.0 }
0x1136   : > { %v3839_v10 = vpack.c.bf16 %v3838_v2, %v3837_v36 }
0x1138   : > { %5447 = vmatmul.mubr.msk.bf16.vlgmr.msra.gmra.mxu0 %vm1460_vm6, %v3839_v10 }
0x1139   : > { %5458 = vmatpush3.bf16.msra.mxu0 %v6465_v17  ;;  %5465 = vmatprep.mubr.msk.bf16.mxu0 %vm5706_vm0, %v5705_v1 }
0x113a   : > { %5459 = vmatprep.subr.bf16.mxu0 %v5705_v1 }
0x113d   : > { %5460 = vmatpush3.bf16.msra.mxu0 %v6473_v28 }
0x113e   : > { %5461 = vmatprep.subr.bf16.mxu0 %v5705_v1 }
0x1141   : > { %5462 = vmatpush3.bf16.msra.mxu0 %v6480_v8 }
0x1142   : > { %5463 = vmatprep.subr.bf16.mxu0 %v5705_v1 }
0x1145   : > { %5464 = vmatpush3.bf16.msra.mxu0 %v6485_v11 }
0x1146   : > { %5485 = vmatprep.subr.mxu0 %v6354_v51 }
0x1148   : > { %5466 = vmatmul.mubr.msk.bf16.vlgmr.msra.gmra.mxu0 %vm1137_vm3, %v4014_v20 }
0x1149   : > { %5486 = vmatpush3.msra.mxu0 %v6354_v51  ;;  %5489 = vmatprep.mubr.msk.f32.mxu0 %vm1910_vm7, %v4908_v12 }
0x114a   : > { %5487 = vmatprep.subr.mxu0 %v6350_v29 }
0x114b   : > { %5488 = vmatpush3.msra.mxu0 %v6350_v29 }
0x114c   : > { %5504 = vmatprep.subr.bf16.mxu0 %v5705_v1 }
0x1150   : > { %5490 = vmatmul.mubr.msk.f32.vlgmr.msra.gmra.mxu0 %vm1910_vm7, %v4909_v3 }
0x1151   : > { %5505 = vmatpush3.bf16.msra.mxu0 %v6502_v21  ;;  %5508 = vmatprep.mubr.msk.bf16.mxu0 %vm5706_vm0, %v5705_v1 }
0x1152   : > { %5506 = vmatprep.subr.bf16.mxu0 %v5705_v1 }
0x1155   : > { %5507 = vmatpush3.bf16.msra.mxu0 %v6507_v58 }
0x1156   : > { %5512 = vmatprep.subr.bf16.mxu0 %v5705_v1 }
0x1193   : > { %v4413_v24 = vpop.xlane.xlu0 %4412 }
0x1194   : > { %vm4417_vm1 = vcmp.ge.f32.partialorder %v4262_v62, %v4413_v24 }
0x1195   : > { %v4419_v22 = vsel %vm4417_vm1, %v6080_v16, 16.0 }
0x1196   : > { %v4421_v30 = vsel %vm1910_vm7, %v4419_v22, inf }
0x1197   : > { %4422 = vmin.xlane.f32.xlu1 %v4421_v30  ;;  %v4416_v31 = vpop.xlane.xlu1 %4415 }
0x1198   : > { %vm4418_vm2 = vcmp.ge.f32.partialorder %v4263_v27, %v4416_v31 }
0x1199   : > { %v4420_v23 = vsel %vm4418_vm2, %v6080_v16, 16.0 }
0x119a   : > { %v4424_v32 = vsel %vm1910_vm7, %v4420_v23, inf }
0x119b   : > { %4425 = vmin.xlane.f32.xlu1 %v4424_v32 }
0x11f8   : > { %v6598_v56 = vpop.f32.mrf.mxu0 }
0x11f9   : > { %v3901_v15 = vadd.f32 %v6646_v14, %v6598_v56 }
0x11fa   : > { %v5448_v33 = vpop.f32.mrf.mxu0 }
0x11fc   : > { %v6600_v35 = vpop.f32.mrf.mxu0 }
0x11fd   : > { %v3904_v12 = vadd.f32 %v6646_v14, %v6600_v35 }
0x11fe   : > { %v5449_v41 = vpop.f32.mrf.mxu0 }
0x1208   : > { %v4052_v42 = vpop.f32.mrf.mxu0 }
0x1209   : > { %v4059_v39 = vadd.f32 %v4052_v42, %v6456_v61 }
0x120a   : > { %v5467_v43 = vpop.f32.mrf.mxu0 }
0x120b   : > { %v4061_v45 = vadd.f32 %v6527_v37, %v4059_v39 }
0x120c   : > { %v4055_v44 = vpop.f32.mrf.mxu0 }
0x120d   : > { %v4060_v38 = vadd.f32 %v4055_v44, %v6458_v63  ;;  %v4063_v34 = vmax.f32 %v4061_v45, 0.0 }
0x120e   : > { %v5468_v6 = vpop.f32.mrf.mxu0 }
0x120f   : > { %v4062_v50 = vadd.f32 %v6527_v37, %v4060_v38 }
0x1210   : > { %v5491_v0 = vpop.f32.mrf.mxu0 }
0x1211   : > { %v4064_v46 = vmax.f32 %v4062_v50, 0.0  ;;  %v4265_v4 = vsub.f32 %v5491_v0, %v6354_v51 }
0x1212   : > { %v4253_v5 = vpop.f32.mrf.mxu0 }
0x1213   : > { %v4065_v47 = vpack.c.bf16 %v4064_v46, %v4063_v34  ;;  %v4264_v7 = vsub.f32 %v4253_v5, %v6350_v29 }
0x1215   : > { %5474 = vmatmul.mubr.msk.bf16.vlgmr.msra.gmra.mxu1 %vm1460_vm6, %v4065_v47  ;;  %v4266_v13 = vpack.c.bf16 %v4265_v4, %v4264_v7 }
0x1216   : > { %5478 = vmatpush3.bf16.msra.mxu1 %v6540_v52  ;;  %5481 = vmatprep.mubr.msk.bf16.mxu1 %vm5706_vm0, %v5705_v1 }
0x1217   : > { %5479 = vmatprep.subr.bf16.mxu1 %v5705_v1 }
0x121a   : > { %5480 = vmatpush3.bf16.msra.mxu1 %v6545_v57 }
0x121b   : > { %5492 = vmatprep.subr.bf16.mxu1 %v5705_v1 }
0x1220   : > { %v4423_v55 = vpop.xlane.xlu1 %4422 }
0x1221   : > { %vm4427_vm4 = vcmp.eq.f32.partialorder %v6080_v16, %v4423_v55 }
0x1222   : > { %v4915_v36 = vsel %vm4427_vm4, 1.0, %v5705_v1 }
0x1224   : > { %v4426_v2 = vpop.xlane.xlu1 %4425 }
0x1225   : > { %vm4428_vm5 = vcmp.eq.f32.partialorder %v6080_v16, %v4426_v2 }
0x1226   : > { %v4916_v10 = vsel %vm4428_vm5, 1.0, %v5705_v1 }
0x12d5   : > { %v4103_v48 = vpop.f32.mrf.mxu1 }
0x12d6   : > { %v4104_v49 = vadd.f32 %v6558_v26, %v4103_v48 }
0x12d7   : > { %v5475_v40 = vpop.f32.mrf.mxu1 }
0x12d8   : > { %v4110_v25 = vmax.f32 %v4104_v49, 0.0 }
0x12d9   : > { %v4106_v60 = vpop.f32.mrf.mxu1 }
0x12da   : > { %v4107_v62 = vadd.f32 %v6558_v26, %v4106_v60 }
0x12db   : > { %v5476_v54 = vpop.f32.mrf.mxu1 }
0x12dc   : > { %v4111_v27 = vmax.f32 %v4107_v62, 0.0 }
0x12de   : > { %v4112_v9 = vpack.c.bf16 %v4111_v27, %v4110_v25 }
0x12e0   : > { %5482 = vmatmul.mubr.msk.bf16.vlgmr.msra.gmra.mxu1 %vm1460_vm6, %v4112_v9 }
0x12e1   : > { %5493 = vmatpush3.bf16.msra.mxu1 %v6465_v17  ;;  %5500 = vmatprep.mubr.msk.bf16.mxu1 %vm5706_vm0, %v5705_v1 }
0x12e2   : > { %5494 = vmatprep.subr.bf16.mxu1 %v5705_v1 }
0x12e5   : > { %5495 = vmatpush3.bf16.msra.mxu1 %v6473_v28 }
0x12e6   : > { %5496 = vmatprep.subr.bf16.mxu1 %v5705_v1 }
0x12e9   : > { %5497 = vmatpush3.bf16.msra.mxu1 %v6480_v8 }
0x12ea   : > { %5498 = vmatprep.subr.bf16.mxu1 %v5705_v1 }
0x12ed   : > { %5499 = vmatpush3.bf16.msra.mxu1 %v6485_v11 }
0x12ee   : > { %5520 = vmatprep.subr.mxu1 %v6354_v51 }
0x12f0   : > { %5501 = vmatmul.mubr.msk.bf16.vlgmr.msra.gmra.mxu1 %vm1137_vm3, %v4266_v13 }
0x12f1   : > { %5521 = vmatpush3.msra.mxu1 %v6354_v51  ;;  %5524 = vmatprep.mubr.msk.f32.mxu1 %vm1910_vm7, %v4915_v36 }
0x12f2   : > { %5522 = vmatprep.subr.mxu1 %v6350_v29 }
0x12f3   : > { %5523 = vmatpush3.msra.mxu1 %v6350_v29 }
0x12f4   : > { %5539 = vmatprep.subr.bf16.mxu1 %v5705_v1 }
0x12f8   : > { %5525 = vmatmul.mubr.msk.f32.vlgmr.msra.gmra.mxu1 %vm1910_vm7, %v4916_v10 }
0x12f9   : > { %5540 = vmatpush3.bf16.msra.mxu1 %v6502_v21  ;;  %5543 = vmatprep.mubr.msk.bf16.mxu1 %vm5706_vm0, %v5705_v1 }
0x12fa   : > { %5541 = vmatprep.subr.bf16.mxu1 %v5705_v1 }
0x12fd   : > { %5542 = vmatpush3.bf16.msra.mxu1 %v6507_v58 }
0x12fe   : > { %5547 = vmatprep.subr.bf16.mxu1 %v5705_v1 }
0x13a0   : > { %v4150_v16 = vpop.f32.mrf.mxu1 }
0x13a1   : > { %v4151_v18 = vadd.f32 %v6646_v14, %v4150_v16 }
0x13a2   : > { %v5483_v19 = vpop.f32.mrf.mxu1 }
0x13a3   : > { %v4157_v20 = vmax.f32 %v3901_v15, %v4151_v18 }
0x13a4   : > { %v4153_v21 = vpop.f32.mrf.mxu1 }
0x13a5   : > { %v4154_v3 = vadd.f32 %v6646_v14, %v4153_v21 }
0x13a6   : > { %v5484_v24 = vpop.f32.mrf.mxu1 }
0x13a7   : > { %v4158_v58 = vmax.f32 %v3904_v12, %v4154_v3 }
0x13b0   : > { %v4304_v22 = vpop.f32.mrf.mxu1 }
0x13b1   : > { %v4311_v30 = vadd.f32 %v4304_v22, %v6456_v61 }
0x13b2   : > { %v5502_v31 = vpop.f32.mrf.mxu1 }
0x13b3   : > { %v4313_v32 = vadd.f32 %v6527_v37, %v4311_v30 }
0x13b4   : > { %v4307_v23 = vpop.f32.mrf.mxu1 }
0x13b5   : > { %v4312_v56 = vadd.f32 %v4307_v23, %v6458_v63  ;;  %v4315_v42 = vmax.f32 %v4313_v32, 0.0 }
0x13b6   : > { %v5503_v33 = vpop.f32.mrf.mxu1 }
0x13b7   : > { %v4314_v41 = vadd.f32 %v6527_v37, %v4312_v56 }
0x13b8   : > { %v5526_v48 = vpop.f32.mrf.mxu1 }
0x13b9   : > { %v4316_v39 = vmax.f32 %v4314_v41, 0.0  ;;  %v4515_v60 = vsub.f32 %v5526_v48, %v6354_v51 }
0x13ba   : > { %v4505_v40 = vpop.f32.mrf.mxu1 }
0x13bb   : > { %v4317_v43 = vpack.c.bf16 %v4316_v39, %v4315_v42  ;;  %v4514_v49 = vsub.f32 %v4505_v40, %v6350_v29 }
0x13bd   : > { %5509 = vmatmul.mubr.msk.bf16.vlgmr.msra.gmra.mxu0 %vm1460_vm6, %v4317_v43 }
0x13be   : > { %5513 = vmatpush3.bf16.msra.mxu0 %v6540_v52  ;;  %5516 = vmatprep.mubr.msk.bf16.mxu0 %vm5706_vm0, %v5705_v1 }
0x13bf   : > { %5514 = vmatprep.subr.bf16.mxu0 %v5705_v1 }
0x13c2   : > { %5515 = vmatpush3.bf16.msra.mxu0 %v6545_v57 }
0x13c3   : > { %5527 = vmatprep.subr.bf16.mxu0 %v5705_v1 }
0x147d   : > { %v4355_v35 = vpop.f32.mrf.mxu0 }
0x147e   : > { %v4356_v45 = vadd.f32 %v6558_v26, %v4355_v35  ;;  %v5661_v35 = vld [vmem:[%s5924_s26 + $0x8] sm:$0xff] }
0x147f   : > { %v5510_v44 = vpop.f32.mrf.mxu0 }
0x1480   : > { %v4362_v34 = vmax.f32 %v4356_v45, 0.0 }
0x1481   : > { %v4358_v38 = vpop.f32.mrf.mxu0 }
0x1482   : > { %v4359_v6 = vadd.f32 %v6558_v26, %v4358_v38 }
0x1483   : > { %v5511_v50 = vpop.f32.mrf.mxu0 }
0x1484   : > { %v4363_v46 = vmax.f32 %v4359_v6, 0.0 }
0x1486   : > { %v4364_v47 = vpack.c.bf16 %v4363_v46, %v4362_v34 }
0x1488   : > { %5517 = vmatmul.mubr.msk.bf16.vlgmr.msra.gmra.mxu0 %vm1460_vm6, %v4364_v47 }
0x1489   : > { %5528 = vmatpush3.bf16.msra.mxu0 %v6465_v17  ;;  %5535 = vmatprep.mubr.msk.bf16.mxu0 %vm5706_vm0, %v5705_v1  ;;  %v4516_v17 = vpack.c.bf16 %v4515_v60, %v4514_v49 }
0x148a   : > { %5529 = vmatprep.subr.bf16.mxu0 %v5705_v1 }
0x148d   : > { %5530 = vmatpush3.bf16.msra.mxu0 %v6473_v28 }
0x148e   : > { %5531 = vmatprep.subr.bf16.mxu0 %v5705_v1 }
0x1491   : > { %5532 = vmatpush3.bf16.msra.mxu0 %v6480_v8 }
0x1492   : > { %5533 = vmatprep.subr.bf16.mxu0 %v5705_v1 }
0x1495   : > { %5534 = vmatpush3.bf16.msra.mxu0 %v6485_v11 }
0x1498   : > { %5536 = vmatmul.mubr.msk.bf16.vlgmr.msra.gmra.mxu0 %vm1137_vm3, %v4516_v17 }
0x1548   : > { %v4402_v62 = vpop.f32.mrf.mxu0 }
0x1549   : > { %v4403_v54 = vadd.f32 %v6646_v14, %v4402_v62 }
0x154a   : > { %v5518_v28 = vpop.f32.mrf.mxu0 }
0x154b   : > { %v4409_v25 = vmax.f32 %v4157_v20, %v4403_v54 }
0x154c   : > { %v4405_v27 = vpop.f32.mrf.mxu0 }
0x154d   : > { %v4406_v9 = vadd.f32 %v6646_v14, %v4405_v27 }
0x154e   : > { %v5519_v8 = vpop.f32.mrf.mxu0 }
0x154f   : > { %v4410_v0 = vmax.f32 %v4158_v58, %v4406_v9 }
0x1558   : > { %v4554_v5 = vpop.f32.mrf.mxu0 }
0x1559   : > { %v4561_v7 = vadd.f32 %v4554_v5, %v6456_v61 }
0x155a   : > { %v5537_v55 = vpop.f32.mrf.mxu0 }
0x155b   : > { %v4563_v11 = vadd.f32 %v6527_v37, %v4561_v7 }
0x155c   : > { %v4557_v4 = vpop.f32.mrf.mxu0 }
0x155d   : > { %v4562_v13 = vadd.f32 %v4557_v4, %v6458_v63  ;;  %v4565_v10 = vmax.f32 %v4563_v11, 0.0 }
0x155e   : > { %v5538_v36 = vpop.f32.mrf.mxu0 }
0x155f   : > { %v4564_v2 = vadd.f32 %v6527_v37, %v4562_v13 }
0x1561   : > { %v4566_v16 = vmax.f32 %v4564_v2, 0.0 }
0x1563   : > { %v4567_v15 = vpack.c.bf16 %v4566_v16, %v4565_v10 }
0x1565   : > { %5544 = vmatmul.mubr.msk.bf16.vlgmr.msra.gmra.mxu1 %vm1460_vm6, %v4567_v15 }
0x1566   : > { %5548 = vmatpush3.bf16.msra.mxu1 %v6540_v52  ;;  %5551 = vmatprep.mubr.msk.bf16.mxu1 %vm5706_vm0, %v5705_v1  ;;  %v4870_v52 = vld [vmem:[%s6761_s1] ss:$0 sm:$0xff]  ;;  %s6762_s1 = sshll.u32 %s6764_s23, 4 }
0x1567   : > { %5549 = vmatprep.subr.bf16.mxu1 %v5705_v1  ;;  %v3362_v1 = vadd.f32 %v4870_v52, %v6452_v53  ;;  %s1070_s0 = scalar_lea.vmem %s5890_s20, %s6762_s1  ;;  %v5660_v53 = vld [vmem:[%s5924_s26] sm:$0xff] }
0x1569   : > { %v4661_v22 = vadd.f32 %v3362_v1, %v6350_v29 }
0x156a   : > { %5550 = vmatpush3.bf16.msra.mxu1 %v6545_v57 }
0x1625   : > { %v4605_v61 = vpop.f32.mrf.mxu1 }
0x1626   : > { %v4606_v18 = vadd.f32 %v6558_v26, %v4605_v61 }
0x1627   : > { %v5545_v63 = vpop.f32.mrf.mxu1 }
0x1628   : > { %v4612_v21 = vmax.f32 %v4606_v18, 0.0 }
0x1629   : > { %v4608_v37 = vpop.f32.mrf.mxu1 }
0x162a   : > { %v4609_v19 = vadd.f32 %v6558_v26, %v4608_v37  ;;  %v3365_v26 = vadd.f32 %v4870_v52, %v6454_v59 }
0x162b   : > { %v5546_v20 = vpop.f32.mrf.mxu1 }
0x162c   : > { %v4613_v12 = vmax.f32 %v4609_v19, 0.0  ;;  %v4662_v33 = vadd.f32 %v3365_v26, %v6354_v51 }
0x162e   : > { %v4614_v3 = vpack.c.bf16 %v4613_v12, %v4612_v21 }
0x1630   : > { %5552 = vmatmul.mubr.msk.bf16.vlgmr.msra.gmra.mxu1 %vm1460_vm6, %v4614_v3 }
0x16f0   : > { %v4652_v57 = vpop.f32.mrf.mxu1 }
0x16f1   : > { %v4653_v24 = vadd.f32 %v6646_v14, %v4652_v57 }
0x16f2   : > { %v5553_v58 = vpop.f32.mrf.mxu1 }
0x16f3   : > { %v4659_v30 = vmax.f32 %v4409_v25, %v4653_v24 }
0x16f4   : > { %v4655_v31 = vpop.f32.mrf.mxu1 }
0x16f5   : > { %v4663_v23 = vadd.f32 %v4661_v22, %v4659_v30  ;;  %v4656_v32 = vadd.f32 %v6646_v14, %v4655_v31 }
0x16f6   : > { %v5554_v56 = vpop.f32.mrf.mxu1 }
0x16f7   : > { %v4665_v41 = vmax.f32 %v4663_v23, 0.0  ;;  %v4660_v42 = vmax.f32 %v4410_v0, %v4656_v32 }
0x16f9   : > { %v4667_v39 = vadd.f32 %v5660_v53, %v4665_v41  ;;  %v4664_v43 = vadd.f32 %v4662_v33, %v4660_v42 }
0x16fb   : > { %4669 = vst.msk [vmem:[%s1070_s0] sm:$0xff] %vm1137_vm3, %v4667_v39  ;;  %v4666_v29 = vmax.f32 %v4664_v43, 0.0 }
0x16fd   : > { %v4668_v59 = vadd.f32 %v5661_v35, %v4666_v29 }
0x16ff   : > { %4670 = vst.msk [vmem:[%s1070_s0 + $0x8] sm:$0xff] %vm1137_vm3, %v4668_v59 }
0x1700 PF: > { %s81_s22 = sadd.s32 1, %s5668_s22  }
0x1701   : > { %p78_p4 = scmp.ge.s32.totalorder %s81_s22, 4  }
0x1703   :  { %80 = sbr.rel (!%p78_p4) target bundleno = 59 (0x3b), region = 225 }

// kernel: shot_query_graph_stream_apply.3
= control target key start
LH: loop header
LB: loop body
LE: loop exit
PB: predicated region body
PF: predicated region fallthrough
CT: control target
= control target key end

     0   :  { %s5922_s6 = smov 1   ;;  %s5923_s10 = smov 2   ;;  %s7047_s0 = inlined_call_operand.smem [shape: u32[39], index: -1, kind: input, shape index: {}] }
   0x1   :  { %s5973_s5 = sld [smem:[%s7047_s0]]   ;;  %s5924_s14 = smov 3  }
   0x2   :  { %s5978_s9 = sld [smem:[%s7047_s0 + %s5922_s6]]   ;;  %s5925_s18 = smov 4  }
   0x3   :  { %s5983_s13 = sld [smem:[%s7047_s0 + %s5923_s10]]   ;;  %s5926_s22 = smov 5  }
   0x4   :  { %s5988_s17 = sld [smem:[%s7047_s0 + %s5924_s14]]   ;;  %s5927_s26 = smov 6  }
   0x5   :  { %s5993_s21 = sld [smem:[%s7047_s0 + %s5925_s18]]   ;;  %s5928_s30 = smov 7  }
   0x6   :  { %s5998_s25 = sld [smem:[%s7047_s0 + %s5926_s22]]   ;;  %s5929_s4 = smov 8  }
   0x7   :  { %7073 = sst [smem:[#allocation5_spill]] %s5973_s5  ;;  %s5930_s10 = smov 9  }
   0x8   :  { %7074 = sst [smem:[#allocation6_spill]] %s5978_s9  ;;  %s5931_s15 = smov 10  }
   0x9   :  { %s6003_s29 = sld [smem:[%s7047_s0 + %s5927_s26]]   ;;  %s5932_s20 = smov 11  }
   0xa   :  { %s6008_s3 = sld [smem:[%s7047_s0 + %s5928_s30]]   ;;  %s5933_s26 = smov 12  }
   0xb   :  { %s6013_s8 = sld [smem:[%s7047_s0 + %s5929_s4]]   ;;  %s5934_s1 = smov 13  }
   0xc   :  { %s6018_s14 = sld [smem:[%s7047_s0 + %s5930_s10]]   ;;  %s5935_s7 = smov 14  }
   0xd   :  { %s6023_s19 = sld [smem:[%s7047_s0 + %s5931_s15]]   ;;  %s5936_s15 = smov 15  }
   0xe   :  { %s6028_s24 = sld [smem:[%s7047_s0 + %s5932_s20]]   ;;  %s5937_s22 = smov 16  }
   0xf   :  { %s6033_s30 = sld [smem:[%s7047_s0 + %s5933_s26]]   ;;  %s5938_s28 = smov 17  }
  0x10   :  { %7075 = sst [smem:[#allocation7_spill]] %s6008_s3 }
  0x11   :  { %7076 = sst [smem:[#allocation8_spill]] %s6013_s8 }
  0x12   :  { %s6038_s6 = sld [smem:[%s7047_s0 + %s5934_s1]]  }
  0x13   :  { %s6043_s12 = sld [smem:[%s7047_s0 + %s5935_s7]]   ;;  %s5939_s7 = smov 18  }
  0x14   :  { %s6048_s20 = sld [smem:[%s7047_s0 + %s5936_s15]]   ;;  %s5940_s15 = smov 19  }
  0x15   :  { %s6053_s27 = sld [smem:[%s7047_s0 + %s5937_s22]]   ;;  %s5941_s22 = smov 20  }
  0x16   :  { %s6058_s4 = sld [smem:[%s7047_s0 + %s5938_s28]]   ;;  %s5942_s28 = smov 21  }
  0x18   :  { %7077 = sst [smem:[#allocation9_spill]] %s6038_s6 }
  0x19   :  { %7078 = sst [smem:[#allocation10_spill]] %s6043_s12 }
  0x1a   :  { %7079 = sst [smem:[#allocation11_spill]] %s6048_s20 }
  0x1b   :  { %7080 = sst [smem:[#allocation12_spill]] %s6053_s27 }
  0x1c   :  { %7081 = sst [smem:[#allocation13_spill]] %s6058_s4 }
  0x1d   :  { %s6063_s6 = sld [smem:[%s7047_s0 + %s5939_s7]]   ;;  %s5943_s7 = smov 22  }
  0x1e   :  { %s6068_s20 = sld [smem:[%s7047_s0 + %s5940_s15]]   ;;  %s5944_s15 = smov 23  }
  0x1f   :  { %s6073_s27 = sld [smem:[%s7047_s0 + %s5941_s22]]   ;;  %s5945_s22 = smov 24  }
  0x20   :  { %s6078_s4 = sld [smem:[%s7047_s0 + %s5942_s28]]   ;;  %s5946_s28 = smov 25  }
  0x23   :  { %7082 = sst [smem:[#allocation14_spill]] %s6063_s6 }
  0x24   :  { %7083 = sst [smem:[#allocation15_spill]] %s6068_s20 }
  0x25   :  { %7084 = sst [smem:[#allocation16_spill]] %s6073_s27 }
  0x26   :  { %7085 = sst [smem:[#allocation17_spill]] %s6078_s4 }
  0x27   :  { %s6083_s6 = sld [smem:[%s7047_s0 + %s5943_s7]]   ;;  %s5947_s7 = smov 26  }
  0x28   :  { %s6088_s20 = sld [smem:[%s7047_s0 + %s5944_s15]]   ;;  %s5948_s15 = smov 27  }
  0x29   :  { %s6093_s27 = sld [smem:[%s7047_s0 + %s5945_s22]]   ;;  %s5949_s22 = smov 28  }
  0x2a   :  { %s6098_s4 = sld [smem:[%s7047_s0 + %s5946_s28]]   ;;  %s5950_s28 = smov 29  }
  0x2d   :  { %7086 = sst [smem:[#allocation18_spill]] %s6083_s6 }
  0x2e   :  { %7087 = sst [smem:[#allocation19_spill]] %s6088_s20 }
  0x2f   :  { %7088 = sst [smem:[#allocation20_spill]] %s6093_s27 }
  0x30   :  { %7089 = sst [smem:[#allocation21_spill]] %s6098_s4 }
  0x31   :  { %s6103_s6 = sld [smem:[%s7047_s0 + %s5947_s7]]   ;;  %s5951_s7 = smov 30  }
  0x32   :  { %s6108_s20 = sld [smem:[%s7047_s0 + %s5948_s15]]   ;;  %s5952_s15 = smov 31  }
  0x33   :  { %s6113_s27 = sld [smem:[%s7047_s0 + %s5949_s22]]   ;;  %s5953_s22 = smov 32  }
  0x34   :  { %s6118_s4 = sld [smem:[%s7047_s0 + %s5950_s28]]   ;;  %s5954_s28 = smov 33  }
  0x37   :  { %7090 = sst [smem:[#allocation22_spill]] %s6103_s6 }
  0x38   :  { %7091 = sst [smem:[#allocation23_spill]] %s6108_s20 }
  0x39   :  { %7092 = sst [smem:[#allocation24_spill]] %s6113_s27 }
  0x3a   :  { %7093 = sst [smem:[#allocation25_spill]] %s6118_s4 }
  0x3b   :  { %s6123_s6 = sld [smem:[%s7047_s0 + %s5951_s7]]   ;;  %s5955_s7 = smov 34  }
  0x3c   :  { %s6128_s20 = sld [smem:[%s7047_s0 + %s5952_s15]]   ;;  %s5956_s15 = smov 35  }
  0x3d   :  { %s6133_s27 = sld [smem:[%s7047_s0 + %s5953_s22]]   ;;  %s5957_s22 = smov 36  }
  0x3e   :  { %s6138_s4 = sld [smem:[%s7047_s0 + %s5954_s28]]   ;;  %s5958_s28 = smov 37  }
  0x41   :  { %7094 = sst [smem:[#allocation26_spill]] %s6123_s6 }
  0x42   :  { %7095 = sst [smem:[#allocation27_spill]] %s6128_s20 }
  0x43   :  { %7096 = sst [smem:[#allocation28_spill]] %s6133_s27 }
  0x44   :  { %7097 = sst [smem:[#allocation29_spill]] %s6138_s4 }
  0x45   :  { %s6143_s6 = sld [smem:[%s7047_s0 + %s5955_s7]]   ;;  %s5959_s7 = smov 38  }
  0x46   :  { %s6148_s20 = sld [smem:[%s7047_s0 + %s5956_s15]]  }
  0x47   :  { %s6153_s27 = sld [smem:[%s7047_s0 + %s5957_s22]]  }
  0x48   :  { %s6158_s4 = sld [smem:[%s7047_s0 + %s5958_s28]]  }
  0x4b   :  { %7098 = sst [smem:[#allocation30_spill]] %s6143_s6 }
  0x4c   :  { %s6163_s6 = sld [smem:[%s7047_s0 + %s5959_s7]]  }
  0x4e   :  { %7099 = sst [smem:[#allocation31_spill]] %s6158_s4 }
  0x4f   :  { %82 = vsyncpa [#allocation3], 0 }
  0x50   :  { %84 = vsyncpa [#allocation3 + $0x1], 0  ;;  %s6165_s15 = smov 0   ;;  %s6167_s16 = smov 0  }
  0x51   :  { %s6169_s18 = smov 0   ;;  %s6171_s22 = smov 0  }
  0x52 LB: > { %s7100_s12 = sld [smem:[#allocation10_spill]]  ;;  %s6186_s0 = sadd.s32 4294967295, %s5920_s22   ;;  %s5912_s16 = sphi %s6167_s16, %s7130_s16   ;;  %s5908_s15 = sphi %s6165_s15, %s7129_s15   ;;  %s5920_s22 = sphi %s6171_s22, %s7132_s22   ;;  %s5916_s18 = sphi %s6169_s18, %s7131_s18  }
  0x53   : > { %s7101_s8 = sld [smem:[#allocation8_spill]]  ;;  %s4936_s23 = sadd.s32 4294967294, %s5920_s22  }
  0x54   : > { %s6190_s26 = sadd.s32 1, %s5920_s22   ;;  %s905_s28 = sadd.s32 1, %s5916_s18 }
  0x55   : > { %s902_s1 = ssub.s32 %s5920_s22, %s6190_s26  ;;  %p915_p0 = scmp.ne.s32.totalorder %s5916_s18, %s5912_s16 }
  0x56   : > { %p903_p1 = scmp.eq.s32.totalorder %s902_s1, 0  ;;  %p916_p2 = scmp.eq.s32.totalorder %s6186_s0, 1 }
  0x57   : > { %p921_p3 = scmp.ne.s32.totalorder %s5912_s16, %s5908_s15  ;;  %p922_p4 = scmp.eq.s32.totalorder %s4936_s23, 1 }
  0x58   : > { %s6201_s2 = scalar_select %p903_p1, %s5916_s18, %s905_s28  }
  0x59   : > { %p6203_p5 = por %p916_p2, %p915_p0  ;;  %p6207_p6 = por %p922_p4, %p921_p3 }
  0x5a   : > { %p4939_p7 = scmp.ge.s32.totalorder %s5920_s22, 1  ;;  %p1063_p8 = scmp.lt.s32.totalorder %s5920_s22, 3 }
  0x5c   : > { %p1064_p9 = pnand %p4939_p7, %p1063_p8 }
  0x5d   : > { %s7104_s5 = sld [smem:[#allocation5_spill]] (!%p1064_p9)  ;;  %p1161_p10 = scmp.lt.s32.totalorder (!%p1064_p9), %s6186_s0, 1 }
  0x5e   : > { %1067 = sbr.rel (%p1064_p9) target bundleno = 5927 (0x1727), region = 172  ;;  %s7105_s9 = sld [smem:[#allocation6_spill]] (!%p1064_p9) }
  0x5f   : > { %s7106_s3 = sld [smem:[#allocation7_spill]] (!%p1064_p9) }
  0x60   : > { %s7127_s4 = sld [smem:[#allocation31_spill]] (!%p1064_p9) }
  0x63   : > { %v5796_v0 = vld [vmem:[%s5988_s17 + $0x18] sm:$0xff]   ;;  %v5960_v1 = vmov 0.0   ;;  %v1174_v3 = vlaneseq  ;;  %v5798_v4 = vld [vmem:[%s5988_s17 + $0x10] sm:$0xff]   ;;  %vm5961_vm0 = vmmov 0   ;;  %s6227_s11 = scalar_select %p1161_p10, %s6186_s0, 1  ;;  %v5800_v7 = vld [vmem:[%s5988_s17 + $0x8] sm:$0xff]  }
  0x64   : > { %5285 = vmatprep.subr.bf16.mxu0 %v5960_v1  ;;  %5297 = vmatprep.subr.bf16.mxu1 %v5960_v1  ;;  %v5797_v2 = vld [vmem:[%s5983_s13 + $0x18] sm:$0xff]   ;;  %v5799_v5 = vld [vmem:[%s5983_s13 + $0x10] sm:$0xff]   ;;  %v5801_v8 = vld [vmem:[%s5983_s13 + $0x8] sm:$0xff]   ;;  %vm1237_vm3 = vcmask 523264   ;;  %vm1464_vm5 = vcmask 261120   ;;  %vm2085_vm7 = vcmask 64512  }
  0x65   : > { %5286 = vmatpush3.bf16.msra.mxu0 %v5796_v0  ;;  %5293 = vmatprep.mubr.msk.bf16.mxu0 %vm5961_vm0, %v5960_v1  ;;  %v6230_v6 = vshrl.u32 %v1174_v3, 7  ;;  %s5103_s23 = sshll.u32 %s6227_s11, 4  ;;  %v5802_v11 = vld [vmem:[%s5988_s17] sm:$0xff]   ;;  %s4943_s1 = sshll.u32 %s6227_s11, 3  ;;  %v5804_v22 = vld [vmem:[%s5993_s21 + $0x18] sm:$0xff]   ;;  %v5806_v24 = vld [vmem:[%s6003_s29 + $0x8] sm:$0xff]  }
  0x66   : > { %5298 = vmatpush3.bf16.msra.mxu1 %v5797_v2  ;;  %5287 = vmatprep.subr.bf16.mxu0 %v5960_v1  ;;  %s6237_s28 = scalar_lea.vmem %s7104_s5, %s5103_s23  ;;  %v5803_v14 = vld [vmem:[%s5983_s13] sm:$0xff]   ;;  %s1169_s11 = scalar_lea.vmem %s7105_s9, %s4943_s1  ;;  %v5805_v25 = vld [vmem:[%s5993_s21 + $0x10] sm:$0xff]   ;;  %v5807_v30 = vld [vmem:[%s5993_s21 + $0x8] sm:$0xff]  }
  0x67   : > { %5299 = vmatprep.subr.bf16.mxu1 %v5960_v1  ;;  %5305 = vmatprep.mubr.msk.bf16.mxu1 %vm5961_vm0, %v5960_v1  ;;  %v1171_v9 = vld [vmem:[%s6237_s28] sm:$0xff]  ;;  %v1172_v10 = vld [vmem:[%s6237_s28 + $0x8] sm:$0xff]  ;;  %vm1181_vm1 = vcmp.lt.s32.totalorder %v6230_v6, 1  ;;  %vm1177_vm2 = vcmp.eq.s32.totalorder %v6230_v6, 0  ;;  %v6258_v23 = vadd.s32 8, %v6230_v6  ;;  %vm1190_vm4 = vcmp.lt.s32.totalorder %v6230_v6, 7 }
  0x68   : > { %v1179_v12 = vrot.slane %v1171_v9, 7  ;;  %v1180_v13 = vrot.slane %v1172_v10, 7  ;;  %v1188_v15 = vrot.slane %v1171_v9, 1  ;;  %v1189_v16 = vrot.slane %v1172_v10, 1  ;;  %v5808_v27 = vld [vmem:[%s6003_s29] sm:$0xff]   ;;  %v5810_v35 = vld [vmem:[%s7101_s8 + $0x18] sm:$0xff]  }
  0x69   : > { %5288 = vmatpush3.bf16.msra.mxu0 %v5798_v4  ;;  %v1204_v19 = vpack.c.bf16 %v1172_v10, %v1171_v9  ;;  %vm1187_vm6 = vcmp.eq.s32.totalorder %v6258_v23, 15  ;;  %v1173_v28 = vld [vmem:[%s1169_s11] sm:$0xff]  ;;  %v5811_v36 = vld [vmem:[%s7101_s8 + $0x10] sm:$0xff]   ;;  %v5812_v37 = vld [vmem:[%s7101_s8 + $0x8] sm:$0xff]   ;;  %s7107_s23 = sld [smem:[#allocation9_spill]] }
  0x6a   : > { %5300 = vmatpush3.bf16.msra.mxu1 %v5799_v5  ;;  %5289 = vmatprep.subr.bf16.mxu0 %v5960_v1  ;;  %v1182_v17 = vsel %vm1181_vm1, %v1179_v12, %v1180_v13  ;;  %v1183_v18 = vsel %vm1181_vm1, %v1180_v13, %v1179_v12  ;;  %v1192_v26 = vsel %vm1190_vm4, %v1189_v16, %v1188_v15  ;;  %v5809_v32 = vld [vmem:[%s5993_s21] sm:$0xff]   ;;  %v5814_v13 = vld [vmem:[%s6033_s30 + $0x8] sm:$0xff]   ;;  %s7108_s1 = sld [smem:[#allocation12_spill]] }
  0x6b   : > { %5301 = vmatprep.subr.bf16.mxu1 %v5960_v1  ;;  %v1184_v20 = vsel %vm1177_vm2, 0.0, %v1183_v18  ;;  %v1194_v29 = vsel %vm1187_vm6, 0.0, %v1192_v26  ;;  %v1440_v31 = vpack.c.bf16 %v1173_v28, %v1173_v28  ;;  %v1191_v33 = vsel %vm1190_vm4, %v1188_v15, %v1189_v16  ;;  %v5813_v38 = vld [vmem:[%s7101_s8] sm:$0xff]   ;;  %v5816_v15 = vld [vmem:[%s6028_s24 + $0x8] sm:$0xff]   ;;  %s7109_s11 = sld [smem:[#allocation15_spill]] }
  0x6c   : > { %v1195_v21 = vpack.c.bf16 %v1182_v17, %v1184_v20  ;;  %v1350_v34 = vpack.c.bf16 %v1194_v29, %v1191_v33  ;;  %v4960_v47 = vld [vmem:[%s7106_s3] ss:$0 sm:$0xff]  ;;  %v5818_v29 = vld [vmem:[%s6023_s19 + $0x8] sm:$0xff]   ;;  %s7113_s3 = sld [smem:[#allocation16_spill]] }
  0x6d   : > { %5290 = vmatpush3.bf16.msra.mxu0 %v5800_v7  ;;  %v4959_v57 = vld [vmem:[%s5998_s25] ss:$0 sm:$0xff]  ;;  %s7117_s5 = sld [smem:[#allocation23_spill]] }
  0x6e   : > { %5302 = vmatpush3.bf16.msra.mxu1 %v5801_v8  ;;  %5291 = vmatprep.subr.bf16.mxu0 %v5960_v1  ;;  %v5817_v16 = vld [vmem:[%s6028_s24] sm:$0xff]   ;;  %s7120_s8 = sld [smem:[#allocation21_spill]] }
  0x6f   : > { %5303 = vmatprep.subr.bf16.mxu1 %v5960_v1  ;;  %v4964_v18 = vld [vmem:[%s6018_s14] ss:$0 sm:$0xff] }
  0x71   : > { %5292 = vmatpush3.bf16.msra.mxu0 %v5802_v11 }
  0x72   : > { %5304 = vmatpush3.bf16.msra.mxu1 %v5803_v14  ;;  %5309 = vmatprep.subr.bf16.mxu0 %v5960_v1  ;;  %v5815_v14 = vld [vmem:[%s6033_s30] sm:$0xff]  }
  0x73   : > { %5321 = vmatprep.subr.bf16.mxu1 %v5960_v1 }
  0x74   : > { %5294 = vmatmul.mubr.msk.bf16.vlgmr.msra.gmra.mxu0 %vm1237_vm3, %v1204_v19 }
  0x75   : > { %5306 = vmatmul.mubr.msk.bf16.vlgmr.msra.gmra.mxu1 %vm1237_vm3, %v1195_v21  ;;  %5310 = vmatpush3.bf16.msra.mxu0 %v5804_v22 }
  0x76   : > { %5311 = vmatprep.subr.bf16.mxu0 %v5960_v1  ;;  %5322 = vmatpush3.bf16.msra.mxu1 %v5806_v24 }
  0x77   : > { %5323 = vmatprep.subr.bf16.mxu1 %v5960_v1  ;;  %5325 = vmatprep.mubr.msk.bf16.mxu1 %vm5961_vm0, %v5960_v1 }
  0x78   : > { %5317 = vmatprep.mubr.msk.bf16.mxu0 %vm5961_vm0, %v5960_v1 }
  0x79   : > { %5312 = vmatpush3.bf16.msra.mxu0 %v5805_v25 }
  0x7a   : > { %5313 = vmatprep.subr.bf16.mxu0 %v5960_v1  ;;  %5324 = vmatpush3.bf16.msra.mxu1 %v5808_v27 }
  0x7b   : > { %5329 = vmatprep.subr.bf16.mxu1 %v5960_v1 }
  0x7d   : > { %5314 = vmatpush3.bf16.msra.mxu0 %v5807_v30  ;;  %5326 = vmatmul.mubr.msk.bf16.vlgmr.msra.gmra.mxu1 %vm1464_vm5, %v1440_v31 }
  0x7e   : > { %5315 = vmatprep.subr.bf16.mxu0 %v5960_v1  ;;  %5337 = vmatprep.mubr.msk.bf16.mxu1 %vm5961_vm0, %v5960_v1 }
  0x7f   : > { %5330 = vmatpush3.bf16.msra.mxu1 %v5810_v35 }
  0x80   : > { %5331 = vmatprep.subr.bf16.mxu1 %v5960_v1 }
  0x81   : > { %5316 = vmatpush3.bf16.msra.mxu0 %v5809_v32 }
  0x82   : > { %5341 = vmatprep.subr.bf16.mxu0 %v5960_v1 }
  0x83   : > { %5332 = vmatpush3.bf16.msra.mxu1 %v5811_v36 }
  0x84   : > { %5318 = vmatmul.mubr.msk.bf16.vlgmr.msra.gmra.mxu0 %vm1237_vm3, %v1350_v34  ;;  %5333 = vmatprep.subr.bf16.mxu1 %v5960_v1 }
  0x85   : > { %5345 = vmatprep.mubr.msk.bf16.mxu0 %vm5961_vm0, %v5960_v1  ;;  %5342 = vmatpush3.bf16.msra.mxu0 %v5816_v15 }
  0x86   : > { %5343 = vmatprep.subr.bf16.mxu0 %v5960_v1 }
  0x87   : > { %5334 = vmatpush3.bf16.msra.mxu1 %v5812_v37 }
  0x88   : > { %5335 = vmatprep.subr.bf16.mxu1 %v5960_v1 }
  0x89   : > { %5344 = vmatpush3.bf16.msra.mxu0 %v5817_v16 }
  0x8a   : > { %5349 = vmatprep.subr.bf16.mxu0 %v5960_v1 }
  0x8b   : > { %5336 = vmatpush3.bf16.msra.mxu1 %v5813_v38  ;;  %v5819_v38 = vld [vmem:[%s6023_s19] sm:$0xff]  }
  0x8c   : > { %5357 = vmatprep.subr.bf16.mxu1 %v5960_v1 }
 0x134   : > { %v1275_v39 = vpop.f32.mrf.mxu0 }
 0x135   : > { %v1343_v40 = vpop.f32.mrf.mxu1 }
 0x136   : > { %v5295_v41 = vpop.f32.mrf.mxu0  ;;  %v1344_v54 = vadd.f32 %v1343_v40, %v1275_v39 }
 0x137   : > { %v5307_v42 = vpop.f32.mrf.mxu1 }
 0x138   : > { %v1278_v43 = vpop.f32.mrf.mxu0 }
 0x139   : > { %v1346_v44 = vpop.f32.mrf.mxu1 }
 0x13a   : > { %v5296_v45 = vpop.f32.mrf.mxu0  ;;  %v1347_v61 = vadd.f32 %v1346_v44, %v1278_v43  ;;  %v5820_v43 = vld [vmem:[%s7100_s12 + $0x8] sm:$0xff]   ;;  %v5821_v44 = vld [vmem:[%s7100_s12] sm:$0xff]  }
 0x13b   : > { %v5308_v46 = vpop.f32.mrf.mxu1 }
 0x13d   : > { %v1502_v48 = vpop.f32.mrf.mxu1 }
 0x13e   : > { %v1503_v49 = vadd.f32 %v4960_v47, %v1502_v48 }
 0x13f   : > { %v5327_v50 = vpop.f32.mrf.mxu1 }
 0x140   : > { %v6302_v51 = vmax.f32 %v1503_v49, 0.0 }
 0x141   : > { %v1505_v52 = vpop.f32.mrf.mxu1 }
 0x142   : > { %v1963_v53 = vmul.f32 %v6302_v51, %v6302_v51 }
 0x143   : > { %v5328_v55 = vpop.f32.mrf.mxu1 }
 0x144   : > { %v1420_v56 = vpop.f32.mrf.mxu0  ;;  %v1964_v58 = vsel %vm1237_vm3, %v1963_v53, 0.0 }
 0x145   : > { %v1427_v59 = vadd.f32 %v1420_v56, %v1344_v54  ;;  %1965 = vadd.xlane.f32.xlu0 %v1964_v58 }
 0x146   : > { %v5319_v60 = vpop.f32.mrf.mxu0 }
 0x147   : > { %v1436_v62 = vadd.f32 %v4959_v57, %v1427_v59  ;;  %v4979_v59 = vld [vmem:[%s7107_s23] ss:$0 sm:$0xff]  ;;  %s7110_s23 = sld [smem:[#allocation13_spill]] }
 0x148   : > { %v1423_v63 = vpop.f32.mrf.mxu0 }
 0x149   : > { %v6308_v0 = vmax.f32 %v1436_v62, 0.0  ;;  %v1428_v2 = vadd.f32 %v1423_v63, %v1347_v61 }
 0x14a   : > { %v5320_v4 = vpop.f32.mrf.mxu0 }
 0x14b   : > { %v1437_v5 = vadd.f32 %v4959_v57, %v1428_v2  ;;  %v1955_v7 = vmul.f32 %v6308_v0, %v6308_v0  ;;  %v2005_v2 = vsub.s32 0, %v6230_v6 }
 0x14d   : > { %v6312_v8 = vmax.f32 %v1437_v5, 0.0  ;;  %v1957_v9 = vsel %vm1237_vm3, %v1955_v7, 0.0 }
 0x14e   : > { %1958 = vadd.xlane.f32.xlu0 %v1957_v9 }
 0x14f   : > { %v6317_v10 = vpack.c.bf16 %v6312_v8, %v6308_v0  ;;  %v1956_v11 = vmul.f32 %v6312_v8, %v6312_v8 }
 0x151   : > { %5338 = vmatmul.mubr.msk.bf16.vlgmr.msra.gmra.mxu1 %vm1237_vm3, %v6317_v10  ;;  %v1960_v12 = vsel %vm1237_vm3, %v1956_v11, 0.0 }
 0x152   : > { %1961 = vadd.xlane.f32.xlu1 %v1960_v12  ;;  %5361 = vmatprep.mubr.msk.bf16.mxu1 %vm5961_vm0, %v5960_v1 }
 0x153   : > { %5358 = vmatpush3.bf16.msra.mxu1 %v5814_v13 }
 0x154   : > { %5359 = vmatprep.subr.bf16.mxu1 %v5960_v1 }
 0x157   : > { %5360 = vmatpush3.bf16.msra.mxu1 %v5815_v14 }
 0x158   : > { %5373 = vmatprep.subr.msk.mxu1 %vm1237_vm3, %v6302_v51 }
 0x1ce   : > { %v1966_v17 = vpop.xlane.xlu0 %1965 }
 0x1cf   : > { %1971 = vxpose.xlu1.b32.start.end [1/1] (short) (narrow) %v1966_v17, 8 }
 0x1d7   : > { %v1959_v13 = vpop.xlane.xlu0 %1958 }
 0x1db   : > { %v1962_v54 = vpop.xlane.xlu1 %1961 }
 0x211   : > { %v1586_v19 = vpop.f32.mrf.mxu1 }
 0x212   : > { %v1587_v20 = vadd.f32 %v4964_v18, %v1586_v19 }
 0x213   : > { %v5339_v21 = vpop.f32.mrf.mxu1 }
 0x214   : > { %v1593_v22 = vmax.f32 %v1587_v20, 0.0  ;;  %v5822_v21 = vld [vmem:[%s7108_s1 + $0x18] sm:$0xff]  }
 0x215   : > { %v1589_v24 = vpop.f32.mrf.mxu1 }
 0x216   : > { %v1590_v25 = vadd.f32 %v4964_v18, %v1589_v24  ;;  %v1595_v28 = vrot.slane %v1593_v22, 7  ;;  %v1601_v30 = vrot.slane %v1593_v22, 1 }
 0x217   : > { %v5340_v26 = vpop.f32.mrf.mxu1 }
 0x218   : > { %v1594_v27 = vmax.f32 %v1590_v25, 0.0  ;;  %v5823_v26 = vld [vmem:[%s7108_s1 + $0x10] sm:$0xff]  }
 0x21a   : > { %v1596_v31 = vrot.slane %v1594_v27, 7  ;;  %v1602_v32 = vrot.slane %v1594_v27, 1  ;;  %v1612_v33 = vpack.c.bf16 %v1594_v27, %v1593_v22 }
 0x21c   : > { %v1598_v34 = vsel %vm1181_vm1, %v1596_v31, %v1595_v28  ;;  %v1603_v35 = vsel %vm1190_vm4, %v1601_v30, %v1602_v32  ;;  %v1604_v36 = vsel %vm1190_vm4, %v1602_v32, %v1601_v30  ;;  %5346 = vmatmul.mubr.msk.bf16.vlgmr.msra.gmra.mxu0 %vm1464_vm5, %v1612_v33  ;;  %v1597_v40 = vsel %vm1181_vm1, %v1595_v28, %v1596_v31  ;;  %v5824_v28 = vld [vmem:[%s7108_s1 + $0x8] sm:$0xff]   ;;  %v6398_v31 = vld [vmem:[%s7109_s11] sm:$0xff]  }
 0x21d   : > { %v1606_v37 = vsel %vm1187_vm6, 0.0, %v1604_v36  ;;  %5350 = vmatpush3.bf16.msra.mxu0 %v5818_v29  ;;  %5353 = vmatprep.mubr.msk.bf16.mxu0 %vm5961_vm0, %v5960_v1  ;;  %v1599_v41 = vsel %vm1177_vm2, 0.0, %v1598_v34  ;;  %v5825_v29 = vld [vmem:[%s7108_s1] sm:$0xff]   ;;  %v6391_v30 = vld [vmem:[%s7109_s11 + $0x8] sm:$0xff]   ;;  %v2083_v32 = vand.u32 127, %v1174_v3  ;;  %s7111_s1 = sld [smem:[#allocation14_spill]] }
 0x21e   : > { %v1729_v39 = vpack.c.bf16 %v1606_v37, %v1603_v35  ;;  %5351 = vmatprep.subr.bf16.mxu0 %v5960_v1  ;;  %v1607_v42 = vpack.c.bf16 %v1597_v40, %v1599_v41 }
 0x21f   : > { %v6406_v33 = vcvt.s32.f32 %v2083_v32 }
 0x220   : > { %5362 = vmatmul.mubr.msk.bf16.vlgmr.msra.gmra.mxu1 %vm1464_vm5, %v1729_v39 }
 0x221   : > { %5374 = vmatpush3.xpose.msk.msra.mxu1 %vm1237_vm3, %v6302_v51  ;;  %5352 = vmatpush3.bf16.msra.mxu0 %v5819_v38 }
 0x222   : > { %5375 = vmatprep.mubr.msk.f32.mxu1 %vm1237_vm3, %v6308_v0  ;;  %5390 = vmatprep.subr.mxu1 %v6302_v51 }
 0x223   : > { %5365 = vmatprep.subr.bf16.mxu0 %v5960_v1 }
 0x224   : > { %5354 = vmatmul.mubr.msk.bf16.vlgmr.msra.gmra.mxu0 %vm1464_vm5, %v1607_v42 }
 0x225   : > { %5369 = vmatprep.mubr.msk.bf16.mxu0 %vm5961_vm0, %v5960_v1  ;;  %5366 = vmatpush3.bf16.msra.mxu0 %v5820_v43 }
 0x226   : > { %5367 = vmatprep.subr.bf16.mxu0 %v5960_v1 }
 0x228   : > { %5376 = vmatmul.mubr.msk.f32.vlgmr.msra.gmra.mxu1 %vm1237_vm3, %v6312_v8 }
 0x229   : > { %5391 = vmatpush3.msra.mxu1 %v6302_v51  ;;  %5368 = vmatpush3.bf16.msra.mxu0 %v5821_v44 }
 0x22a   : > { %5395 = vmatprep.subr.bf16.mxu1 %v5960_v1  ;;  %5378 = vmatprep.subr.bf16.mxu0 %v5960_v1 }
 0x24b   : > { %v1987_v4 = vpop.trf.xlu1 }
 0x24c   : > { %v6374_v16 = vrot.slane %v1987_v4, %v2005_v2 }
 0x2dc   : > { %v1666_v45 = vpop.f32.mrf.mxu0 }
 0x2de   : > { %v5347_v46 = vpop.f32.mrf.mxu0 }
 0x2e0   : > { %v1669_v47 = vpop.f32.mrf.mxu0  ;;  %v1783_v48 = vpop.f32.mrf.mxu1 }
 0x2e2   : > { %v5348_v49 = vpop.f32.mrf.mxu0  ;;  %v5363_v50 = vpop.f32.mrf.mxu1 }
 0x2e4   : > { %v1722_v52 = vpop.f32.mrf.mxu0  ;;  %v1786_v53 = vpop.f32.mrf.mxu1 }
 0x2e5   : > { %v1723_v55 = vadd.f32 %v1722_v52, %v1666_v45 }
 0x2e6   : > { %v5355_v56 = vpop.f32.mrf.mxu0  ;;  %v5364_v57 = vpop.f32.mrf.mxu1 }
 0x2e7   : > { %v1790_v58 = vadd.f32 %v1783_v48, %v1723_v55  ;;  %v6431_v55 = vld [vmem:[%s7110_s23 + $0x18] sm:$0xff]   ;;  %v6435_v56 = vld [vmem:[%s7110_s23 + $0x10] sm:$0xff]   ;;  %v6441_v57 = vld [vmem:[%s7110_s23 + $0x8] sm:$0xff]  }
 0x2e8   : > { %v1725_v60 = vpop.f32.mrf.mxu0  ;;  %v5377_v61 = vpop.f32.mrf.mxu1 }
 0x2e9   : > { %v1726_v62 = vadd.f32 %v1725_v60, %v1669_v47  ;;  %v1968_v63 = vmul.f32 2.0, %v5377_v61  ;;  %v1799_v9 = vadd.f32 %v4979_v59, %v1790_v58  ;;  %v6446_v58 = vld [vmem:[%s7110_s23] sm:$0xff]  }
 0x2ea   : > { %v5356_v5 = vpop.f32.mrf.mxu0  ;;  %v1946_v7 = vpop.f32.mrf.mxu1 }
 0x2eb   : > { %v1791_v11 = vadd.f32 %v1786_v53, %v1726_v62  ;;  %v1967_v12 = vmul.f32 2.0, %v1946_v7  ;;  %v1970_v15 = vsub.f32 %v1968_v63, %v1962_v54  ;;  %v1801_v18 = vmax.f32 %v1799_v9, 0.0 }
 0x2ed   : > { %v1800_v14 = vadd.f32 %v4979_v59, %v1791_v11  ;;  %v1969_v17 = vsub.f32 %v1967_v12, %v1959_v13  ;;  %v2008_v25 = vsub.f32 %v1970_v15, %v6374_v16 }
 0x2ef   : > { %v1802_v19 = vmax.f32 %v1800_v14, 0.0  ;;  %v2007_v20 = vsub.f32 %v1969_v17, %v6374_v16  ;;  %v2089_v27 = vsel %vm2085_vm7, %v2008_v25, -inf }
 0x2f1   : > { %v1803_v22 = vpack.c.bf16 %v1802_v19, %v1801_v18  ;;  %v2086_v24 = vsel %vm2085_vm7, %v2007_v20, -inf }
 0x2f2   : > { %2087 = vmax.xlane.f32.xlu0 %v2086_v24 }
 0x2f3   : > { %5370 = vmatmul.mubr.msk.bf16.vlgmr.msra.gmra.mxu0 %vm1464_vm5, %v1803_v22 }
 0x2f4   : > { %5379 = vmatpush3.bf16.msra.mxu0 %v5822_v21  ;;  %5386 = vmatprep.mubr.msk.bf16.mxu0 %vm5961_vm0, %v5960_v1  ;;  %v6469_v21 = vld [vmem:[%s7111_s1] ss:$0 sm:$0xff]  ;;  %s7112_s1 = sld [smem:[#allocation17_spill]] }
 0x2f5   : > { %5380 = vmatprep.subr.bf16.mxu0 %v5960_v1 }
 0x2f6   : > { %2090 = vmax.xlane.f32.xlu0 %v2089_v27 }
 0x2f8   : > { %5381 = vmatpush3.bf16.msra.mxu0 %v5823_v26 }
 0x2f9   : > { %5382 = vmatprep.subr.bf16.mxu0 %v5960_v1 }
 0x2fc   : > { %5383 = vmatpush3.bf16.msra.mxu0 %v5824_v28 }
 0x2fd   : > { %5384 = vmatprep.subr.bf16.mxu0 %v5960_v1 }
 0x300   : > { %5385 = vmatpush3.bf16.msra.mxu0 %v5825_v29 }
 0x301   : > { %5407 = vmatprep.subr.bf16.mxu0 %v5960_v1 }
 0x303   : > { %5387 = vmatmul.mubr.msk.bf16.vlgmr.msra.gmra.mxu0 %vm1237_vm3, %v6317_v10 }
 0x304   : > { %5408 = vmatpush3.bf16.msra.mxu0 %v6391_v30  ;;  %5411 = vmatprep.mubr.msk.bf16.mxu0 %vm5961_vm0, %v5960_v1 }
 0x305   : > { %5409 = vmatprep.subr.bf16.mxu0 %v5960_v1 }
 0x308   : > { %5410 = vmatpush3.bf16.msra.mxu0 %v6398_v31 }
 0x309   : > { %5423 = vmatprep.subr.mxu0 %v6302_v51 }
 0x37b   : > { %v2088_v34 = vpop.xlane.xlu0 %2087 }
 0x37c   : > { %vm2092_vm8 = vcmp.ge.f32.partialorder %v2007_v20, %v2088_v34 }
 0x37d   : > { %v2094_v10 = vsel %vm2092_vm8, %v6406_v33, 8.0 }
 0x37e   : > { %v2096_v35 = vsel %vm2085_vm7, %v2094_v10, inf }
 0x37f   : > { %2097 = vmin.xlane.f32.xlu0 %v2096_v35  ;;  %v2091_v36 = vpop.xlane.xlu0 %2090 }
 0x380   : > { %vm2093_vm9 = vcmp.ge.f32.partialorder %v2008_v25, %v2091_v36 }
 0x381   : > { %v2095_v37 = vsel %vm2093_vm9, %v6406_v33, 8.0 }
 0x382   : > { %v2099_v38 = vsel %vm2085_vm7, %v2095_v37, inf }
 0x383   : > { %2100 = vmin.xlane.f32.xlu0 %v2099_v38 }
 0x3b3   : > { %v6412_v39 = vpop.f32.mrf.mxu0 }
 0x3b5   : > { %v5371_v40 = vpop.f32.mrf.mxu0 }
 0x3b7   : > { %v6414_v3 = vpop.f32.mrf.mxu0 }
 0x3b9   : > { %v5372_v41 = vpop.f32.mrf.mxu0 }
 0x3c3   : > { %v6416_v42 = vpop.f32.mrf.mxu0 }
 0x3c5   : > { %v5388_v43 = vpop.f32.mrf.mxu0 }
 0x3c7   : > { %v6418_v44 = vpop.f32.mrf.mxu0 }
 0x3c9   : > { %v5389_v45 = vpop.f32.mrf.mxu0 }
 0x3ca   : > { %v6496_v45 = vld [vmem:[%s7112_s1 + $0x8] sm:$0xff]  }
 0x408   : > { %v2098_v46 = vpop.xlane.xlu0 %2097 }
 0x409   : > { %vm2102_vm10 = vcmp.eq.f32.partialorder %v6406_v33, %v2098_v46  ;;  %v6501_v46 = vld [vmem:[%s7112_s1] sm:$0xff]   ;;  %s7116_s1 = sld [smem:[#allocation11_spill]] }
 0x40a   : > { %v4992_v47 = vsel %vm2102_vm10, 1.0, %v5960_v1  ;;  %v2189_v48 = vsel %vm2102_vm10, -1e+30, %v2007_v20 }
 0x40b   : > { %5392 = vmatprep.mubr.msk.f32.mxu1 %vm2085_vm7, %v4992_v47  ;;  %v2421_v49 = vsel %vm2085_vm7, %v2189_v48, -inf }
 0x40c   : > { %2422 = vmax.xlane.f32.xlu0 %v2421_v49  ;;  %v2101_v50 = vpop.xlane.xlu0 %2100 }
 0x40d   : > { %vm2103_vm11 = vcmp.eq.f32.partialorder %v6406_v33, %v2101_v50 }
 0x40e   : > { %v4993_v52 = vsel %vm2103_vm11, 1.0, %v5960_v1  ;;  %v2190_v53 = vsel %vm2103_vm11, -1e+30, %v2008_v25 }
 0x40f   : > { %5393 = vmatmul.mubr.msk.f32.vlgmr.msra.gmra.mxu1 %vm2085_vm7, %v4993_v52  ;;  %v2424_v54 = vsel %vm2085_vm7, %v2190_v53, -inf }
 0x410   : > { %2425 = vmax.xlane.f32.xlu0 %v2424_v54  ;;  %5403 = vmatprep.mubr.msk.bf16.mxu1 %vm5961_vm0, %v5960_v1  ;;  %v6514_v54 = vld [vmem:[%s7113_s3] ss:$0 sm:$0xff]  ;;  %s7114_s3 = sld [smem:[#allocation18_spill]] }
 0x411   : > { %5396 = vmatpush3.bf16.msra.mxu1 %v6431_v55 }
 0x412   : > { %5397 = vmatprep.subr.bf16.mxu1 %v5960_v1 }
 0x415   : > { %5398 = vmatpush3.bf16.msra.mxu1 %v6435_v56 }
 0x416   : > { %5399 = vmatprep.subr.bf16.mxu1 %v5960_v1 }
 0x419   : > { %5400 = vmatpush3.bf16.msra.mxu1 %v6441_v57 }
 0x41a   : > { %5401 = vmatprep.subr.bf16.mxu1 %v5960_v1 }
 0x41d   : > { %5402 = vmatpush3.bf16.msra.mxu1 %v6446_v58 }
 0x41e   : > { %5415 = vmatprep.subr.bf16.mxu1 %v5960_v1 }
 0x495   : > { %v2423_v59 = vpop.xlane.xlu0 %2422 }
 0x496   : > { %vm2427_vm12 = vcmp.ge.f32.partialorder %v2189_v48, %v2423_v59 }
 0x497   : > { %v2429_v60 = vsel %vm2427_vm12, %v6406_v33, 8.0 }
 0x498   : > { %v2431_v61 = vsel %vm2085_vm7, %v2429_v60, inf }
 0x499   : > { %2432 = vmin.xlane.f32.xlu0 %v2431_v61  ;;  %v2426_v62 = vpop.xlane.xlu0 %2425 }
 0x49a   : > { %vm2428_vm13 = vcmp.ge.f32.partialorder %v2190_v53, %v2426_v62 }
 0x49b   : > { %v2430_v63 = vsel %vm2428_vm13, %v6406_v33, 8.0 }
 0x49c   : > { %v2434_v2 = vsel %vm2085_vm7, %v2430_v63, inf }
 0x49d   : > { %2435 = vmin.xlane.f32.xlu0 %v2434_v2 }
 0x4cf   : > { %v5394_v4 = vpop.f32.mrf.mxu1 }
 0x4d0   : > { %v2192_v7 = vsub.f32 %v5394_v4, %v6312_v8 }
 0x4d1   : > { %v2180_v5 = vpop.f32.mrf.mxu1 }
 0x4d2   : > { %v2191_v9 = vsub.f32 %v2180_v5, %v6308_v0 }
 0x4d4   : > { %v2193_v11 = vpack.c.bf16 %v2192_v7, %v2191_v9 }
 0x4d6   : > { %5404 = vmatmul.mubr.msk.bf16.vlgmr.msra.gmra.mxu1 %vm1237_vm3, %v2193_v11 }
 0x4d7   : > { %5419 = vmatprep.mubr.msk.bf16.mxu1 %vm5961_vm0, %v5960_v1  ;;  %5416 = vmatpush3.bf16.msra.mxu1 %v6496_v45 }
 0x4d8   : > { %5417 = vmatprep.subr.bf16.mxu1 %v5960_v1 }
 0x4db   : > { %5418 = vmatpush3.bf16.msra.mxu1 %v6501_v46 }
 0x4dc   : > { %5428 = vmatprep.subr.bf16.mxu1 %v5960_v1 }
 0x522   : > { %v2433_v12 = vpop.xlane.xlu0 %2432 }
 0x523   : > { %vm2437_vm14 = vcmp.eq.f32.partialorder %v6406_v33, %v2433_v12 }
 0x524   : > { %v2524_v13 = vsel %vm2437_vm14, -1e+30, %v2189_v48  ;;  %v5010_v10 = vsel %vm2437_vm14, 1.0, %v5960_v1 }
 0x525   : > { %v2673_v14 = vsel %vm2085_vm7, %v2524_v13, -inf }
 0x526   : > { %2674 = vmax.xlane.f32.xlu0 %v2673_v14  ;;  %v2436_v15 = vpop.xlane.xlu0 %2435 }
 0x527   : > { %vm2438_vm15 = vcmp.eq.f32.partialorder %v6406_v33, %v2436_v15 }
 0x528   : > { %v2525_v17 = vsel %vm2438_vm15, -1e+30, %v2190_v53  ;;  %v5011_v35 = vsel %vm2438_vm15, 1.0, %v5960_v1 }
 0x529   : > { %v2676_v18 = vsel %vm2085_vm7, %v2525_v17, -inf }
 0x52a   : > { %2677 = vmax.xlane.f32.xlu0 %v2676_v18 }
 0x596   : > { %v2263_v19 = vpop.f32.mrf.mxu1 }
 0x597   : > { %v2270_v20 = vadd.f32 %v2263_v19, %v6416_v42 }
 0x598   : > { %v5405_v22 = vpop.f32.mrf.mxu1 }
 0x599   : > { %v2279_v25 = vadd.f32 %v6469_v21, %v2270_v20 }
 0x59a   : > { %v2266_v24 = vpop.f32.mrf.mxu1 }
 0x59b   : > { %v2271_v26 = vadd.f32 %v2266_v24, %v6418_v44  ;;  %v2281_v29 = vmax.f32 %v2279_v25, 0.0 }
 0x59c   : > { %v5406_v27 = vpop.f32.mrf.mxu1 }
 0x59d   : > { %v2280_v28 = vadd.f32 %v6469_v21, %v2271_v26 }
 0x59f   : > { %v2282_v32 = vmax.f32 %v2280_v28, 0.0 }
 0x5a1   : > { %v2283_v34 = vpack.c.bf16 %v2282_v32, %v2281_v29 }
 0x5a3   : > { %5412 = vmatmul.mubr.msk.bf16.vlgmr.msra.gmra.mxu0 %vm1464_vm5, %v2283_v34 }
 0x5a4   : > { %5424 = vmatpush3.msra.mxu0 %v6302_v51  ;;  %5425 = vmatprep.mubr.msk.f32.mxu0 %vm2085_vm7, %v5010_v10 }
 0x5a5   : > { %5440 = vmatprep.subr.bf16.mxu0 %v5960_v1 }
 0x5ab   : > { %5426 = vmatmul.mubr.msk.f32.vlgmr.msra.gmra.mxu0 %vm2085_vm7, %v5011_v35 }
 0x5ac   : > { %5441 = vmatpush3.bf16.msra.mxu0 %v6391_v30  ;;  %5444 = vmatprep.mubr.msk.bf16.mxu0 %vm5961_vm0, %v5960_v1 }
 0x5ad   : > { %5442 = vmatprep.subr.bf16.mxu0 %v5960_v1 }
 0x5af   : > { %v2675_v36 = vpop.xlane.xlu0 %2674 }
 0x5b0   : > { %vm2679_vm8 = vcmp.ge.f32.partialorder %v2524_v13, %v2675_v36  ;;  %5443 = vmatpush3.bf16.msra.mxu0 %v6398_v31 }
 0x5b1   : > { %v2681_v37 = vsel %vm2679_vm8, %v6406_v33, 8.0  ;;  %5448 = vmatprep.subr.bf16.mxu0 %v5960_v1 }
 0x5b2   : > { %v2683_v38 = vsel %vm2085_vm7, %v2681_v37, inf }
 0x5b3   : > { %2684 = vmin.xlane.f32.xlu0 %v2683_v38  ;;  %v2678_v40 = vpop.xlane.xlu0 %2677 }
 0x5b4   : > { %vm2680_vm9 = vcmp.ge.f32.partialorder %v2525_v17, %v2678_v40 }
 0x5b5   : > { %v2682_v41 = vsel %vm2680_vm9, %v6406_v33, 8.0 }
 0x5b6   : > { %v2686_v43 = vsel %vm2085_vm7, %v2682_v41, inf }
 0x5b7   : > { %2687 = vmin.xlane.f32.xlu0 %v2686_v43 }
 0x63c   : > { %v2685_v47 = vpop.xlane.xlu0 %2684 }
 0x63d   : > { %vm2689_vm10 = vcmp.eq.f32.partialorder %v6406_v33, %v2685_v47 }
 0x63e   : > { %v2776_v48 = vsel %vm2689_vm10, -1e+30, %v2524_v13  ;;  %v5017_v15 = vsel %vm2689_vm10, 1.0, %v5960_v1 }
 0x63f   : > { %v2925_v49 = vsel %vm2085_vm7, %v2776_v48, -inf }
 0x640   : > { %2926 = vmax.xlane.f32.xlu1 %v2925_v49  ;;  %v2688_v50 = vpop.xlane.xlu0 %2687 }
 0x641   : > { %vm2690_vm11 = vcmp.eq.f32.partialorder %v6406_v33, %v2688_v50 }
 0x642   : > { %v2777_v52 = vsel %vm2690_vm11, -1e+30, %v2525_v17  ;;  %v5018_v17 = vsel %vm2690_vm11, 1.0, %v5960_v1 }
 0x643   : > { %v2928_v53 = vsel %vm2085_vm7, %v2777_v52, -inf }
 0x644   : > { %2929 = vmax.xlane.f32.xlu0 %v2928_v53 }
 0x663   : > { %v2344_v59 = vpop.f32.mrf.mxu0 }
 0x664   : > { %v2345_v61 = vadd.f32 %v6514_v54, %v2344_v59 }
 0x665   : > { %v5413_v60 = vpop.f32.mrf.mxu0 }
 0x666   : > { %v2351_v4 = vmax.f32 %v2345_v61, 0.0 }
 0x667   : > { %v2347_v62 = vpop.f32.mrf.mxu0 }
 0x668   : > { %v2348_v63 = vadd.f32 %v6514_v54, %v2347_v62 }
 0x669   : > { %v5414_v2 = vpop.f32.mrf.mxu0 }
 0x66a   : > { %v2352_v5 = vmax.f32 %v2348_v63, 0.0 }
 0x66b   : > { %v5427_v9 = vpop.f32.mrf.mxu0 }
 0x66c   : > { %v2353_v7 = vpack.c.bf16 %v2352_v5, %v2351_v4  ;;  %v2527_v13 = vsub.f32 %v5427_v9, %v6312_v8 }
 0x66d   : > { %v2515_v11 = vpop.f32.mrf.mxu0 }
 0x66e   : > { %5420 = vmatmul.mubr.msk.bf16.vlgmr.msra.gmra.mxu1 %vm1464_vm5, %v2353_v7  ;;  %v2526_v12 = vsub.f32 %v2515_v11, %v6308_v0 }
 0x66f   : > { %5429 = vmatpush3.bf16.msra.mxu1 %v6431_v55  ;;  %5436 = vmatprep.mubr.msk.bf16.mxu1 %vm5961_vm0, %v5960_v1 }
 0x670   : > { %5430 = vmatprep.subr.bf16.mxu1 %v5960_v1  ;;  %v2528_v14 = vpack.c.bf16 %v2527_v13, %v2526_v12 }
 0x673   : > { %5431 = vmatpush3.bf16.msra.mxu1 %v6435_v56 }
 0x674   : > { %5432 = vmatprep.subr.bf16.mxu1 %v5960_v1 }
 0x677   : > { %5433 = vmatpush3.bf16.msra.mxu1 %v6441_v57 }
 0x678   : > { %5434 = vmatprep.subr.bf16.mxu1 %v5960_v1 }
 0x67b   : > { %5435 = vmatpush3.bf16.msra.mxu1 %v6446_v58 }
 0x67c   : > { %5456 = vmatprep.subr.mxu1 %v6302_v51 }
 0x67e   : > { %5437 = vmatmul.mubr.msk.bf16.vlgmr.msra.gmra.mxu1 %vm1237_vm3, %v2528_v14  ;;  %v6598_v14 = vld [vmem:[%s7114_s3] ss:$0 sm:$0xff]  ;;  %s7115_s3 = sld [smem:[#allocation19_spill]] }
 0x67f   : > { %5457 = vmatpush3.msra.mxu1 %v6302_v51  ;;  %5458 = vmatprep.mubr.msk.f32.mxu1 %vm2085_vm7, %v5017_v15 }
 0x680   : > { %5473 = vmatprep.subr.bf16.mxu1 %v5960_v1 }
 0x686   : > { %5459 = vmatmul.mubr.msk.f32.vlgmr.msra.gmra.mxu1 %vm2085_vm7, %v5018_v17 }
 0x687   : > { %5474 = vmatpush3.bf16.msra.mxu1 %v6391_v30  ;;  %5477 = vmatprep.mubr.msk.bf16.mxu1 %vm5961_vm0, %v5960_v1 }
 0x688   : > { %5475 = vmatprep.subr.bf16.mxu1 %v5960_v1 }
 0x68b   : > { %5476 = vmatpush3.bf16.msra.mxu1 %v6398_v31 }
 0x68c   : > { %5481 = vmatprep.subr.bf16.mxu1 %v5960_v1 }
 0x6c9   : > { %v2927_v18 = vpop.xlane.xlu1 %2926 }
 0x6ca   : > { %vm2931_vm12 = vcmp.ge.f32.partialorder %v2776_v48, %v2927_v18 }
 0x6cb   : > { %v2933_v19 = vsel %vm2931_vm12, %v6406_v33, 8.0 }
 0x6cc   : > { %v2935_v20 = vsel %vm2085_vm7, %v2933_v19, inf }
 0x6cd   : > { %2936 = vmin.xlane.f32.xlu0 %v2935_v20  ;;  %v2930_v22 = vpop.xlane.xlu0 %2929 }
 0x6ce   : > { %vm2932_vm13 = vcmp.ge.f32.partialorder %v2777_v52, %v2930_v22 }
 0x6cf   : > { %v2934_v24 = vsel %vm2932_vm13, %v6406_v33, 8.0 }
 0x6d0   : > { %v2938_v25 = vsel %vm2085_vm7, %v2934_v24, inf }
 0x6d1   : > { %2939 = vmin.xlane.f32.xlu0 %v2938_v25 }
 0x72e   : > { %v6552_v26 = vpop.f32.mrf.mxu1 }
 0x72f   : > { %v2415_v17 = vadd.f32 %v6598_v14, %v6552_v26 }
 0x730   : > { %v5421_v27 = vpop.f32.mrf.mxu1 }
 0x732   : > { %v6554_v28 = vpop.f32.mrf.mxu1 }
 0x733   : > { %v2418_v22 = vadd.f32 %v6598_v14, %v6554_v28 }
 0x734   : > { %v5422_v29 = vpop.f32.mrf.mxu1 }
 0x73e   : > { %v2566_v32 = vpop.f32.mrf.mxu1 }
 0x73f   : > { %v2573_v34 = vadd.f32 %v2566_v32, %v6416_v42 }
 0x740   : > { %v5438_v10 = vpop.f32.mrf.mxu1 }
 0x741   : > { %v2575_v36 = vadd.f32 %v6469_v21, %v2573_v34 }
 0x742   : > { %v2569_v35 = vpop.f32.mrf.mxu1 }
 0x743   : > { %v2574_v37 = vadd.f32 %v2569_v35, %v6418_v44  ;;  %v2577_v41 = vmax.f32 %v2575_v36, 0.0 }
 0x744   : > { %v5439_v38 = vpop.f32.mrf.mxu1 }
 0x745   : > { %v2576_v40 = vadd.f32 %v6469_v21, %v2574_v37 }
 0x746   : > { %v5460_v63 = vpop.f32.mrf.mxu1 }
 0x747   : > { %v2578_v43 = vmax.f32 %v2576_v40, 0.0  ;;  %v2779_v7 = vsub.f32 %v5460_v63, %v6312_v8 }
 0x748   : > { %v2767_v2 = vpop.f32.mrf.mxu1 }
 0x749   : > { %v2579_v47 = vpack.c.bf16 %v2578_v43, %v2577_v41  ;;  %v2778_v4 = vsub.f32 %v2767_v2, %v6308_v0 }
 0x74b   : > { %5445 = vmatmul.mubr.msk.bf16.vlgmr.msra.gmra.mxu0 %vm1464_vm5, %v2579_v47  ;;  %v2780_v9 = vpack.c.bf16 %v2779_v7, %v2778_v4 }
 0x74c   : > { %5449 = vmatpush3.bf16.msra.mxu0 %v6496_v45  ;;  %5452 = vmatprep.mubr.msk.bf16.mxu0 %vm5961_vm0, %v5960_v1 }
 0x74d   : > { %5450 = vmatprep.subr.bf16.mxu0 %v5960_v1 }
 0x750   : > { %5451 = vmatpush3.bf16.msra.mxu0 %v6501_v46 }
 0x751   : > { %5461 = vmatprep.subr.bf16.mxu0 %v5960_v1 }
 0x756   : > { %v2937_v5 = vpop.xlane.xlu0 %2936 }
 0x757   : > { %vm2941_vm14 = vcmp.eq.f32.partialorder %v6406_v33, %v2937_v5 }
 0x758   : > { %v5024_v11 = vsel %vm2941_vm14, 1.0, %v5960_v1 }
 0x75a   : > { %v2940_v12 = vpop.xlane.xlu0 %2939 }
 0x75b   : > { %vm2942_vm15 = vcmp.eq.f32.partialorder %v6406_v33, %v2940_v12 }
 0x75c   : > { %v5025_v13 = vsel %vm2942_vm15, 1.0, %v5960_v1 }
 0x80b   : > { %v2617_v48 = vpop.f32.mrf.mxu0 }
 0x80c   : > { %v2618_v50 = vadd.f32 %v6514_v54, %v2617_v48 }
 0x80d   : > { %v5446_v49 = vpop.f32.mrf.mxu0 }
 0x80e   : > { %v2624_v60 = vmax.f32 %v2618_v50, 0.0 }
 0x80f   : > { %v2620_v52 = vpop.f32.mrf.mxu0 }
 0x810   : > { %v2621_v53 = vadd.f32 %v6514_v54, %v2620_v52 }
 0x811   : > { %v5447_v59 = vpop.f32.mrf.mxu0 }
 0x812   : > { %v2625_v61 = vmax.f32 %v2621_v53, 0.0 }
 0x814   : > { %v2626_v62 = vpack.c.bf16 %v2625_v61, %v2624_v60 }
 0x816   : > { %5453 = vmatmul.mubr.msk.bf16.vlgmr.msra.gmra.mxu0 %vm1464_vm5, %v2626_v62 }
 0x817   : > { %5462 = vmatpush3.bf16.msra.mxu0 %v6431_v55  ;;  %5469 = vmatprep.mubr.msk.bf16.mxu0 %vm5961_vm0, %v5960_v1 }
 0x818   : > { %5463 = vmatprep.subr.bf16.mxu0 %v5960_v1 }
 0x81b   : > { %5464 = vmatpush3.bf16.msra.mxu0 %v6435_v56 }
 0x81c   : > { %5465 = vmatprep.subr.bf16.mxu0 %v5960_v1 }
 0x81f   : > { %5466 = vmatpush3.bf16.msra.mxu0 %v6441_v57 }
 0x820   : > { %5467 = vmatprep.subr.bf16.mxu0 %v5960_v1 }
 0x823   : > { %5468 = vmatpush3.bf16.msra.mxu0 %v6446_v58 }
 0x824   : > { %5489 = vmatprep.subr.mxu0 %v6302_v51 }
 0x826   : > { %5470 = vmatmul.mubr.msk.bf16.vlgmr.msra.gmra.mxu0 %vm1237_vm3, %v2780_v9 }
 0x827   : > { %5490 = vmatpush3.msra.mxu0 %v6302_v51  ;;  %5491 = vmatprep.mubr.msk.f32.mxu0 %vm2085_vm7, %v5024_v11 }
 0x828   : > { %5506 = vmatprep.subr.bf16.mxu0 %v5960_v1 }
 0x82e   : > { %5492 = vmatmul.mubr.msk.f32.vlgmr.msra.gmra.mxu0 %vm2085_vm7, %v5025_v13 }
 0x82f   : > { %5507 = vmatpush3.bf16.msra.mxu0 %v6391_v30  ;;  %5510 = vmatprep.mubr.msk.bf16.mxu0 %vm5961_vm0, %v5960_v1 }
 0x830   : > { %5508 = vmatprep.subr.bf16.mxu0 %v5960_v1 }
 0x833   : > { %5509 = vmatpush3.bf16.msra.mxu0 %v6398_v31 }
 0x834   : > { %5514 = vmatprep.subr.bf16.mxu0 %v5960_v1 }
 0x8d6   : > { %v2664_v15 = vpop.f32.mrf.mxu0 }
 0x8d7   : > { %v2665_v18 = vadd.f32 %v6598_v14, %v2664_v15 }
 0x8d8   : > { %v5454_v19 = vpop.f32.mrf.mxu0 }
 0x8d9   : > { %v2671_v20 = vmax.f32 %v2415_v17, %v2665_v18 }
 0x8da   : > { %v2667_v30 = vpop.f32.mrf.mxu0 }
 0x8db   : > { %v2668_v24 = vadd.f32 %v6598_v14, %v2667_v30 }
 0x8dc   : > { %v5455_v25 = vpop.f32.mrf.mxu0 }
 0x8dd   : > { %v2672_v31 = vmax.f32 %v2418_v22, %v2668_v24 }
 0x8e6   : > { %v2818_v27 = vpop.f32.mrf.mxu0 }
 0x8e7   : > { %v2825_v29 = vadd.f32 %v2818_v27, %v6416_v42 }
 0x8e8   : > { %v5471_v32 = vpop.f32.mrf.mxu0 }
 0x8e9   : > { %v2827_v10 = vadd.f32 %v6469_v21, %v2825_v29  ;;  %v5835_v32 = vld [vmem:[%s7115_s3 + $0x10] sm:$0xff]  }
 0x8ea   : > { %v2821_v34 = vpop.f32.mrf.mxu0 }
 0x8eb   : > { %v2826_v26 = vadd.f32 %v2821_v34, %v6418_v44  ;;  %v2829_v37 = vmax.f32 %v2827_v10, 0.0  ;;  %v5836_v34 = vld [vmem:[%s7115_s3 + $0x8] sm:$0xff]   ;;  %v5837_v10 = vld [vmem:[%s7115_s3] sm:$0xff]  }
 0x8ec   : > { %v5472_v35 = vpop.f32.mrf.mxu0 }
 0x8ed   : > { %v2828_v36 = vadd.f32 %v6469_v21, %v2826_v26 }
 0x8ee   : > { %v5493_v59 = vpop.f32.mrf.mxu0 }
 0x8ef   : > { %v2830_v38 = vmax.f32 %v2828_v36, 0.0  ;;  %v3029_v62 = vsub.f32 %v5493_v59, %v6312_v8  ;;  %v5838_v59 = vld [vmem:[%s7117_s5 + $0x8] sm:$0xff]  }
 0x8f0   : > { %v3019_v60 = vpop.f32.mrf.mxu0 }
 0x8f1   : > { %v2831_v40 = vpack.c.bf16 %v2830_v38, %v2829_v37  ;;  %v3028_v61 = vsub.f32 %v3019_v60, %v6308_v0 }
 0x8f3   : > { %5478 = vmatmul.mubr.msk.bf16.vlgmr.msra.gmra.mxu1 %vm1464_vm5, %v2831_v40 }
 0x8f4   : > { %5482 = vmatpush3.bf16.msra.mxu1 %v6496_v45  ;;  %5485 = vmatprep.mubr.msk.bf16.mxu1 %vm5961_vm0, %v5960_v1 }
 0x8f5   : > { %5483 = vmatprep.subr.bf16.mxu1 %v5960_v1 }
 0x8f8   : > { %5484 = vmatpush3.bf16.msra.mxu1 %v6501_v46 }
 0x8f9   : > { %5494 = vmatprep.subr.bf16.mxu1 %v5960_v1 }
 0x9b3   : > { %v2869_v28 = vpop.f32.mrf.mxu1 }
 0x9b4   : > { %v2870_v43 = vadd.f32 %v6514_v54, %v2869_v28 }
 0x9b5   : > { %v5479_v41 = vpop.f32.mrf.mxu1 }
 0x9b6   : > { %v2876_v50 = vmax.f32 %v2870_v43, 0.0 }
 0x9b7   : > { %v2872_v47 = vpop.f32.mrf.mxu1 }
 0x9b8   : > { %v2873_v48 = vadd.f32 %v6514_v54, %v2872_v47 }
 0x9b9   : > { %v5480_v49 = vpop.f32.mrf.mxu1 }
 0x9ba   : > { %v2877_v52 = vmax.f32 %v2873_v48, 0.0 }
 0x9bc   : > { %v2878_v53 = vpack.c.bf16 %v2877_v52, %v2876_v50 }
 0x9be   : > { %5486 = vmatmul.mubr.msk.bf16.vlgmr.msra.gmra.mxu1 %vm1464_vm5, %v2878_v53 }
 0x9bf   : > { %5495 = vmatpush3.bf16.msra.mxu1 %v6431_v55  ;;  %5502 = vmatprep.mubr.msk.bf16.mxu1 %vm5961_vm0, %v5960_v1  ;;  %v3030_v55 = vpack.c.bf16 %v3029_v62, %v3028_v61  ;;  %v5839_v61 = vld [vmem:[%s7117_s5] sm:$0xff]  }
 0x9c0   : > { %5496 = vmatprep.subr.bf16.mxu1 %v5960_v1 }
 0x9c3   : > { %5497 = vmatpush3.bf16.msra.mxu1 %v6435_v56 }
 0x9c4   : > { %5498 = vmatprep.subr.bf16.mxu1 %v5960_v1 }
 0x9c7   : > { %5499 = vmatpush3.bf16.msra.mxu1 %v6441_v57 }
 0x9c8   : > { %5500 = vmatprep.subr.bf16.mxu1 %v5960_v1 }
 0x9cb   : > { %5501 = vmatpush3.bf16.msra.mxu1 %v6446_v58 }
 0x9cc   : > { %5522 = vmatprep.subr.bf16.mxu1 %v5960_v1 }
 0x9ce   : > { %5503 = vmatmul.mubr.msk.bf16.vlgmr.msra.gmra.mxu1 %vm1237_vm3, %v3030_v55 }
 0x9cf   : > { %5530 = vmatprep.mubr.msk.bf16.mxu1 %vm5961_vm0, %v5960_v1 }
 0xa7e   : > { %v2916_v56 = vpop.f32.mrf.mxu1 }
 0xa7f   : > { %v2917_v63 = vadd.f32 %v6598_v14, %v2916_v56 }
 0xa80   : > { %v5487_v57 = vpop.f32.mrf.mxu1 }
 0xa81   : > { %v2923_v2 = vmax.f32 %v2671_v20, %v2917_v63 }
 0xa82   : > { %v2919_v4 = vpop.f32.mrf.mxu1 }
 0xa83   : > { %v2920_v5 = vadd.f32 %v6598_v14, %v2919_v4 }
 0xa84   : > { %v5488_v7 = vpop.f32.mrf.mxu1 }
 0xa85   : > { %v2924_v9 = vmax.f32 %v2672_v31, %v2920_v5 }
 0xa8e   : > { %v3068_v11 = vpop.f32.mrf.mxu1 }
 0xa8f   : > { %v3075_v58 = vadd.f32 %v3068_v11, %v6416_v42  ;;  %v5834_v42 = vld [vmem:[%s7115_s3 + $0x18] sm:$0xff]   ;;  %s7119_s3 = sld [smem:[#allocation20_spill]] }
 0xa90   : > { %v5504_v12 = vpop.f32.mrf.mxu1  ;;  %5523 = vmatpush3.bf16.msra.mxu1 %v5834_v42  ;;  %v5843_v42 = vld [vmem:[%s7120_s8] sm:$0xff]  }
 0xa91   : > { %v3077_v15 = vadd.f32 %v6469_v21, %v3075_v58  ;;  %5524 = vmatprep.subr.bf16.mxu1 %v5960_v1  ;;  %v5842_v12 = vld [vmem:[%s7120_s8 + $0x8] sm:$0xff]  }
 0xa92   : > { %v3071_v13 = vpop.f32.mrf.mxu1 }
 0xa93   : > { %v3076_v17 = vadd.f32 %v3071_v13, %v6418_v44  ;;  %v3079_v30 = vmax.f32 %v3077_v15, 0.0 }
 0xa94   : > { %v5505_v18 = vpop.f32.mrf.mxu1  ;;  %5525 = vmatpush3.bf16.msra.mxu1 %v5835_v32 }
 0xa95   : > { %v3078_v19 = vadd.f32 %v6469_v21, %v3076_v17  ;;  %5526 = vmatprep.subr.bf16.mxu1 %v5960_v1  ;;  %v5031_v56 = vld [vmem:[%s7119_s3] ss:$0 sm:$0xff]  ;;  %s7121_s3 = sld [smem:[#allocation25_spill]] }
 0xa97   : > { %v3080_v20 = vmax.f32 %v3078_v19, 0.0 }
 0xa98   : > { %5527 = vmatpush3.bf16.msra.mxu1 %v5836_v34 }
 0xa99   : > { %v3081_v22 = vpack.c.bf16 %v3080_v20, %v3079_v30  ;;  %5528 = vmatprep.subr.bf16.mxu1 %v5960_v1 }
 0xa9b   : > { %5511 = vmatmul.mubr.msk.bf16.vlgmr.msra.gmra.mxu0 %vm1464_vm5, %v3081_v22  ;;  %v5844_v6 = vld [vmem:[%s7121_s3 + $0x8] sm:$0xff]  }
 0xa9c   : > { %5515 = vmatpush3.bf16.msra.mxu0 %v6496_v45  ;;  %5518 = vmatprep.mubr.msk.bf16.mxu0 %vm5961_vm0, %v5960_v1 }
 0xa9d   : > { %5516 = vmatprep.subr.bf16.mxu0 %v5960_v1  ;;  %5529 = vmatpush3.bf16.msra.mxu1 %v5837_v10 }
 0xa9e   : > { %5550 = vmatprep.subr.bf16.mxu1 %v5960_v1 }
 0xaa0   : > { %5517 = vmatpush3.bf16.msra.mxu0 %v6501_v46 }
 0xaa1   : > { %5534 = vmatprep.subr.bf16.mxu0 %v5960_v1 }
 0xb5b   : > { %v3119_v44 = vpop.f32.mrf.mxu0 }
 0xb5c   : > { %v3120_v45 = vadd.f32 %v6514_v54, %v3119_v44 }
 0xb5d   : > { %v5512_v21 = vpop.f32.mrf.mxu0 }
 0xb5e   : > { %v3126_v27 = vmax.f32 %v3120_v45, 0.0 }
 0xb5f   : > { %v3122_v24 = vpop.f32.mrf.mxu0 }
 0xb60   : > { %v3123_v25 = vadd.f32 %v6514_v54, %v3122_v24  ;;  %v4980_v54 = vld [vmem:[%s7116_s1] ss:$0 sm:$0xff]  ;;  %s7118_s1 = sld [smem:[#allocation22_spill]] }
 0xb61   : > { %v5513_v31 = vpop.f32.mrf.mxu0  ;;  %v1865_v26 = vadd.f32 %v4980_v54, %v6412_v39  ;;  %v1868_v40 = vadd.f32 %v4980_v54, %v6414_v3  ;;  %v5845_v24 = vld [vmem:[%s7121_s3] sm:$0xff]   ;;  %s7123_s3 = sld [smem:[#allocation27_spill]] }
 0xb62   : > { %v3127_v46 = vmax.f32 %v3123_v25, 0.0 }
 0xb63   : > { %v3175_v38 = vadd.f32 %v1865_v26, %v6308_v0  ;;  %v3176_v49 = vadd.f32 %v1868_v40, %v6312_v8 }
 0xb64   : > { %v3128_v29 = vpack.c.bf16 %v3127_v46, %v3126_v27 }
 0xb66   : > { %5519 = vmatmul.mubr.msk.bf16.vlgmr.msra.gmra.mxu0 %vm1464_vm5, %v3128_v29  ;;  %v5840_v62 = vld [vmem:[%s7118_s1 + $0x8] sm:$0xff]   ;;  %v5841_v55 = vld [vmem:[%s7118_s1] sm:$0xff]   ;;  %s7122_s1 = sld [smem:[#allocation24_spill]] }
 0xb67   : > { %5538 = vmatprep.mubr.msk.bf16.mxu0 %vm5961_vm0, %v5960_v1  ;;  %5535 = vmatpush3.bf16.msra.mxu0 %v5840_v62 }
 0xb68   : > { %5536 = vmatprep.subr.bf16.mxu0 %v5960_v1 }
 0xb6b   : > { %5537 = vmatpush3.bf16.msra.mxu0 %v5841_v55  ;;  %v5846_v55 = vld [vmem:[%s7123_s3 + $0x18] sm:$0xff]  }
 0xb6c   : > { %5542 = vmatprep.subr.bf16.mxu0 %v5960_v1 }
 0xc26   : > { %v3166_v35 = vpop.f32.mrf.mxu0 }
 0xc27   : > { %v3167_v36 = vadd.f32 %v6598_v14, %v3166_v35 }
 0xc28   : > { %v5520_v37 = vpop.f32.mrf.mxu0 }
 0xc29   : > { %v3173_v28 = vmax.f32 %v2923_v2, %v3167_v36 }
 0xc2a   : > { %v3169_v41 = vpop.f32.mrf.mxu0 }
 0xc2b   : > { %v3177_v43 = vadd.f32 %v3175_v38, %v3173_v28  ;;  %v3170_v47 = vadd.f32 %v6598_v14, %v3169_v41  ;;  %v5046_v38 = vld [vmem:[%s7122_s1] ss:$0 sm:$0xff]  ;;  %s7124_s1 = sld [smem:[#allocation28_spill]] }
 0xc2c   : > { %v5521_v48 = vpop.f32.mrf.mxu0 }
 0xc2d   : > { %v6668_v50 = vmax.f32 %v3177_v43, 0.0  ;;  %v3174_v39 = vmax.f32 %v2924_v9, %v3170_v47 }
 0xc2f   : > { %v3178_v52 = vadd.f32 %v3176_v49, %v3174_v39  ;;  %v3624_v53 = vmul.f32 %v6668_v50, %v6668_v50 }
 0xc31   : > { %v6672_v0 = vmax.f32 %v3178_v52, 0.0  ;;  %v3626_v3 = vsel %vm1237_vm3, %v3624_v53, 0.0 }
 0xc32   : > { %3627 = vadd.xlane.f32.xlu0 %v3626_v3 }
 0xc33   : > { %v6678_v14 = vpack.c.bf16 %v6672_v0, %v6668_v50  ;;  %v3625_v8 = vmul.f32 %v6672_v0, %v6672_v0 }
 0xc35   : > { %5531 = vmatmul.mubr.msk.bf16.vlgmr.msra.gmra.mxu1 %vm1237_vm3, %v6678_v14  ;;  %v3629_v60 = vsel %vm1237_vm3, %v3625_v8, 0.0 }
 0xc36   : > { %5551 = vmatpush3.bf16.msra.mxu1 %v5838_v59  ;;  %3630 = vadd.xlane.f32.xlu0 %v3629_v60 }
 0xc37   : > { %5552 = vmatprep.subr.bf16.mxu1 %v5960_v1  ;;  %5554 = vmatprep.mubr.msk.bf16.mxu1 %vm5961_vm0, %v5960_v1 }
 0xc3a   : > { %5553 = vmatpush3.bf16.msra.mxu1 %v5839_v61 }
 0xc3b   : > { %5566 = vmatprep.subr.msk.mxu1 %vm1237_vm3, %v6302_v51 }
 0xcbb   : > { %v3628_v54 = vpop.xlane.xlu0 %3627 }
 0xcbf   : > { %v3631_v53 = vpop.xlane.xlu0 %3630 }
 0xcf5   : > { %v3258_v63 = vpop.f32.mrf.mxu1 }
 0xcf6   : > { %v3259_v57 = vadd.f32 %v5031_v56, %v3258_v63 }
 0xcf7   : > { %v5532_v2 = vpop.f32.mrf.mxu1 }
 0xcf8   : > { %v3265_v4 = vmax.f32 %v3259_v57, 0.0  ;;  %v5847_v2 = vld [vmem:[%s7123_s3 + $0x10] sm:$0xff]  }
 0xcf9   : > { %v3261_v5 = vpop.f32.mrf.mxu1 }
 0xcfa   : > { %v3262_v7 = vadd.f32 %v5031_v56, %v3261_v5  ;;  %v3267_v58 = vrot.slane %v3265_v4, 7  ;;  %v3273_v13 = vrot.slane %v3265_v4, 1  ;;  %v5848_v5 = vld [vmem:[%s7123_s3 + $0x8] sm:$0xff]  }
 0xcfb   : > { %v5533_v9 = vpop.f32.mrf.mxu1 }
 0xcfc   : > { %v3266_v11 = vmax.f32 %v3262_v7, 0.0 }
 0xcfe   : > { %v3268_v15 = vrot.slane %v3266_v11, 7  ;;  %v3274_v17 = vrot.slane %v3266_v11, 1  ;;  %v3284_v18 = vpack.c.bf16 %v3266_v11, %v3265_v4 }
 0xd00   : > { %v3270_v19 = vsel %vm1181_vm1, %v3268_v15, %v3267_v58  ;;  %v3275_v30 = vsel %vm1190_vm4, %v3273_v13, %v3274_v17  ;;  %v3276_v20 = vsel %vm1190_vm4, %v3274_v17, %v3273_v13  ;;  %5539 = vmatmul.mubr.msk.bf16.vlgmr.msra.gmra.mxu0 %vm1464_vm5, %v3284_v18  ;;  %v3269_v21 = vsel %vm1181_vm1, %v3267_v58, %v3268_v15 }
 0xd01   : > { %v3278_v22 = vsel %vm1187_vm6, 0.0, %v3276_v20  ;;  %5543 = vmatpush3.bf16.msra.mxu0 %v5842_v12  ;;  %5546 = vmatprep.mubr.msk.bf16.mxu0 %vm5961_vm0, %v5960_v1  ;;  %v3271_v45 = vsel %vm1177_vm2, 0.0, %v3270_v19 }
 0xd02   : > { %v3401_v44 = vpack.c.bf16 %v3278_v22, %v3275_v30  ;;  %5544 = vmatprep.subr.bf16.mxu0 %v5960_v1  ;;  %v3279_v23 = vpack.c.bf16 %v3269_v21, %v3271_v45 }
 0xd04   : > { %5555 = vmatmul.mubr.msk.bf16.vlgmr.msra.gmra.mxu1 %vm1464_vm5, %v3401_v44 }
 0xd05   : > { %5567 = vmatpush3.xpose.msk.msra.mxu1 %vm1237_vm3, %v6302_v51  ;;  %5545 = vmatpush3.bf16.msra.mxu0 %v5843_v42 }
 0xd06   : > { %5568 = vmatprep.mubr.msk.f32.mxu1 %vm1237_vm3, %v6668_v50  ;;  %5583 = vmatprep.subr.mxu1 %v6302_v51 }
 0xd07   : > { %5558 = vmatprep.subr.bf16.mxu0 %v5960_v1 }
 0xd08   : > { %5547 = vmatmul.mubr.msk.bf16.vlgmr.msra.gmra.mxu0 %vm1464_vm5, %v3279_v23 }
 0xd09   : > { %5562 = vmatprep.mubr.msk.bf16.mxu0 %vm5961_vm0, %v5960_v1  ;;  %5559 = vmatpush3.bf16.msra.mxu0 %v5844_v6  ;;  %v6769_v6 = vld [vmem:[%s7124_s1 + $0x18] sm:$0xff]  }
 0xd0a   : > { %5560 = vmatprep.subr.bf16.mxu0 %v5960_v1 }
 0xd0c   : > { %5569 = vmatmul.mubr.msk.f32.vlgmr.msra.gmra.mxu1 %vm1237_vm3, %v6672_v0 }
 0xd0d   : > { %5584 = vmatpush3.msra.mxu1 %v6302_v51  ;;  %5561 = vmatpush3.bf16.msra.mxu0 %v5845_v24 }
 0xd0e   : > { %5588 = vmatprep.subr.bf16.mxu1 %v5960_v1  ;;  %5571 = vmatprep.subr.bf16.mxu0 %v5960_v1 }
 0xdc0   : > { %v3338_v25 = vpop.f32.mrf.mxu0 }
 0xdc2   : > { %v5540_v31 = vpop.f32.mrf.mxu0 }
 0xdc4   : > { %v3341_v27 = vpop.f32.mrf.mxu0  ;;  %v3455_v46 = vpop.f32.mrf.mxu1 }
 0xdc6   : > { %v5541_v29 = vpop.f32.mrf.mxu0  ;;  %v5556_v32 = vpop.f32.mrf.mxu1 }
 0xdc7   : > { %v6789_v29 = vld [vmem:[%s7124_s1] sm:$0xff]  }
 0xdc8   : > { %v3394_v34 = vpop.f32.mrf.mxu0  ;;  %v3458_v10 = vpop.f32.mrf.mxu1 }
 0xdc9   : > { %v3395_v26 = vadd.f32 %v3394_v34, %v3338_v25 }
 0xdca   : > { %v5548_v35 = vpop.f32.mrf.mxu0  ;;  %v5557_v36 = vpop.f32.mrf.mxu1 }
 0xdcb   : > { %v3462_v37 = vadd.f32 %v3455_v46, %v3395_v26  ;;  %v6784_v46 = vld [vmem:[%s7124_s1 + $0x8] sm:$0xff]  }
 0xdcc   : > { %v3397_v40 = vpop.f32.mrf.mxu0  ;;  %v5570_v28 = vpop.f32.mrf.mxu1 }
 0xdcd   : > { %v3398_v41 = vadd.f32 %v3397_v40, %v3341_v27  ;;  %v3633_v43 = vmul.f32 2.0, %v5570_v28  ;;  %v3471_v49 = vadd.f32 %v5046_v38, %v3462_v37  ;;  %v6777_v27 = vld [vmem:[%s7124_s1 + $0x10] sm:$0xff]   ;;  %s7126_s1 = sld [smem:[#allocation29_spill]] }
 0xdce   : > { %v5549_v47 = vpop.f32.mrf.mxu0  ;;  %v3615_v48 = vpop.f32.mrf.mxu1 }
 0xdcf   : > { %v3463_v39 = vadd.f32 %v3458_v10, %v3398_v41  ;;  %v3632_v52 = vmul.f32 2.0, %v3615_v48  ;;  %v3635_v59 = vsub.f32 %v3633_v43, %v3631_v53  ;;  %v3473_v60 = vmax.f32 %v3471_v49, 0.0 }
 0xdd1   : > { %v3472_v3 = vadd.f32 %v5046_v38, %v3463_v39  ;;  %v3634_v8 = vsub.f32 %v3632_v52, %v3628_v54  ;;  %v3637_v63 = vsub.f32 %v3635_v59, %v6374_v16 }
 0xdd3   : > { %v3474_v61 = vmax.f32 %v3472_v3, 0.0  ;;  %v3636_v62 = vsub.f32 %v3634_v8, %v6374_v16  ;;  %v3714_v4 = vsel %vm2085_vm7, %v3637_v63, -inf  ;;  %v5849_v16 = vld [vmem:[%s7123_s3] sm:$0xff]   ;;  %s7125_s3 = sld [smem:[#allocation30_spill]] }
 0xdd5   : > { %v3475_v56 = vpack.c.bf16 %v3474_v61, %v3473_v60  ;;  %v3711_v57 = vsel %vm2085_vm7, %v3636_v62, -inf  ;;  %v6829_v61 = vld [vmem:[%s7126_s1] ss:$0 sm:$0xff]  ;;  %s7128_s1 = sld [smem:[#allocation26_spill]] }
 0xdd6   : > { %3712 = vmax.xlane.f32.xlu0 %v3711_v57 }
 0xdd7   : > { %5563 = vmatmul.mubr.msk.bf16.vlgmr.msra.gmra.mxu0 %vm1464_vm5, %v3475_v56 }
 0xdd8   : > { %5572 = vmatpush3.bf16.msra.mxu0 %v5846_v55  ;;  %5579 = vmatprep.mubr.msk.bf16.mxu0 %vm5961_vm0, %v5960_v1 }
 0xdd9   : > { %5573 = vmatprep.subr.bf16.mxu0 %v5960_v1  ;;  %v6804_v41 = vld [vmem:[%s7125_s3 + $0x8] sm:$0xff]   ;;  %v6809_v43 = vld [vmem:[%s7125_s3] sm:$0xff]   ;;  %s1158_s3 = sand.u32 1, %s5912_s16  }
 0xdda   : > { %3715 = vmax.xlane.f32.xlu0 %v3714_v4  ;;  %s7011_s11 = scalar_lea.sflag [#allocation3], %s1158_s3 }
 0xddc   : > { %5574 = vmatpush3.bf16.msra.mxu0 %v5847_v2 }
 0xddd   : > { %5575 = vmatprep.subr.bf16.mxu0 %v5960_v1 }
 0xde0   : > { %5576 = vmatpush3.bf16.msra.mxu0 %v5848_v5 }
 0xde1   : > { %5577 = vmatprep.subr.bf16.mxu0 %v5960_v1 }
 0xde4   : > { %5578 = vmatpush3.bf16.msra.mxu0 %v5849_v16 }
 0xde5   : > { %5600 = vmatprep.subr.bf16.mxu0 %v5960_v1 }
 0xde7   : > { %5580 = vmatmul.mubr.msk.bf16.vlgmr.msra.gmra.mxu0 %vm1237_vm3, %v6678_v14 }
 0xde8   : > { %5604 = vmatprep.mubr.msk.bf16.mxu0 %vm5961_vm0, %v5960_v1  ;;  %5601 = vmatpush3.bf16.msra.mxu0 %v6804_v41 }
 0xde9   : > { %5602 = vmatprep.subr.bf16.mxu0 %v5960_v1 }
 0xdec   : > { %5603 = vmatpush3.bf16.msra.mxu0 %v6809_v43 }
 0xded   : > { %5608 = vmatprep.subr.bf16.mxu0 %v5960_v1 }
 0xe5f   : > { %v3713_v7 = vpop.xlane.xlu0 %3712 }
 0xe60   : > { %vm3717_vm1 = vcmp.ge.f32.partialorder %v3636_v62, %v3713_v7 }
 0xe61   : > { %v3719_v9 = vsel %vm3717_vm1, %v6406_v33, 8.0 }
 0xe62   : > { %v3721_v11 = vsel %vm2085_vm7, %v3719_v9, inf }
 0xe63   : > { %3722 = vmin.xlane.f32.xlu0 %v3721_v11  ;;  %v3716_v58 = vpop.xlane.xlu0 %3715 }
 0xe64   : > { %vm3718_vm2 = vcmp.ge.f32.partialorder %v3637_v63, %v3716_v58 }
 0xe65   : > { %v3720_v12 = vsel %vm3718_vm2, %v6406_v33, 8.0 }
 0xe66   : > { %v3724_v13 = vsel %vm2085_vm7, %v3720_v12, inf }
 0xe67   : > { %3725 = vmin.xlane.f32.xlu0 %v3724_v13 }
 0xe97   : > { %v6756_v15 = vpop.f32.mrf.mxu0 }
 0xe99   : > { %v5564_v14 = vpop.f32.mrf.mxu0 }
 0xe9a   : > { %v6842_v14 = vld [vmem:[%s6153_s27 + $0x8] sm:$0xff]  }
 0xe9b   : > { %v6758_v17 = vpop.f32.mrf.mxu0 }
 0xe9d   : > { %v5565_v18 = vpop.f32.mrf.mxu0 }
 0xe9e   : > { %v6847_v18 = vld [vmem:[%s6153_s27] sm:$0xff]  }
 0xea7   : > { %v6760_v19 = vpop.f32.mrf.mxu0 }
 0xea9   : > { %v5581_v30 = vpop.f32.mrf.mxu0 }
 0xeab   : > { %v6762_v20 = vpop.f32.mrf.mxu0 }
 0xead   : > { %v5582_v22 = vpop.f32.mrf.mxu0 }
 0xeec   : > { %v3723_v42 = vpop.xlane.xlu0 %3722 }
 0xeed   : > { %vm3727_vm4 = vcmp.eq.f32.partialorder %v6406_v33, %v3723_v42 }
 0xeee   : > { %v5059_v44 = vsel %vm3727_vm4, 1.0, %v5960_v1  ;;  %v3814_v21 = vsel %vm3727_vm4, -1e+30, %v3636_v62 }
 0xeef   : > { %5585 = vmatprep.mubr.msk.f32.mxu1 %vm2085_vm7, %v5059_v44  ;;  %v4046_v45 = vsel %vm2085_vm7, %v3814_v21, -inf }
 0xef0   : > { %4047 = vmax.xlane.f32.xlu0 %v4046_v45  ;;  %v3726_v23 = vpop.xlane.xlu0 %3725 }
 0xef1   : > { %vm3728_vm6 = vcmp.eq.f32.partialorder %v6406_v33, %v3726_v23  ;;  %v6860_v23 = vld [vmem:[%s6148_s20] ss:$0 sm:$0xff] }
 0xef2   : > { %v5060_v24 = vsel %vm3728_vm6, 1.0, %v5960_v1  ;;  %v3815_v25 = vsel %vm3728_vm6, -1e+30, %v3637_v63 }
 0xef3   : > { %5586 = vmatmul.mubr.msk.f32.vlgmr.msra.gmra.mxu1 %vm2085_vm7, %v5060_v24  ;;  %v4049_v31 = vsel %vm2085_vm7, %v3815_v25, -inf }
 0xef4   : > { %5589 = vmatpush3.bf16.msra.mxu1 %v6769_v6  ;;  %4050 = vmax.xlane.f32.xlu1 %v4049_v31 }
 0xef5   : > { %5590 = vmatprep.subr.bf16.mxu1 %v5960_v1  ;;  %5596 = vmatprep.mubr.msk.bf16.mxu1 %vm5961_vm0, %v5960_v1 }
 0xef8   : > { %5591 = vmatpush3.bf16.msra.mxu1 %v6777_v27 }
 0xef9   : > { %5592 = vmatprep.subr.bf16.mxu1 %v5960_v1 }
 0xefc   : > { %5593 = vmatpush3.bf16.msra.mxu1 %v6784_v46 }
 0xefd   : > { %5594 = vmatprep.subr.bf16.mxu1 %v5960_v1 }
 0xf00   : > { %5595 = vmatpush3.bf16.msra.mxu1 %v6789_v29 }
 0xf01   : > { %5616 = vmatprep.subr.mxu1 %v6302_v51 }
 0xf79   : > { %v4048_v32 = vpop.xlane.xlu0 %4047 }
 0xf7a   : > { %vm4052_vm8 = vcmp.ge.f32.partialorder %v3814_v21, %v4048_v32 }
 0xf7b   : > { %v4054_v34 = vsel %vm4052_vm8, %v6406_v33, 8.0 }
 0xf7c   : > { %v4056_v10 = vsel %vm2085_vm7, %v4054_v34, inf }
 0xf7d   : > { %v4051_v54 = vpop.xlane.xlu1 %4050  ;;  %4057 = vmin.xlane.f32.xlu0 %v4056_v10 }
 0xf7e   : > { %vm4053_vm9 = vcmp.ge.f32.partialorder %v3815_v25, %v4051_v54 }
 0xf7f   : > { %v4055_v26 = vsel %vm4053_vm9, %v6406_v33, 8.0 }
 0xf80   : > { %v4059_v35 = vsel %vm2085_vm7, %v4055_v26, inf }
 0xf81   : > { %4060 = vmin.xlane.f32.xlu1 %v4059_v35 }
 0xfb3   : > { %v5587_v36 = vpop.f32.mrf.mxu1 }
 0xfb4   : > { %v3817_v38 = vsub.f32 %v5587_v36, %v6672_v0 }
 0xfb5   : > { %v3805_v37 = vpop.f32.mrf.mxu1 }
 0xfb6   : > { %v3816_v40 = vsub.f32 %v3805_v37, %v6668_v50 }
 0xfb8   : > { %v3818_v28 = vpack.c.bf16 %v3817_v38, %v3816_v40 }
 0xfba   : > { %5597 = vmatmul.mubr.msk.bf16.vlgmr.msra.gmra.mxu1 %vm1237_vm3, %v3818_v28 }
 0xfbb   : > { %5617 = vmatpush3.msra.mxu1 %v6302_v51 }
 0xfbc   : > { %5633 = vmatprep.subr.bf16.mxu1 %v5960_v1 }
0x1006   : > { %v4058_v47 = vpop.xlane.xlu0 %4057 }
0x1007   : > { %vm4062_vm10 = vcmp.eq.f32.partialorder %v6406_v33, %v4058_v47 }
0x1008   : > { %v5077_v48 = vsel %vm4062_vm10, 1.0, %v5960_v1  ;;  %v4149_v49 = vsel %vm4062_vm10, -1e+30, %v3814_v21 }
0x1009   : > { %5618 = vmatprep.mubr.msk.f32.mxu1 %vm2085_vm7, %v5077_v48  ;;  %v4298_v39 = vsel %vm2085_vm7, %v4149_v49, -inf }
0x100a   : > { %v4061_v52 = vpop.xlane.xlu1 %4060  ;;  %4299 = vmax.xlane.f32.xlu0 %v4298_v39 }
0x100b   : > { %vm4063_vm11 = vcmp.eq.f32.partialorder %v6406_v33, %v4061_v52 }
0x100c   : > { %v5078_v53 = vsel %vm4063_vm11, 1.0, %v5960_v1  ;;  %v4150_v3 = vsel %vm4063_vm11, -1e+30, %v3815_v25 }
0x100d   : > { %5619 = vmatmul.mubr.msk.f32.vlgmr.msra.gmra.mxu1 %vm2085_vm7, %v5078_v53  ;;  %v4301_v59 = vsel %vm2085_vm7, %v4150_v3, -inf }
0x100e   : > { %4302 = vmax.xlane.f32.xlu1 %v4301_v59  ;;  %5634 = vmatpush3.bf16.msra.mxu1 %v6804_v41 }
0x100f   : > { %5635 = vmatprep.subr.bf16.mxu1 %v5960_v1  ;;  %5637 = vmatprep.mubr.msk.bf16.mxu1 %vm5961_vm0, %v5960_v1 }
0x1012   : > { %5636 = vmatpush3.bf16.msra.mxu1 %v6809_v43 }
0x1013   : > { %5641 = vmatprep.subr.bf16.mxu1 %v5960_v1 }
0x107a   : > { %v3888_v8 = vpop.f32.mrf.mxu1 }
0x107b   : > { %v3895_v60 = vadd.f32 %v3888_v8, %v6760_v19 }
0x107c   : > { %v5598_v62 = vpop.f32.mrf.mxu1 }
0x107d   : > { %v3904_v56 = vadd.f32 %v6829_v61, %v3895_v60 }
0x107e   : > { %v3891_v55 = vpop.f32.mrf.mxu1 }
0x107f   : > { %v3896_v63 = vadd.f32 %v3891_v55, %v6762_v20  ;;  %v3906_v4 = vmax.f32 %v3904_v56, 0.0 }
0x1080   : > { %v5599_v57 = vpop.f32.mrf.mxu1 }
0x1081   : > { %v3905_v2 = vadd.f32 %v6829_v61, %v3896_v63 }
0x1083   : > { %v3907_v5 = vmax.f32 %v3905_v2, 0.0 }
0x1085   : > { %v3908_v16 = vpack.c.bf16 %v3907_v5, %v3906_v4 }
0x1087   : > { %5605 = vmatmul.mubr.msk.bf16.vlgmr.msra.gmra.mxu0 %vm1464_vm5, %v3908_v16 }
0x1088   : > { %5612 = vmatprep.mubr.msk.bf16.mxu0 %vm5961_vm0, %v5960_v1  ;;  %5609 = vmatpush3.bf16.msra.mxu0 %v6842_v14 }
0x1089   : > { %5610 = vmatprep.subr.bf16.mxu0 %v5960_v1 }
0x108c   : > { %5611 = vmatpush3.bf16.msra.mxu0 %v6847_v18 }
0x108d   : > { %5621 = vmatprep.subr.bf16.mxu0 %v5960_v1 }
0x1093   : > { %v4300_v7 = vpop.xlane.xlu0 %4299 }
0x1094   : > { %vm4304_vm12 = vcmp.ge.f32.partialorder %v4149_v49, %v4300_v7 }
0x1095   : > { %v4306_v9 = vsel %vm4304_vm12, %v6406_v33, 8.0 }
0x1096   : > { %v4308_v11 = vsel %vm2085_vm7, %v4306_v9, inf }
0x1097   : > { %v4303_v58 = vpop.xlane.xlu1 %4302  ;;  %4309 = vmin.xlane.f32.xlu0 %v4308_v11 }
0x1098   : > { %vm4305_vm13 = vcmp.ge.f32.partialorder %v4150_v3, %v4303_v58 }
0x1099   : > { %v4307_v12 = vsel %vm4305_vm13, %v6406_v33, 8.0 }
0x109a   : > { %v4311_v13 = vsel %vm2085_vm7, %v4307_v12, inf }
0x109b   : > { %4312 = vmin.xlane.f32.xlu1 %v4311_v13 }
0x10cd   : > { %v5620_v36 = vpop.f32.mrf.mxu1 }
0x10ce   : > { %v4152_v40 = vsub.f32 %v5620_v36, %v6672_v0 }
0x10cf   : > { %v4140_v37 = vpop.f32.mrf.mxu1 }
0x10d0   : > { %v4151_v38 = vsub.f32 %v4140_v37, %v6668_v50 }
0x10d2   : > { %v4153_v28 = vpack.c.bf16 %v4152_v40, %v4151_v38 }
0x1120   : > { %v4310_v30 = vpop.xlane.xlu0 %4309 }
0x1121   : > { %vm4314_vm14 = vcmp.eq.f32.partialorder %v6406_v33, %v4310_v30 }
0x1122   : > { %v4401_v22 = vsel %vm4314_vm14, -1e+30, %v4149_v49  ;;  %v5084_v47 = vsel %vm4314_vm14, 1.0, %v5960_v1 }
0x1123   : > { %v4550_v42 = vsel %vm2085_vm7, %v4401_v22, -inf }
0x1124   : > { %v4313_v44 = vpop.xlane.xlu1 %4312  ;;  %4551 = vmax.xlane.f32.xlu0 %v4550_v42 }
0x1125   : > { %vm4315_vm15 = vcmp.eq.f32.partialorder %v6406_v33, %v4313_v44 }
0x1126   : > { %v4402_v21 = vsel %vm4315_vm15, -1e+30, %v4150_v3  ;;  %v5085_v48 = vsel %vm4315_vm15, 1.0, %v5960_v1 }
0x1127   : > { %v4553_v45 = vsel %vm2085_vm7, %v4402_v21, -inf }
0x1128   : > { %4554 = vmax.xlane.f32.xlu1 %v4553_v45 }
0x1147   : > { %v3969_v24 = vpop.f32.mrf.mxu0 }
0x1148   : > { %v3970_v31 = vadd.f32 %v6860_v23, %v3969_v24 }
0x1149   : > { %v5606_v25 = vpop.f32.mrf.mxu0 }
0x114a   : > { %v3976_v54 = vmax.f32 %v3970_v31, 0.0 }
0x114b   : > { %v3972_v32 = vpop.f32.mrf.mxu0 }
0x114c   : > { %v3973_v34 = vadd.f32 %v6860_v23, %v3972_v32 }
0x114d   : > { %v5607_v10 = vpop.f32.mrf.mxu0 }
0x114e   : > { %v3977_v26 = vmax.f32 %v3973_v34, 0.0 }
0x1150   : > { %v3978_v35 = vpack.c.bf16 %v3977_v26, %v3976_v54 }
0x1152   : > { %5613 = vmatmul.mubr.msk.bf16.vlgmr.msra.gmra.mxu0 %vm1464_vm5, %v3978_v35 }
0x1153   : > { %5622 = vmatpush3.bf16.msra.mxu0 %v6769_v6  ;;  %5629 = vmatprep.mubr.msk.bf16.mxu0 %vm5961_vm0, %v5960_v1 }
0x1154   : > { %5623 = vmatprep.subr.bf16.mxu0 %v5960_v1 }
0x1157   : > { %5624 = vmatpush3.bf16.msra.mxu0 %v6777_v27 }
0x1158   : > { %5625 = vmatprep.subr.bf16.mxu0 %v5960_v1 }
0x115b   : > { %5626 = vmatpush3.bf16.msra.mxu0 %v6784_v46 }
0x115c   : > { %5627 = vmatprep.subr.bf16.mxu0 %v5960_v1 }
0x115f   : > { %5628 = vmatpush3.bf16.msra.mxu0 %v6789_v29 }
0x1160   : > { %5649 = vmatprep.subr.mxu0 %v6302_v51 }
0x1162   : > { %5630 = vmatmul.mubr.msk.bf16.vlgmr.msra.gmra.mxu0 %vm1237_vm3, %v4153_v28 }
0x1163   : > { %5650 = vmatpush3.msra.mxu0 %v6302_v51  ;;  %5651 = vmatprep.mubr.msk.f32.mxu0 %vm2085_vm7, %v5084_v47 }
0x1164   : > { %5666 = vmatprep.subr.bf16.mxu0 %v5960_v1 }
0x116a   : > { %5652 = vmatmul.mubr.msk.f32.vlgmr.msra.gmra.mxu0 %vm2085_vm7, %v5085_v48 }
0x116b   : > { %5667 = vmatpush3.bf16.msra.mxu0 %v6804_v41  ;;  %5670 = vmatprep.mubr.msk.bf16.mxu0 %vm5961_vm0, %v5960_v1 }
0x116c   : > { %5668 = vmatprep.subr.bf16.mxu0 %v5960_v1 }
0x116f   : > { %5669 = vmatpush3.bf16.msra.mxu0 %v6809_v43 }
0x1170   : > { %5674 = vmatprep.subr.bf16.mxu0 %v5960_v1 }
0x11ad   : > { %v4552_v49 = vpop.xlane.xlu0 %4551 }
0x11ae   : > { %vm4556_vm1 = vcmp.ge.f32.partialorder %v4401_v22, %v4552_v49 }
0x11af   : > { %v4558_v39 = vsel %vm4556_vm1, %v6406_v33, 8.0 }
0x11b0   : > { %v4560_v52 = vsel %vm2085_vm7, %v4558_v39, inf }
0x11b1   : > { %v4555_v53 = vpop.xlane.xlu1 %4554  ;;  %4561 = vmin.xlane.f32.xlu0 %v4560_v52 }
0x11b2   : > { %vm4557_vm2 = vcmp.ge.f32.partialorder %v4402_v21, %v4555_v53 }
0x11b3   : > { %v4559_v3 = vsel %vm4557_vm2, %v6406_v33, 8.0 }
0x11b4   : > { %v4563_v59 = vsel %vm2085_vm7, %v4559_v3, inf }
0x11b5   : > { %4564 = vmin.xlane.f32.xlu1 %v4563_v59 }
0x1212   : > { %v6898_v8 = vpop.f32.mrf.mxu0 }
0x1214   : > { %v5614_v60 = vpop.f32.mrf.mxu0 }
0x1216   : > { %v6900_v62 = vpop.f32.mrf.mxu0 }
0x1218   : > { %v5615_v55 = vpop.f32.mrf.mxu0 }
0x1222   : > { %v4191_v56 = vpop.f32.mrf.mxu0 }
0x1223   : > { %v4198_v63 = vadd.f32 %v4191_v56, %v6760_v19 }
0x1224   : > { %v5631_v57 = vpop.f32.mrf.mxu0 }
0x1225   : > { %v4200_v4 = vadd.f32 %v6829_v61, %v4198_v63 }
0x1226   : > { %v4194_v2 = vpop.f32.mrf.mxu0 }
0x1227   : > { %v4199_v5 = vadd.f32 %v4194_v2, %v6762_v20  ;;  %v4202_v9 = vmax.f32 %v4200_v4, 0.0 }
0x1228   : > { %v5632_v16 = vpop.f32.mrf.mxu0 }
0x1229   : > { %v4201_v7 = vadd.f32 %v6829_v61, %v4199_v5 }
0x122a   : > { %v5653_v25 = vpop.f32.mrf.mxu0 }
0x122b   : > { %v4203_v11 = vmax.f32 %v4201_v7, 0.0  ;;  %v4404_v10 = vsub.f32 %v5653_v25, %v6672_v0 }
0x122c   : > { %v4392_v31 = vpop.f32.mrf.mxu0 }
0x122d   : > { %v4204_v58 = vpack.c.bf16 %v4203_v11, %v4202_v9  ;;  %v4403_v32 = vsub.f32 %v4392_v31, %v6668_v50 }
0x122f   : > { %5638 = vmatmul.mubr.msk.bf16.vlgmr.msra.gmra.mxu1 %vm1464_vm5, %v4204_v58  ;;  %v4405_v54 = vpack.c.bf16 %v4404_v10, %v4403_v32 }
0x1230   : > { %5642 = vmatpush3.bf16.msra.mxu1 %v6842_v14  ;;  %5645 = vmatprep.mubr.msk.bf16.mxu1 %vm5961_vm0, %v5960_v1 }
0x1231   : > { %5643 = vmatprep.subr.bf16.mxu1 %v5960_v1 }
0x1234   : > { %5644 = vmatpush3.bf16.msra.mxu1 %v6847_v18 }
0x1235   : > { %5654 = vmatprep.subr.bf16.mxu1 %v5960_v1 }
0x123a   : > { %v4562_v34 = vpop.xlane.xlu0 %4561 }
0x123b   : > { %vm4566_vm4 = vcmp.eq.f32.partialorder %v6406_v33, %v4562_v34 }
0x123c   : > { %v5091_v26 = vsel %vm4566_vm4, 1.0, %v5960_v1 }
0x123e   : > { %v4565_v35 = vpop.xlane.xlu1 %4564 }
0x123f   : > { %vm4567_vm6 = vcmp.eq.f32.partialorder %v6406_v33, %v4565_v35 }
0x1240   : > { %v5092_v36 = vsel %vm4567_vm6, 1.0, %v5960_v1 }
0x12ef   : > { %v4242_v12 = vpop.f32.mrf.mxu1 }
0x12f0   : > { %v4243_v30 = vadd.f32 %v6860_v23, %v4242_v12 }
0x12f1   : > { %v5639_v13 = vpop.f32.mrf.mxu1 }
0x12f2   : > { %v4249_v21 = vmax.f32 %v4243_v30, 0.0 }
0x12f3   : > { %v4245_v22 = vpop.f32.mrf.mxu1 }
0x12f4   : > { %v4246_v42 = vadd.f32 %v6860_v23, %v4245_v22 }
0x12f5   : > { %v5640_v44 = vpop.f32.mrf.mxu1 }
0x12f6   : > { %v4250_v45 = vmax.f32 %v4246_v42, 0.0 }
0x12f8   : > { %v4251_v24 = vpack.c.bf16 %v4250_v45, %v4249_v21 }
0x12fa   : > { %5646 = vmatmul.mubr.msk.bf16.vlgmr.msra.gmra.mxu1 %vm1464_vm5, %v4251_v24 }
0x12fb   : > { %5655 = vmatpush3.bf16.msra.mxu1 %v6769_v6  ;;  %5662 = vmatprep.mubr.msk.bf16.mxu1 %vm5961_vm0, %v5960_v1 }
0x12fc   : > { %5656 = vmatprep.subr.bf16.mxu1 %v5960_v1 }
0x12ff   : > { %5657 = vmatpush3.bf16.msra.mxu1 %v6777_v27 }
0x1300   : > { %5658 = vmatprep.subr.bf16.mxu1 %v5960_v1 }
0x1303   : > { %5659 = vmatpush3.bf16.msra.mxu1 %v6784_v46 }
0x1304   : > { %5660 = vmatprep.subr.bf16.mxu1 %v5960_v1 }
0x1307   : > { %5661 = vmatpush3.bf16.msra.mxu1 %v6789_v29 }
0x1308   : > { %5682 = vmatprep.subr.mxu1 %v6302_v51 }
0x130a   : > { %5663 = vmatmul.mubr.msk.bf16.vlgmr.msra.gmra.mxu1 %vm1237_vm3, %v4405_v54 }
0x130b   : > { %5683 = vmatpush3.msra.mxu1 %v6302_v51  ;;  %5684 = vmatprep.mubr.msk.f32.mxu1 %vm2085_vm7, %v5091_v26  ;;  %v6944_v51 = vld [vmem:[%s7127_s4] ss:$0 sm:$0xff]  ;;  %s4940_s4 = sshll.u32 %s1158_s3, 4 }
0x130c   : > { %5699 = vmatprep.subr.bf16.mxu1 %v5960_v1  ;;  %v4040_v33 = vadd.f32 %v6944_v51, %v6898_v8  ;;  %v4043_v47 = vadd.f32 %v6944_v51, %v6900_v62  ;;  %s1160_s5 = scalar_lea.vmem [#allocation2], %s4940_s4  ;;  %s5962_s4 = smov [#allocation2]  }
0x130d   : > { %s4824_s8 = sshll.u32 %s1160_s5, 4  ;;  %s7007_s8 = int_to_ptr.vmem [resolvable:$true] %s4824_s8 }
0x130e   : > { %s5860_s12 = scalar_lea.vmem %s7007_s8, 256 }
0x130f   : > { %p5861_p11 = scmp.ne.s32.totalorder %s7007_s8, %s5860_s12 }
0x1311   : > { %p5862_p12 = pnand %p5861_p11, %p6203_p5 }
0x1312   : > { %5685 = vmatmul.mubr.msk.f32.vlgmr.msra.gmra.mxu1 %vm2085_vm7, %v5092_v36 }
0x1313   : > { %5700 = vmatpush3.bf16.msra.mxu1 %v6804_v41  ;;  %5703 = vmatprep.mubr.msk.bf16.mxu1 %vm5961_vm0, %v5960_v1  ;;  %p5863_p13 = pneg %p5862_p12 }
0x1314   : > { %5701 = vmatprep.subr.bf16.mxu1 %v5960_v1 }
0x1317   : > { %5702 = vmatpush3.bf16.msra.mxu1 %v6809_v43 }
0x1318   : > { %5707 = vmatprep.subr.bf16.mxu1 %v5960_v1 }
0x13ba   : > { %v4289_v37 = vpop.f32.mrf.mxu1 }
0x13bb   : > { %v4290_v38 = vadd.f32 %v6944_v51, %v4289_v37 }
0x13bc   : > { %v5647_v40 = vpop.f32.mrf.mxu1 }
0x13bd   : > { %v4296_v28 = vmax.f32 %v4040_v33, %v4290_v38 }
0x13be   : > { %v4292_v41 = vpop.f32.mrf.mxu1 }
0x13bf   : > { %v4293_v48 = vadd.f32 %v6944_v51, %v4292_v41 }
0x13c0   : > { %v5648_v49 = vpop.f32.mrf.mxu1 }
0x13c1   : > { %v4297_v43 = vmax.f32 %v4043_v47, %v4293_v48 }
0x13ca   : > { %v4443_v39 = vpop.f32.mrf.mxu1 }
0x13cb   : > { %v4450_v52 = vadd.f32 %v4443_v39, %v6760_v19 }
0x13cc   : > { %v5664_v53 = vpop.f32.mrf.mxu1 }
0x13cd   : > { %v4452_v59 = vadd.f32 %v6829_v61, %v4450_v52 }
0x13ce   : > { %v4446_v3 = vpop.f32.mrf.mxu1 }
0x13cf   : > { %v4451_v8 = vadd.f32 %v4446_v3, %v6762_v20  ;;  %v4454_v56 = vmax.f32 %v4452_v59, 0.0 }
0x13d0   : > { %v5665_v60 = vpop.f32.mrf.mxu1 }
0x13d1   : > { %v4453_v55 = vadd.f32 %v6829_v61, %v4451_v8 }
0x13d2   : > { %v5686_v12 = vpop.f32.mrf.mxu1 }
0x13d3   : > { %v4455_v63 = vmax.f32 %v4453_v55, 0.0  ;;  %v4654_v22 = vsub.f32 %v5686_v12, %v6672_v0 }
0x13d4   : > { %v4644_v13 = vpop.f32.mrf.mxu1 }
0x13d5   : > { %v4456_v57 = vpack.c.bf16 %v4455_v63, %v4454_v56  ;;  %v4653_v30 = vsub.f32 %v4644_v13, %v6668_v50  ;;  %v5858_v56 = vld [vmem:[%s6237_s28] sm:$0xff] }
0x13d7   : > { %5671 = vmatmul.mubr.msk.bf16.vlgmr.msra.gmra.mxu0 %vm1464_vm5, %v4456_v57 }
0x13d8   : > { %5675 = vmatpush3.bf16.msra.mxu0 %v6842_v14  ;;  %5678 = vmatprep.mubr.msk.bf16.mxu0 %vm5961_vm0, %v5960_v1 }
0x13d9   : > { %5676 = vmatprep.subr.bf16.mxu0 %v5960_v1 }
0x13dc   : > { %5677 = vmatpush3.bf16.msra.mxu0 %v6847_v18 }
0x13dd   : > { %5687 = vmatprep.subr.bf16.mxu0 %v5960_v1 }
0x1497   : > { %v4494_v62 = vpop.f32.mrf.mxu0 }
0x1498   : > { %v4495_v4 = vadd.f32 %v6860_v23, %v4494_v62 }
0x1499   : > { %v5672_v2 = vpop.f32.mrf.mxu0 }
0x149a   : > { %v4501_v9 = vmax.f32 %v4495_v4, 0.0 }
0x149b   : > { %v4497_v5 = vpop.f32.mrf.mxu0 }
0x149c   : > { %v4498_v16 = vadd.f32 %v6860_v23, %v4497_v5 }
0x149d   : > { %v5673_v7 = vpop.f32.mrf.mxu0 }
0x149e   : > { %v4502_v11 = vmax.f32 %v4498_v16, 0.0 }
0x14a0   : > { %v4503_v58 = vpack.c.bf16 %v4502_v11, %v4501_v9 }
0x14a2   : > { %5679 = vmatmul.mubr.msk.bf16.vlgmr.msra.gmra.mxu0 %vm1464_vm5, %v4503_v58 }
0x14a3   : > { %5688 = vmatpush3.bf16.msra.mxu0 %v6769_v6  ;;  %5695 = vmatprep.mubr.msk.bf16.mxu0 %vm5961_vm0, %v5960_v1  ;;  %v4655_v6 = vpack.c.bf16 %v4654_v22, %v4653_v30 }
0x14a4   : > { %5689 = vmatprep.subr.bf16.mxu0 %v5960_v1 }
0x14a7   : > { %5690 = vmatpush3.bf16.msra.mxu0 %v6777_v27 }
0x14a8   : > { %5691 = vmatprep.subr.bf16.mxu0 %v5960_v1 }
0x14ab   : > { %5692 = vmatpush3.bf16.msra.mxu0 %v6784_v46 }
0x14ac   : > { %5693 = vmatprep.subr.bf16.mxu0 %v5960_v1 }
0x14af   : > { %5694 = vmatpush3.bf16.msra.mxu0 %v6789_v29 }
0x14b2   : > { %5696 = vmatmul.mubr.msk.bf16.vlgmr.msra.gmra.mxu0 %vm1237_vm3, %v4655_v6 }
0x1562   : > { %v4541_v42 = vpop.f32.mrf.mxu0 }
0x1563   : > { %v4542_v44 = vadd.f32 %v6944_v51, %v4541_v42 }
0x1564   : > { %v5680_v27 = vpop.f32.mrf.mxu0 }
0x1565   : > { %v4548_v21 = vmax.f32 %v4296_v28, %v4542_v44 }
0x1566   : > { %v4544_v45 = vpop.f32.mrf.mxu0 }
0x1567   : > { %v4545_v24 = vadd.f32 %v6944_v51, %v4544_v45 }
0x1568   : > { %v5681_v46 = vpop.f32.mrf.mxu0 }
0x1569   : > { %v4549_v25 = vmax.f32 %v4297_v43, %v4545_v24 }
0x1572   : > { %v4693_v31 = vpop.f32.mrf.mxu0 }
0x1573   : > { %v4700_v32 = vadd.f32 %v4693_v31, %v6760_v19 }
0x1574   : > { %v5697_v34 = vpop.f32.mrf.mxu0 }
0x1575   : > { %v4702_v29 = vadd.f32 %v6829_v61, %v4700_v32 }
0x1576   : > { %v4696_v10 = vpop.f32.mrf.mxu0 }
0x1577   : > { %v4701_v54 = vadd.f32 %v4696_v10, %v6762_v20  ;;  %v4704_v36 = vmax.f32 %v4702_v29, 0.0 }
0x1578   : > { %v5698_v26 = vpop.f32.mrf.mxu0 }
0x1579   : > { %v4703_v35 = vadd.f32 %v6829_v61, %v4701_v54 }
0x157b   : > { %v4705_v37 = vmax.f32 %v4703_v35, 0.0 }
0x157d   : > { %v4706_v33 = vpack.c.bf16 %v4705_v37, %v4704_v36 }
0x157f   : > { %5704 = vmatmul.mubr.msk.bf16.vlgmr.msra.gmra.mxu1 %vm1464_vm5, %v4706_v33 }
0x1580   : > { %5708 = vmatpush3.bf16.msra.mxu1 %v6842_v14  ;;  %5711 = vmatprep.mubr.msk.bf16.mxu1 %vm5961_vm0, %v5960_v1  ;;  %v5047_v14 = vld [vmem:[%s7128_s1] ss:$0 sm:$0xff]  ;;  %s5104_s1 = sshll.u32 %s6186_s0, 8  ;;  %s5864_s0 = sshll.u32 %s5962_s4, 4  ;;  %s5865_s0 = int_to_ptr.vmem [resolvable:$false] %s5864_s0 }
0x1581   : > { %5709 = vmatprep.subr.bf16.mxu1 %v5960_v1  ;;  %v3537_v49 = vadd.f32 %v5047_v14, %v6756_v15  ;;  %s7005_s9 = scalar_lea.hbm %s6163_s6, %s5104_s1  ;;  %s5866_s1 = scalar_lea.vmem %s5865_s0, 512 }
0x1582   : > { %p5867_p0 = scmp.lt.s32.totalorder %s7007_s8, %s5865_s0  ;;  %p5868_p1 = scmp.lt.s32.totalorder %s5866_s1, %s5860_s12 }
0x1583   : > { %v4800_v39 = vadd.f32 %v3537_v49, %v6668_v50 }
0x1584   : > { %5710 = vmatpush3.bf16.msra.mxu1 %v6847_v18  ;;  %p5869_p2 = por %p5868_p1, %p5867_p0 }
0x1586   : > { %p5870_p3 = pnand %p5869_p2, %p5863_p13 }
0x163f   : > { %v4744_v19 = vpop.f32.mrf.mxu1 }
0x1640   : > { %v4745_v61 = vadd.f32 %v6860_v23, %v4744_v19 }
0x1641   : > { %v5705_v20 = vpop.f32.mrf.mxu1 }
0x1642   : > { %v4751_v41 = vmax.f32 %v4745_v61, 0.0 }
0x1643   : > { %v4747_v38 = vpop.f32.mrf.mxu1 }
0x1644   : > { %v4748_v40 = vadd.f32 %v6860_v23, %v4747_v38  ;;  %v3540_v23 = vadd.f32 %v5047_v14, %v6758_v17 }
0x1645   : > { %v5706_v28 = vpop.f32.mrf.mxu1 }
0x1646   : > { %v4752_v47 = vmax.f32 %v4748_v40, 0.0  ;;  %v4801_v8 = vadd.f32 %v3540_v23, %v6672_v0  ;;  %v5859_v0 = vld [vmem:[%s6237_s28 + $0x8] sm:$0xff] }
0x1648   : > { %v4753_v48 = vpack.c.bf16 %v4752_v47, %v4751_v41 }
0x164a   : > { %5712 = vmatmul.mubr.msk.bf16.vlgmr.msra.gmra.mxu1 %vm1464_vm5, %v4753_v48 }
0x170a   : > { %v4791_v1 = vpop.f32.mrf.mxu1 }
0x170b   : > { %v4792_v18 = vadd.f32 %v6944_v51, %v4791_v1 }
0x170c   : > { %v5713_v43 = vpop.f32.mrf.mxu1 }
0x170d   : > { %v4798_v52 = vmax.f32 %v4548_v21, %v4792_v18 }
0x170e   : > { %v4794_v53 = vpop.f32.mrf.mxu1 }
0x170f   : > { %v4802_v3 = vadd.f32 %v4800_v39, %v4798_v52  ;;  %v4795_v59 = vadd.f32 %v6944_v51, %v4794_v53 }
0x1710   : > { %v5714_v15 = vpop.f32.mrf.mxu1 }
0x1711   : > { %v4804_v60 = vmax.f32 %v4802_v3, 0.0  ;;  %v4799_v55 = vmax.f32 %v4549_v25, %v4795_v59 }
0x1713   : > { %v4806_v63 = vadd.f32 %v5858_v56, %v4804_v60  ;;  %v4803_v57 = vadd.f32 %v4801_v8, %v4799_v55 }
0x1715   : > { %4808 = vst.msk [vmem:[%s1160_s5] sm:$0xff] %vm1237_vm3, %v4806_v63  ;;  %v4805_v50 = vmax.f32 %v4803_v57, 0.0 }
0x1717   : > { %v4807_v17 = vadd.f32 %v5859_v0, %v4805_v50 }
0x1719   : > { %4809 = vst.msk [vmem:[%s1160_s5 + $0x8] sm:$0xff] %vm1237_vm3, %v4807_v17 }
0x171a   : > { %5873 = shalt.err (!%p5870_p3)
}
0x171b   : > { %s5874_s5 = scalar_lea.hbm %s7005_s9, 256  ;;  %s5878_s28 = scalar_lea.hbm %s6163_s6, 512 }
0x171c   : > { %p5875_p4 = scmp.ne.s32.totalorder %s7005_s9, %s5874_s5  ;;  %p5879_p9 = scmp.lt.s32.totalorder %s7005_s9, %s6163_s6 }
0x171d   : > { %p5880_p10 = scmp.lt.s32.totalorder %s5878_s28, %s5874_s5 }
0x171e   : > { %p5876_p7 = pnand %p5875_p4, %p6203_p5 }
0x171f   : > { %p5881_p11 = por %p5880_p10, %p5879_p9 }
0x1720   : > { %p5877_p8 = pneg %p5876_p7 }
0x1722   : > { %p5882_p12 = pnand %p5881_p11, %p5877_p8 }
0x1724   : > { %5885 = shalt.err (!%p5882_p12)
}
0x1725   : > { %s5963_s12 = smov 128   ;;  %s5964_s3 = smov 8  }
0x1726   : > { %5715 = dma.vmem_to_hbm [thread:$0]  (%p6203_p5), %s7007_s8, 256, %s7005_s9, %s7011_s11, %s5963_s12, %s5963_s12, %s5964_s3  }
0x1727 PF: > { %p5721_p13 = scmp.ge.s32.totalorder %s5920_s22, 2  ;;  %s4839_s4 = sand.u32 1, %s5908_s15  }
0x1728   : > { %s4840_s0 = scalar_lea.sflag [#allocation3], %s4839_s4 }
0x1729   : > { %p5718_p0 = pnand %p5721_p13, %p6207_p6 }
0x172b   : > { %p5719_p1 = pneg %p5718_p0 }
0x172d   : > { %5903 = dma.done.wait (%p5719_p1), %s4840_s0, 256  }
0x172e   : > { %5905 = vsyncadd (%p5719_p1), %s4840_s0, 4294967040  ;;  %p87_p2 = scmp.ge.s32.totalorder %s6190_s26, 4   ;;  %s7129_s15 = smov %s5912_s16 }
0x172f   : > { %s7130_s16 = smov %s5916_s18  ;;  %s7131_s18 = smov %s6201_s2 }
0x1730   : > { %s7132_s22 = smov %s6190_s26  ;;  %89 = sbr.rel (!%p87_p2) target bundleno = 82 (0x52), region = 248 }
0x1735   :  { %4845 = vsyncpa [#allocation3], 1 }
0x1736   :  { %4847 = vsyncpa [#allocation3 + $0x1], 1 }

</bundles_post_ra>
